<compile_context>
chip_gen: v5e
topology: v5e:2x2
jax: 0.10.0
libtpu: 0.0.40
codegen_flags: <defaults>
</compile_context>

<pallas_src>
import math

import jax
import jax.numpy as jnp
from jax.experimental import pallas as pl
from jax.experimental.pallas import tpu as pltpu

# ---------------- module constants (from the PyTorch file) ----------------
BBOX = 200
NUM_END_TOKEN = 3
NUM_MASK_AND_EOM = 2
COORD_PAD = NUM_END_TOKEN + NUM_MASK_AND_EOM   # 5
MASK = 1
PIX_PAD = NUM_END_TOKEN + NUM_MASK_AND_EOM     # 5
SVG_END = 1

# ---------------- small synthetic config ----------------
EMBED_DIM = 32
HIDDEN_DIM = 64
NUM_HEADS = 4
HEAD_DIM = EMBED_DIM // NUM_HEADS
NUM_LAYERS = 2
TEXT_LEN = 4
PIX_LEN = 8
NUM_TEXT_TOKEN = 16
NUM_IMAGE_TOKEN = BBOX * BBOX + PIX_PAD + SVG_END          # 40006
TOTAL_TOKEN = NUM_TEXT_TOKEN + NUM_IMAGE_TOKEN             # 40022
TOTAL_SEQ_LEN = TEXT_LEN + PIX_LEN                         # 12
COORD_VOCAB = BBOX + COORD_PAD + SVG_END                   # 206
LN_EPS = 1e-5
NEG_BIG = -1e30                                            # additive attn mask (f32 scores)
MASK_FILL_VALUE = -float(jnp.finfo(jnp.float32).max)       # torch masked_fill value
ATTN_SCALE = 1.0 / math.sqrt(HEAD_DIM)

VOCAB_TILE = 10240                                         # 80 * 128 lanes, 4 grid steps
N_VOCAB_TILES = (TOTAL_TOKEN + VOCAB_TILE - 1) // VOCAB_TILE     # 4
TOTAL_TOKEN_PAD = N_VOCAB_TILES * VOCAB_TILE                     # 40960 (weight/bias padding)

# ---------------- packed-parameter layout ----------------
WSEG = 128            # lane stride between weight segments (keeps every slice 128-aligned)
N_WSEG = 5            # Wq | Wk | Wv | Wo | W1
NSEG_VEC = 15         # bias / LN / cross-const rows, one 128-lane row each
(SEG_BQ, SEG_BK, SEG_BV, SEG_BO, SEG_CROSS, SEG_B1, SEG_B2,
 SEG_LN1G, SEG_LN1B, SEG_LN2G, SEG_LN2B, SEG_LN3G, SEG_LN3B,
 SEG_FNG, SEG_FNB) = range(NSEG_VEC)


# ============================ shared math (kernel + reference) ============================

def _layer_norm(h, g, b):
    mu = jnp.mean(h, axis=-1, keepdims=True)
    var = jnp.mean((h - mu) ** 2, axis=-1, keepdims=True)
    return (h - mu) * jax.lax.rsqrt(var + LN_EPS) * g + b


def _layer_forward(x, amask, wp, w2, vp):
    """One post-LN transformer decoder layer (self-attn -> constant cross-attn -> FFN).

    x: (M, E) f32, amask: (M, M) additive f32 (causal + padding + cross-batch),
    wp: (E, N_WSEG*128) weight panel, w2: (HIDDEN, E), vp: (NSEG_VEC, 128) bias/LN panel.
    Used both inside the Pallas kernel and by the pure-JAX reference.
    """
    E, HID, f32 = EMBED_DIM, HIDDEN_DIM, jnp.float32
    wq = wp[:, 0 * WSEG:0 * WSEG + E]
    wk = wp[:, 1 * WSEG:1 * WSEG + E]
    wv = wp[:, 2 * WSEG:2 * WSEG + E]
    wo = wp[:, 3 * WSEG:3 * WSEG + E]
    w1 = wp[:, 4 * WSEG:4 * WSEG + HID]
    vec = lambda i, c=E: vp[i:i + 1, :c]

    # ---- self attention (per-head loop statically unrolled, H=4) ----
    q = (jnp.dot(x, wq, preferred_element_type=f32) + vec(SEG_BQ)) * ATTN_SCALE
    k = jnp.dot(x, wk, preferred_element_type=f32) + vec(SEG_BK)
    v = jnp.dot(x, wv, preferred_element_type=f32) + vec(SEG_BV)

    attn = vec(SEG_BO)
    for h in range(NUM_HEADS):
        sl = slice(h * HEAD_DIM, (h + 1) * HEAD_DIM)
        s = jnp.dot(q[:, sl], k[:, sl].T, preferred_element_type=f32) + amask
        m = jnp.max(s, axis=-1, keepdims=True)
        p = jnp.exp(s - m)
        p = p / jnp.sum(p, axis=-1, keepdims=True)
        oh = jnp.dot(p, v[:, sl], preferred_element_type=f32)
        # fold the output projection per head: oh @ Wo[h*dh:(h+1)*dh, :]
        attn = attn + jnp.dot(oh, wo[sl, :], preferred_element_type=f32)

    h1 = _layer_norm(x + attn, vec(SEG_LN1G), vec(SEG_LN1B))

    # ---- cross attention to the single all-zero memory token ----
    # softmax over one key == 1, so the block reduces to the constant bv2@Wo2+bo2
    # (precomputed on the host and stored in the vector panel).
    h2 = _layer_norm(h1 + vec(SEG_CROSS), vec(SEG_LN2G), vec(SEG_LN2B))

    # ---- feed forward (ReLU, the TransformerDecoderLayer default) ----
    f = jnp.maximum(jnp.dot(h2, w1, preferred_element_type=f32) + vec(SEG_B1, HID), 0.0)
    f = jnp.dot(f, w2, preferred_element_type=f32) + vec(SEG_B2)
    return _layer_norm(h2 + f, vec(SEG_LN3G), vec(SEG_LN3B))


# ============================ the fused Pallas kernel ============================

def _fused_kernel(x_ref, mask_ref, rowflag_ref, wpanel_ref, w2_ref, vec_ref,
                  lw_ref, lb_ref, o_ref, hn_ref):
    """Whole forward: decoder stack (once, cached in VMEM scratch) + per-vocab-tile
    logit matmul with in-kernel logits mask."""
    j = pl.program_id(0)

    # Decoder layers + final LayerNorm run only on the first vocab tile; the normalized
    # bf16 activations persist in the `hn_ref` scratch across grid steps.
    @pl.when(j == 0)
    def _():
        x = x_ref[...]                       # (M, E) f32
        amask = mask_ref[...]                # (M, M) additive f32
        for l in range(NUM_LAYERS):          # static unroll
            x = _layer_forward(x, amask, wpanel_ref[l], w2_ref[l], vec_ref[l])
        vp0 = vec_ref[0]
        hn = _layer_norm(x, vp0[SEG_FNG:SEG_FNG + 1, :EMBED_DIM],
                         vp0[SEG_FNB:SEG_FNB + 1, :EMBED_DIM])
        hn_ref[...] = hn.astype(jnp.bfloat16)

    # bf16 x bf16 -> f32 MXU matmul against this vocab tile of the logit weights.
    tile = lw_ref.shape[-1]
    acc = jnp.dot(hn_ref[...], lw_ref[...], preferred_element_type=jnp.float32)
    acc = acc + lb_ref[...].astype(jnp.float32)

    # logits mask generated on the fly: token index from program_id + iota,
    # sequence position from a tiny (M, 1) per-row flag (seq_idx < text_len,
    # matching PyTorch's logits_mask[:, :c_seqlen+1] indexing incl. the context row).
    tok = j * tile + jax.lax.broadcasted_iota(jnp.int32, acc.shape, 1)
    is_text_tok = tok < NUM_TEXT_TOKEN
    is_text_row = rowflag_ref[...] > 0.5
    o_ref[...] = jnp.where(jnp.logical_xor(is_text_row, is_text_tok),
                           MASK_FILL_VALUE, acc)


def fused_decoder_logits(x2d, mask_add, rowflag, w_panel, w2, vecs, logit_w, logit_b):
    """x2d: (M, E) f32 -> logits (M, TOTAL_TOKEN) f32 in one pallas_call."""
    M, E = x2d.shape
    L = w_panel.shape[0]
    c2 = lambda j: (0, 0)
    c3 = lambda j: (0, 0, 0)
    return pl.pallas_call(
        _fused_kernel,
        out_shape=jax.ShapeDtypeStruct((M, TOTAL_TOKEN), jnp.float32),
        grid=(N_VOCAB_TILES,),
        in_specs=[
            pl.BlockSpec((M, E), c2),                          # embeddings (fetched once)
            pl.BlockSpec((M, M), c2),                          # block-diag additive mask
            pl.BlockSpec((M, 1), c2),                          # row-is-text flag
            pl.BlockSpec((L, E, N_WSEG * WSEG), c3),           # packed per-layer weights
            pl.BlockSpec((L, HIDDEN_DIM, E), c3),              # W2 stack
            pl.BlockSpec((L, NSEG_VEC, 128), c3),              # biases / LN / cross consts
            pl.BlockSpec((E, VOCAB_TILE), lambda j: (0, j)),   # logit weights (bf16)
            pl.BlockSpec((1, VOCAB_TILE), lambda j: (0, j)),   # logit bias (bf16)
        ],
        out_specs=pl.BlockSpec((M, VOCAB_TILE), lambda j: (0, j)),
        scratch_shapes=[pltpu.VMEM((M, E), jnp.bfloat16)],     # cached normalized activations
        compiler_params=pltpu.CompilerParams(
            # "arbitrary": the j==0 step must run first to populate the scratch.
            # (The kernel is HBM-bound on the 2.6 MB weight stream + logits writeback,
            #  so losing the v7x megacore split of the vocab axis costs little.)
            dimension_semantics=("arbitrary",),
            vmem_limit_bytes=32 * 1024 * 1024,                 # safe on v5e/v6e/v7x
        ),
    )(x2d, mask_add, rowflag, w_panel, w2, vecs, logit_w, logit_b)


# ============================ model glue (XLA) ============================

def _prepare_inputs(params, pix, xy, mask, text):
    """Embeddings + positional encoding + block-diagonal additive attention mask."""
    B, T = text.shape
    P = pix.shape[1]
    S = T + P + 1

    tokens_text = params["text_emb"][text]                               # (B, T, E)
    coord = params["coord_x"][xy[..., 0]] + params["coord_y"][xy[..., 1]]
    pixel = params["pixel_emb"][pix]
    tokens = jnp.concatenate([tokens_text, pixel + coord], axis=1)       # (B, T+P, E)
    context = jnp.zeros((B, 1, EMBED_DIM), jnp.float32)
    embeddings = jnp.concatenate([context, tokens], axis=1)              # (B, S, E)
    x = embeddings + params["pos_emb"][jnp.arange(S)][None, :, :]        # dropout = identity
    x2d = x.reshape(B * S, EMBED_DIM)

    # (B*S, B*S) block-diagonal additive mask: causal + pixel key padding + cross-batch.
    idx = jnp.arange(B * S)
    b_of = idx // S
    p_of = idx % S
    padding = jnp.zeros((B, S), dtype=bool).at[:, 1 + T:].set(mask)
    pad_key = padding[b_of, p_of]                                        # (B*S,)
    masked = (b_of[:, None] != b_of[None, :]) \
        | (p_of[None, :] > p_of[:, None]) \
        | pad_key[None, :]
    mask_add = jnp.where(masked, NEG_BIG, 0.0).astype(jnp.float32)

    rowflag = (p_of < T).astype(jnp.float32).reshape(B * S, 1)
    return x2d, mask_add, rowflag, B, S


def sketch_decoder_forward(params, pix, xy, mask, text):
    """Equivalent of SketchDecoder.forward(pix, xy, mask, text, return_loss=False).
    Returns logits of shape (B, c_seqlen + 1, TOTAL_TOKEN)."""
    x2d, mask_add, rowflag, B, S = _prepare_inputs(params, pix, xy, mask, text)
    logits2d = fused_decoder_logits(
        x2d, mask_add, rowflag,
        params["w_panel"], params["w2"], params["vecs"],
        params["logit_w"], params["logit_b"])
    return logits2d.reshape(B, S, TOTAL_TOKEN)


def reference_forward(params, pix, xy, mask, text):
    """Pure-JAX (no Pallas) reference using the same packed parameters."""
    x2d, mask_add, rowflag, B, S = _prepare_inputs(params, pix, xy, mask, text)
    x = x2d
    for l in range(NUM_LAYERS):
        x = _layer_forward(x, mask_add, params["w_panel"][l], params["w2"][l],
                           params["vecs"][l])
    vp0 = params["vecs"][0]
    hn = _layer_norm(x, vp0[SEG_FNG:SEG_FNG + 1, :EMBED_DIM],
                     vp0[SEG_FNB:SEG_FNB + 1, :EMBED_DIM]).astype(jnp.bfloat16)
    lw = params["logit_w"][:, :TOTAL_TOKEN]
    lb = params["logit_b"][:, :TOTAL_TOKEN].astype(jnp.float32)
    logits = jnp.dot(hn, lw, preferred_element_type=jnp.float32) + lb
    tok = jnp.arange(TOTAL_TOKEN)[None, :]
    masked = jnp.logical_xor(rowflag > 0.5, tok < NUM_TEXT_TOKEN)
    logits = jnp.where(masked, MASK_FILL_VALUE, logits)
    return logits.reshape(B, S, TOTAL_TOKEN)


# ============================ parameter init ============================

def init_params(key):
    ks = iter(jax.random.split(key, 128))

    def rnd(shape, scale=0.02):
        return (scale * jax.random.normal(next(ks), shape)).astype(jnp.float32)

    params = {}
    params["text_emb"] = rnd((NUM_TEXT_TOKEN, EMBED_DIM), 0.1)
    params["coord_x"] = rnd((COORD_VOCAB, EMBED_DIM), 0.1).at[MASK].set(0.0)  # padding_idx
    params["coord_y"] = rnd((COORD_VOCAB, EMBED_DIM), 0.1).at[MASK].set(0.0)
    params["pixel_emb"] = rnd((NUM_IMAGE_TOKEN, EMBED_DIM), 0.1).at[MASK].set(0.0)
    # kaiming_normal_ fan_in on (max_len, d_model): std = sqrt(2 / d_model)
    params["pos_emb"] = rnd((TOTAL_SEQ_LEN, EMBED_DIM), math.sqrt(2.0 / EMBED_DIM))

    norm_g = jnp.ones((1, EMBED_DIM), jnp.float32)
    norm_b = jnp.zeros((1, EMBED_DIM), jnp.float32)

    w_panels, w2s, vec_panels = [], [], []
    for _ in range(NUM_LAYERS):
        Wq = rnd((EMBED_DIM, EMBED_DIM), 0.05)
        Wk = rnd((EMBED_DIM, EMBED_DIM), 0.05)
        Wv = rnd((EMBED_DIM, EMBED_DIM), 0.05)
        Wo = rnd((EMBED_DIM, EMBED_DIM), 0.05)
        W1 = rnd((EMBED_DIM, HIDDEN_DIM), 0.05)
        W2 = rnd((HIDDEN_DIM, EMBED_DIM), 0.05)
        bq = rnd((1, EMBED_DIM), 0.01)
        bk = rnd((1, EMBED_DIM), 0.01)
        bv = rnd((1, EMBED_DIM), 0.01)
        bo = rnd((1, EMBED_DIM), 0.01)
        b1 = rnd((1, HIDDEN_DIM), 0.01)
        b2 = rnd((1, EMBED_DIM), 0.01)
        # Cross-attention weights: the memory token is identically zero, so the whole
        # cross-attention block collapses to the constant bv2 @ Wo2 + bo2 (precomputed).
        Wo2 = rnd((EMBED_DIM, EMBED_DIM), 0.05)
        bv2 = rnd((1, EMBED_DIM), 0.01)
        bo2 = rnd((1, EMBED_DIM), 0.01)
        cross = jnp.dot(bv2, Wo2) + bo2

        panel = jnp.zeros((EMBED_DIM, N_WSEG * WSEG), jnp.float32)
        for i, (wseg, cols) in enumerate([(Wq, EMBED_DIM), (Wk, EMBED_DIM),
                                          (Wv, EMBED_DIM), (Wo, EMBED_DIM),
                                          (W1, HIDDEN_DIM)]):
            panel = panel.at[:, i * WSEG:i * WSEG + cols].set(wseg)

        vec = jnp.zeros((NSEG_VEC, 128), jnp.float32)
        rows = [bq, bk, bv, bo, cross, b1, b2,
                jnp.ones((1, EMBED_DIM), jnp.float32), jnp.zeros((1, EMBED_DIM), jnp.float32),
                jnp.ones((1, EMBED_DIM), jnp.float32), jnp.zeros((1, EMBED_DIM), jnp.float32),
                jnp.ones((1, EMBED_DIM), jnp.float32), jnp.zeros((1, EMBED_DIM), jnp.float32),
                norm_g, norm_b]
        for i, r in enumerate(rows):
            vec = vec.at[i:i + 1, :r.shape[1]].set(r)

        w_panels.append(panel)
        w2s.append(W2)
        vec_panels.append(vec)

    params["w_panel"] = jnp.stack(w_panels)      # (L, E, 640) f32
    params["w2"] = jnp.stack(w2s)                # (L, HIDDEN, E) f32
    params["vecs"] = jnp.stack(vec_panels)       # (L, 15, 128) f32

    # logit_fc stored transposed (E, V), zero-padded to TOTAL_TOKEN_PAD, bf16 weights+bias
    w = rnd((EMBED_DIM, TOTAL_TOKEN), 0.05)
    b = rnd((1, TOTAL_TOKEN), 0.01)
    params["logit_w"] = (
        jnp.zeros((EMBED_DIM, TOTAL_TOKEN_PAD), jnp.float32).at[:, :TOTAL_TOKEN].set(w)
    ).astype(jnp.bfloat16)
    params["logit_b"] = (
        jnp.zeros((1, TOTAL_TOKEN_PAD), jnp.float32).at[:, :TOTAL_TOKEN].set(b)
    ).astype(jnp.bfloat16)
    return params


# ============================ main ============================

if __name__ == "__main__":
    params = init_params(jax.random.PRNGKey(0))

    B = 2
    P_IN = PIX_LEN - 1  # keeps S <= pos-embed max_len (matches sampling-style usage)

    k1, k2, k3, k4 = jax.random.split(jax.random.PRNGKey(0), 4)
    text = jax.random.randint(k1, (B, TEXT_LEN), 0, NUM_TEXT_TOKEN, dtype=jnp.int32)
    pix = jax.random.randint(k2, (B, P_IN), 0, NUM_IMAGE_TOKEN, dtype=jnp.int32)
    xy = jax.random.randint(k3, (B, P_IN, 2), 0, COORD_VOCAB, dtype=jnp.int32)
    # pixel padding mask (True = padded); last two pixel positions of batch 0 are padding
    mask = jnp.zeros((B, P_IN), dtype=bool).at[0, -2:].set(True)

    fwd = jax.jit(sketch_decoder_forward)
    logits = fwd(params, pix, xy, mask, text)
    jax.block_until_ready(logits)

    S = 1 + TEXT_LEN + P_IN
    assert logits.shape == (B, S, TOTAL_TOKEN), logits.shape
    assert bool(jnp.all(jnp.isfinite(logits)))
    # text-position rows (incl. context) must have all image-token logits filled with -max
    assert bool(jnp.all(logits[:, :TEXT_LEN, NUM_TEXT_TOKEN:] < -1e37))
    # image-position rows must have all text-token logits filled with -max
    assert bool(jnp.all(logits[:, TEXT_LEN:, :NUM_TEXT_TOKEN] < -1e37))
    # unmasked regions must be ordinary-magnitude values
    assert bool(jnp.all(logits[:, :TEXT_LEN, :NUM_TEXT_TOKEN] > -1e37))
    assert bool(jnp.all(logits[:, TEXT_LEN:, NUM_TEXT_TOKEN:] > -1e37))

    # numerical check against the pure-JAX reference (same packed params / bf16 weights)
    ref = jax.jit(reference_forward)(params, pix, xy, mask, text)
    jax.block_until_ready(ref)
    assert bool(jnp.array_equal(logits < -1e37, ref < -1e37))
    unmasked = ref > -1e37
    max_diff = float(jnp.max(jnp.abs(jnp.where(unmasked, logits - ref, 0.0))))
    assert max_diff < 5e-2, max_diff

    print("KERNEL_OK")
</pallas_src>

<mosaic_0001>
module attributes {stable_mosaic.version = 11 : i64} {
  func.func @_fused_kernel(%arg0: i32, %arg1: memref<24x32xf32, #tpu.memory_space<vmem>>, %arg2: memref<24x24xf32, #tpu.memory_space<vmem>>, %arg3: memref<24x1xf32, #tpu.memory_space<vmem>>, %arg4: memref<2x32x640xf32, #tpu.memory_space<vmem>>, %arg5: memref<2x64x32xf32, #tpu.memory_space<vmem>>, %arg6: memref<2x15x128xf32, #tpu.memory_space<vmem>>, %arg7: memref<32x10240xbf16, #tpu.memory_space<vmem>>, %arg8: memref<1x10240xbf16, #tpu.memory_space<vmem>>, %arg9: memref<24x10240xf32, #tpu.memory_space<vmem>>, %arg10: memref<24x32xbf16, #tpu.memory_space<vmem>>) attributes {dimension_semantics = [#tpu.dimension_semantics<arbitrary>], iteration_bounds = array<i64: 4>, scalar_prefetch = 0 : i64, scratch_operands = 1 : i64, tpu.core_type = #tpu.core_type<tc>, window_params = [{pipeline_mode = #tpu.pipeline_mode<synchronous>, transform_indices = @transform_0, window_bounds = array<i64: 24, 32>}, {pipeline_mode = #tpu.pipeline_mode<synchronous>, transform_indices = @transform_1, window_bounds = array<i64: 24, 24>}, {pipeline_mode = #tpu.pipeline_mode<synchronous>, transform_indices = @transform_2, window_bounds = array<i64: 24, 1>}, {pipeline_mode = #tpu.pipeline_mode<synchronous>, transform_indices = @transform_3, window_bounds = array<i64: 2, 32, 640>}, {pipeline_mode = #tpu.pipeline_mode<synchronous>, transform_indices = @transform_4, window_bounds = array<i64: 2, 64, 32>}, {pipeline_mode = #tpu.pipeline_mode<synchronous>, transform_indices = @transform_5, window_bounds = array<i64: 2, 15, 128>}, {transform_indices = @transform_6, window_bounds = array<i64: 32, 10240>}, {transform_indices = @transform_7, window_bounds = array<i64: 1, 10240>}, {transform_indices = @transform_8, window_bounds = array<i64: 24, 10240>}]} {
    %c0_i32 = arith.constant 0 : i32
    %0 = arith.cmpi eq, %arg0, %c0_i32 : i32
    %1 = arith.extui %0 : i1 to i32
    %c0_i32_0 = arith.constant 0 : i32
    %2 = arith.cmpi ne, %1, %c0_i32_0 : i32
    scf.if %2 {
      %c0_12 = arith.constant 0 : index
      %c0_13 = arith.constant 0 : index
      %24 = vector.load %arg1[%c0_12, %c0_13] : memref<24x32xf32, #tpu.memory_space<vmem>>, vector<24x32xf32>
      %c0_14 = arith.constant 0 : index
      %c0_15 = arith.constant 0 : index
      %25 = vector.load %arg2[%c0_14, %c0_15] : memref<24x24xf32, #tpu.memory_space<vmem>>, vector<24x24xf32>
      %c0_16 = arith.constant 0 : index
      %c0_17 = arith.constant 0 : index
      %c0_18 = arith.constant 0 : index
      %26 = vector.load %arg4[%c0_16, %c0_17, %c0_18] : memref<2x32x640xf32, #tpu.memory_space<vmem>>, vector<1x32x640xf32>
      %27 = vector.shape_cast %26 : vector<1x32x640xf32> to vector<32x640xf32>
      %c0_19 = arith.constant 0 : index
      %c0_20 = arith.constant 0 : index
      %c0_21 = arith.constant 0 : index
      %28 = vector.load %arg5[%c0_19, %c0_20, %c0_21] : memref<2x64x32xf32, #tpu.memory_space<vmem>>, vector<1x64x32xf32>
      %29 = vector.shape_cast %28 : vector<1x64x32xf32> to vector<64x32xf32>
      %c0_22 = arith.constant 0 : index
      %c0_23 = arith.constant 0 : index
      %c0_24 = arith.constant 0 : index
      %30 = vector.load %arg6[%c0_22, %c0_23, %c0_24] : memref<2x15x128xf32, #tpu.memory_space<vmem>>, vector<1x15x128xf32>
      %31 = vector.shape_cast %30 : vector<1x15x128xf32> to vector<15x128xf32>
      %32 = vector.extract_strided_slice %27 {offsets = [0, 0], sizes = [32, 32], strides = [1, 1]} : vector<32x640xf32> to vector<32x32xf32>
      %33 = vector.extract_strided_slice %27 {offsets = [0, 128], sizes = [32, 32], strides = [1, 1]} : vector<32x640xf32> to vector<32x32xf32>
      %34 = vector.extract_strided_slice %27 {offsets = [0, 256], sizes = [32, 32], strides = [1, 1]} : vector<32x640xf32> to vector<32x32xf32>
      %35 = vector.extract_strided_slice %27 {offsets = [0, 384], sizes = [32, 32], strides = [1, 1]} : vector<32x640xf32> to vector<32x32xf32>
      %36 = vector.extract_strided_slice %27 {offsets = [0, 512], sizes = [32, 64], strides = [1, 1]} : vector<32x640xf32> to vector<32x64xf32>
      %cst_25 = arith.constant dense<0.000000e+00> : vector<24x32xf32>
      %37 = tpu.matmul %24, %32, %cst_25 {dimension_numbers = #tpu.dot_dimension_numbers<[1], [0], [0], [1], [0, 0, 1, 1], [], []>} : vector<24x32xf32>, vector<32x32xf32>, vector<24x32xf32> -> vector<24x32xf32>
      %38 = vector.extract_strided_slice %31 {offsets = [0, 0], sizes = [1, 32], strides = [1, 1]} : vector<15x128xf32> to vector<1x32xf32>
      %39 = vector.broadcast %38 : vector<1x32xf32> to vector<24x32xf32>
      %40 = arith.addf %37, %39 : vector<24x32xf32>
      %cst_26 = arith.constant 0.353553385 : f32
      %41 = vector.broadcast %cst_26 : f32 to vector<24x32xf32>
      %42 = arith.mulf %40, %41 : vector<24x32xf32>
      %cst_27 = arith.constant dense<0.000000e+00> : vector<24x32xf32>
      %43 = tpu.matmul %24, %33, %cst_27 {dimension_numbers = #tpu.dot_dimension_numbers<[1], [0], [0], [1], [0, 0, 1, 1], [], []>} : vector<24x32xf32>, vector<32x32xf32>, vector<24x32xf32> -> vector<24x32xf32>
      %44 = vector.extract_strided_slice %31 {offsets = [1, 0], sizes = [1, 32], strides = [1, 1]} : vector<15x128xf32> to vector<1x32xf32>
      %45 = vector.broadcast %44 : vector<1x32xf32> to vector<24x32xf32>
      %46 = arith.addf %43, %45 : vector<24x32xf32>
      %cst_28 = arith.constant dense<0.000000e+00> : vector<24x32xf32>
      %47 = tpu.matmul %24, %34, %cst_28 {dimension_numbers = #tpu.dot_dimension_numbers<[1], [0], [0], [1], [0, 0, 1, 1], [], []>} : vector<24x32xf32>, vector<32x32xf32>, vector<24x32xf32> -> vector<24x32xf32>
      %48 = vector.extract_strided_slice %31 {offsets = [2, 0], sizes = [1, 32], strides = [1, 1]} : vector<15x128xf32> to vector<1x32xf32>
      %49 = vector.broadcast %48 : vector<1x32xf32> to vector<24x32xf32>
      %50 = arith.addf %47, %49 : vector<24x32xf32>
      %51 = vector.extract_strided_slice %31 {offsets = [3, 0], sizes = [1, 32], strides = [1, 1]} : vector<15x128xf32> to vector<1x32xf32>
      %52 = vector.extract_strided_slice %42 {offsets = [0, 0], sizes = [24, 8], strides = [1, 1]} : vector<24x32xf32> to vector<24x8xf32>
      %53 = vector.extract_strided_slice %46 {offsets = [0, 0], sizes = [24, 8], strides = [1, 1]} : vector<24x32xf32> to vector<24x8xf32>
      %54 = tpu.transpose %53, [1, 0] : vector<24x8xf32> -> vector<8x24xf32>
      %cst_29 = arith.constant dense<0.000000e+00> : vector<24x24xf32>
      %55 = tpu.matmul %52, %54, %cst_29 {dimension_numbers = #tpu.dot_dimension_numbers<[1], [0], [0], [1], [0, 0, 1, 1], [], []>} : vector<24x8xf32>, vector<8x24xf32>, vector<24x24xf32> -> vector<24x24xf32>
      %56 = arith.addf %55, %25 : vector<24x24xf32>
      %cst_30 = arith.constant dense<0xFF800000> : vector<24xf32>
      %57 = vector.multi_reduction <maximumf>, %56, %cst_30 [1] : vector<24x24xf32> to vector<24xf32>
      %58 = vector.shape_cast %57 : vector<24xf32> to vector<24x1xf32>
      %59 = vector.broadcast %58 : vector<24x1xf32> to vector<24x24xf32>
      %60 = arith.subf %56, %59 : vector<24x24xf32>
      %61 = math.exp %60 : vector<24x24xf32>
      %cst_31 = arith.constant dense<0.000000e+00> : vector<24xf32>
      %62 = vector.multi_reduction <add>, %61, %cst_31 [1] : vector<24x24xf32> to vector<24xf32>
      %63 = vector.shape_cast %62 : vector<24xf32> to vector<24x1xf32>
      %64 = vector.broadcast %63 : vector<24x1xf32> to vector<24x24xf32>
      %65 = arith.divf %61, %64 : vector<24x24xf32>
      %66 = vector.extract_strided_slice %50 {offsets = [0, 0], sizes = [24, 8], strides = [1, 1]} : vector<24x32xf32> to vector<24x8xf32>
      %cst_32 = arith.constant dense<0.000000e+00> : vector<24x8xf32>
      %67 = tpu.matmul %65, %66, %cst_32 {dimension_numbers = #tpu.dot_dimension_numbers<[1], [0], [0], [1], [0, 0, 1, 1], [], []>} : vector<24x24xf32>, vector<24x8xf32>, vector<24x8xf32> -> vector<24x8xf32>
      %68 = vector.extract_strided_slice %35 {offsets = [0, 0], sizes = [8, 32], strides = [1, 1]} : vector<32x32xf32> to vector<8x32xf32>
      %cst_33 = arith.constant dense<0.000000e+00> : vector<24x32xf32>
      %69 = tpu.matmul %67, %68, %cst_33 {dimension_numbers = #tpu.dot_dimension_numbers<[1], [0], [0], [1], [0, 0, 1, 1], [], []>} : vector<24x8xf32>, vector<8x32xf32>, vector<24x32xf32> -> vector<24x32xf32>
      %70 = vector.broadcast %51 : vector<1x32xf32> to vector<24x32xf32>
      %71 = arith.addf %70, %69 : vector<24x32xf32>
      %72 = vector.extract_strided_slice %42 {offsets = [0, 8], sizes = [24, 8], strides = [1, 1]} : vector<24x32xf32> to vector<24x8xf32>
      %73 = vector.extract_strided_slice %46 {offsets = [0, 8], sizes = [24, 8], strides = [1, 1]} : vector<24x32xf32> to vector<24x8xf32>
      %74 = tpu.transpose %73, [1, 0] : vector<24x8xf32> -> vector<8x24xf32>
      %cst_34 = arith.constant dense<0.000000e+00> : vector<24x24xf32>
      %75 = tpu.matmul %72, %74, %cst_34 {dimension_numbers = #tpu.dot_dimension_numbers<[1], [0], [0], [1], [0, 0, 1, 1], [], []>} : vector<24x8xf32>, vector<8x24xf32>, vector<24x24xf32> -> vector<24x24xf32>
      %76 = arith.addf %75, %25 : vector<24x24xf32>
      %cst_35 = arith.constant dense<0xFF800000> : vector<24xf32>
      %77 = vector.multi_reduction <maximumf>, %76, %cst_35 [1] : vector<24x24xf32> to vector<24xf32>
      %78 = vector.shape_cast %77 : vector<24xf32> to vector<24x1xf32>
      %79 = vector.broadcast %78 : vector<24x1xf32> to vector<24x24xf32>
      %80 = arith.subf %76, %79 : vector<24x24xf32>
      %81 = math.exp %80 : vector<24x24xf32>
      %cst_36 = arith.constant dense<0.000000e+00> : vector<24xf32>
      %82 = vector.multi_reduction <add>, %81, %cst_36 [1] : vector<24x24xf32> to vector<24xf32>
      %83 = vector.shape_cast %82 : vector<24xf32> to vector<24x1xf32>
      %84 = vector.broadcast %83 : vector<24x1xf32> to vector<24x24xf32>
      %85 = arith.divf %81, %84 : vector<24x24xf32>
      %86 = vector.extract_strided_slice %50 {offsets = [0, 8], sizes = [24, 8], strides = [1, 1]} : vector<24x32xf32> to vector<24x8xf32>
      %cst_37 = arith.constant dense<0.000000e+00> : vector<24x8xf32>
      %87 = tpu.matmul %85, %86, %cst_37 {dimension_numbers = #tpu.dot_dimension_numbers<[1], [0], [0], [1], [0, 0, 1, 1], [], []>} : vector<24x24xf32>, vector<24x8xf32>, vector<24x8xf32> -> vector<24x8xf32>
      %88 = vector.extract_strided_slice %35 {offsets = [8, 0], sizes = [8, 32], strides = [1, 1]} : vector<32x32xf32> to vector<8x32xf32>
      %cst_38 = arith.constant dense<0.000000e+00> : vector<24x32xf32>
      %89 = tpu.matmul %87, %88, %cst_38 {dimension_numbers = #tpu.dot_dimension_numbers<[1], [0], [0], [1], [0, 0, 1, 1], [], []>} : vector<24x8xf32>, vector<8x32xf32>, vector<24x32xf32> -> vector<24x32xf32>
      %90 = arith.addf %71, %89 : vector<24x32xf32>
      %91 = vector.extract_strided_slice %42 {offsets = [0, 16], sizes = [24, 8], strides = [1, 1]} : vector<24x32xf32> to vector<24x8xf32>
      %92 = vector.extract_strided_slice %46 {offsets = [0, 16], sizes = [24, 8], strides = [1, 1]} : vector<24x32xf32> to vector<24x8xf32>
      %93 = tpu.transpose %92, [1, 0] : vector<24x8xf32> -> vector<8x24xf32>
      %cst_39 = arith.constant dense<0.000000e+00> : vector<24x24xf32>
      %94 = tpu.matmul %91, %93, %cst_39 {dimension_numbers = #tpu.dot_dimension_numbers<[1], [0], [0], [1], [0, 0, 1, 1], [], []>} : vector<24x8xf32>, vector<8x24xf32>, vector<24x24xf32> -> vector<24x24xf32>
      %95 = arith.addf %94, %25 : vector<24x24xf32>
      %cst_40 = arith.constant dense<0xFF800000> : vector<24xf32>
      %96 = vector.multi_reduction <maximumf>, %95, %cst_40 [1] : vector<24x24xf32> to vector<24xf32>
      %97 = vector.shape_cast %96 : vector<24xf32> to vector<24x1xf32>
      %98 = vector.broadcast %97 : vector<24x1xf32> to vector<24x24xf32>
      %99 = arith.subf %95, %98 : vector<24x24xf32>
      %100 = math.exp %99 : vector<24x24xf32>
      %cst_41 = arith.constant dense<0.000000e+00> : vector<24xf32>
      %101 = vector.multi_reduction <add>, %100, %cst_41 [1] : vector<24x24xf32> to vector<24xf32>
      %102 = vector.shape_cast %101 : vector<24xf32> to vector<24x1xf32>
      %103 = vector.broadcast %102 : vector<24x1xf32> to vector<24x24xf32>
      %104 = arith.divf %100, %103 : vector<24x24xf32>
      %105 = vector.extract_strided_slice %50 {offsets = [0, 16], sizes = [24, 8], strides = [1, 1]} : vector<24x32xf32> to vector<24x8xf32>
      %cst_42 = arith.constant dense<0.000000e+00> : vector<24x8xf32>
      %106 = tpu.matmul %104, %105, %cst_42 {dimension_numbers = #tpu.dot_dimension_numbers<[1], [0], [0], [1], [0, 0, 1, 1], [], []>} : vector<24x24xf32>, vector<24x8xf32>, vector<24x8xf32> -> vector<24x8xf32>
      %107 = vector.extract_strided_slice %35 {offsets = [16, 0], sizes = [8, 32], strides = [1, 1]} : vector<32x32xf32> to vector<8x32xf32>
      %cst_43 = arith.constant dense<0.000000e+00> : vector<24x32xf32>
      %108 = tpu.matmul %106, %107, %cst_43 {dimension_numbers = #tpu.dot_dimension_numbers<[1], [0], [0], [1], [0, 0, 1, 1], [], []>} : vector<24x8xf32>, vector<8x32xf32>, vector<24x32xf32> -> vector<24x32xf32>
      %109 = arith.addf %90, %108 : vector<24x32xf32>
      %110 = vector.extract_strided_slice %42 {offsets = [0, 24], sizes = [24, 8], strides = [1, 1]} : vector<24x32xf32> to vector<24x8xf32>
      %111 = vector.extract_strided_slice %46 {offsets = [0, 24], sizes = [24, 8], strides = [1, 1]} : vector<24x32xf32> to vector<24x8xf32>
      %112 = tpu.transpose %111, [1, 0] : vector<24x8xf32> -> vector<8x24xf32>
      %cst_44 = arith.constant dense<0.000000e+00> : vector<24x24xf32>
      %113 = tpu.matmul %110, %112, %cst_44 {dimension_numbers = #tpu.dot_dimension_numbers<[1], [0], [0], [1], [0, 0, 1, 1], [], []>} : vector<24x8xf32>, vector<8x24xf32>, vector<24x24xf32> -> vector<24x24xf32>
      %114 = arith.addf %113, %25 : vector<24x24xf32>
      %cst_45 = arith.constant dense<0xFF800000> : vector<24xf32>
      %115 = vector.multi_reduction <maximumf>, %114, %cst_45 [1] : vector<24x24xf32> to vector<24xf32>
      %116 = vector.shape_cast %115 : vector<24xf32> to vector<24x1xf32>
      %117 = vector.broadcast %116 : vector<24x1xf32> to vector<24x24xf32>
      %118 = arith.subf %114, %117 : vector<24x24xf32>
      %119 = math.exp %118 : vector<24x24xf32>
      %cst_46 = arith.constant dense<0.000000e+00> : vector<24xf32>
      %120 = vector.multi_reduction <add>, %119, %cst_46 [1] : vector<24x24xf32> to vector<24xf32>
      %121 = vector.shape_cast %120 : vector<24xf32> to vector<24x1xf32>
      %122 = vector.broadcast %121 : vector<24x1xf32> to vector<24x24xf32>
      %123 = arith.divf %119, %122 : vector<24x24xf32>
      %124 = vector.extract_strided_slice %50 {offsets = [0, 24], sizes = [24, 8], strides = [1, 1]} : vector<24x32xf32> to vector<24x8xf32>
      %cst_47 = arith.constant dense<0.000000e+00> : vector<24x8xf32>
      %125 = tpu.matmul %123, %124, %cst_47 {dimension_numbers = #tpu.dot_dimension_numbers<[1], [0], [0], [1], [0, 0, 1, 1], [], []>} : vector<24x24xf32>, vector<24x8xf32>, vector<24x8xf32> -> vector<24x8xf32>
      %126 = vector.extract_strided_slice %35 {offsets = [24, 0], sizes = [8, 32], strides = [1, 1]} : vector<32x32xf32> to vector<8x32xf32>
      %cst_48 = arith.constant dense<0.000000e+00> : vector<24x32xf32>
      %127 = tpu.matmul %125, %126, %cst_48 {dimension_numbers = #tpu.dot_dimension_numbers<[1], [0], [0], [1], [0, 0, 1, 1], [], []>} : vector<24x8xf32>, vector<8x32xf32>, vector<24x32xf32> -> vector<24x32xf32>
      %128 = arith.addf %109, %127 : vector<24x32xf32>
      %129 = arith.addf %24, %128 : vector<24x32xf32>
      %130 = vector.extract_strided_slice %31 {offsets = [7, 0], sizes = [1, 32], strides = [1, 1]} : vector<15x128xf32> to vector<1x32xf32>
      %131 = vector.extract_strided_slice %31 {offsets = [8, 0], sizes = [1, 32], strides = [1, 1]} : vector<15x128xf32> to vector<1x32xf32>
      %cst_49 = arith.constant dense<0.000000e+00> : vector<24xf32>
      %132 = vector.multi_reduction <add>, %129, %cst_49 [1] : vector<24x32xf32> to vector<24xf32>
      %133 = vector.shape_cast %132 : vector<24xf32> to vector<24x1xf32>
      %cst_50 = arith.constant 3.200000e+01 : f32
      %134 = vector.broadcast %cst_50 : f32 to vector<24x1xf32>
      %135 = arith.divf %133, %134 : vector<24x1xf32>
      %136 = vector.broadcast %135 : vector<24x1xf32> to vector<24x32xf32>
      %137 = arith.subf %129, %136 : vector<24x32xf32>
      %138 = arith.mulf %137, %137 : vector<24x32xf32>
      %cst_51 = arith.constant dense<0.000000e+00> : vector<24xf32>
      %139 = vector.multi_reduction <add>, %138, %cst_51 [1] : vector<24x32xf32> to vector<24xf32>
      %140 = vector.shape_cast %139 : vector<24xf32> to vector<24x1xf32>
      %cst_52 = arith.constant 3.200000e+01 : f32
      %141 = vector.broadcast %cst_52 : f32 to vector<24x1xf32>
      %142 = arith.divf %140, %141 : vector<24x1xf32>
      %143 = vector.broadcast %135 : vector<24x1xf32> to vector<24x32xf32>
      %144 = arith.subf %129, %143 : vector<24x32xf32>
      %cst_53 = arith.constant 9.99999974E-6 : f32
      %145 = vector.broadcast %cst_53 : f32 to vector<24x1xf32>
      %146 = arith.addf %142, %145 : vector<24x1xf32>
      %147 = math.rsqrt %146 : vector<24x1xf32>
      %148 = vector.broadcast %147 : vector<24x1xf32> to vector<24x32xf32>
      %149 = arith.mulf %144, %148 : vector<24x32xf32>
      %150 = vector.broadcast %130 : vector<1x32xf32> to vector<24x32xf32>
      %151 = arith.mulf %149, %150 : vector<24x32xf32>
      %152 = vector.broadcast %131 : vector<1x32xf32> to vector<24x32xf32>
      %153 = arith.addf %151, %152 : vector<24x32xf32>
      %154 = vector.extract_strided_slice %31 {offsets = [4, 0], sizes = [1, 32], strides = [1, 1]} : vector<15x128xf32> to vector<1x32xf32>
      %155 = vector.broadcast %154 : vector<1x32xf32> to vector<24x32xf32>
      %156 = arith.addf %153, %155 : vector<24x32xf32>
      %157 = vector.extract_strided_slice %31 {offsets = [9, 0], sizes = [1, 32], strides = [1, 1]} : vector<15x128xf32> to vector<1x32xf32>
      %158 = vector.extract_strided_slice %31 {offsets = [10, 0], sizes = [1, 32], strides = [1, 1]} : vector<15x128xf32> to vector<1x32xf32>
      %cst_54 = arith.constant dense<0.000000e+00> : vector<24xf32>
      %159 = vector.multi_reduction <add>, %156, %cst_54 [1] : vector<24x32xf32> to vector<24xf32>
      %160 = vector.shape_cast %159 : vector<24xf32> to vector<24x1xf32>
      %cst_55 = arith.constant 3.200000e+01 : f32
      %161 = vector.broadcast %cst_55 : f32 to vector<24x1xf32>
      %162 = arith.divf %160, %161 : vector<24x1xf32>
      %163 = vector.broadcast %162 : vector<24x1xf32> to vector<24x32xf32>
      %164 = arith.subf %156, %163 : vector<24x32xf32>
      %165 = arith.mulf %164, %164 : vector<24x32xf32>
      %cst_56 = arith.constant dense<0.000000e+00> : vector<24xf32>
      %166 = vector.multi_reduction <add>, %165, %cst_56 [1] : vector<24x32xf32> to vector<24xf32>
      %167 = vector.shape_cast %166 : vector<24xf32> to vector<24x1xf32>
      %cst_57 = arith.constant 3.200000e+01 : f32
      %168 = vector.broadcast %cst_57 : f32 to vector<24x1xf32>
      %169 = arith.divf %167, %168 : vector<24x1xf32>
      %170 = vector.broadcast %162 : vector<24x1xf32> to vector<24x32xf32>
      %171 = arith.subf %156, %170 : vector<24x32xf32>
      %cst_58 = arith.constant 9.99999974E-6 : f32
      %172 = vector.broadcast %cst_58 : f32 to vector<24x1xf32>
      %173 = arith.addf %169, %172 : vector<24x1xf32>
      %174 = math.rsqrt %173 : vector<24x1xf32>
      %175 = vector.broadcast %174 : vector<24x1xf32> to vector<24x32xf32>
      %176 = arith.mulf %171, %175 : vector<24x32xf32>
      %177 = vector.broadcast %157 : vector<1x32xf32> to vector<24x32xf32>
      %178 = arith.mulf %176, %177 : vector<24x32xf32>
      %179 = vector.broadcast %158 : vector<1x32xf32> to vector<24x32xf32>
      %180 = arith.addf %178, %179 : vector<24x32xf32>
      %cst_59 = arith.constant dense<0.000000e+00> : vector<24x64xf32>
      %181 = tpu.matmul %180, %36, %cst_59 {dimension_numbers = #tpu.dot_dimension_numbers<[1], [0], [0], [1], [0, 0, 1, 1], [], []>} : vector<24x32xf32>, vector<32x64xf32>, vector<24x64xf32> -> vector<24x64xf32>
      %182 = vector.extract_strided_slice %31 {offsets = [5, 0], sizes = [1, 64], strides = [1, 1]} : vector<15x128xf32> to vector<1x64xf32>
      %183 = vector.broadcast %182 : vector<1x64xf32> to vector<24x64xf32>
      %184 = arith.addf %181, %183 : vector<24x64xf32>
      %cst_60 = arith.constant 0.000000e+00 : f32
      %185 = vector.broadcast %cst_60 : f32 to vector<24x64xf32>
      %186 = arith.maximumf %184, %185 : vector<24x64xf32>
      %cst_61 = arith.constant dense<0.000000e+00> : vector<24x32xf32>
      %187 = tpu.matmul %186, %29, %cst_61 {dimension_numbers = #tpu.dot_dimension_numbers<[1], [0], [0], [1], [0, 0, 1, 1], [], []>} : vector<24x64xf32>, vector<64x32xf32>, vector<24x32xf32> -> vector<24x32xf32>
      %188 = vector.extract_strided_slice %31 {offsets = [6, 0], sizes = [1, 32], strides = [1, 1]} : vector<15x128xf32> to vector<1x32xf32>
      %189 = vector.broadcast %188 : vector<1x32xf32> to vector<24x32xf32>
      %190 = arith.addf %187, %189 : vector<24x32xf32>
      %191 = arith.addf %180, %190 : vector<24x32xf32>
      %192 = vector.extract_strided_slice %31 {offsets = [11, 0], sizes = [1, 32], strides = [1, 1]} : vector<15x128xf32> to vector<1x32xf32>
      %193 = vector.extract_strided_slice %31 {offsets = [12, 0], sizes = [1, 32], strides = [1, 1]} : vector<15x128xf32> to vector<1x32xf32>
      %cst_62 = arith.constant dense<0.000000e+00> : vector<24xf32>
      %194 = vector.multi_reduction <add>, %191, %cst_62 [1] : vector<24x32xf32> to vector<24xf32>
      %195 = vector.shape_cast %194 : vector<24xf32> to vector<24x1xf32>
      %cst_63 = arith.constant 3.200000e+01 : f32
      %196 = vector.broadcast %cst_63 : f32 to vector<24x1xf32>
      %197 = arith.divf %195, %196 : vector<24x1xf32>
      %198 = vector.broadcast %197 : vector<24x1xf32> to vector<24x32xf32>
      %199 = arith.subf %191, %198 : vector<24x32xf32>
      %200 = arith.mulf %199, %199 : vector<24x32xf32>
      %cst_64 = arith.constant dense<0.000000e+00> : vector<24xf32>
      %201 = vector.multi_reduction <add>, %200, %cst_64 [1] : vector<24x32xf32> to vector<24xf32>
      %202 = vector.shape_cast %201 : vector<24xf32> to vector<24x1xf32>
      %cst_65 = arith.constant 3.200000e+01 : f32
      %203 = vector.broadcast %cst_65 : f32 to vector<24x1xf32>
      %204 = arith.divf %202, %203 : vector<24x1xf32>
      %205 = vector.broadcast %197 : vector<24x1xf32> to vector<24x32xf32>
      %206 = arith.subf %191, %205 : vector<24x32xf32>
      %cst_66 = arith.constant 9.99999974E-6 : f32
      %207 = vector.broadcast %cst_66 : f32 to vector<24x1xf32>
      %208 = arith.addf %204, %207 : vector<24x1xf32>
      %209 = math.rsqrt %208 : vector<24x1xf32>
      %210 = vector.broadcast %209 : vector<24x1xf32> to vector<24x32xf32>
      %211 = arith.mulf %206, %210 : vector<24x32xf32>
      %212 = vector.broadcast %192 : vector<1x32xf32> to vector<24x32xf32>
      %213 = arith.mulf %211, %212 : vector<24x32xf32>
      %214 = vector.broadcast %193 : vector<1x32xf32> to vector<24x32xf32>
      %215 = arith.addf %213, %214 : vector<24x32xf32>
      %c1 = arith.constant 1 : index
      %c0_67 = arith.constant 0 : index
      %c0_68 = arith.constant 0 : index
      %216 = vector.load %arg4[%c1, %c0_67, %c0_68] : memref<2x32x640xf32, #tpu.memory_space<vmem>>, vector<1x32x640xf32>
      %217 = vector.shape_cast %216 : vector<1x32x640xf32> to vector<32x640xf32>
      %c1_69 = arith.constant 1 : index
      %c0_70 = arith.constant 0 : index
      %c0_71 = arith.constant 0 : index
      %218 = vector.load %arg5[%c1_69, %c0_70, %c0_71] : memref<2x64x32xf32, #tpu.memory_space<vmem>>, vector<1x64x32xf32>
      %219 = vector.shape_cast %218 : vector<1x64x32xf32> to vector<64x32xf32>
      %c1_72 = arith.constant 1 : index
      %c0_73 = arith.constant 0 : index
      %c0_74 = arith.constant 0 : index
      %220 = vector.load %arg6[%c1_72, %c0_73, %c0_74] : memref<2x15x128xf32, #tpu.memory_space<vmem>>, vector<1x15x128xf32>
      %221 = vector.shape_cast %220 : vector<1x15x128xf32> to vector<15x128xf32>
      %222 = vector.extract_strided_slice %217 {offsets = [0, 0], sizes = [32, 32], strides = [1, 1]} : vector<32x640xf32> to vector<32x32xf32>
      %223 = vector.extract_strided_slice %217 {offsets = [0, 128], sizes = [32, 32], strides = [1, 1]} : vector<32x640xf32> to vector<32x32xf32>
      %224 = vector.extract_strided_slice %217 {offsets = [0, 256], sizes = [32, 32], strides = [1, 1]} : vector<32x640xf32> to vector<32x32xf32>
      %225 = vector.extract_strided_slice %217 {offsets = [0, 384], sizes = [32, 32], strides = [1, 1]} : vector<32x640xf32> to vector<32x32xf32>
      %226 = vector.extract_strided_slice %217 {offsets = [0, 512], sizes = [32, 64], strides = [1, 1]} : vector<32x640xf32> to vector<32x64xf32>
      %cst_75 = arith.constant dense<0.000000e+00> : vector<24x32xf32>
      %227 = tpu.matmul %215, %222, %cst_75 {dimension_numbers = #tpu.dot_dimension_numbers<[1], [0], [0], [1], [0, 0, 1, 1], [], []>} : vector<24x32xf32>, vector<32x32xf32>, vector<24x32xf32> -> vector<24x32xf32>
      %228 = vector.extract_strided_slice %221 {offsets = [0, 0], sizes = [1, 32], strides = [1, 1]} : vector<15x128xf32> to vector<1x32xf32>
      %229 = vector.broadcast %228 : vector<1x32xf32> to vector<24x32xf32>
      %230 = arith.addf %227, %229 : vector<24x32xf32>
      %cst_76 = arith.constant 0.353553385 : f32
      %231 = vector.broadcast %cst_76 : f32 to vector<24x32xf32>
      %232 = arith.mulf %230, %231 : vector<24x32xf32>
      %cst_77 = arith.constant dense<0.000000e+00> : vector<24x32xf32>
      %233 = tpu.matmul %215, %223, %cst_77 {dimension_numbers = #tpu.dot_dimension_numbers<[1], [0], [0], [1], [0, 0, 1, 1], [], []>} : vector<24x32xf32>, vector<32x32xf32>, vector<24x32xf32> -> vector<24x32xf32>
      %234 = vector.extract_strided_slice %221 {offsets = [1, 0], sizes = [1, 32], strides = [1, 1]} : vector<15x128xf32> to vector<1x32xf32>
      %235 = vector.broadcast %234 : vector<1x32xf32> to vector<24x32xf32>
      %236 = arith.addf %233, %235 : vector<24x32xf32>
      %cst_78 = arith.constant dense<0.000000e+00> : vector<24x32xf32>
      %237 = tpu.matmul %215, %224, %cst_78 {dimension_numbers = #tpu.dot_dimension_numbers<[1], [0], [0], [1], [0, 0, 1, 1], [], []>} : vector<24x32xf32>, vector<32x32xf32>, vector<24x32xf32> -> vector<24x32xf32>
      %238 = vector.extract_strided_slice %221 {offsets = [2, 0], sizes = [1, 32], strides = [1, 1]} : vector<15x128xf32> to vector<1x32xf32>
      %239 = vector.broadcast %238 : vector<1x32xf32> to vector<24x32xf32>
      %240 = arith.addf %237, %239 : vector<24x32xf32>
      %241 = vector.extract_strided_slice %221 {offsets = [3, 0], sizes = [1, 32], strides = [1, 1]} : vector<15x128xf32> to vector<1x32xf32>
      %242 = vector.extract_strided_slice %232 {offsets = [0, 0], sizes = [24, 8], strides = [1, 1]} : vector<24x32xf32> to vector<24x8xf32>
      %243 = vector.extract_strided_slice %236 {offsets = [0, 0], sizes = [24, 8], strides = [1, 1]} : vector<24x32xf32> to vector<24x8xf32>
      %244 = tpu.transpose %243, [1, 0] : vector<24x8xf32> -> vector<8x24xf32>
      %cst_79 = arith.constant dense<0.000000e+00> : vector<24x24xf32>
      %245 = tpu.matmul %242, %244, %cst_79 {dimension_numbers = #tpu.dot_dimension_numbers<[1], [0], [0], [1], [0, 0, 1, 1], [], []>} : vector<24x8xf32>, vector<8x24xf32>, vector<24x24xf32> -> vector<24x24xf32>
      %246 = arith.addf %245, %25 : vector<24x24xf32>
      %cst_80 = arith.constant dense<0xFF800000> : vector<24xf32>
      %247 = vector.multi_reduction <maximumf>, %246, %cst_80 [1] : vector<24x24xf32> to vector<24xf32>
      %248 = vector.shape_cast %247 : vector<24xf32> to vector<24x1xf32>
      %249 = vector.broadcast %248 : vector<24x1xf32> to vector<24x24xf32>
      %250 = arith.subf %246, %249 : vector<24x24xf32>
      %251 = math.exp %250 : vector<24x24xf32>
      %cst_81 = arith.constant dense<0.000000e+00> : vector<24xf32>
      %252 = vector.multi_reduction <add>, %251, %cst_81 [1] : vector<24x24xf32> to vector<24xf32>
      %253 = vector.shape_cast %252 : vector<24xf32> to vector<24x1xf32>
      %254 = vector.broadcast %253 : vector<24x1xf32> to vector<24x24xf32>
      %255 = arith.divf %251, %254 : vector<24x24xf32>
      %256 = vector.extract_strided_slice %240 {offsets = [0, 0], sizes = [24, 8], strides = [1, 1]} : vector<24x32xf32> to vector<24x8xf32>
      %cst_82 = arith.constant dense<0.000000e+00> : vector<24x8xf32>
      %257 = tpu.matmul %255, %256, %cst_82 {dimension_numbers = #tpu.dot_dimension_numbers<[1], [0], [0], [1], [0, 0, 1, 1], [], []>} : vector<24x24xf32>, vector<24x8xf32>, vector<24x8xf32> -> vector<24x8xf32>
      %258 = vector.extract_strided_slice %225 {offsets = [0, 0], sizes = [8, 32], strides = [1, 1]} : vector<32x32xf32> to vector<8x32xf32>
      %cst_83 = arith.constant dense<0.000000e+00> : vector<24x32xf32>
      %259 = tpu.matmul %257, %258, %cst_83 {dimension_numbers = #tpu.dot_dimension_numbers<[1], [0], [0], [1], [0, 0, 1, 1], [], []>} : vector<24x8xf32>, vector<8x32xf32>, vector<24x32xf32> -> vector<24x32xf32>
      %260 = vector.broadcast %241 : vector<1x32xf32> to vector<24x32xf32>
      %261 = arith.addf %260, %259 : vector<24x32xf32>
      %262 = vector.extract_strided_slice %232 {offsets = [0, 8], sizes = [24, 8], strides = [1, 1]} : vector<24x32xf32> to vector<24x8xf32>
      %263 = vector.extract_strided_slice %236 {offsets = [0, 8], sizes = [24, 8], strides = [1, 1]} : vector<24x32xf32> to vector<24x8xf32>
      %264 = tpu.transpose %263, [1, 0] : vector<24x8xf32> -> vector<8x24xf32>
      %cst_84 = arith.constant dense<0.000000e+00> : vector<24x24xf32>
      %265 = tpu.matmul %262, %264, %cst_84 {dimension_numbers = #tpu.dot_dimension_numbers<[1], [0], [0], [1], [0, 0, 1, 1], [], []>} : vector<24x8xf32>, vector<8x24xf32>, vector<24x24xf32> -> vector<24x24xf32>
      %266 = arith.addf %265, %25 : vector<24x24xf32>
      %cst_85 = arith.constant dense<0xFF800000> : vector<24xf32>
      %267 = vector.multi_reduction <maximumf>, %266, %cst_85 [1] : vector<24x24xf32> to vector<24xf32>
      %268 = vector.shape_cast %267 : vector<24xf32> to vector<24x1xf32>
      %269 = vector.broadcast %268 : vector<24x1xf32> to vector<24x24xf32>
      %270 = arith.subf %266, %269 : vector<24x24xf32>
      %271 = math.exp %270 : vector<24x24xf32>
      %cst_86 = arith.constant dense<0.000000e+00> : vector<24xf32>
      %272 = vector.multi_reduction <add>, %271, %cst_86 [1] : vector<24x24xf32> to vector<24xf32>
      %273 = vector.shape_cast %272 : vector<24xf32> to vector<24x1xf32>
      %274 = vector.broadcast %273 : vector<24x1xf32> to vector<24x24xf32>
      %275 = arith.divf %271, %274 : vector<24x24xf32>
      %276 = vector.extract_strided_slice %240 {offsets = [0, 8], sizes = [24, 8], strides = [1, 1]} : vector<24x32xf32> to vector<24x8xf32>
      %cst_87 = arith.constant dense<0.000000e+00> : vector<24x8xf32>
      %277 = tpu.matmul %275, %276, %cst_87 {dimension_numbers = #tpu.dot_dimension_numbers<[1], [0], [0], [1], [0, 0, 1, 1], [], []>} : vector<24x24xf32>, vector<24x8xf32>, vector<24x8xf32> -> vector<24x8xf32>
      %278 = vector.extract_strided_slice %225 {offsets = [8, 0], sizes = [8, 32], strides = [1, 1]} : vector<32x32xf32> to vector<8x32xf32>
      %cst_88 = arith.constant dense<0.000000e+00> : vector<24x32xf32>
      %279 = tpu.matmul %277, %278, %cst_88 {dimension_numbers = #tpu.dot_dimension_numbers<[1], [0], [0], [1], [0, 0, 1, 1], [], []>} : vector<24x8xf32>, vector<8x32xf32>, vector<24x32xf32> -> vector<24x32xf32>
      %280 = arith.addf %261, %279 : vector<24x32xf32>
      %281 = vector.extract_strided_slice %232 {offsets = [0, 16], sizes = [24, 8], strides = [1, 1]} : vector<24x32xf32> to vector<24x8xf32>
      %282 = vector.extract_strided_slice %236 {offsets = [0, 16], sizes = [24, 8], strides = [1, 1]} : vector<24x32xf32> to vector<24x8xf32>
      %283 = tpu.transpose %282, [1, 0] : vector<24x8xf32> -> vector<8x24xf32>
      %cst_89 = arith.constant dense<0.000000e+00> : vector<24x24xf32>
      %284 = tpu.matmul %281, %283, %cst_89 {dimension_numbers = #tpu.dot_dimension_numbers<[1], [0], [0], [1], [0, 0, 1, 1], [], []>} : vector<24x8xf32>, vector<8x24xf32>, vector<24x24xf32> -> vector<24x24xf32>
      %285 = arith.addf %284, %25 : vector<24x24xf32>
      %cst_90 = arith.constant dense<0xFF800000> : vector<24xf32>
      %286 = vector.multi_reduction <maximumf>, %285, %cst_90 [1] : vector<24x24xf32> to vector<24xf32>
      %287 = vector.shape_cast %286 : vector<24xf32> to vector<24x1xf32>
      %288 = vector.broadcast %287 : vector<24x1xf32> to vector<24x24xf32>
      %289 = arith.subf %285, %288 : vector<24x24xf32>
      %290 = math.exp %289 : vector<24x24xf32>
      %cst_91 = arith.constant dense<0.000000e+00> : vector<24xf32>
      %291 = vector.multi_reduction <add>, %290, %cst_91 [1] : vector<24x24xf32> to vector<24xf32>
      %292 = vector.shape_cast %291 : vector<24xf32> to vector<24x1xf32>
      %293 = vector.broadcast %292 : vector<24x1xf32> to vector<24x24xf32>
      %294 = arith.divf %290, %293 : vector<24x24xf32>
      %295 = vector.extract_strided_slice %240 {offsets = [0, 16], sizes = [24, 8], strides = [1, 1]} : vector<24x32xf32> to vector<24x8xf32>
      %cst_92 = arith.constant dense<0.000000e+00> : vector<24x8xf32>
      %296 = tpu.matmul %294, %295, %cst_92 {dimension_numbers = #tpu.dot_dimension_numbers<[1], [0], [0], [1], [0, 0, 1, 1], [], []>} : vector<24x24xf32>, vector<24x8xf32>, vector<24x8xf32> -> vector<24x8xf32>
      %297 = vector.extract_strided_slice %225 {offsets = [16, 0], sizes = [8, 32], strides = [1, 1]} : vector<32x32xf32> to vector<8x32xf32>
      %cst_93 = arith.constant dense<0.000000e+00> : vector<24x32xf32>
      %298 = tpu.matmul %296, %297, %cst_93 {dimension_numbers = #tpu.dot_dimension_numbers<[1], [0], [0], [1], [0, 0, 1, 1], [], []>} : vector<24x8xf32>, vector<8x32xf32>, vector<24x32xf32> -> vector<24x32xf32>
      %299 = arith.addf %280, %298 : vector<24x32xf32>
      %300 = vector.extract_strided_slice %232 {offsets = [0, 24], sizes = [24, 8], strides = [1, 1]} : vector<24x32xf32> to vector<24x8xf32>
      %301 = vector.extract_strided_slice %236 {offsets = [0, 24], sizes = [24, 8], strides = [1, 1]} : vector<24x32xf32> to vector<24x8xf32>
      %302 = tpu.transpose %301, [1, 0] : vector<24x8xf32> -> vector<8x24xf32>
      %cst_94 = arith.constant dense<0.000000e+00> : vector<24x24xf32>
      %303 = tpu.matmul %300, %302, %cst_94 {dimension_numbers = #tpu.dot_dimension_numbers<[1], [0], [0], [1], [0, 0, 1, 1], [], []>} : vector<24x8xf32>, vector<8x24xf32>, vector<24x24xf32> -> vector<24x24xf32>
      %304 = arith.addf %303, %25 : vector<24x24xf32>
      %cst_95 = arith.constant dense<0xFF800000> : vector<24xf32>
      %305 = vector.multi_reduction <maximumf>, %304, %cst_95 [1] : vector<24x24xf32> to vector<24xf32>
      %306 = vector.shape_cast %305 : vector<24xf32> to vector<24x1xf32>
      %307 = vector.broadcast %306 : vector<24x1xf32> to vector<24x24xf32>
      %308 = arith.subf %304, %307 : vector<24x24xf32>
      %309 = math.exp %308 : vector<24x24xf32>
      %cst_96 = arith.constant dense<0.000000e+00> : vector<24xf32>
      %310 = vector.multi_reduction <add>, %309, %cst_96 [1] : vector<24x24xf32> to vector<24xf32>
      %311 = vector.shape_cast %310 : vector<24xf32> to vector<24x1xf32>
      %312 = vector.broadcast %311 : vector<24x1xf32> to vector<24x24xf32>
      %313 = arith.divf %309, %312 : vector<24x24xf32>
      %314 = vector.extract_strided_slice %240 {offsets = [0, 24], sizes = [24, 8], strides = [1, 1]} : vector<24x32xf32> to vector<24x8xf32>
      %cst_97 = arith.constant dense<0.000000e+00> : vector<24x8xf32>
      %315 = tpu.matmul %313, %314, %cst_97 {dimension_numbers = #tpu.dot_dimension_numbers<[1], [0], [0], [1], [0, 0, 1, 1], [], []>} : vector<24x24xf32>, vector<24x8xf32>, vector<24x8xf32> -> vector<24x8xf32>
      %316 = vector.extract_strided_slice %225 {offsets = [24, 0], sizes = [8, 32], strides = [1, 1]} : vector<32x32xf32> to vector<8x32xf32>
      %cst_98 = arith.constant dense<0.000000e+00> : vector<24x32xf32>
      %317 = tpu.matmul %315, %316, %cst_98 {dimension_numbers = #tpu.dot_dimension_numbers<[1], [0], [0], [1], [0, 0, 1, 1], [], []>} : vector<24x8xf32>, vector<8x32xf32>, vector<24x32xf32> -> vector<24x32xf32>
      %318 = arith.addf %299, %317 : vector<24x32xf32>
      %319 = arith.addf %215, %318 : vector<24x32xf32>
      %320 = vector.extract_strided_slice %221 {offsets = [7, 0], sizes = [1, 32], strides = [1, 1]} : vector<15x128xf32> to vector<1x32xf32>
      %321 = vector.extract_strided_slice %221 {offsets = [8, 0], sizes = [1, 32], strides = [1, 1]} : vector<15x128xf32> to vector<1x32xf32>
      %cst_99 = arith.constant dense<0.000000e+00> : vector<24xf32>
      %322 = vector.multi_reduction <add>, %319, %cst_99 [1] : vector<24x32xf32> to vector<24xf32>
      %323 = vector.shape_cast %322 : vector<24xf32> to vector<24x1xf32>
      %cst_100 = arith.constant 3.200000e+01 : f32
      %324 = vector.broadcast %cst_100 : f32 to vector<24x1xf32>
      %325 = arith.divf %323, %324 : vector<24x1xf32>
      %326 = vector.broadcast %325 : vector<24x1xf32> to vector<24x32xf32>
      %327 = arith.subf %319, %326 : vector<24x32xf32>
      %328 = arith.mulf %327, %327 : vector<24x32xf32>
      %cst_101 = arith.constant dense<0.000000e+00> : vector<24xf32>
      %329 = vector.multi_reduction <add>, %328, %cst_101 [1] : vector<24x32xf32> to vector<24xf32>
      %330 = vector.shape_cast %329 : vector<24xf32> to vector<24x1xf32>
      %cst_102 = arith.constant 3.200000e+01 : f32
      %331 = vector.broadcast %cst_102 : f32 to vector<24x1xf32>
      %332 = arith.divf %330, %331 : vector<24x1xf32>
      %333 = vector.broadcast %325 : vector<24x1xf32> to vector<24x32xf32>
      %334 = arith.subf %319, %333 : vector<24x32xf32>
      %cst_103 = arith.constant 9.99999974E-6 : f32
      %335 = vector.broadcast %cst_103 : f32 to vector<24x1xf32>
      %336 = arith.addf %332, %335 : vector<24x1xf32>
      %337 = math.rsqrt %336 : vector<24x1xf32>
      %338 = vector.broadcast %337 : vector<24x1xf32> to vector<24x32xf32>
      %339 = arith.mulf %334, %338 : vector<24x32xf32>
      %340 = vector.broadcast %320 : vector<1x32xf32> to vector<24x32xf32>
      %341 = arith.mulf %339, %340 : vector<24x32xf32>
      %342 = vector.broadcast %321 : vector<1x32xf32> to vector<24x32xf32>
      %343 = arith.addf %341, %342 : vector<24x32xf32>
      %344 = vector.extract_strided_slice %221 {offsets = [4, 0], sizes = [1, 32], strides = [1, 1]} : vector<15x128xf32> to vector<1x32xf32>
      %345 = vector.broadcast %344 : vector<1x32xf32> to vector<24x32xf32>
      %346 = arith.addf %343, %345 : vector<24x32xf32>
      %347 = vector.extract_strided_slice %221 {offsets = [9, 0], sizes = [1, 32], strides = [1, 1]} : vector<15x128xf32> to vector<1x32xf32>
      %348 = vector.extract_strided_slice %221 {offsets = [10, 0], sizes = [1, 32], strides = [1, 1]} : vector<15x128xf32> to vector<1x32xf32>
      %cst_104 = arith.constant dense<0.000000e+00> : vector<24xf32>
      %349 = vector.multi_reduction <add>, %346, %cst_104 [1] : vector<24x32xf32> to vector<24xf32>
      %350 = vector.shape_cast %349 : vector<24xf32> to vector<24x1xf32>
      %cst_105 = arith.constant 3.200000e+01 : f32
      %351 = vector.broadcast %cst_105 : f32 to vector<24x1xf32>
      %352 = arith.divf %350, %351 : vector<24x1xf32>
      %353 = vector.broadcast %352 : vector<24x1xf32> to vector<24x32xf32>
      %354 = arith.subf %346, %353 : vector<24x32xf32>
      %355 = arith.mulf %354, %354 : vector<24x32xf32>
      %cst_106 = arith.constant dense<0.000000e+00> : vector<24xf32>
      %356 = vector.multi_reduction <add>, %355, %cst_106 [1] : vector<24x32xf32> to vector<24xf32>
      %357 = vector.shape_cast %356 : vector<24xf32> to vector<24x1xf32>
      %cst_107 = arith.constant 3.200000e+01 : f32
      %358 = vector.broadcast %cst_107 : f32 to vector<24x1xf32>
      %359 = arith.divf %357, %358 : vector<24x1xf32>
      %360 = vector.broadcast %352 : vector<24x1xf32> to vector<24x32xf32>
      %361 = arith.subf %346, %360 : vector<24x32xf32>
      %cst_108 = arith.constant 9.99999974E-6 : f32
      %362 = vector.broadcast %cst_108 : f32 to vector<24x1xf32>
      %363 = arith.addf %359, %362 : vector<24x1xf32>
      %364 = math.rsqrt %363 : vector<24x1xf32>
      %365 = vector.broadcast %364 : vector<24x1xf32> to vector<24x32xf32>
      %366 = arith.mulf %361, %365 : vector<24x32xf32>
      %367 = vector.broadcast %347 : vector<1x32xf32> to vector<24x32xf32>
      %368 = arith.mulf %366, %367 : vector<24x32xf32>
      %369 = vector.broadcast %348 : vector<1x32xf32> to vector<24x32xf32>
      %370 = arith.addf %368, %369 : vector<24x32xf32>
      %cst_109 = arith.constant dense<0.000000e+00> : vector<24x64xf32>
      %371 = tpu.matmul %370, %226, %cst_109 {dimension_numbers = #tpu.dot_dimension_numbers<[1], [0], [0], [1], [0, 0, 1, 1], [], []>} : vector<24x32xf32>, vector<32x64xf32>, vector<24x64xf32> -> vector<24x64xf32>
      %372 = vector.extract_strided_slice %221 {offsets = [5, 0], sizes = [1, 64], strides = [1, 1]} : vector<15x128xf32> to vector<1x64xf32>
      %373 = vector.broadcast %372 : vector<1x64xf32> to vector<24x64xf32>
      %374 = arith.addf %371, %373 : vector<24x64xf32>
      %cst_110 = arith.constant 0.000000e+00 : f32
      %375 = vector.broadcast %cst_110 : f32 to vector<24x64xf32>
      %376 = arith.maximumf %374, %375 : vector<24x64xf32>
      %cst_111 = arith.constant dense<0.000000e+00> : vector<24x32xf32>
      %377 = tpu.matmul %376, %219, %cst_111 {dimension_numbers = #tpu.dot_dimension_numbers<[1], [0], [0], [1], [0, 0, 1, 1], [], []>} : vector<24x64xf32>, vector<64x32xf32>, vector<24x32xf32> -> vector<24x32xf32>
      %378 = vector.extract_strided_slice %221 {offsets = [6, 0], sizes = [1, 32], strides = [1, 1]} : vector<15x128xf32> to vector<1x32xf32>
      %379 = vector.broadcast %378 : vector<1x32xf32> to vector<24x32xf32>
      %380 = arith.addf %377, %379 : vector<24x32xf32>
      %381 = arith.addf %370, %380 : vector<24x32xf32>
      %382 = vector.extract_strided_slice %221 {offsets = [11, 0], sizes = [1, 32], strides = [1, 1]} : vector<15x128xf32> to vector<1x32xf32>
      %383 = vector.extract_strided_slice %221 {offsets = [12, 0], sizes = [1, 32], strides = [1, 1]} : vector<15x128xf32> to vector<1x32xf32>
      %cst_112 = arith.constant dense<0.000000e+00> : vector<24xf32>
      %384 = vector.multi_reduction <add>, %381, %cst_112 [1] : vector<24x32xf32> to vector<24xf32>
      %385 = vector.shape_cast %384 : vector<24xf32> to vector<24x1xf32>
      %cst_113 = arith.constant 3.200000e+01 : f32
      %386 = vector.broadcast %cst_113 : f32 to vector<24x1xf32>
      %387 = arith.divf %385, %386 : vector<24x1xf32>
      %388 = vector.broadcast %387 : vector<24x1xf32> to vector<24x32xf32>
      %389 = arith.subf %381, %388 : vector<24x32xf32>
      %390 = arith.mulf %389, %389 : vector<24x32xf32>
      %cst_114 = arith.constant dense<0.000000e+00> : vector<24xf32>
      %391 = vector.multi_reduction <add>, %390, %cst_114 [1] : vector<24x32xf32> to vector<24xf32>
      %392 = vector.shape_cast %391 : vector<24xf32> to vector<24x1xf32>
      %cst_115 = arith.constant 3.200000e+01 : f32
      %393 = vector.broadcast %cst_115 : f32 to vector<24x1xf32>
      %394 = arith.divf %392, %393 : vector<24x1xf32>
      %395 = vector.broadcast %387 : vector<24x1xf32> to vector<24x32xf32>
      %396 = arith.subf %381, %395 : vector<24x32xf32>
      %cst_116 = arith.constant 9.99999974E-6 : f32
      %397 = vector.broadcast %cst_116 : f32 to vector<24x1xf32>
      %398 = arith.addf %394, %397 : vector<24x1xf32>
      %399 = math.rsqrt %398 : vector<24x1xf32>
      %400 = vector.broadcast %399 : vector<24x1xf32> to vector<24x32xf32>
      %401 = arith.mulf %396, %400 : vector<24x32xf32>
      %402 = vector.broadcast %382 : vector<1x32xf32> to vector<24x32xf32>
      %403 = arith.mulf %401, %402 : vector<24x32xf32>
      %404 = vector.broadcast %383 : vector<1x32xf32> to vector<24x32xf32>
      %405 = arith.addf %403, %404 : vector<24x32xf32>
      %c0_117 = arith.constant 0 : index
      %c0_118 = arith.constant 0 : index
      %c0_119 = arith.constant 0 : index
      %406 = vector.load %arg6[%c0_117, %c0_118, %c0_119] : memref<2x15x128xf32, #tpu.memory_space<vmem>>, vector<1x15x128xf32>
      %407 = vector.shape_cast %406 : vector<1x15x128xf32> to vector<15x128xf32>
      %408 = vector.extract_strided_slice %407 {offsets = [13, 0], sizes = [1, 32], strides = [1, 1]} : vector<15x128xf32> to vector<1x32xf32>
      %409 = vector.extract_strided_slice %407 {offsets = [14, 0], sizes = [1, 32], strides = [1, 1]} : vector<15x128xf32> to vector<1x32xf32>
      %cst_120 = arith.constant dense<0.000000e+00> : vector<24xf32>
      %410 = vector.multi_reduction <add>, %405, %cst_120 [1] : vector<24x32xf32> to vector<24xf32>
      %411 = vector.shape_cast %410 : vector<24xf32> to vector<24x1xf32>
      %cst_121 = arith.constant 3.200000e+01 : f32
      %412 = vector.broadcast %cst_121 : f32 to vector<24x1xf32>
      %413 = arith.divf %411, %412 : vector<24x1xf32>
      %414 = vector.broadcast %413 : vector<24x1xf32> to vector<24x32xf32>
      %415 = arith.subf %405, %414 : vector<24x32xf32>
      %416 = arith.mulf %415, %415 : vector<24x32xf32>
      %cst_122 = arith.constant dense<0.000000e+00> : vector<24xf32>
      %417 = vector.multi_reduction <add>, %416, %cst_122 [1] : vector<24x32xf32> to vector<24xf32>
      %418 = vector.shape_cast %417 : vector<24xf32> to vector<24x1xf32>
      %cst_123 = arith.constant 3.200000e+01 : f32
      %419 = vector.broadcast %cst_123 : f32 to vector<24x1xf32>
      %420 = arith.divf %418, %419 : vector<24x1xf32>
      %421 = vector.broadcast %413 : vector<24x1xf32> to vector<24x32xf32>
      %422 = arith.subf %405, %421 : vector<24x32xf32>
      %cst_124 = arith.constant 9.99999974E-6 : f32
      %423 = vector.broadcast %cst_124 : f32 to vector<24x1xf32>
      %424 = arith.addf %420, %423 : vector<24x1xf32>
      %425 = math.rsqrt %424 : vector<24x1xf32>
      %426 = vector.broadcast %425 : vector<24x1xf32> to vector<24x32xf32>
      %427 = arith.mulf %422, %426 : vector<24x32xf32>
      %428 = vector.broadcast %408 : vector<1x32xf32> to vector<24x32xf32>
      %429 = arith.mulf %427, %428 : vector<24x32xf32>
      %430 = vector.broadcast %409 : vector<1x32xf32> to vector<24x32xf32>
      %431 = arith.addf %429, %430 : vector<24x32xf32>
      %432 = arith.truncf %431 : vector<24x32xf32> to vector<24x32xbf16>
      %c0_125 = arith.constant 0 : index
      %c0_126 = arith.constant 0 : index
      %433 = vector.load %arg10[%c0_125, %c0_126] : memref<24x32xbf16, #tpu.memory_space<vmem>>, vector<24x32xbf16>
      tpu.vector_store %arg10[%c0_125, %c0_126], %432 {strides = array<i32>} : memref<24x32xbf16, #tpu.memory_space<vmem>>, vector<24x32xbf16>,
    } else {
    }
    %c0 = arith.constant 0 : index
    %c0_1 = arith.constant 0 : index
    %3 = vector.load %arg10[%c0, %c0_1] : memref<24x32xbf16, #tpu.memory_space<vmem>>, vector<24x32xbf16>
    %c0_2 = arith.constant 0 : index
    %c0_3 = arith.constant 0 : index
    %4 = vector.load %arg7[%c0_2, %c0_3] : memref<32x10240xbf16, #tpu.memory_space<vmem>>, vector<32x10240xbf16>
    %cst = arith.constant dense<0.000000e+00> : vector<24x10240xf32>
    %5 = tpu.matmul %3, %4, %cst {dimension_numbers = #tpu.dot_dimension_numbers<[1], [0], [0], [1], [0, 0, 1, 1], [], []>} : vector<24x32xbf16>, vector<32x10240xbf16>, vector<24x10240xf32> -> vector<24x10240xf32>
    %c0_4 = arith.constant 0 : index
    %c0_5 = arith.constant 0 : index
    %6 = vector.load %arg8[%c0_4, %c0_5] : memref<1x10240xbf16, #tpu.memory_space<vmem>>, vector<1x10240xbf16>
    %7 = arith.extf %6 : vector<1x10240xbf16> to vector<1x10240xf32>
    %8 = vector.broadcast %7 : vector<1x10240xf32> to vector<24x10240xf32>
    %9 = arith.addf %5, %8 : vector<24x10240xf32>
    %c10240_i32 = arith.constant 10240 : i32
    %10 = arith.muli %arg0, %c10240_i32 : i32
    %11 = tpu.iota {dimensions = array<i32: 1>} : vector<24x10240xi32>
    %12 = vector.broadcast %10 : i32 to vector<24x10240xi32>
    %13 = arith.addi %12, %11 : vector<24x10240xi32>
    %c16_i32 = arith.constant 16 : i32
    %14 = vector.broadcast %c16_i32 : i32 to vector<24x10240xi32>
    %15 = arith.cmpi slt, %13, %14 : vector<24x10240xi32>
    %c0_6 = arith.constant 0 : index
    %c0_7 = arith.constant 0 : index
    %16 = vector.load %arg3[%c0_6, %c0_7] : memref<24x1xf32, #tpu.memory_space<vmem>>, vector<24x1xf32>
    %cst_8 = arith.constant 5.000000e-01 : f32
    %17 = vector.broadcast %cst_8 : f32 to vector<24x1xf32>
    %18 = arith.cmpf ogt, %16, %17 : vector<24x1xf32>
    %19 = vector.broadcast %18 : vector<24x1xi1> to vector<24x10240xi1>
    %20 = arith.xori %19, %15 : vector<24x10240xi1>
    %cst_9 = arith.constant -3.40282347E+38 : f32
    %21 = vector.broadcast %cst_9 : f32 to vector<24x10240xf32>
    %22 = arith.select %20, %21, %9 : vector<24x10240xi1>, vector<24x10240xf32>
    %c0_10 = arith.constant 0 : index
    %c0_11 = arith.constant 0 : index
    %23 = vector.load %arg9[%c0_10, %c0_11] : memref<24x10240xf32, #tpu.memory_space<vmem>>, vector<24x10240xf32>
    tpu.vector_store %arg9[%c0_10, %c0_11], %22 {strides = array<i32>} : memref<24x10240xf32, #tpu.memory_space<vmem>>, vector<24x10240xf32>,
    return
  }
  func.func @transform_0(%arg0: i32) -> (i32, i32) {
    %c0_i32 = arith.constant 0 : i32
    %c0_i32_0 = arith.constant 0 : i32
    %c0_i32_1 = arith.constant 0 : i32
    return %c0_i32, %c0_i32_0 : i32, i32
  }
  func.func @transform_1(%arg0: i32) -> (i32, i32) {
    %c0_i32 = arith.constant 0 : i32
    %c0_i32_0 = arith.constant 0 : i32
    %c0_i32_1 = arith.constant 0 : i32
    return %c0_i32, %c0_i32_0 : i32, i32
  }
  func.func @transform_2(%arg0: i32) -> (i32, i32) {
    %c0_i32 = arith.constant 0 : i32
    %c0_i32_0 = arith.constant 0 : i32
    %c0_i32_1 = arith.constant 0 : i32
    return %c0_i32, %c0_i32_0 : i32, i32
  }
  func.func @transform_3(%arg0: i32) -> (i32, i32, i32) {
    %c0_i32 = arith.constant 0 : i32
    %c0_i32_0 = arith.constant 0 : i32
    %c0_i32_1 = arith.constant 0 : i32
    %c0_i32_2 = arith.constant 0 : i32
    return %c0_i32, %c0_i32_0, %c0_i32_1 : i32, i32, i32
  }
  func.func @transform_4(%arg0: i32) -> (i32, i32, i32) {
    %c0_i32 = arith.constant 0 : i32
    %c0_i32_0 = arith.constant 0 : i32
    %c0_i32_1 = arith.constant 0 : i32
    %c0_i32_2 = arith.constant 0 : i32
    return %c0_i32, %c0_i32_0, %c0_i32_1 : i32, i32, i32
  }
  func.func @transform_5(%arg0: i32) -> (i32, i32, i32) {
    %c0_i32 = arith.constant 0 : i32
    %c0_i32_0 = arith.constant 0 : i32
    %c0_i32_1 = arith.constant 0 : i32
    %c0_i32_2 = arith.constant 0 : i32
    return %c0_i32, %c0_i32_0, %c0_i32_1 : i32, i32, i32
  }
  func.func @transform_6(%arg0: i32) -> (i32, i32) {
    %c0_i32 = arith.constant 0 : i32
    %c0_i32_0 = arith.constant 0 : i32
    return %c0_i32, %arg0 : i32, i32
  }
  func.func @transform_7(%arg0: i32) -> (i32, i32) {
    %c0_i32 = arith.constant 0 : i32
    %c0_i32_0 = arith.constant 0 : i32
    return %c0_i32, %arg0 : i32, i32
  }
  func.func @transform_8(%arg0: i32) -> (i32, i32) {
    %c0_i32 = arith.constant 0 : i32
    %c0_i32_0 = arith.constant 0 : i32
    return %c0_i32, %arg0 : i32, i32
  }
}

</mosaic_0001>

<bundles_post_ra>
// kernel: sketch_decoder_forward.1
= control target key start
LH: loop header
LB: loop body
LE: loop exit
PB: predicated region body
PF: predicated region fallthrough
CT: control target
= control target key end

     0   :  { %s9118_s27 = smov 0   ;;  %s9120_s28 = smov 0   ;;  %s13936_s0 = inlined_call_operand.vmem [shape: f32[24,32], index: 0, kind: input, shape index: {}]   ;;  %s13937_s1 = inlined_call_operand.vmem [shape: f32[24,24], index: 1, kind: input, shape index: {}]   ;;  %s13938_s2 = inlined_call_operand.vmem [shape: f32[24,1], index: 2, kind: input, shape index: {}]   ;;  %s13939_s3 = inlined_call_operand.vmem [shape: f32[2,32,640], index: 3, kind: input, shape index: {}]   ;;  %s13940_s4 = inlined_call_operand.vmem [shape: f32[2,64,32], index: 4, kind: input, shape index: {}]   ;;  %s13941_s5 = inlined_call_operand.vmem [shape: f32[2,15,128], index: 5, kind: input, shape index: {}]   ;;  %s13942_s6 = inlined_call_operand.vmem [shape: bf16[32,40960], index: 6, kind: input, shape index: {}]   ;;  %s13943_s7 = inlined_call_operand.vmem [shape: bf16[1,40960], index: 7, kind: input, shape index: {}]   ;;  %s13944_s8 = inlined_call_operand.vmem [shape: f32[24,40022], index: 8, kind: output, shape index: {}]  }
   0x1   :  { %s9122_s29 = smov 0  }
   0x2 LB: > { %s9134_s30 = sadd.s32 4294967295, %s9000_s29   ;;  %s9137_s9 = sadd.s32 1, %s9000_s29   ;;  %s9000_s29 = sphi %s9122_s29, %s14160_s29   ;;  %s8996_s28 = sphi %s9120_s28, %s14159_s28   ;;  %s8992_s27 = sphi %s9118_s27, %s14158_s27  }
   0x3   : > { %s148_s10 = ssub.s32 %s9000_s29, %s9137_s9  ;;  %s151_s11 = sadd.s32 1, %s8996_s28 }
   0x4   : > { %p149_p0 = scmp.eq.s32.totalorder %s148_s10, 0  ;;  %p158_p1 = scmp.ne.s32.totalorder %s8996_s28, %s8992_s27 }
   0x5   : > { %p159_p2 = scmp.eq.s32.totalorder %s9000_s29, 0  ;;  %p214_p3 = scmp.eq.s32.totalorder %s9134_s30, 3 }
   0x6   : > { %s9147_s12 = scalar_select %p149_p0, %s8996_s28, %s151_s11  }
   0x7   : > { %p160_p4 = por %p159_p2, %p158_p1  ;;  %p9149_p5 = por %p214_p3, %p158_p1 }
   0x8   : > { %p7397_p6 = scmp.ge.s32.totalorder %s9000_s29, 4 }
   0xa   : > { %254 = sbr.rel (%p7397_p6) target bundleno = 180 (0xb4), region = 40 }
   0xf   : > { %257 = sbr.rel (!%p160_p4) target bundleno = 180 (0xb4), region = 44  ;;  %s259_s14 = sand.u32 (%p160_p4), 1, %s8996_s28  }
  0x10   : > { %s8383_s15 = smul.u32 (%p160_p4), 320, %s9000_s29 }
  0x11   : > { %s8554_s16 = smul.u32 (%p160_p4), 1280, %s259_s14 }
  0x12   : > { %s9159_s19 = scalar_lea.vmem (%p160_p4), %s13942_s6, %s8383_s15 }
  0x13   : > { %v277_v0 = vld [vmem:[%s9159_s19] sm:$0xff] (%p160_p4)  ;;  %v279_v1 = vld [vmem:[%s9159_s19 + $0x8] sm:$0xff] (%p160_p4)  ;;  %v281_v2 = vld [vmem:[%s9159_s19 + $0x10] sm:$0xff] (%p160_p4)  ;;  %s9164_s20 = scalar_lea.vmem (%p160_p4), [#allocation3], %s8554_s16 }
  0x14   : > { %278 = vst [vmem:[%s9164_s20] sm:$0xff] %v277_v0  ;;  %v283_v3 = vld [vmem:[%s9159_s19 + $0x18] sm:$0xff]  ;;  %v285_v4 = vld [vmem:[%s9159_s19 + $0x20] sm:$0xff]  ;;  %v287_v5 = vld [vmem:[%s9159_s19 + $0x28] sm:$0xff] }
  0x15   : > { %280 = vst [vmem:[%s9164_s20 + $0x8] sm:$0xff] %v279_v1  ;;  %v289_v6 = vld [vmem:[%s9159_s19 + $0x30] sm:$0xff]  ;;  %v291_v7 = vld [vmem:[%s9159_s19 + $0x38] sm:$0xff]  ;;  %v293_v8 = vld [vmem:[%s9159_s19 + $0x40] sm:$0xff] }
  0x16   : > { %282 = vst [vmem:[%s9164_s20 + $0x10] sm:$0xff] %v281_v2  ;;  %v295_v9 = vld [vmem:[%s9159_s19 + $0x48] sm:$0xff]  ;;  %v297_v10 = vld [vmem:[%s9159_s19 + $0x50] sm:$0xff]  ;;  %v299_v11 = vld [vmem:[%s9159_s19 + $0x58] sm:$0xff] }
  0x17   : > { %284 = vst [vmem:[%s9164_s20 + $0x18] sm:$0xff] %v283_v3  ;;  %v301_v12 = vld [vmem:[%s9159_s19 + $0x60] sm:$0xff]  ;;  %v303_v13 = vld [vmem:[%s9159_s19 + $0x68] sm:$0xff]  ;;  %v305_v14 = vld [vmem:[%s9159_s19 + $0x70] sm:$0xff] }
  0x18   : > { %286 = vst [vmem:[%s9164_s20 + $0x20] sm:$0xff] %v285_v4  ;;  %v307_v15 = vld [vmem:[%s9159_s19 + $0x78] sm:$0xff]  ;;  %v309_v16 = vld [vmem:[%s9159_s19 + $0x80] sm:$0xff]  ;;  %v311_v17 = vld [vmem:[%s9159_s19 + $0x88] sm:$0xff] }
  0x19   : > { %288 = vst [vmem:[%s9164_s20 + $0x28] sm:$0xff] %v287_v5  ;;  %v313_v18 = vld [vmem:[%s9159_s19 + $0x90] sm:$0xff]  ;;  %v315_v19 = vld [vmem:[%s9159_s19 + $0x98] sm:$0xff]  ;;  %v317_v20 = vld [vmem:[%s9159_s19 + $0xa0] sm:$0xff] }
  0x1a   : > { %290 = vst [vmem:[%s9164_s20 + $0x30] sm:$0xff] %v289_v6  ;;  %v319_v21 = vld [vmem:[%s9159_s19 + $0xa8] sm:$0xff]  ;;  %v321_v22 = vld [vmem:[%s9159_s19 + $0xb0] sm:$0xff]  ;;  %v323_v23 = vld [vmem:[%s9159_s19 + $0xb8] sm:$0xff] }
  0x1b   : > { %292 = vst [vmem:[%s9164_s20 + $0x38] sm:$0xff] %v291_v7  ;;  %v325_v24 = vld [vmem:[%s9159_s19 + $0xc0] sm:$0xff]  ;;  %v327_v25 = vld [vmem:[%s9159_s19 + $0xc8] sm:$0xff]  ;;  %v329_v26 = vld [vmem:[%s9159_s19 + $0xd0] sm:$0xff] }
  0x1c   : > { %294 = vst [vmem:[%s9164_s20 + $0x40] sm:$0xff] %v293_v8  ;;  %v331_v27 = vld [vmem:[%s9159_s19 + $0xd8] sm:$0xff]  ;;  %v333_v28 = vld [vmem:[%s9159_s19 + $0xe0] sm:$0xff]  ;;  %v335_v29 = vld [vmem:[%s9159_s19 + $0xe8] sm:$0xff] }
  0x1d   : > { %296 = vst [vmem:[%s9164_s20 + $0x48] sm:$0xff] %v295_v9  ;;  %v337_v30 = vld [vmem:[%s9159_s19 + $0xf0] sm:$0xff]  ;;  %v339_v31 = vld [vmem:[%s9159_s19 + $0xf8] sm:$0xff]  ;;  %v341_v32 = vld [vmem:[%s9159_s19 + $0x100] sm:$0xff] }
  0x1e   : > { %298 = vst [vmem:[%s9164_s20 + $0x50] sm:$0xff] %v297_v10  ;;  %v343_v33 = vld [vmem:[%s9159_s19 + $0x108] sm:$0xff]  ;;  %v345_v34 = vld [vmem:[%s9159_s19 + $0x110] sm:$0xff]  ;;  %v347_v35 = vld [vmem:[%s9159_s19 + $0x118] sm:$0xff] }
  0x1f   : > { %300 = vst [vmem:[%s9164_s20 + $0x58] sm:$0xff] %v299_v11  ;;  %v349_v36 = vld [vmem:[%s9159_s19 + $0x120] sm:$0xff]  ;;  %v351_v37 = vld [vmem:[%s9159_s19 + $0x128] sm:$0xff]  ;;  %v353_v38 = vld [vmem:[%s9159_s19 + $0x130] sm:$0xff] }
  0x20   : > { %302 = vst [vmem:[%s9164_s20 + $0x60] sm:$0xff] %v301_v12  ;;  %v355_v39 = vld [vmem:[%s9159_s19 + $0x138] sm:$0xff]  ;;  %v357_v40 = vld [vmem:[%s9159_s19 + $0x500] sm:$0xff]  ;;  %v359_v41 = vld [vmem:[%s9159_s19 + $0x508] sm:$0xff] }
  0x21   : > { %304 = vst [vmem:[%s9164_s20 + $0x68] sm:$0xff] %v303_v13  ;;  %v361_v42 = vld [vmem:[%s9159_s19 + $0x510] sm:$0xff]  ;;  %v363_v43 = vld [vmem:[%s9159_s19 + $0x518] sm:$0xff]  ;;  %v365_v44 = vld [vmem:[%s9159_s19 + $0x520] sm:$0xff] }
  0x22   : > { %306 = vst [vmem:[%s9164_s20 + $0x70] sm:$0xff] %v305_v14  ;;  %v367_v45 = vld [vmem:[%s9159_s19 + $0x528] sm:$0xff]  ;;  %v369_v46 = vld [vmem:[%s9159_s19 + $0x530] sm:$0xff]  ;;  %v371_v47 = vld [vmem:[%s9159_s19 + $0x538] sm:$0xff] }
  0x23   : > { %308 = vst [vmem:[%s9164_s20 + $0x78] sm:$0xff] %v307_v15  ;;  %v373_v48 = vld [vmem:[%s9159_s19 + $0x540] sm:$0xff]  ;;  %v375_v49 = vld [vmem:[%s9159_s19 + $0x548] sm:$0xff]  ;;  %v377_v50 = vld [vmem:[%s9159_s19 + $0x550] sm:$0xff] }
  0x24   : > { %310 = vst [vmem:[%s9164_s20 + $0x80] sm:$0xff] %v309_v16  ;;  %v379_v51 = vld [vmem:[%s9159_s19 + $0x558] sm:$0xff]  ;;  %v381_v52 = vld [vmem:[%s9159_s19 + $0x560] sm:$0xff]  ;;  %v383_v53 = vld [vmem:[%s9159_s19 + $0x568] sm:$0xff] }
  0x25   : > { %312 = vst [vmem:[%s9164_s20 + $0x88] sm:$0xff] %v311_v17  ;;  %v385_v54 = vld [vmem:[%s9159_s19 + $0x570] sm:$0xff]  ;;  %v387_v55 = vld [vmem:[%s9159_s19 + $0x578] sm:$0xff]  ;;  %v389_v56 = vld [vmem:[%s9159_s19 + $0x580] sm:$0xff] }
  0x26   : > { %314 = vst [vmem:[%s9164_s20 + $0x90] sm:$0xff] %v313_v18  ;;  %v391_v57 = vld [vmem:[%s9159_s19 + $0x588] sm:$0xff]  ;;  %v393_v58 = vld [vmem:[%s9159_s19 + $0x590] sm:$0xff]  ;;  %v395_v59 = vld [vmem:[%s9159_s19 + $0x598] sm:$0xff] }
  0x27   : > { %316 = vst [vmem:[%s9164_s20 + $0x98] sm:$0xff] %v315_v19  ;;  %v397_v60 = vld [vmem:[%s9159_s19 + $0x5a0] sm:$0xff]  ;;  %v399_v61 = vld [vmem:[%s9159_s19 + $0x5a8] sm:$0xff]  ;;  %v401_v62 = vld [vmem:[%s9159_s19 + $0x5b0] sm:$0xff] }
  0x28   : > { %318 = vst [vmem:[%s9164_s20 + $0xa0] sm:$0xff] %v317_v20  ;;  %v403_v63 = vld [vmem:[%s9159_s19 + $0x5b8] sm:$0xff]  ;;  %v405_v0 = vld [vmem:[%s9159_s19 + $0x5c0] sm:$0xff]  ;;  %v407_v1 = vld [vmem:[%s9159_s19 + $0x5c8] sm:$0xff] }
  0x29   : > { %320 = vst [vmem:[%s9164_s20 + $0xa8] sm:$0xff] %v319_v21  ;;  %v409_v2 = vld [vmem:[%s9159_s19 + $0x5d0] sm:$0xff]  ;;  %v411_v3 = vld [vmem:[%s9159_s19 + $0x5d8] sm:$0xff]  ;;  %v413_v4 = vld [vmem:[%s9159_s19 + $0x5e0] sm:$0xff] }
  0x2a   : > { %322 = vst [vmem:[%s9164_s20 + $0xb0] sm:$0xff] %v321_v22  ;;  %v415_v5 = vld [vmem:[%s9159_s19 + $0x5e8] sm:$0xff]  ;;  %v417_v6 = vld [vmem:[%s9159_s19 + $0x5f0] sm:$0xff]  ;;  %v419_v7 = vld [vmem:[%s9159_s19 + $0x5f8] sm:$0xff] }
  0x2b   : > { %324 = vst [vmem:[%s9164_s20 + $0xb8] sm:$0xff] %v323_v23  ;;  %v421_v8 = vld [vmem:[%s9159_s19 + $0x600] sm:$0xff]  ;;  %v423_v9 = vld [vmem:[%s9159_s19 + $0x608] sm:$0xff]  ;;  %v425_v10 = vld [vmem:[%s9159_s19 + $0x610] sm:$0xff] }
  0x2c   : > { %326 = vst [vmem:[%s9164_s20 + $0xc0] sm:$0xff] %v325_v24  ;;  %v427_v11 = vld [vmem:[%s9159_s19 + $0x618] sm:$0xff]  ;;  %v429_v12 = vld [vmem:[%s9159_s19 + $0x620] sm:$0xff]  ;;  %v431_v13 = vld [vmem:[%s9159_s19 + $0x628] sm:$0xff] }
  0x2d   : > { %328 = vst [vmem:[%s9164_s20 + $0xc8] sm:$0xff] %v327_v25  ;;  %v433_v14 = vld [vmem:[%s9159_s19 + $0x630] sm:$0xff]  ;;  %v435_v15 = vld [vmem:[%s9159_s19 + $0x638] sm:$0xff]  ;;  %v437_v16 = vld [vmem:[%s9159_s19 + $0xa00] sm:$0xff] }
  0x2e   : > { %330 = vst [vmem:[%s9164_s20 + $0xd0] sm:$0xff] %v329_v26  ;;  %v439_v17 = vld [vmem:[%s9159_s19 + $0xa08] sm:$0xff]  ;;  %v441_v18 = vld [vmem:[%s9159_s19 + $0xa10] sm:$0xff]  ;;  %v443_v19 = vld [vmem:[%s9159_s19 + $0xa18] sm:$0xff] }
  0x2f   : > { %332 = vst [vmem:[%s9164_s20 + $0xd8] sm:$0xff] %v331_v27  ;;  %v445_v20 = vld [vmem:[%s9159_s19 + $0xa20] sm:$0xff]  ;;  %v447_v21 = vld [vmem:[%s9159_s19 + $0xa28] sm:$0xff]  ;;  %v449_v22 = vld [vmem:[%s9159_s19 + $0xa30] sm:$0xff] }
  0x30   : > { %334 = vst [vmem:[%s9164_s20 + $0xe0] sm:$0xff] %v333_v28  ;;  %v451_v23 = vld [vmem:[%s9159_s19 + $0xa38] sm:$0xff]  ;;  %v453_v24 = vld [vmem:[%s9159_s19 + $0xa40] sm:$0xff]  ;;  %v455_v25 = vld [vmem:[%s9159_s19 + $0xa48] sm:$0xff] }
  0x31   : > { %336 = vst [vmem:[%s9164_s20 + $0xe8] sm:$0xff] %v335_v29  ;;  %v457_v26 = vld [vmem:[%s9159_s19 + $0xa50] sm:$0xff]  ;;  %v459_v27 = vld [vmem:[%s9159_s19 + $0xa58] sm:$0xff]  ;;  %v461_v28 = vld [vmem:[%s9159_s19 + $0xa60] sm:$0xff] }
  0x32   : > { %338 = vst [vmem:[%s9164_s20 + $0xf0] sm:$0xff] %v337_v30  ;;  %v463_v29 = vld [vmem:[%s9159_s19 + $0xa68] sm:$0xff]  ;;  %v465_v30 = vld [vmem:[%s9159_s19 + $0xa70] sm:$0xff] }
  0x33   : > { %340 = vst [vmem:[%s9164_s20 + $0xf8] sm:$0xff] %v339_v31  ;;  %v467_v31 = vld [vmem:[%s9159_s19 + $0xa78] sm:$0xff] }
  0x34   : > { %342 = vst [vmem:[%s9164_s20 + $0x100] sm:$0xff] %v341_v32  ;;  %v469_v32 = vld [vmem:[%s9159_s19 + $0xa80] sm:$0xff] }
  0x35   : > { %344 = vst [vmem:[%s9164_s20 + $0x108] sm:$0xff] %v343_v33  ;;  %v471_v33 = vld [vmem:[%s9159_s19 + $0xa88] sm:$0xff] }
  0x36   : > { %346 = vst [vmem:[%s9164_s20 + $0x110] sm:$0xff] %v345_v34  ;;  %v473_v34 = vld [vmem:[%s9159_s19 + $0xa90] sm:$0xff] }
  0x37   : > { %348 = vst [vmem:[%s9164_s20 + $0x118] sm:$0xff] %v347_v35  ;;  %v475_v35 = vld [vmem:[%s9159_s19 + $0xa98] sm:$0xff] }
  0x38   : > { %350 = vst [vmem:[%s9164_s20 + $0x120] sm:$0xff] %v349_v36  ;;  %v477_v36 = vld [vmem:[%s9159_s19 + $0xaa0] sm:$0xff] }
  0x39   : > { %352 = vst [vmem:[%s9164_s20 + $0x128] sm:$0xff] %v351_v37  ;;  %v479_v37 = vld [vmem:[%s9159_s19 + $0xaa8] sm:$0xff] }
  0x3a   : > { %354 = vst [vmem:[%s9164_s20 + $0x130] sm:$0xff] %v353_v38  ;;  %v481_v38 = vld [vmem:[%s9159_s19 + $0xab0] sm:$0xff] }
  0x3b   : > { %356 = vst [vmem:[%s9164_s20 + $0x138] sm:$0xff] %v355_v39  ;;  %v483_v39 = vld [vmem:[%s9159_s19 + $0xab8] sm:$0xff] }
  0x3c   : > { %358 = vst [vmem:[%s9164_s20 + $0x140] sm:$0xff] %v357_v40  ;;  %v485_v40 = vld [vmem:[%s9159_s19 + $0xac0] sm:$0xff] }
  0x3d   : > { %360 = vst [vmem:[%s9164_s20 + $0x148] sm:$0xff] %v359_v41  ;;  %v487_v41 = vld [vmem:[%s9159_s19 + $0xac8] sm:$0xff] }
  0x3e   : > { %362 = vst [vmem:[%s9164_s20 + $0x150] sm:$0xff] %v361_v42  ;;  %v489_v42 = vld [vmem:[%s9159_s19 + $0xad0] sm:$0xff] }
  0x3f   : > { %364 = vst [vmem:[%s9164_s20 + $0x158] sm:$0xff] %v363_v43  ;;  %v491_v43 = vld [vmem:[%s9159_s19 + $0xad8] sm:$0xff] }
  0x40   : > { %366 = vst [vmem:[%s9164_s20 + $0x160] sm:$0xff] %v365_v44  ;;  %v493_v44 = vld [vmem:[%s9159_s19 + $0xae0] sm:$0xff] }
  0x41   : > { %368 = vst [vmem:[%s9164_s20 + $0x168] sm:$0xff] %v367_v45  ;;  %v495_v45 = vld [vmem:[%s9159_s19 + $0xae8] sm:$0xff] }
  0x42   : > { %370 = vst [vmem:[%s9164_s20 + $0x170] sm:$0xff] %v369_v46  ;;  %v497_v46 = vld [vmem:[%s9159_s19 + $0xaf0] sm:$0xff] }
  0x43   : > { %372 = vst [vmem:[%s9164_s20 + $0x178] sm:$0xff] %v371_v47  ;;  %v499_v47 = vld [vmem:[%s9159_s19 + $0xaf8] sm:$0xff] }
  0x44   : > { %374 = vst [vmem:[%s9164_s20 + $0x180] sm:$0xff] %v373_v48  ;;  %v501_v48 = vld [vmem:[%s9159_s19 + $0xb00] sm:$0xff] }
  0x45   : > { %376 = vst [vmem:[%s9164_s20 + $0x188] sm:$0xff] %v375_v49  ;;  %v503_v49 = vld [vmem:[%s9159_s19 + $0xb08] sm:$0xff] }
  0x46   : > { %378 = vst [vmem:[%s9164_s20 + $0x190] sm:$0xff] %v377_v50  ;;  %v505_v50 = vld [vmem:[%s9159_s19 + $0xb10] sm:$0xff] }
  0x47   : > { %380 = vst [vmem:[%s9164_s20 + $0x198] sm:$0xff] %v379_v51  ;;  %v507_v51 = vld [vmem:[%s9159_s19 + $0xb18] sm:$0xff] }
  0x48   : > { %382 = vst [vmem:[%s9164_s20 + $0x1a0] sm:$0xff] %v381_v52  ;;  %v509_v52 = vld [vmem:[%s9159_s19 + $0xb20] sm:$0xff] }
  0x49   : > { %384 = vst [vmem:[%s9164_s20 + $0x1a8] sm:$0xff] %v383_v53  ;;  %v511_v53 = vld [vmem:[%s9159_s19 + $0xb28] sm:$0xff] }
  0x4a   : > { %386 = vst [vmem:[%s9164_s20 + $0x1b0] sm:$0xff] %v385_v54  ;;  %v513_v54 = vld [vmem:[%s9159_s19 + $0xb30] sm:$0xff] }
  0x4b   : > { %388 = vst [vmem:[%s9164_s20 + $0x1b8] sm:$0xff] %v387_v55  ;;  %v515_v55 = vld [vmem:[%s9159_s19 + $0xb38] sm:$0xff] }
  0x4c   : > { %390 = vst [vmem:[%s9164_s20 + $0x1c0] sm:$0xff] %v389_v56  ;;  %v517_v56 = vld [vmem:[%s9159_s19 + $0xf00] sm:$0xff] }
  0x4d   : > { %392 = vst [vmem:[%s9164_s20 + $0x1c8] sm:$0xff] %v391_v57  ;;  %v519_v57 = vld [vmem:[%s9159_s19 + $0xf08] sm:$0xff] }
  0x4e   : > { %394 = vst [vmem:[%s9164_s20 + $0x1d0] sm:$0xff] %v393_v58  ;;  %v521_v58 = vld [vmem:[%s9159_s19 + $0xf10] sm:$0xff] }
  0x4f   : > { %396 = vst [vmem:[%s9164_s20 + $0x1d8] sm:$0xff] %v395_v59  ;;  %v523_v59 = vld [vmem:[%s9159_s19 + $0xf18] sm:$0xff] }
  0x50   : > { %398 = vst [vmem:[%s9164_s20 + $0x1e0] sm:$0xff] %v397_v60  ;;  %v525_v60 = vld [vmem:[%s9159_s19 + $0xf20] sm:$0xff] }
  0x51   : > { %400 = vst [vmem:[%s9164_s20 + $0x1e8] sm:$0xff] %v399_v61  ;;  %v527_v61 = vld [vmem:[%s9159_s19 + $0xf28] sm:$0xff] }
  0x52   : > { %402 = vst [vmem:[%s9164_s20 + $0x1f0] sm:$0xff] %v401_v62  ;;  %v529_v62 = vld [vmem:[%s9159_s19 + $0xf30] sm:$0xff] }
  0x53   : > { %404 = vst [vmem:[%s9164_s20 + $0x1f8] sm:$0xff] %v403_v63  ;;  %v531_v63 = vld [vmem:[%s9159_s19 + $0xf38] sm:$0xff] }
  0x54   : > { %406 = vst [vmem:[%s9164_s20 + $0x200] sm:$0xff] %v405_v0  ;;  %v533_v0 = vld [vmem:[%s9159_s19 + $0xf40] sm:$0xff] }
  0x55   : > { %408 = vst [vmem:[%s9164_s20 + $0x208] sm:$0xff] %v407_v1  ;;  %v535_v1 = vld [vmem:[%s9159_s19 + $0xf48] sm:$0xff] }
  0x56   : > { %410 = vst [vmem:[%s9164_s20 + $0x210] sm:$0xff] %v409_v2  ;;  %v537_v2 = vld [vmem:[%s9159_s19 + $0xf50] sm:$0xff] }
  0x57   : > { %412 = vst [vmem:[%s9164_s20 + $0x218] sm:$0xff] %v411_v3  ;;  %v539_v3 = vld [vmem:[%s9159_s19 + $0xf58] sm:$0xff] }
  0x58   : > { %414 = vst [vmem:[%s9164_s20 + $0x220] sm:$0xff] %v413_v4  ;;  %v541_v4 = vld [vmem:[%s9159_s19 + $0xf60] sm:$0xff] }
  0x59   : > { %416 = vst [vmem:[%s9164_s20 + $0x228] sm:$0xff] %v415_v5  ;;  %v543_v5 = vld [vmem:[%s9159_s19 + $0xf68] sm:$0xff] }
  0x5a   : > { %418 = vst [vmem:[%s9164_s20 + $0x230] sm:$0xff] %v417_v6  ;;  %v545_v6 = vld [vmem:[%s9159_s19 + $0xf70] sm:$0xff] }
  0x5b   : > { %420 = vst [vmem:[%s9164_s20 + $0x238] sm:$0xff] %v419_v7  ;;  %v547_v7 = vld [vmem:[%s9159_s19 + $0xf78] sm:$0xff] }
  0x5c   : > { %422 = vst [vmem:[%s9164_s20 + $0x240] sm:$0xff] %v421_v8  ;;  %v549_v8 = vld [vmem:[%s9159_s19 + $0xf80] sm:$0xff] }
  0x5d   : > { %424 = vst [vmem:[%s9164_s20 + $0x248] sm:$0xff] %v423_v9  ;;  %v551_v9 = vld [vmem:[%s9159_s19 + $0xf88] sm:$0xff] }
  0x5e   : > { %426 = vst [vmem:[%s9164_s20 + $0x250] sm:$0xff] %v425_v10  ;;  %v553_v10 = vld [vmem:[%s9159_s19 + $0xf90] sm:$0xff] }
  0x5f   : > { %428 = vst [vmem:[%s9164_s20 + $0x258] sm:$0xff] %v427_v11  ;;  %v555_v11 = vld [vmem:[%s9159_s19 + $0xf98] sm:$0xff] }
  0x60   : > { %430 = vst [vmem:[%s9164_s20 + $0x260] sm:$0xff] %v429_v12  ;;  %v557_v12 = vld [vmem:[%s9159_s19 + $0xfa0] sm:$0xff] }
  0x61   : > { %432 = vst [vmem:[%s9164_s20 + $0x268] sm:$0xff] %v431_v13  ;;  %v559_v13 = vld [vmem:[%s9159_s19 + $0xfa8] sm:$0xff] }
  0x62   : > { %434 = vst [vmem:[%s9164_s20 + $0x270] sm:$0xff] %v433_v14  ;;  %v561_v14 = vld [vmem:[%s9159_s19 + $0xfb0] sm:$0xff] }
  0x63   : > { %436 = vst [vmem:[%s9164_s20 + $0x278] sm:$0xff] %v435_v15  ;;  %v563_v15 = vld [vmem:[%s9159_s19 + $0xfb8] sm:$0xff] }
  0x64   : > { %438 = vst [vmem:[%s9164_s20 + $0x280] sm:$0xff] %v437_v16  ;;  %v565_v16 = vld [vmem:[%s9159_s19 + $0xfc0] sm:$0xff] }
  0x65   : > { %440 = vst [vmem:[%s9164_s20 + $0x288] sm:$0xff] %v439_v17  ;;  %v567_v17 = vld [vmem:[%s9159_s19 + $0xfc8] sm:$0xff] }
  0x66   : > { %442 = vst [vmem:[%s9164_s20 + $0x290] sm:$0xff] %v441_v18  ;;  %v569_v18 = vld [vmem:[%s9159_s19 + $0xfd0] sm:$0xff] }
  0x67   : > { %444 = vst [vmem:[%s9164_s20 + $0x298] sm:$0xff] %v443_v19  ;;  %v571_v19 = vld [vmem:[%s9159_s19 + $0xfd8] sm:$0xff] }
  0x68   : > { %446 = vst [vmem:[%s9164_s20 + $0x2a0] sm:$0xff] %v445_v20  ;;  %v573_v20 = vld [vmem:[%s9159_s19 + $0xfe0] sm:$0xff] }
  0x69   : > { %448 = vst [vmem:[%s9164_s20 + $0x2a8] sm:$0xff] %v447_v21  ;;  %v575_v21 = vld [vmem:[%s9159_s19 + $0xfe8] sm:$0xff] }
  0x6a   : > { %450 = vst [vmem:[%s9164_s20 + $0x2b0] sm:$0xff] %v449_v22  ;;  %v577_v22 = vld [vmem:[%s9159_s19 + $0xff0] sm:$0xff] }
  0x6b   : > { %452 = vst [vmem:[%s9164_s20 + $0x2b8] sm:$0xff] %v451_v23  ;;  %v579_v23 = vld [vmem:[%s9159_s19 + $0xff8] sm:$0xff] }
  0x6c   : > { %454 = vst [vmem:[%s9164_s20 + $0x2c0] sm:$0xff] %v453_v24  ;;  %v581_v24 = vld [vmem:[%s9159_s19 + $0x1000] sm:$0xff] }
  0x6d   : > { %456 = vst [vmem:[%s9164_s20 + $0x2c8] sm:$0xff] %v455_v25  ;;  %v583_v25 = vld [vmem:[%s9159_s19 + $0x1008] sm:$0xff] }
  0x6e   : > { %458 = vst [vmem:[%s9164_s20 + $0x2d0] sm:$0xff] %v457_v26  ;;  %v585_v26 = vld [vmem:[%s9159_s19 + $0x1010] sm:$0xff] }
  0x6f   : > { %460 = vst [vmem:[%s9164_s20 + $0x2d8] sm:$0xff] %v459_v27  ;;  %v587_v27 = vld [vmem:[%s9159_s19 + $0x1018] sm:$0xff] }
  0x70   : > { %462 = vst [vmem:[%s9164_s20 + $0x2e0] sm:$0xff] %v461_v28  ;;  %v589_v28 = vld [vmem:[%s9159_s19 + $0x1020] sm:$0xff] }
  0x71   : > { %464 = vst [vmem:[%s9164_s20 + $0x2e8] sm:$0xff] %v463_v29  ;;  %v591_v29 = vld [vmem:[%s9159_s19 + $0x1028] sm:$0xff] }
  0x72   : > { %466 = vst [vmem:[%s9164_s20 + $0x2f0] sm:$0xff] %v465_v30  ;;  %v593_v30 = vld [vmem:[%s9159_s19 + $0x1030] sm:$0xff] }
  0x73   : > { %468 = vst [vmem:[%s9164_s20 + $0x2f8] sm:$0xff] %v467_v31  ;;  %v595_v31 = vld [vmem:[%s9159_s19 + $0x1038] sm:$0xff] }
  0x74   : > { %470 = vst [vmem:[%s9164_s20 + $0x300] sm:$0xff] %v469_v32 }
  0x75   : > { %472 = vst [vmem:[%s9164_s20 + $0x308] sm:$0xff] %v471_v33 }
  0x76   : > { %474 = vst [vmem:[%s9164_s20 + $0x310] sm:$0xff] %v473_v34 }
  0x77   : > { %476 = vst [vmem:[%s9164_s20 + $0x318] sm:$0xff] %v475_v35 }
  0x78   : > { %478 = vst [vmem:[%s9164_s20 + $0x320] sm:$0xff] %v477_v36 }
  0x79   : > { %480 = vst [vmem:[%s9164_s20 + $0x328] sm:$0xff] %v479_v37 }
  0x7a   : > { %482 = vst [vmem:[%s9164_s20 + $0x330] sm:$0xff] %v481_v38 }
  0x7b   : > { %484 = vst [vmem:[%s9164_s20 + $0x338] sm:$0xff] %v483_v39 }
  0x7c   : > { %486 = vst [vmem:[%s9164_s20 + $0x340] sm:$0xff] %v485_v40 }
  0x7d   : > { %488 = vst [vmem:[%s9164_s20 + $0x348] sm:$0xff] %v487_v41 }
  0x7e   : > { %490 = vst [vmem:[%s9164_s20 + $0x350] sm:$0xff] %v489_v42 }
  0x7f   : > { %492 = vst [vmem:[%s9164_s20 + $0x358] sm:$0xff] %v491_v43 }
  0x80   : > { %494 = vst [vmem:[%s9164_s20 + $0x360] sm:$0xff] %v493_v44 }
  0x81   : > { %496 = vst [vmem:[%s9164_s20 + $0x368] sm:$0xff] %v495_v45 }
  0x82   : > { %498 = vst [vmem:[%s9164_s20 + $0x370] sm:$0xff] %v497_v46 }
  0x83   : > { %500 = vst [vmem:[%s9164_s20 + $0x378] sm:$0xff] %v499_v47 }
  0x84   : > { %502 = vst [vmem:[%s9164_s20 + $0x380] sm:$0xff] %v501_v48 }
  0x85   : > { %504 = vst [vmem:[%s9164_s20 + $0x388] sm:$0xff] %v503_v49 }
  0x86   : > { %506 = vst [vmem:[%s9164_s20 + $0x390] sm:$0xff] %v505_v50 }
  0x87   : > { %508 = vst [vmem:[%s9164_s20 + $0x398] sm:$0xff] %v507_v51 }
  0x88   : > { %510 = vst [vmem:[%s9164_s20 + $0x3a0] sm:$0xff] %v509_v52 }
  0x89   : > { %512 = vst [vmem:[%s9164_s20 + $0x3a8] sm:$0xff] %v511_v53 }
  0x8a   : > { %514 = vst [vmem:[%s9164_s20 + $0x3b0] sm:$0xff] %v513_v54 }
  0x8b   : > { %516 = vst [vmem:[%s9164_s20 + $0x3b8] sm:$0xff] %v515_v55 }
  0x8c   : > { %518 = vst [vmem:[%s9164_s20 + $0x3c0] sm:$0xff] %v517_v56 }
  0x8d   : > { %520 = vst [vmem:[%s9164_s20 + $0x3c8] sm:$0xff] %v519_v57 }
  0x8e   : > { %522 = vst [vmem:[%s9164_s20 + $0x3d0] sm:$0xff] %v521_v58 }
  0x8f   : > { %524 = vst [vmem:[%s9164_s20 + $0x3d8] sm:$0xff] %v523_v59 }
  0x90   : > { %526 = vst [vmem:[%s9164_s20 + $0x3e0] sm:$0xff] %v525_v60 }
  0x91   : > { %528 = vst [vmem:[%s9164_s20 + $0x3e8] sm:$0xff] %v527_v61 }
  0x92   : > { %530 = vst [vmem:[%s9164_s20 + $0x3f0] sm:$0xff] %v529_v62 }
  0x93   : > { %532 = vst [vmem:[%s9164_s20 + $0x3f8] sm:$0xff] %v531_v63 }
  0x94   : > { %534 = vst [vmem:[%s9164_s20 + $0x400] sm:$0xff] %v533_v0 }
  0x95   : > { %536 = vst [vmem:[%s9164_s20 + $0x408] sm:$0xff] %v535_v1 }
  0x96   : > { %538 = vst [vmem:[%s9164_s20 + $0x410] sm:$0xff] %v537_v2 }
  0x97   : > { %540 = vst [vmem:[%s9164_s20 + $0x418] sm:$0xff] %v539_v3 }
  0x98   : > { %542 = vst [vmem:[%s9164_s20 + $0x420] sm:$0xff] %v541_v4 }
  0x99   : > { %544 = vst [vmem:[%s9164_s20 + $0x428] sm:$0xff] %v543_v5 }
  0x9a   : > { %546 = vst [vmem:[%s9164_s20 + $0x430] sm:$0xff] %v545_v6 }
  0x9b   : > { %548 = vst [vmem:[%s9164_s20 + $0x438] sm:$0xff] %v547_v7 }
  0x9c   : > { %550 = vst [vmem:[%s9164_s20 + $0x440] sm:$0xff] %v549_v8 }
  0x9d   : > { %552 = vst [vmem:[%s9164_s20 + $0x448] sm:$0xff] %v551_v9 }
  0x9e   : > { %554 = vst [vmem:[%s9164_s20 + $0x450] sm:$0xff] %v553_v10 }
  0x9f   : > { %556 = vst [vmem:[%s9164_s20 + $0x458] sm:$0xff] %v555_v11 }
  0xa0   : > { %558 = vst [vmem:[%s9164_s20 + $0x460] sm:$0xff] %v557_v12 }
  0xa1   : > { %560 = vst [vmem:[%s9164_s20 + $0x468] sm:$0xff] %v559_v13 }
  0xa2   : > { %562 = vst [vmem:[%s9164_s20 + $0x470] sm:$0xff] %v561_v14 }
  0xa3   : > { %564 = vst [vmem:[%s9164_s20 + $0x478] sm:$0xff] %v563_v15 }
  0xa4   : > { %566 = vst [vmem:[%s9164_s20 + $0x480] sm:$0xff] %v565_v16 }
  0xa5   : > { %568 = vst [vmem:[%s9164_s20 + $0x488] sm:$0xff] %v567_v17 }
  0xa6   : > { %570 = vst [vmem:[%s9164_s20 + $0x490] sm:$0xff] %v569_v18 }
  0xa7   : > { %572 = vst [vmem:[%s9164_s20 + $0x498] sm:$0xff] %v571_v19 }
  0xa8   : > { %574 = vst [vmem:[%s9164_s20 + $0x4a0] sm:$0xff] %v573_v20 }
  0xa9   : > { %576 = vst [vmem:[%s9164_s20 + $0x4a8] sm:$0xff] %v575_v21 }
  0xaa   : > { %578 = vst [vmem:[%s9164_s20 + $0x4b0] sm:$0xff] %v577_v22 }
  0xab   : > { %580 = vst [vmem:[%s9164_s20 + $0x4b8] sm:$0xff] %v579_v23 }
  0xac   : > { %582 = vst [vmem:[%s9164_s20 + $0x4c0] sm:$0xff] %v581_v24 }
  0xad   : > { %584 = vst [vmem:[%s9164_s20 + $0x4c8] sm:$0xff] %v583_v25 }
  0xae   : > { %586 = vst [vmem:[%s9164_s20 + $0x4d0] sm:$0xff] %v585_v26 }
  0xaf   : > { %588 = vst [vmem:[%s9164_s20 + $0x4d8] sm:$0xff] %v587_v27 }
  0xb0   : > { %590 = vst [vmem:[%s9164_s20 + $0x4e0] sm:$0xff] %v589_v28 }
  0xb1   : > { %592 = vst [vmem:[%s9164_s20 + $0x4e8] sm:$0xff] %v591_v29 }
  0xb2   : > { %594 = vst [vmem:[%s9164_s20 + $0x4f0] sm:$0xff] %v593_v30 }
  0xb3   : > { %596 = vst [vmem:[%s9164_s20 + $0x4f8] sm:$0xff] %v595_v31 }
  0xb4 PF: > { %p7399_p7 = scmp.ge.s32.totalorder %s9000_s29, 1  ;;  %p609_p8 = scmp.lt.s32.totalorder %s9000_s29, 5 }
  0xb6   : > { %p610_p9 = pnand %p7399_p7, %p609_p8 }
  0xb7   : > { %s616_s21 = sand.u32 (!%p610_p9), 1, %s8992_s27   ;;  %s9487_s22 = smul.u32 (!%p610_p9), 80, %s9134_s30 }
  0xb8   : > { %613 = sbr.rel (%p610_p9) target bundleno = 6694 (0x1a26), region = 71  ;;  %p7400_p11 = scmp.ne.s32.totalorder (!%p610_p9), %s9134_s30, 0 }
  0xb9   : > { %s8555_s23 = smul.u32 (!%p610_p9), 1280, %s616_s21  ;;  %p654_p10 = scmp.lt.s32.totalorder (!%p610_p9), %s9487_s22, 319 }
  0xba   : > { %s8556_s24 = smul.u32 (!%p610_p9), 1920, %s616_s21 }
  0xbb   : > { %s9496_s14 = scalar_lea.vmem (!%p610_p9), [#allocation3], %s8555_s23 }
  0xbc   : > { %s9498_s29 = scalar_lea.vmem (!%p610_p9), [#allocation4], %s8556_s24  }
  0xbd   : > { %s655_s25 = scalar_select %p654_p10, %s9487_s22, 319 }
  0xbe   : > { %667 = sbr.rel (%p7400_p11) target bundleno = 5721 (0x1659), region = 79  ;;  %s9066_s26 = smov (!%p7400_p11), 120  }
  0xbf   : > { %s9494_s11 = scalar_lea.vmem %s13943_s7, %s655_s25  ;;  %s9067_s15 = smov (!%p7400_p11), 112  }
  0xc0   : > { %s9068_s16 = smov (!%p7400_p11), 104  }
  0xc3   : > { %v690_v32 = vld [vmem:[%s13939_s3 + $0x80] sm:$0xff]  ;;  %v685_v33 = vld [vmem:[%s13939_s3 + $0x58] sm:$0xff]  ;;  %v680_v34 = vld [vmem:[%s13939_s3 + $0x30] sm:$0xff]  ;;  %vm705_vm0 = vcmask 261120   ;;  %vm798_vm1 = vcmask 64512   ;;  %vm843_vm2 = vcmask 195584  }
  0xc4   : > { %8550 = vmatpush.msra.mxu3 %v690_v32  ;;  %757 = vmatpush.msra.mxu1 %v690_v32  ;;  %v689_v35 = vld [vmem:[%s13939_s3 + $0x78] sm:$0xff]  ;;  %v684_v36 = vld [vmem:[%s13939_s3 + $0x50] sm:$0xff]  ;;  %v675_v37 = vld [vmem:[%s13939_s3 + $0x8] sm:$0xff] }
  0xc5   : > { %727 = vmatpush.msra.mxu0 %v689_v35  ;;  %8546 = vmatpush.msra.mxu2 %v689_v35  ;;  %v679_v38 = vld [vmem:[%s13939_s3 + $0x28] sm:$0xff]  ;;  %v668_v40 = vld [vmem:[%s13936_s0] sm:$0xff]  ;;  %v670_v42 = vld [vmem:[%s13936_s0 + $0x10] sm:$0xff] }
  0xc6   : > { %8551 = vmatpush.msra.mxu3 %v685_v33  ;;  %758 = vmatpush.msra.mxu1 %v685_v33  ;;  %v669_v39 = vld [vmem:[%s13936_s0 + $0x8] sm:$0xff]  ;;  %v674_v41 = vld [vmem:[%s13939_s3] sm:$0xff]  ;;  %v681_v59 = vld [vmem:[%s13939_s3 + $0x38] sm:$0xff] }
  0xc7   : > { %728 = vmatpush.msra.mxu0 %v684_v36  ;;  %8547 = vmatpush.msra.mxu2 %v684_v36  ;;  %v9543_v43 = vld [vmem:[%s13941_s5] sm:$0xff]  ;;  %v691_v54 = vld [vmem:[%s13939_s3 + $0x88] sm:$0xff]  ;;  %v676_v60 = vld [vmem:[%s13939_s3 + $0x10] sm:$0xff] }
  0xc8   : > { %8552 = vmatpush.msra.mxu3 %v680_v34  ;;  %759 = vmatpush.msra.mxu1 %v680_v34  ;;  %v744_v44 = vperm.slane %v9543_v43, 1  ;;  %v704_v47 = vperm.slane %v9543_v43, 0  ;;  %v686_v55 = vld [vmem:[%s13939_s3 + $0x60] sm:$0xff]  ;;  %v9614_v13 = vld [vmem:[%s13937_s1 + $0x8] sm:$0xff]  ;;  %v771_v14 = vperm.slane %v9543_v43, 2  ;;  %v9624_v22 = vld [vmem:[%s13937_s1 + $0x10] sm:$0xff] }
  0xc9   : > { %729 = vmatpush.msra.mxu0 %v679_v38  ;;  %8548 = vmatpush.msra.mxu2 %v679_v38  ;;  %v9606_v7 = vld [vmem:[%s13937_s1] sm:$0xff] }
  0xca   : > { %8553 = vmatpush.msra.mxu3 %v675_v37  ;;  %760 = vmatpush.msra.mxu1 %v675_v37 }
  0xcb   : > { %7405 = vmatmul.msk.f32.vlgmr.msra.gmra.mxu3 %vm705_vm0, %v669_v39  ;;  %7404 = vmatmul.msk.f32.vlgmr.msra.gmra.mxu1 %vm705_vm0, %v668_v40 }
  0xcc   : > { %730 = vmatpush.msra.mxu0 %v674_v41  ;;  %8549 = vmatpush.msra.mxu2 %v674_v41 }
  0xcd   : > { %7401 = vmatmul.msk.f32.vlgmr.msra.gmra.mxu0 %vm705_vm0, %v668_v40  ;;  %7402 = vmatmul.msk.f32.vlgmr.msra.gmra.mxu2 %vm705_vm0, %v669_v39 }
  0xce   : > { %784 = vmatpush.msrb.mxu2 %v691_v54 }
  0xd0   : > { %785 = vmatpush.msrb.mxu2 %v686_v55 }
  0xd2   : > { %786 = vmatpush.msrb.mxu2 %v681_v59 }
  0xd3   : > { %7406 = vmatmul.msk.f32.gmra.mxu3 %vm705_vm0, %v670_v42 }
  0xd4   : > { %787 = vmatpush.msrb.mxu2 %v676_v60 }
  0xd5   : > { %7403 = vmatmul.msk.f32.gmra.mxu2 %vm705_vm0, %v670_v42 }
  0xdd   : > { %7407 = vmatmul.msk.f32.vlgmr.msrb.gmra.mxu2 %vm705_vm0, %v668_v40 }
  0xe5   : > { %7408 = vmatmul.msk.f32.gmra.mxu2 %vm705_vm0, %v669_v39 }
  0xed   : > { %7409 = vmatmul.msk.f32.gmra.mxu2 %vm705_vm0, %v670_v42 }
 0x148   : > { %v762_v45 = vpop.f32.mrf.mxu1 }
 0x149   : > { %v9546_v46 = vadd.f32 %v762_v45, %v744_v44 }
 0x14a   : > { %v732_v48 = vpop.f32.mrf.mxu0 }
 0x14b   : > { %996 = vrot.lane.b32.xlu1 %v9546_v46, %s9066_s26  ;;  %v733_v50 = vadd.f32 %v732_v48, %v704_v47 }
 0x14d   : > { %v9551_v51 = vmul.f32 0.35355338, %v733_v50 }
 0x14e   : > { %v765_v49 = vpop.f32.mrf.mxu3 }
 0x14f   : > { %v9577_v62 = vadd.f32 %v765_v49, %v744_v44 }
 0x150   : > { %v735_v52 = vpop.f32.mrf.mxu2 }
 0x151   : > { %v736_v53 = vadd.f32 %v735_v52, %v704_v47 }
 0x153   : > { %990 = vrot.lane.b32.xlu1 %v9551_v51, %s9066_s26  ;;  %v9561_v56 = vmul.f32 0.35355338, %v736_v53 }
 0x155   : > { %992 = vrot.lane.b32.xlu2 %v9561_v56, %s9066_s26 }
 0x156   : > { %v768_v57 = vpop.f32.mrf.mxu3 }
 0x157   : > { %v9563_v58 = vadd.f32 %v768_v57, %v744_v44 }
 0x158   : > { %v738_v61 = vpop.f32.mrf.mxu2 }
 0x159   : > { %1000 = vrot.lane.b32.xlu0 %v9563_v58, %s9066_s26  ;;  %7410 = vmatpush.xpose.msk.msrb.mxu3 %vm798_vm1, %v9563_v58  ;;  %v739_v63 = vadd.f32 %v738_v61, %v704_v47 }
 0x15b   : > { %v9581_v0 = vmul.f32 0.35355338, %v739_v63 }
 0x15d   : > { %7411 = vmatpush.xpose.msk.msrb.mxu3 %vm798_vm1, %v9577_v62  ;;  %994 = vrot.lane.b32.xlu2 %v9581_v0, %s9066_s26 }
 0x160   : > { %v789_v6 = vpop.f32.mrf.mxu2 }
 0x161   : > { %998 = vrot.lane.b32.xlu0 %v9577_v62, %s9066_s26  ;;  %7412 = vmatpush.xpose.msk.msrb.mxu3 %vm798_vm1, %v9546_v46  ;;  %v9619_v21 = vadd.f32 %v789_v6, %v771_v14 }
 0x164   : > { %7413 = vmatmul.msk.f32.vlgmr.msrb.gmra.mxu3 %vm798_vm1, %v9551_v51 }
 0x168   : > { %v792_v11 = vpop.f32.mrf.mxu2 }
 0x169   : > { %v793_v18 = vadd.f32 %v792_v11, %v771_v14 }
 0x16c   : > { %7414 = vmatmul.msk.f32.gmra.mxu3 %vm798_vm1, %v9561_v56 }
 0x170   : > { %v795_v17 = vpop.f32.mrf.mxu2 }
 0x171   : > { %v796_v19 = vadd.f32 %v795_v17, %v771_v14 }
 0x173   : > { %938 = vmatpush.msrb.mxu0 %v796_v19  ;;  %v9629_v26 = vpack.i.bf16 %v793_v18, %v796_v19 }
 0x174   : > { %7415 = vmatmul.msk.f32.gmra.mxu3 %vm798_vm1, %v9581_v0 }
 0x175   : > { %939 = vmatpush.msrb.mxu0 %v793_v18 }
 0x177   : > { %940 = vmatpush.msrb.mxu0 %v9619_v21 }
 0x1af   : > { %v993_v5 = vpop.permute.xlu2 %992 }
 0x1b7   : > { %v995_v10 = vpop.permute.xlu2 %994 }
 0x1bd   : > { %v997_v2 = vpop.permute.xlu1 %996 }
 0x1c5   : > { %v991_v4 = vpop.permute.xlu1 %990 }
 0x1cb   : > { %v1001_v1 = vpop.permute.xlu0 %1000 }
 0x1cc   : > { %7422 = vmatpush.xpose.msk.msra.mxu2 %vm798_vm1, %v1001_v1 }
 0x1d3   : > { %v999_v3 = vpop.permute.xlu0 %998 }
 0x1d4   : > { %7423 = vmatpush.xpose.msk.msra.mxu2 %vm798_vm1, %v999_v3 }
 0x1d8   : > { %7424 = vmatpush.xpose.msk.msra.mxu2 %vm798_vm1, %v997_v2 }
 0x1db   : > { %7425 = vmatmul.msk.f32.vlgmr.msra.gmra.mxu2 %vm798_vm1, %v991_v4 }
 0x1e3   : > { %7426 = vmatmul.msk.f32.gmra.mxu2 %vm798_vm1, %v993_v5 }
 0x1e7   : > { %v834_v8 = vpop.f32.mrf.mxu3 }
 0x1e8   : > { %v835_v9 = vadd.f32 %v834_v8, %v9606_v7 }
 0x1ea   : > { %v844_v12 = vsel %vm843_vm2, %v835_v9, -inf }
 0x1eb   : > { %7427 = vmatmul.msk.f32.gmra.mxu2 %vm798_vm1, %v995_v10  ;;  %845 = vmax.xlane.f32.xlu0 %v844_v12 }
 0x1ef   : > { %v837_v15 = vpop.f32.mrf.mxu3 }
 0x1f0   : > { %v838_v16 = vadd.f32 %v837_v15, %v9614_v13 }
 0x1f2   : > { %v847_v20 = vsel %vm843_vm2, %v838_v16, -inf }
 0x1f3   : > { %848 = vmax.xlane.f32.xlu2 %v847_v20  ;;  %v682_v20 = vld [vmem:[%s13939_s3 + $0x40] sm:$0xff] }
 0x1f4   : > { %1183 = vmatpush.msra.mxu0 %v682_v20 }
 0x1f7   : > { %v840_v23 = vpop.f32.mrf.mxu3 }
 0x1f8   : > { %v841_v24 = vadd.f32 %v840_v23, %v9624_v22 }
 0x1fa   : > { %v850_v25 = vsel %vm843_vm2, %v841_v24, -inf }
 0x1fb   : > { %851 = vmax.xlane.f32.xlu0 %v850_v25 }
 0x25e   : > { %v1031_v27 = vpop.f32.mrf.mxu2  ;;  %v846_v28 = vpop.xlane.xlu0 %845 }
 0x25f   : > { %v1032_v29 = vadd.f32 %v1031_v27, %v9606_v7  ;;  %v853_v30 = vsub.f32 %v835_v9, %v846_v28 }
 0x261   : > { %v1040_v31 = vsel %vm843_vm2, %v1032_v29, -inf  ;;  %v856_v32 = vmul.f32 1.442695, %v853_v30 }
 0x262   : > { %1041 = vmax.xlane.f32.xlu1 %v1040_v31 }
 0x263   : > { %8748 = vpow2.f32 %v856_v32 }
 0x266   : > { %v1034_v33 = vpop.f32.mrf.mxu2  ;;  %v849_v34 = vpop.xlane.xlu2 %848 }
 0x267   : > { %v1035_v35 = vadd.f32 %v1034_v33, %v9614_v13  ;;  %v854_v36 = vsub.f32 %v838_v16, %v849_v34 }
 0x269   : > { %v1043_v37 = vsel %vm843_vm2, %v1035_v35, -inf  ;;  %v858_v38 = vmul.f32 1.442695, %v854_v36  ;;  %v9635_v39 = vpop.eup %8748 }
 0x26a   : > { %1044 = vmax.xlane.f32.xlu2 %v1043_v37  ;;  %v862_v48 = vsel %vm843_vm2, %v9635_v39, 0.0 }
 0x26b   : > { %8750 = vpow2.f32 %v858_v38 }
 0x26e   : > { %v1037_v40 = vpop.f32.mrf.mxu2  ;;  %v852_v41 = vpop.xlane.xlu0 %851 }
 0x26f   : > { %v1038_v42 = vadd.f32 %v1037_v40, %v9624_v22  ;;  %v855_v44 = vsub.f32 %v841_v24, %v852_v41 }
 0x271   : > { %v860_v45 = vmul.f32 1.442695, %v855_v44  ;;  %v1046_v47 = vsel %vm843_vm2, %v1038_v42, -inf  ;;  %v9641_v49 = vpop.eup %8750 }
 0x272   : > { %1047 = vmax.xlane.f32.xlu1 %v1046_v47  ;;  %863 = vadd.xlane.f32.xlu2 %v862_v48  ;;  %v865_v52 = vsel %vm843_vm2, %v9641_v49, 0.0 }
 0x273   : > { %8752 = vpow2.f32 %v860_v45 }
 0x279   : > { %v9643_v50 = vpop.eup %8752 }
 0x27a   : > { %866 = vadd.xlane.f32.xlu1 %v865_v52  ;;  %v868_v53 = vsel %vm843_vm2, %v9643_v50, 0.0 }
 0x27b   : > { %869 = vadd.xlane.f32.xlu0 %v868_v53 }
 0x293   : > { %8719 = vrot.lane.b32.xlu1 %v9629_v26, %s9066_s26 }
 0x29b   : > { %1205 = vrot.lane.b32.xlu1 %v9577_v62, %s9067_s15 }
 0x2a3   : > { %1411 = vrot.lane.b32.xlu1 %v9563_v58, %s9068_s16 }
 0x2ab   : > { %1407 = vrot.lane.b32.xlu1 %v9546_v46, %s9068_s16 }
 0x2b3   : > { %1201 = vrot.lane.b32.xlu1 %v9581_v0, %s9067_s15 }
 0x2d5   : > { %v1042_v54 = vpop.xlane.xlu1 %1041 }
 0x2d6   : > { %v1049_v55 = vsub.f32 %v1032_v29, %v1042_v54 }
 0x2d8   : > { %v1052_v57 = vmul.f32 1.442695, %v1049_v55 }
 0x2da   : > { %8754 = vpow2.f32 %v1052_v57 }
 0x2dd   : > { %v1045_v59 = vpop.xlane.xlu2 %1044 }
 0x2de   : > { %v1050_v60 = vsub.f32 %v1035_v35, %v1045_v59 }
 0x2e0   : > { %v9659_v61 = vpop.eup %8754  ;;  %v1054_v63 = vmul.f32 1.442695, %v1050_v60 }
 0x2e1   : > { %v1058_v1 = vsel %vm843_vm2, %v9659_v61, 0.0 }
 0x2e2   : > { %8756 = vpow2.f32 %v1054_v63  ;;  %1059 = vadd.xlane.f32.xlu0 %v1058_v1 }
 0x2e5   : > { %v1048_v2 = vpop.xlane.xlu1 %1047  ;;  %v864_v3 = vpop.xlane.xlu2 %863 }
 0x2e6   : > { %v1051_v4 = vsub.f32 %v1038_v42, %v1048_v2  ;;  %8758 = vrcp.f32 %v864_v3  ;;  %v882_v16 = vand.u32 2147483648, %v864_v3  ;;  %v880_v18 = vand.u32 2147483647, %v864_v3 }
 0x2e7   : > { %vm876_vm4 = vweird.f32 %v864_v3 }
 0x2e8   : > { %v9663_v5 = vpop.eup %8756  ;;  %v1056_v6 = vmul.f32 1.442695, %v1051_v4  ;;  %v883_v25 = vor.u32 1.1754944e-38, %v882_v16  ;;  %vm881_vm6 = vcmp.eq.f32.partialorder %v880_v18, 8.507059e+37 }
 0x2e9   : > { %v1061_v8 = vsel %vm843_vm2, %v9663_v5, 0.0 }
 0x2ea   : > { %8760 = vpow2.f32 %v1056_v6  ;;  %1062 = vadd.xlane.f32.xlu2 %v1061_v8 }
 0x2ec   : > { %v8759_v9 = vpop.eup %8758 }
 0x2ed   : > { %v872_v10 = vmul.f32 %v8759_v9, %v864_v3  ;;  %v867_v11 = vpop.xlane.xlu1 %866  ;;  %vm877_vm3 = vweird.f32 %v8759_v9 }
 0x2ee   : > { %8762 = vrcp.f32 %v867_v11  ;;  %v870_v12 = vpop.xlane.xlu0 %869  ;;  %vm878_vm5 = vmor %vm876_vm4, %vm877_vm3  ;;  %v897_v34 = vand.u32 2147483648, %v867_v11  ;;  %v895_v37 = vand.u32 2147483647, %v867_v11  ;;  %vm891_vm8 = vweird.f32 %v867_v11 }
 0x2ef   : > { %v873_v14 = vsub.f32 1.0, %v872_v10  ;;  %8764 = vrcp.f32 %v870_v12  ;;  %v912_v45 = vand.u32 2147483648, %v870_v12  ;;  %vm906_vm12 = vweird.f32 %v870_v12 }
 0x2f0   : > { %v9667_v15 = vpop.eup %8760  ;;  %v898_v41 = vor.u32 1.1754944e-38, %v897_v34  ;;  %vm896_vm10 = vcmp.eq.f32.partialorder %v895_v37, 8.507059e+37  ;;  %v910_v48 = vand.u32 2147483647, %v870_v12 }
 0x2f1   : > { %v874_v17 = vmul.f32 %v8759_v9, %v873_v14  ;;  %v1064_v19 = vsel %vm843_vm2, %v9667_v15, 0.0  ;;  %v913_v53 = vor.u32 1.1754944e-38, %v912_v45 }
 0x2f2   : > { %1065 = vadd.xlane.f32.xlu2 %v1064_v19  ;;  %vm911_vm14 = vcmp.eq.f32.partialorder %v910_v48, 8.507059e+37 }
 0x2f3   : > { %v875_v23 = vadd.f32 %v8759_v9, %v874_v17 }
 0x2f4   : > { %v8763_v24 = vpop.eup %8762 }
 0x2f5   : > { %v8765_v27 = vpop.eup %8764  ;;  %v887_v28 = vmul.f32 %v8763_v24, %v867_v11  ;;  %v879_v29 = vsel %vm878_vm5, %v8759_v9, %v875_v23  ;;  %vm892_vm7 = vweird.f32 %v8763_v24 }
 0x2f6   : > { %v902_v30 = vmul.f32 %v8765_v27, %v870_v12  ;;  %1115 = vrot.lane.b32.xlu0 %v9619_v21, %s9066_s26  ;;  %v884_v31 = vsel %vm881_vm6, %v883_v25, %v879_v29  ;;  %vm893_vm9 = vmor %vm891_vm8, %vm892_vm7  ;;  %vm907_vm11 = vweird.f32 %v8765_v27 }
 0x2f7   : > { %v888_v32 = vsub.f32 1.0, %v887_v28  ;;  %v885_v33 = vmul.f32 %v9635_v39, %v884_v31  ;;  %vm908_vm13 = vmor %vm906_vm12, %vm907_vm11 }
 0x2f8   : > { %v903_v35 = vsub.f32 1.0, %v902_v30 }
 0x2f9   : > { %v889_v36 = vmul.f32 %v8763_v24, %v888_v32  ;;  %7416 = vmatmul.msk.f32.vlgmr.msrb.gmra.mxu0 %vm843_vm2, %v885_v33 }
 0x2fa   : > { %v904_v38 = vmul.f32 %v8765_v27, %v903_v35 }
 0x2fb   : > { %v890_v40 = vadd.f32 %v8763_v24, %v889_v36 }
 0x2fc   : > { %v905_v44 = vadd.f32 %v8765_v27, %v904_v38 }
 0x2fd   : > { %v894_v42 = vsel %vm893_vm9, %v8763_v24, %v890_v40 }
 0x2fe   : > { %1203 = vrot.lane.b32.xlu0 %v9546_v46, %s9067_s15  ;;  %v899_v39 = vsel %vm896_vm10, %v898_v41, %v894_v42  ;;  %v909_v52 = vsel %vm908_vm13, %v8765_v27, %v905_v44 }
 0x2ff   : > { %v900_v47 = vmul.f32 %v9641_v49, %v899_v39  ;;  %v914_v54 = vsel %vm911_vm14, %v913_v53, %v909_v52 }
 0x300   : > { %v915_v59 = vmul.f32 %v9643_v50, %v914_v54 }
 0x301   : > { %7417 = vmatmul.msk.f32.gmra.mxu0 %vm843_vm2, %v900_v47 }
 0x305   : > { %v8720_v55 = vpop.permute.xlu1 %8719 }
 0x306   : > { %v8721_v57 = vunpack.i.l.bf16 %v8720_v55  ;;  %1197 = vrot.lane.b32.xlu0 %v9551_v51, %s9067_s15  ;;  %v8722_v46 = vunpack.i.h.bf16 %v8720_v55 }
 0x308   : > { %1146 = vmatpush.msra.mxu3 %v8721_v57 }
 0x309   : > { %7418 = vmatmul.msk.f32.gmra.mxu0 %vm843_vm2, %v915_v59 }
 0x30a   : > { %1147 = vmatpush.msra.mxu3 %v8722_v46  ;;  %1207 = vrot.lane.b32.xlu2 %v9563_v58, %s9067_s15  ;;  %v677_v58 = vld [vmem:[%s13939_s3 + $0x18] sm:$0xff] }
 0x30b   : > { %975 = vmatpush.msrb.mxu1 %v677_v58 }
 0x30d   : > { %v1206_v49 = vpop.permute.xlu1 %1205 }
 0x30e   : > { %1199 = vrot.lane.b32.xlu0 %v9561_v56, %s9067_s15 }
 0x312   : > { %1409 = vrot.lane.b32.xlu2 %v9577_v62, %s9068_s16 }
 0x315   : > { %v1412_v60 = vpop.permute.xlu1 %1411 }
 0x316   : > { %7446 = vmatpush.xpose.msk.msrb.mxu0 %vm798_vm1, %v1412_v60  ;;  %1403 = vrot.lane.b32.xlu0 %v9561_v56, %s9068_s16 }
 0x31a   : > { %1401 = vrot.lane.b32.xlu2 %v9551_v51, %s9068_s16 }
 0x31d   : > { %v1408_v42 = vpop.permute.xlu1 %1407 }
 0x322   : > { %1405 = vrot.lane.b32.xlu2 %v9581_v0, %s9068_s16 }
 0x325   : > { %v1202_v48 = vpop.permute.xlu1 %1201 }
 0x355   : > { %v1060_v50 = vpop.xlane.xlu0 %1059 }
 0x356   : > { %8766 = vrcp.f32 %v1060_v50  ;;  %v1078_v3 = vand.u32 2147483648, %v1060_v50  ;;  %v1076_v4 = vand.u32 2147483647, %v1060_v50  ;;  %vm1072_vm3 = vweird.f32 %v1060_v50 }
 0x358   : > { %v1079_v0 = vor.u32 1.1754944e-38, %v1078_v3  ;;  %vm1077_vm5 = vcmp.eq.f32.partialorder %v1076_v4, 8.507059e+37  ;;  %v986_v4 = vperm.slane %v9543_v43, 3 }
 0x35c   : > { %v8767_v62 = vpop.eup %8766 }
 0x35d   : > { %v1068_v63 = vmul.f32 %v8767_v62, %v1060_v50  ;;  %v1063_v1 = vpop.xlane.xlu2 %1062  ;;  %vm1073_vm15 = vweird.f32 %v8767_v62 }
 0x35e   : > { %8768 = vrcp.f32 %v1063_v1  ;;  %vm1074_vm4 = vmor %vm1072_vm3, %vm1073_vm15  ;;  %v1093_v16 = vand.u32 2147483648, %v1063_v1  ;;  %v1091_v19 = vand.u32 2147483647, %v1063_v1  ;;  %vm1087_vm7 = vweird.f32 %v1063_v1 }
 0x35f   : > { %v1069_v2 = vsub.f32 1.0, %v1068_v63 }
 0x360   : > { %v1094_v24 = vor.u32 1.1754944e-38, %v1093_v16  ;;  %vm1092_vm9 = vcmp.eq.f32.partialorder %v1091_v19, 8.507059e+37 }
 0x361   : > { %v1070_v56 = vmul.f32 %v8767_v62, %v1069_v2 }
 0x363   : > { %v1071_v51 = vadd.f32 %v8767_v62, %v1070_v56 }
 0x364   : > { %v8769_v6 = vpop.eup %8768 }
 0x365   : > { %v1075_v8 = vsel %vm1074_vm4, %v8767_v62, %v1071_v51  ;;  %v1083_v9 = vmul.f32 %v8769_v6, %v1063_v1  ;;  %v1066_v10 = vpop.xlane.xlu2 %1065  ;;  %vm1088_vm6 = vweird.f32 %v8769_v6 }
 0x366   : > { %v1080_v11 = vsel %vm1077_vm5, %v1079_v0, %v1075_v8  ;;  %8770 = vrcp.f32 %v1066_v10  ;;  %vm1089_vm8 = vmor %vm1087_vm7, %vm1088_vm6  ;;  %v1108_v31 = vand.u32 2147483648, %v1066_v10  ;;  %v1106_v33 = vand.u32 2147483647, %v1066_v10 }
 0x367   : > { %v1084_v12 = vsub.f32 1.0, %v1083_v9  ;;  %v1081_v14 = vmul.f32 %v9659_v61, %v1080_v11  ;;  %vm1102_vm11 = vweird.f32 %v1066_v10 }
 0x368   : > { %v1116_v17 = vpop.permute.xlu0 %1115  ;;  %v1109_v35 = vor.u32 1.1754944e-38, %v1108_v31  ;;  %vm1107_vm13 = vcmp.eq.f32.partialorder %v1106_v33, 8.507059e+37 }
 0x369   : > { %v1085_v18 = vmul.f32 %v8769_v6, %v1084_v12  ;;  %1148 = vmatpush.msra.mxu3 %v1116_v17 }
 0x36a   : > { %7428 = vmatmul.msk.f32.vlgmr.msra.gmra.mxu3 %vm843_vm2, %v1081_v14 }
 0x36b   : > { %v1086_v20 = vadd.f32 %v8769_v6, %v1085_v18 }
 0x36c   : > { %v8771_v23 = vpop.eup %8770 }
 0x36d   : > { %v1098_v25 = vmul.f32 %v8771_v23, %v1066_v10  ;;  %v1208_v27 = vpop.permute.xlu2 %1207  ;;  %v1090_v28 = vsel %vm1089_vm8, %v8769_v6, %v1086_v20  ;;  %vm1103_vm10 = vweird.f32 %v8771_v23 }
 0x36e   : > { %7434 = vmatpush.xpose.msk.msra.mxu1 %vm798_vm1, %v1208_v27  ;;  %v1095_v61 = vsel %vm1092_vm9, %v1094_v24, %v1090_v28  ;;  %vm1104_vm12 = vmor %vm1102_vm11, %vm1103_vm10 }
 0x36f   : > { %v1099_v29 = vsub.f32 1.0, %v1098_v25  ;;  %v1096_v30 = vmul.f32 %v9663_v5, %v1095_v61 }
 0x370   : > { %v1204_v36 = vpop.permute.xlu0 %1203 }
 0x371   : > { %v1100_v32 = vmul.f32 %v8771_v23, %v1099_v29 }
 0x372   : > { %7429 = vmatmul.msk.f32.gmra.mxu3 %vm843_vm2, %v1096_v30  ;;  %7435 = vmatpush.xpose.msk.msra.mxu1 %vm798_vm1, %v1206_v49 }
 0x373   : > { %v1101_v34 = vadd.f32 %v8771_v23, %v1100_v32 }
 0x375   : > { %v1410_v37 = vpop.permute.xlu2 %1409  ;;  %v1105_v38 = vsel %vm1104_vm12, %v8771_v23, %v1101_v34 }
 0x376   : > { %v942_v40 = vpop.f32.mrf.mxu0  ;;  %7436 = vmatpush.xpose.msk.msra.mxu1 %vm798_vm1, %v1204_v36  ;;  %7447 = vmatpush.xpose.msk.msrb.mxu0 %vm798_vm1, %v1410_v37  ;;  %v1110_v5 = vsel %vm1107_vm13, %v1109_v35, %v1105_v38 }
 0x377   : > { %7419 = vmatmul.msk.f32.vlgmr.msrb.gmra.mxu1 %vm798_vm1, %v942_v40  ;;  %v1111_v41 = vmul.f32 %v9667_v15, %v1110_v5 }
 0x378   : > { %v1198_v39 = vpop.permute.xlu0 %1197 }
 0x37a   : > { %7430 = vmatmul.msk.f32.gmra.mxu3 %vm843_vm2, %v1111_v41  ;;  %7448 = vmatpush.xpose.msk.msrb.mxu0 %vm798_vm1, %v1408_v42 }
 0x37d   : > { %v1402_v59 = vpop.permute.xlu2 %1401 }
 0x37e   : > { %v945_v44 = vpop.f32.mrf.mxu0 }
 0x37f   : > { %7420 = vmatmul.msk.f32.gmra.mxu1 %vm798_vm1, %v945_v44 }
 0x380   : > { %v1200_v47 = vpop.permute.xlu0 %1199 }
 0x385   : > { %v1406_v62 = vpop.permute.xlu2 %1405 }
 0x386   : > { %v948_v45 = vpop.f32.mrf.mxu0 }
 0x387   : > { %7421 = vmatmul.msk.f32.gmra.mxu1 %vm798_vm1, %v948_v45 }
 0x388   : > { %v1404_v49 = vpop.permute.xlu0 %1403 }
 0x38f   : > { %7437 = vmatmul.msk.f32.vlgmr.msra.gmra.mxu1 %vm798_vm1, %v1198_v39 }
 0x397   : > { %7438 = vmatmul.msk.f32.gmra.mxu1 %vm798_vm1, %v1200_v47 }
 0x39f   : > { %7439 = vmatmul.msk.f32.gmra.mxu1 %vm798_vm1, %v1202_v48 }
 0x3ed   : > { %v1150_v15 = vpop.f32.mrf.mxu3 }
 0x3ee   : > { %7431 = vmatmul.msk.f32.vlgmr.msra.gmra.mxu0 %vm798_vm1, %v1150_v15 }
 0x3f4   : > { %v977_v52 = vpop.f32.mrf.mxu1 }
 0x3f5   : > { %v1153_v53 = vpop.f32.mrf.mxu3  ;;  %v987_v51 = vadd.f32 %v986_v4, %v977_v52 }
 0x3f6   : > { %7432 = vmatmul.msk.f32.gmra.mxu0 %vm798_vm1, %v1153_v53 }
 0x3fc   : > { %v980_v54 = vpop.f32.mrf.mxu1 }
 0x3fd   : > { %v1156_v55 = vpop.f32.mrf.mxu3  ;;  %v988_v8 = vadd.f32 %v986_v4, %v980_v54 }
 0x3fe   : > { %7433 = vmatmul.msk.f32.gmra.mxu0 %vm798_vm1, %v1156_v55 }
 0x404   : > { %v983_v57 = vpop.f32.mrf.mxu1 }
 0x405   : > { %v989_v11 = vadd.f32 %v986_v4, %v983_v57 }
 0x406   : > { %7449 = vmatmul.msk.f32.vlgmr.msrb.gmra.mxu0 %vm798_vm1, %v1402_v59 }
 0x40c   : > { %v1238_v46 = vpop.f32.mrf.mxu1 }
 0x40d   : > { %v1239_v60 = vadd.f32 %v1238_v46, %v9606_v7 }
 0x40e   : > { %7450 = vmatmul.msk.f32.gmra.mxu0 %vm798_vm1, %v1404_v49 }
 0x40f   : > { %v1247_v58 = vsel %vm843_vm2, %v1239_v60, -inf }
 0x410   : > { %1248 = vmax.xlane.f32.xlu1 %v1247_v58 }
 0x414   : > { %v1241_v50 = vpop.f32.mrf.mxu1 }
 0x415   : > { %v1242_v63 = vadd.f32 %v1241_v50, %v9614_v13 }
 0x416   : > { %7451 = vmatmul.msk.f32.gmra.mxu0 %vm798_vm1, %v1406_v62 }
 0x417   : > { %v1250_v1 = vsel %vm843_vm2, %v1242_v63, -inf }
 0x418   : > { %1251 = vmax.xlane.f32.xlu0 %v1250_v1 }
 0x41c   : > { %v1244_v2 = vpop.f32.mrf.mxu1 }
 0x41d   : > { %v1245_v3 = vadd.f32 %v1244_v2, %v9624_v22 }
 0x41f   : > { %v1253_v56 = vsel %vm843_vm2, %v1245_v3, -inf }
 0x420   : > { %1254 = vmax.xlane.f32.xlu1 %v1253_v56 }
 0x46b   : > { %v1185_v6 = vpop.f32.mrf.mxu0 }
 0x46c   : > { %v9732_v0 = vadd.f32 %v1185_v6, %v987_v51 }
 0x473   : > { %v1188_v9 = vpop.f32.mrf.mxu0 }
 0x474   : > { %v9734_v10 = vadd.f32 %v1188_v9, %v988_v8 }
 0x47b   : > { %v1191_v12 = vpop.f32.mrf.mxu0 }
 0x47c   : > { %v9736_v14 = vadd.f32 %v1191_v12, %v989_v11 }
 0x483   : > { %v1442_v16 = vpop.f32.mrf.mxu0  ;;  %v1249_v17 = vpop.xlane.xlu1 %1248 }
 0x484   : > { %v1443_v18 = vadd.f32 %v1442_v16, %v9606_v7  ;;  %v1256_v19 = vsub.f32 %v1239_v60, %v1249_v17 }
 0x486   : > { %v1259_v20 = vmul.f32 1.442695, %v1256_v19  ;;  %v1451_v43 = vsel %vm843_vm2, %v1443_v18, -inf }
 0x487   : > { %1452 = vmax.xlane.f32.xlu2 %v1451_v43 }
 0x488   : > { %8772 = vpow2.f32 %v1259_v20 }
 0x48b   : > { %v1445_v23 = vpop.f32.mrf.mxu0 }
 0x48c   : > { %v1446_v24 = vadd.f32 %v1445_v23, %v9614_v13  ;;  %v1252_v13 = vpop.xlane.xlu0 %1251 }
 0x48d   : > { %v1257_v30 = vsub.f32 %v1242_v63, %v1252_v13 }
 0x48e   : > { %v9741_v25 = vpop.eup %8772  ;;  %v1454_v27 = vsel %vm843_vm2, %v1446_v24, -inf }
 0x48f   : > { %1455 = vmax.xlane.f32.xlu0 %v1454_v27  ;;  %v1265_v28 = vsel %vm843_vm2, %v9741_v25, 0.0  ;;  %v1261_v31 = vmul.f32 1.442695, %v1257_v30 }
 0x490   : > { %1266 = vadd.xlane.f32.xlu1 %v1265_v28 }
 0x491   : > { %8774 = vpow2.f32 %v1261_v31 }
 0x493   : > { %v1448_v61 = vpop.f32.mrf.mxu0  ;;  %v1255_v32 = vpop.xlane.xlu1 %1254 }
 0x494   : > { %v1449_v7 = vadd.f32 %v1448_v61, %v9624_v22  ;;  %v1258_v33 = vsub.f32 %v1245_v3, %v1255_v32 }
 0x496   : > { %v1457_v29 = vsel %vm843_vm2, %v1449_v7, -inf  ;;  %v1263_v34 = vmul.f32 1.442695, %v1258_v33 }
 0x497   : > { %1458 = vmax.xlane.f32.xlu2 %v1457_v29  ;;  %v9752_v35 = vpop.eup %8774 }
 0x498   : > { %8776 = vpow2.f32 %v1263_v34  ;;  %v1268_v22 = vsel %vm843_vm2, %v9752_v35, 0.0 }
 0x49e   : > { %v9756_v36 = vpop.eup %8776 }
 0x49f   : > { %v1271_v37 = vsel %vm843_vm2, %v9756_v36, 0.0 }
 0x4a3   : > { %1319 = vrot.lane.b32.xlu0 %v9619_v21, %s9067_s15 }
 0x4a9   : > { %8724 = vrot.lane.b32.xlu1 %v9629_v26, %s9067_s15 }
 0x4cd   : > { %1269 = vadd.xlane.f32.xlu0 %v1268_v22 }
 0x4d5   : > { %1272 = vadd.xlane.f32.xlu0 %v1271_v37 }
 0x4e9   : > { %1523 = vrot.lane.b32.xlu0 %v9619_v21, %s9068_s16 }
 0x4fa   : > { %v1453_v38 = vpop.xlane.xlu2 %1452 }
 0x4fb   : > { %v1460_v40 = vsub.f32 %v1443_v18, %v1453_v38 }
 0x4fd   : > { %v1463_v5 = vmul.f32 1.442695, %v1460_v40  ;;  %v687_v40 = vld [vmem:[%s13939_s3 + $0x68] sm:$0xff] }
 0x4fe   : > { %1387 = vmatpush.msrb.mxu3 %v687_v40  ;;  %v9069_v40 = vmov 32.0  }
 0x4ff   : > { %8778 = vpow2.f32 %v1463_v5 }
 0x502   : > { %v1456_v41 = vpop.xlane.xlu0 %1455 }
 0x503   : > { %v1461_v42 = vsub.f32 %v1446_v24, %v1456_v41  ;;  %v1267_v44 = vpop.xlane.xlu1 %1266 }
 0x504   : > { %8780 = vrcp.f32 %v1267_v44  ;;  %v1285_v58 = vand.u32 2147483648, %v1267_v44  ;;  %vm1279_vm15 = vweird.f32 %v1267_v44  ;;  %v1283_v50 = vand.u32 2147483647, %v1267_v44 }
 0x505   : > { %v9762_v45 = vpop.eup %8778  ;;  %v1465_v39 = vmul.f32 1.442695, %v1461_v42 }
 0x506   : > { %v1469_v47 = vsel %vm843_vm2, %v9762_v45, 0.0  ;;  %v1286_v1 = vor.u32 1.1754944e-38, %v1285_v58  ;;  %vm1284_vm4 = vcmp.eq.f32.partialorder %v1283_v50, 8.507059e+37 }
 0x507   : > { %8782 = vpow2.f32 %v1465_v39  ;;  %1470 = vadd.xlane.f32.xlu2 %v1469_v47 }
 0x50a   : > { %v8781_v48 = vpop.eup %8780  ;;  %v1459_v15 = vpop.xlane.xlu2 %1458 }
 0x50b   : > { %v1275_v52 = vmul.f32 %v8781_v48, %v1267_v44  ;;  %v1462_v21 = vsub.f32 %v1449_v7, %v1459_v15  ;;  %vm1280_vm14 = vweird.f32 %v8781_v48 }
 0x50c   : > { %vm1281_vm3 = vmor %vm1279_vm15, %vm1280_vm14 }
 0x50d   : > { %v9766_v53 = vpop.eup %8782  ;;  %v1467_v54 = vmul.f32 1.442695, %v1462_v21  ;;  %v1276_v57 = vsub.f32 1.0, %v1275_v52 }
 0x50e   : > { %v1472_v55 = vsel %vm843_vm2, %v9766_v53, 0.0 }
 0x50f   : > { %8784 = vpow2.f32 %v1467_v54  ;;  %1473 = vadd.xlane.f32.xlu2 %v1472_v55  ;;  %v1277_v59 = vmul.f32 %v8781_v48, %v1276_v57 }
 0x511   : > { %v1278_v60 = vadd.f32 %v8781_v48, %v1277_v59 }
 0x513   : > { %v1282_v62 = vsel %vm1281_vm3, %v8781_v48, %v1278_v60 }
 0x514   : > { %v1287_v3 = vsel %vm1284_vm4, %v1286_v1, %v1282_v62 }
 0x515   : > { %v9770_v46 = vpop.eup %8784  ;;  %v1320_v4 = vpop.permute.xlu0 %1319  ;;  %v1288_v51 = vmul.f32 %v9741_v25, %v1287_v3 }
 0x516   : > { %v1475_v49 = vsel %vm843_vm2, %v9770_v46, 0.0 }
 0x517   : > { %1476 = vadd.xlane.f32.xlu1 %v1475_v49 }
 0x51b   : > { %v8725_v63 = vpop.permute.xlu1 %8724 }
 0x51c   : > { %v8726_v2 = vunpack.i.l.bf16 %v8725_v63  ;;  %v8727_v56 = vunpack.i.h.bf16 %v8725_v63 }
 0x51e   : > { %1350 = vmatpush.msrb.mxu2 %v8726_v2 }
 0x520   : > { %1351 = vmatpush.msrb.mxu2 %v8727_v56 }
 0x522   : > { %1352 = vmatpush.msrb.mxu2 %v1320_v4 }
 0x523   : > { %7440 = vmatmul.msk.f32.vlgmr.msrb.gmra.mxu2 %vm843_vm2, %v1288_v51 }
 0x527   : > { %8729 = vrot.lane.b32.xlu2 %v9629_v26, %s9068_s16 }
 0x540   : > { %v1270_v6 = vpop.xlane.xlu0 %1269 }
 0x541   : > { %8786 = vrcp.f32 %v1270_v6  ;;  %v1300_v16 = vand.u32 2147483648, %v1270_v6  ;;  %v1298_v18 = vand.u32 2147483647, %v1270_v6  ;;  %vm1294_vm6 = vweird.f32 %v1270_v6 }
 0x543   : > { %v1301_v43 = vor.u32 1.1754944e-38, %v1300_v16  ;;  %vm1299_vm8 = vcmp.eq.f32.partialorder %v1298_v18, 8.507059e+37  ;;  %v692_v18 = vld [vmem:[%s13939_s3 + $0x90] sm:$0xff] }
 0x544   : > { %1591 = vmatpush.msra.mxu2 %v692_v18 }
 0x547   : > { %v8787_v8 = vpop.eup %8786 }
 0x548   : > { %v1290_v9 = vmul.f32 %v8787_v8, %v1270_v6  ;;  %v1273_v11 = vpop.xlane.xlu0 %1272  ;;  %vm1295_vm5 = vweird.f32 %v8787_v8 }
 0x549   : > { %8788 = vrcp.f32 %v1273_v11  ;;  %vm1296_vm7 = vmor %vm1294_vm6, %vm1295_vm5  ;;  %v1315_v28 = vand.u32 2147483648, %v1273_v11  ;;  %v1313_v7 = vand.u32 2147483647, %v1273_v11  ;;  %vm1309_vm10 = vweird.f32 %v1273_v11 }
 0x54a   : > { %v1291_v12 = vsub.f32 1.0, %v1290_v9 }
 0x54b   : > { %v1316_v13 = vor.u32 1.1754944e-38, %v1315_v28  ;;  %vm1314_vm12 = vcmp.eq.f32.partialorder %v1313_v7, 8.507059e+37  ;;  %v8888_v28 = vld [vmem:[%s13936_s0] sm:$0xff] }
 0x54c   : > { %v1292_v17 = vmul.f32 %v8787_v8, %v1291_v12 }
 0x54e   : > { %v1293_v19 = vadd.f32 %v8787_v8, %v1292_v17 }
 0x54f   : > { %v8789_v20 = vpop.eup %8788 }
 0x550   : > { %v1305_v23 = vmul.f32 %v8789_v20, %v1273_v11  ;;  %v1297_v24 = vsel %vm1296_vm7, %v8787_v8, %v1293_v19  ;;  %vm1310_vm9 = vweird.f32 %v8789_v20 }
 0x551   : > { %v1302_v26 = vsel %vm1299_vm8, %v1301_v43, %v1297_v24  ;;  %vm1311_vm11 = vmor %vm1309_vm10, %vm1310_vm9 }
 0x552   : > { %v1306_v25 = vsub.f32 1.0, %v1305_v23  ;;  %v1303_v27 = vmul.f32 %v9752_v35, %v1302_v26 }
 0x554   : > { %v1307_v61 = vmul.f32 %v8789_v20, %v1306_v25  ;;  %7441 = vmatmul.msk.f32.gmra.mxu2 %vm843_vm2, %v1303_v27 }
 0x556   : > { %v1308_v29 = vadd.f32 %v8789_v20, %v1307_v61 }
 0x558   : > { %v1312_v30 = vsel %vm1311_vm11, %v8789_v20, %v1308_v29 }
 0x559   : > { %v1317_v31 = vsel %vm1314_vm12, %v1316_v13, %v1312_v30 }
 0x55a   : > { %v1318_v32 = vmul.f32 %v9756_v36, %v1317_v31  ;;  %v8889_v31 = vld [vmem:[%s13936_s0 + $0x8] sm:$0xff] }
 0x55b   : > { %v1524_v58 = vpop.permute.xlu0 %1523 }
 0x55c   : > { %7442 = vmatmul.msk.f32.gmra.mxu2 %vm843_vm2, %v1318_v32 }
 0x57a   : > { %v1471_v33 = vpop.xlane.xlu2 %1470 }
 0x57b   : > { %8790 = vrcp.f32 %v1471_v33  ;;  %v1489_v41 = vand.u32 2147483648, %v1471_v33  ;;  %vm1483_vm14 = vweird.f32 %v1471_v33  ;;  %v1487_v36 = vand.u32 2147483647, %v1471_v33 }
 0x57d   : > { %v1490_v15 = vor.u32 1.1754944e-38, %v1489_v41  ;;  %vm1488_vm3 = vcmp.eq.f32.partialorder %v1487_v36, 8.507059e+37 }
 0x581   : > { %v8791_v34 = vpop.eup %8790 }
 0x582   : > { %v1479_v35 = vmul.f32 %v8791_v34, %v1471_v33  ;;  %v1474_v22 = vpop.xlane.xlu2 %1473  ;;  %vm1484_vm13 = vweird.f32 %v8791_v34 }
 0x583   : > { %8792 = vrcp.f32 %v1474_v22  ;;  %vm1485_vm15 = vmor %vm1483_vm14, %vm1484_vm13  ;;  %v1504_v59 = vand.u32 2147483648, %v1474_v22  ;;  %vm1498_vm5 = vweird.f32 %v1474_v22  ;;  %v1502_v62 = vand.u32 2147483647, %v1474_v22 }
 0x584   : > { %v1480_v37 = vsub.f32 1.0, %v1479_v35 }
 0x585   : > { %v1505_v2 = vor.u32 1.1754944e-38, %v1504_v59  ;;  %vm1503_vm7 = vcmp.eq.f32.partialorder %v1502_v62, 8.507059e+37 }
 0x586   : > { %v1481_v38 = vmul.f32 %v8791_v34, %v1480_v37  ;;  %v8890_v37 = vld [vmem:[%s13936_s0 + $0x10] sm:$0xff] }
 0x588   : > { %v1482_v5 = vadd.f32 %v8791_v34, %v1481_v38 }
 0x589   : > { %v8793_v42 = vpop.eup %8792 }
 0x58a   : > { %v1494_v44 = vmul.f32 %v8793_v42, %v1474_v22  ;;  %v1477_v39 = vpop.xlane.xlu1 %1476  ;;  %v8730_v47 = vpop.permute.xlu2 %8729  ;;  %v1486_v48 = vsel %vm1485_vm15, %v8791_v34, %v1482_v5  ;;  %vm1499_vm4 = vweird.f32 %v8793_v42 }
 0x58b   : > { %8794 = vrcp.f32 %v1477_v39  ;;  %v8731_v21 = vunpack.i.l.bf16 %v8730_v47  ;;  %v1491_v54 = vsel %vm1488_vm3, %v1490_v15, %v1486_v48  ;;  %v8732_v57 = vunpack.i.h.bf16 %v8730_v47  ;;  %vm1500_vm6 = vmor %vm1498_vm5, %vm1499_vm4 }
 0x58c   : > { %v1495_v52 = vsub.f32 1.0, %v1494_v44  ;;  %v1492_v50 = vmul.f32 %v9762_v45, %v1491_v54  ;;  %v1519_v51 = vand.u32 2147483648, %v1477_v39  ;;  %vm1513_vm9 = vweird.f32 %v1477_v39 }
 0x58d   : > { %1554 = vmatpush.msrb.mxu1 %v8731_v21  ;;  %v1517_v9 = vand.u32 2147483647, %v1477_v39  ;;  %8796 = vrcp.f32 %v9069_v40 }
 0x58e   : > { %v1496_v55 = vmul.f32 %v8793_v42, %v1495_v52  ;;  %v1520_v11 = vor.u32 1.1754944e-38, %v1519_v51 }
 0x58f   : > { %1555 = vmatpush.msrb.mxu1 %v8732_v57  ;;  %vm1518_vm11 = vcmp.eq.f32.partialorder %v1517_v9, 8.507059e+37 }
 0x590   : > { %v1497_v49 = vadd.f32 %v8793_v42, %v1496_v55 }
 0x591   : > { %v8795_v60 = vpop.eup %8794  ;;  %1556 = vmatpush.msrb.mxu1 %v1524_v58 }
 0x592   : > { %v1509_v63 = vmul.f32 %v8795_v60, %v1477_v39  ;;  %7452 = vmatmul.msk.f32.vlgmr.msrb.gmra.mxu1 %vm843_vm2, %v1492_v50  ;;  %v1501_v1 = vsel %vm1500_vm6, %v8793_v42, %v1497_v49  ;;  %vm1514_vm8 = vweird.f32 %v8795_v60 }
 0x593   : > { %v1506_v4 = vsel %vm1503_vm7, %v1505_v2, %v1501_v1  ;;  %vm1515_vm10 = vmor %vm1513_vm9, %vm1514_vm8  ;;  %v8797_v5 = vpop.eup %8796 }
 0x594   : > { %v1510_v3 = vsub.f32 1.0, %v1509_v63  ;;  %v1507_v8 = vmul.f32 %v9766_v53, %v1506_v4  ;;  %v1618_v41 = vmul.f32 32.0, %v8797_v5  ;;  %vm1622_vm12 = vweird.f32 %v8797_v5 }
 0x596   : > { %v1511_v56 = vmul.f32 %v8795_v60, %v1510_v3  ;;  %v1619_v42 = vsub.f32 1.0, %v1618_v41 }
 0x598   : > { %v1512_v6 = vadd.f32 %v8795_v60, %v1511_v56  ;;  %v1620_v36 = vmul.f32 %v8797_v5, %v1619_v42 }
 0x59a   : > { %7453 = vmatmul.msk.f32.gmra.mxu1 %vm843_vm2, %v1507_v8  ;;  %v1516_v45 = vsel %vm1515_vm10, %v8795_v60, %v1512_v6  ;;  %v1621_v44 = vadd.f32 %v8797_v5, %v1620_v36 }
 0x59b   : > { %v1521_v12 = vsel %vm1518_vm11, %v1520_v11, %v1516_v45 }
 0x59c   : > { %v1522_v16 = vmul.f32 %v9770_v46, %v1521_v12  ;;  %v9815_v39 = vsel %vm1622_vm12, %v8797_v5, %v1621_v44 }
 0x5a2   : > { %7454 = vmatmul.msk.f32.gmra.mxu1 %vm843_vm2, %v1522_v16 }
 0x5a6   : > { %v1354_v17 = vpop.f32.mrf.mxu2 }
 0x5a7   : > { %7443 = vmatmul.msk.f32.vlgmr.msrb.gmra.mxu3 %vm798_vm1, %v1354_v17 }
 0x5d7   : > { %v1357_v53 = vpop.f32.mrf.mxu2 }
 0x5d8   : > { %7444 = vmatmul.msk.f32.gmra.mxu3 %vm798_vm1, %v1357_v53 }
 0x5df   : > { %v1360_v19 = vpop.f32.mrf.mxu2 }
 0x5e0   : > { %7445 = vmatmul.msk.f32.gmra.mxu3 %vm798_vm1, %v1360_v19  ;;  %v9829_v19 = vld [vmem:[%s13941_s5 + $0x8] sm:$0x7f] }
 0x60f   : > { %v1558_v20 = vpop.f32.mrf.mxu1 }
 0x610   : > { %7455 = vmatmul.msk.f32.vlgmr.msra.gmra.mxu2 %vm798_vm1, %v1558_v20  ;;  %v9834_v20 = vld [vmem:[%s13941_s5] sm:$0xff] }
 0x617   : > { %v1561_v46 = vpop.f32.mrf.mxu1 }
 0x618   : > { %7456 = vmatmul.msk.f32.gmra.mxu2 %vm798_vm1, %v1561_v46  ;;  %v1681_v46 = vperm.slane %v9834_v20, 7 }
 0x61f   : > { %v1564_v43 = vpop.f32.mrf.mxu1 }
 0x620   : > { %7457 = vmatmul.msk.f32.gmra.mxu2 %vm798_vm1, %v1564_v43 }
 0x62a   : > { %v1389_v23 = vpop.f32.mrf.mxu3 }
 0x62b   : > { %v1398_v24 = vadd.f32 %v1389_v23, %v9732_v0 }
 0x65b   : > { %v1392_v27 = vpop.f32.mrf.mxu3 }
 0x65c   : > { %v1399_v29 = vadd.f32 %v1392_v27, %v9734_v10 }
 0x663   : > { %v1395_v32 = vpop.f32.mrf.mxu3 }
 0x664   : > { %v1400_v34 = vadd.f32 %v1395_v32, %v9736_v14 }
 0x693   : > { %v1593_v26 = vpop.f32.mrf.mxu2 }
 0x694   : > { %v1602_v25 = vadd.f32 %v1593_v26, %v1398_v24  ;;  %v1685_v26 = vperm.slane %v9829_v19, 0 }
 0x696   : > { %v1605_v61 = vadd.f32 %v8888_v28, %v1602_v25  ;;  %v1689_v28 = vperm.slane %v9834_v20, 4 }
 0x698   : > { %v1608_v7 = vsel %vm705_vm0, %v1605_v61, 0.0 }
 0x699   : > { %1609 = vadd.xlane.f32.xlu2 %v1608_v7 }
 0x69b   : > { %v1596_v13 = vpop.f32.mrf.mxu2 }
 0x69c   : > { %v1603_v30 = vadd.f32 %v1596_v13, %v1399_v29 }
 0x69e   : > { %v1606_v0 = vadd.f32 %v8889_v31, %v1603_v30 }
 0x6a0   : > { %v1611_v33 = vsel %vm705_vm0, %v1606_v0, 0.0 }
 0x6a1   : > { %1612 = vadd.xlane.f32.xlu0 %v1611_v33 }
 0x6a3   : > { %v1599_v35 = vpop.f32.mrf.mxu2 }
 0x6a4   : > { %v1604_v22 = vadd.f32 %v1599_v35, %v1400_v34 }
 0x6a6   : > { %v1607_v10 = vadd.f32 %v8890_v37, %v1604_v22 }
 0x6a8   : > { %v1614_v38 = vsel %vm705_vm0, %v1607_v10, 0.0 }
 0x6a9   : > { %1615 = vadd.xlane.f32.xlu1 %v1614_v38 }
 0x70c   : > { %v1610_v14 = vpop.xlane.xlu2 %1609 }
 0x70d   : > { %v1624_v47 = vmul.f32 %v9815_v39, %v1610_v14 }
 0x70f   : > { %v1627_v48 = vsub.f32 %v1605_v61, %v1624_v47 }
 0x711   : > { %v1630_v15 = vmul.f32 %v1627_v48, %v1627_v48 }
 0x713   : > { %v1633_v52 = vsel %vm705_vm0, %v1630_v15, 0.0 }
 0x714   : > { %v1613_v21 = vpop.xlane.xlu0 %1612  ;;  %1634 = vadd.xlane.f32.xlu1 %v1633_v52 }
 0x715   : > { %v1625_v54 = vmul.f32 %v9815_v39, %v1613_v21 }
 0x717   : > { %v1628_v55 = vsub.f32 %v1606_v0, %v1625_v54 }
 0x719   : > { %v1631_v57 = vmul.f32 %v1628_v55, %v1628_v55 }
 0x71b   : > { %v1636_v59 = vsel %vm705_vm0, %v1631_v57, 0.0 }
 0x71c   : > { %1637 = vadd.xlane.f32.xlu2 %v1636_v59  ;;  %v1616_v49 = vpop.xlane.xlu1 %1615 }
 0x71d   : > { %v1626_v60 = vmul.f32 %v9815_v39, %v1616_v49 }
 0x71f   : > { %v1629_v58 = vsub.f32 %v1607_v10, %v1626_v60 }
 0x721   : > { %v1632_v50 = vmul.f32 %v1629_v58, %v1629_v58 }
 0x723   : > { %v1639_v62 = vsel %vm705_vm0, %v1632_v50, 0.0 }
 0x724   : > { %1640 = vadd.xlane.f32.xlu0 %v1639_v62 }
 0x787   : > { %v1635_v63 = vpop.xlane.xlu1 %1634 }
 0x788   : > { %v1642_v1 = vmul.f32 %v1635_v63, %v9815_v39 }
 0x78a   : > { %v1645_v2 = vadd.f32 1e-05, %v1642_v1 }
 0x78c   : > { %8798 = vrsqrt.f32 %v1645_v2  ;;  %vm1654_vm14 = vweird.f32 %v1645_v2 }
 0x78f   : > { %v1638_v3 = vpop.xlane.xlu2 %1637 }
 0x790   : > { %v1643_v56 = vmul.f32 %v1638_v3, %v9815_v39  ;;  %v688_v3 = vld [vmem:[%s13939_s3 + $0x70] sm:$0xff] }
 0x792   : > { %v8799_v4 = vpop.eup %8798  ;;  %v1646_v51 = vadd.f32 1e-05, %v1643_v56  ;;  %v683_v56 = vld [vmem:[%s13939_s3 + $0x48] sm:$0xff] }
 0x793   : > { %v1649_v6 = vmul.f32 %v8799_v4, %v1645_v2  ;;  %vm1655_vm13 = vweird.f32 %v8799_v4  ;;  %v693_v2 = vld [vmem:[%s13939_s3 + $0x98] sm:$0xff] }
 0x794   : > { %8800 = vrsqrt.f32 %v1646_v51  ;;  %vm1656_vm15 = vmor %vm1654_vm14, %vm1655_vm13  ;;  %vm1664_vm4 = vweird.f32 %v1646_v51  ;;  %1789 = vmatpush.msra.mxu3 %v693_v2 }
 0x795   : > { %v1650_v8 = vmul.f32 %v8799_v4, %v1649_v6 }
 0x796   : > { %1790 = vmatpush.msra.mxu3 %v688_v3 }
 0x797   : > { %v1651_v9 = vmul.f32 0.5, %v1650_v8  ;;  %v1641_v45 = vpop.xlane.xlu0 %1640 }
 0x798   : > { %v1644_v11 = vmul.f32 %v1641_v45, %v9815_v39  ;;  %1791 = vmatpush.msra.mxu3 %v683_v56  ;;  %v1806_v56 = vperm.slane %v9834_v20, 6 }
 0x799   : > { %v1652_v12 = vsub.f32 1.5, %v1651_v9 }
 0x79a   : > { %v8801_v16 = vpop.eup %8800  ;;  %v1647_v17 = vadd.f32 1e-05, %v1644_v11 }
 0x79b   : > { %v1653_v18 = vmul.f32 %v8799_v4, %v1652_v12  ;;  %v1659_v53 = vmul.f32 %v8801_v16, %v1646_v51  ;;  %vm1665_vm3 = vweird.f32 %v8801_v16 }
 0x79c   : > { %8802 = vrsqrt.f32 %v1647_v17  ;;  %vm1666_vm5 = vmor %vm1664_vm4, %vm1665_vm3  ;;  %vm1674_vm7 = vweird.f32 %v1647_v17 }
 0x79d   : > { %v1657_v43 = vsel %vm1656_vm15, %v8799_v4, %v1653_v18  ;;  %v1660_v23 = vmul.f32 %v8801_v16, %v1659_v53  ;;  %v678_v4 = vld [vmem:[%s13939_s3 + $0x20] sm:$0xff]  ;;  %v700_v18 = vld [vmem:[%s13940_s4 + $0x30] sm:$0xff] }
 0x79e   : > { %v1678_v24 = vmul.f32 %v1657_v43, %v1627_v48  ;;  %1792 = vmatpush.msra.mxu3 %v678_v4 }
 0x79f   : > { %v1661_v25 = vmul.f32 0.5, %v1660_v23 }
 0x7a0   : > { %v1682_v27 = vmul.f32 %v1681_v46, %v1678_v24 }
 0x7a1   : > { %v1662_v61 = vsub.f32 1.5, %v1661_v25 }
 0x7a2   : > { %v8803_v7 = vpop.eup %8802  ;;  %v1686_v29 = vadd.f32 %v1685_v26, %v1682_v27 }
 0x7a3   : > { %v1663_v13 = vmul.f32 %v8801_v16, %v1662_v61  ;;  %v1669_v30 = vmul.f32 %v8803_v7, %v1647_v17  ;;  %vm1675_vm6 = vweird.f32 %v8803_v7  ;;  %v701_v17 = vld [vmem:[%s13940_s4 + $0x38] sm:$0xff] }
 0x7a4   : > { %v1690_v31 = vadd.f32 %v1689_v28, %v1686_v29  ;;  %vm1676_vm8 = vmor %vm1674_vm7, %vm1675_vm6  ;;  %1825 = vmatpush.msra.mxu0 %v701_v17  ;;  %v697_v61 = vld [vmem:[%s13940_s4 + $0x18] sm:$0xff] }
 0x7a5   : > { %v1667_v0 = vsel %vm1666_vm5, %v8801_v16, %v1663_v13  ;;  %v1670_v32 = vmul.f32 %v8803_v7, %v1669_v30  ;;  %v1759_v13 = vperm.slane %v9829_v19, 1  ;;  %vm1807_vm5 = vcmask 523264  }
 0x7a6   : > { %v1693_v33 = vsel %vm705_vm0, %v1690_v31, 0.0  ;;  %v1679_v34 = vmul.f32 %v1667_v0, %v1628_v55  ;;  %1826 = vmatpush.msra.mxu0 %v700_v18 }
 0x7a7   : > { %v1671_v35 = vmul.f32 0.5, %v1670_v32  ;;  %1694 = vadd.xlane.f32.xlu1 %v1693_v33  ;;  %v1763_v32 = vperm.slane %v9829_v19, 2 }
 0x7a8   : > { %v1683_v22 = vmul.f32 %v1681_v46, %v1679_v34 }
 0x7a9   : > { %v1672_v37 = vsub.f32 1.5, %v1671_v35 }
 0x7aa   : > { %v1687_v10 = vadd.f32 %v1685_v26, %v1683_v22 }
 0x7ab   : > { %v1673_v38 = vmul.f32 %v8803_v7, %v1672_v37 }
 0x7ac   : > { %v1691_v40 = vadd.f32 %v1689_v28, %v1687_v10 }
 0x7ad   : > { %v1677_v5 = vsel %vm1676_vm8, %v8803_v7, %v1673_v38 }
 0x7ae   : > { %v1696_v41 = vsel %vm705_vm0, %v1691_v40, 0.0  ;;  %v1680_v42 = vmul.f32 %v1677_v5, %v1629_v58 }
 0x7af   : > { %1697 = vadd.xlane.f32.xlu2 %v1696_v41 }
 0x7b0   : > { %v1684_v36 = vmul.f32 %v1681_v46, %v1680_v42  ;;  %v699_v46 = vld [vmem:[%s13940_s4 + $0x28] sm:$0xff] }
 0x7b1   : > { %1827 = vmatpush.msra.mxu0 %v699_v46 }
 0x7b2   : > { %v1688_v44 = vadd.f32 %v1685_v26, %v1684_v36  ;;  %v698_v26 = vld [vmem:[%s13940_s4 + $0x20] sm:$0xff] }
 0x7b3   : > { %1828 = vmatpush.msra.mxu0 %v698_v26 }
 0x7b4   : > { %v1692_v14 = vadd.f32 %v1689_v28, %v1688_v44 }
 0x7b5   : > { %1829 = vmatpush.msra.mxu0 %v697_v61 }
 0x7b6   : > { %v1699_v47 = vsel %vm705_vm0, %v1692_v14, 0.0 }
 0x7b7   : > { %1700 = vadd.xlane.f32.xlu0 %v1699_v47 }
 0x81a   : > { %v1695_v48 = vpop.xlane.xlu1 %1694 }
 0x81b   : > { %v1702_v15 = vmul.f32 %v1695_v48, %v9815_v39 }
 0x81d   : > { %v1705_v52 = vsub.f32 %v1690_v31, %v1702_v15 }
 0x81f   : > { %v1708_v21 = vmul.f32 %v1705_v52, %v1705_v52 }
 0x821   : > { %v1711_v54 = vsel %vm705_vm0, %v1708_v21, 0.0 }
 0x822   : > { %v1698_v55 = vpop.xlane.xlu2 %1697  ;;  %1712 = vadd.xlane.f32.xlu1 %v1711_v54  ;;  %v696_v54 = vld [vmem:[%s13940_s4 + $0x10] sm:$0xff] }
 0x823   : > { %v1703_v57 = vmul.f32 %v1698_v55, %v9815_v39  ;;  %1830 = vmatpush.msra.mxu0 %v696_v54  ;;  %v695_v55 = vld [vmem:[%s13940_s4 + $0x8] sm:$0xff] }
 0x825   : > { %v9845_v59 = vsub.f32 %v1691_v40, %v1703_v57  ;;  %1831 = vmatpush.msra.mxu0 %v695_v55  ;;  %v694_v57 = vld [vmem:[%s13940_s4] sm:$0xff] }
 0x827   : > { %v1709_v49 = vmul.f32 %v9845_v59, %v9845_v59  ;;  %1832 = vmatpush.msra.mxu0 %v694_v57 }
 0x829   : > { %v1714_v60 = vsel %vm705_vm0, %v1709_v49, 0.0 }
 0x82a   : > { %1715 = vadd.xlane.f32.xlu2 %v1714_v60  ;;  %v1701_v58 = vpop.xlane.xlu0 %1700 }
 0x82b   : > { %v1704_v50 = vmul.f32 %v1701_v58, %v9815_v39 }
 0x82d   : > { %v9851_v62 = vsub.f32 %v1692_v14, %v1704_v50 }
 0x82f   : > { %v1710_v63 = vmul.f32 %v9851_v62, %v9851_v62 }
 0x831   : > { %v1717_v1 = vsel %vm705_vm0, %v1710_v63, 0.0 }
 0x832   : > { %1718 = vadd.xlane.f32.xlu0 %v1717_v1 }
 0x895   : > { %v1713_v51 = vpop.xlane.xlu1 %1712 }
 0x896   : > { %v1720_v6 = vmul.f32 %v1713_v51, %v9815_v39 }
 0x898   : > { %v1723_v8 = vadd.f32 1e-05, %v1720_v6 }
 0x89a   : > { %8804 = vrsqrt.f32 %v1723_v8  ;;  %vm1732_vm10 = vweird.f32 %v1723_v8 }
 0x89d   : > { %v1716_v9 = vpop.xlane.xlu2 %1715 }
 0x89e   : > { %v1721_v45 = vmul.f32 %v1716_v9, %v9815_v39 }
 0x8a0   : > { %v8805_v11 = vpop.eup %8804  ;;  %v1724_v12 = vadd.f32 1e-05, %v1721_v45 }
 0x8a1   : > { %v1727_v16 = vmul.f32 %v8805_v11, %v1723_v8  ;;  %vm1733_vm9 = vweird.f32 %v8805_v11 }
 0x8a2   : > { %8806 = vrsqrt.f32 %v1724_v12  ;;  %vm1734_vm11 = vmor %vm1732_vm10, %vm1733_vm9  ;;  %vm1742_vm13 = vweird.f32 %v1724_v12 }
 0x8a3   : > { %v1728_v53 = vmul.f32 %v8805_v11, %v1727_v16 }
 0x8a5   : > { %v1729_v43 = vmul.f32 0.5, %v1728_v53  ;;  %v1719_v23 = vpop.xlane.xlu0 %1718 }
 0x8a6   : > { %v1722_v24 = vmul.f32 %v1719_v23, %v9815_v39 }
 0x8a7   : > { %v1730_v25 = vsub.f32 1.5, %v1729_v43 }
 0x8a8   : > { %v8807_v27 = vpop.eup %8806  ;;  %v1725_v28 = vadd.f32 1e-05, %v1722_v24 }
 0x8a9   : > { %v1731_v7 = vmul.f32 %v8805_v11, %v1730_v25  ;;  %v1737_v29 = vmul.f32 %v8807_v27, %v1724_v12  ;;  %vm1743_vm12 = vweird.f32 %v8807_v27 }
 0x8aa   : > { %8808 = vrsqrt.f32 %v1725_v28  ;;  %vm1744_vm14 = vmor %vm1742_vm13, %vm1743_vm12  ;;  %vm1752_vm3 = vweird.f32 %v1725_v28 }
 0x8ab   : > { %v1735_v30 = vsel %vm1734_vm11, %v8805_v11, %v1731_v7  ;;  %v1738_v31 = vmul.f32 %v8807_v27, %v1737_v29 }
 0x8ac   : > { %v1756_v0 = vmul.f32 %v1735_v30, %v1705_v52 }
 0x8ad   : > { %v1739_v33 = vmul.f32 0.5, %v1738_v31 }
 0x8ae   : > { %v1760_v34 = vmul.f32 %v1759_v13, %v1756_v0  ;;  %v7479_v0 = vld [vmem:[%s13939_s3 + $0x118] sm:$0xff] }
 0x8af   : > { %v1740_v35 = vsub.f32 1.5, %v1739_v33  ;;  %v7481_v33 = vld [vmem:[%s13939_s3 + $0x128] sm:$0xff]  ;;  %1975 = vmatpush.msra.mxu1 %v7479_v0 }
 0x8b0   : > { %v8809_v22 = vpop.eup %8808  ;;  %v1764_v37 = vadd.f32 %v1763_v32, %v1760_v34  ;;  %2032 = vmatpush.msrb.mxu3 %v7481_v33  ;;  %v7474_v34 = vld [vmem:[%s13939_s3 + $0xf0] sm:$0xff] }
 0x8b1   : > { %v1741_v10 = vmul.f32 %v8807_v27, %v1740_v35  ;;  %v1747_v38 = vmul.f32 %v8809_v22, %v1725_v28  ;;  %vm1753_vm15 = vweird.f32 %v8809_v22  ;;  %v7475_v35 = vld [vmem:[%s13939_s3 + $0xf8] sm:$0xff]  ;;  %1976 = vmatpush.msra.mxu1 %v7474_v34 }
 0x8b2   : > { %7458 = vmatmul.msk.f32.vlgmr.msra.gmra.mxu3 %vm705_vm0, %v1764_v37  ;;  %vm1754_vm4 = vmor %vm1752_vm3, %vm1753_vm15 }
 0x8b3   : > { %v1745_v40 = vsel %vm1744_vm14, %v8807_v27, %v1741_v10  ;;  %v1748_v5 = vmul.f32 %v8809_v22, %v1747_v38  ;;  %v7470_v10 = vld [vmem:[%s13939_s3 + $0xd0] sm:$0xff]  ;;  %v7471_v38 = vld [vmem:[%s13939_s3 + $0xd8] sm:$0xff] }
 0x8b4   : > { %v1757_v41 = vmul.f32 %v1745_v40, %v9845_v59  ;;  %v1767_v59 = vperm.slane %v9834_v20, 5  ;;  %v7464_v40 = vld [vmem:[%s13939_s3 + $0xa0] sm:$0xff] }
 0x8b5   : > { %v1749_v42 = vmul.f32 0.5, %v1748_v5  ;;  %v7465_v5 = vld [vmem:[%s13939_s3 + $0xa8] sm:$0xff] }
 0x8b6   : > { %v1761_v36 = vmul.f32 %v1759_v13, %v1757_v41  ;;  %v7466_v41 = vld [vmem:[%s13939_s3 + $0xb0] sm:$0xff] }
 0x8b7   : > { %v1750_v44 = vsub.f32 1.5, %v1749_v42 }
 0x8b8   : > { %v1765_v14 = vadd.f32 %v1763_v32, %v1761_v36 }
 0x8b9   : > { %v1751_v47 = vmul.f32 %v8809_v22, %v1750_v44 }
 0x8ba   : > { %7459 = vmatmul.msk.f32.gmra.mxu3 %vm705_vm0, %v1765_v14 }
 0x8bb   : > { %v1755_v48 = vsel %vm1754_vm4, %v8809_v22, %v1751_v47  ;;  %v7476_v22 = vld [vmem:[%s13939_s3 + $0x100] sm:$0xff] }
 0x8bc   : > { %v1758_v15 = vmul.f32 %v1755_v48, %v9851_v62  ;;  %2033 = vmatpush.msrb.mxu3 %v7476_v22 }
 0x8be   : > { %v1762_v52 = vmul.f32 %v1759_v13, %v1758_v15  ;;  %2034 = vmatpush.msrb.mxu3 %v7471_v38 }
 0x8c0   : > { %v1766_v21 = vadd.f32 %v1763_v32, %v1762_v52  ;;  %v7480_v32 = vld [vmem:[%s13939_s3 + $0x120] sm:$0xff]  ;;  %2035 = vmatpush.msrb.mxu3 %v7466_v41 }
 0x8c1   : > { %2005 = vmatpush.msrb.mxu2 %v7480_v32 }
 0x8c2   : > { %7460 = vmatmul.msk.f32.gmra.mxu3 %vm705_vm0, %v1766_v21 }
 0x8c3   : > { %2006 = vmatpush.msrb.mxu2 %v7475_v35 }
 0x8c5   : > { %2007 = vmatpush.msrb.mxu2 %v7470_v10 }
 0x8c7   : > { %2008 = vmatpush.msrb.mxu2 %v7465_v5 }
 0x935   : > { %v1794_v49 = vpop.f32.mrf.mxu3 }
 0x936   : > { %v1795_v60 = vadd.f32 %v1794_v49, %v1767_v59 }
 0x938   : > { %v1803_v58 = vmax.f32 %v1795_v60, 0.0 }
 0x93a   : > { %7461 = vmatmul.msk.f32.vlgmr.msra.gmra.mxu0 %vm1807_vm5, %v1803_v58 }
 0x93d   : > { %v1797_v50 = vpop.f32.mrf.mxu3 }
 0x93e   : > { %v1798_v62 = vadd.f32 %v1797_v50, %v1767_v59 }
 0x940   : > { %v1804_v63 = vmax.f32 %v1798_v62, 0.0  ;;  %v1912_v62 = vperm.slane %v9829_v19, 3 }
 0x942   : > { %7462 = vmatmul.msk.f32.gmra.mxu0 %vm1807_vm5, %v1804_v63 }
 0x945   : > { %v1800_v1 = vpop.f32.mrf.mxu3 }
 0x946   : > { %v1801_v2 = vadd.f32 %v1800_v1, %v1767_v59 }
 0x948   : > { %v1805_v3 = vmax.f32 %v1801_v2, 0.0 }
 0x94a   : > { %7463 = vmatmul.msk.f32.gmra.mxu0 %vm1807_vm5, %v1805_v3  ;;  %v1916_v3 = vperm.slane %v9829_v19, 4 }
 0x9b7   : > { %v1834_v4 = vpop.f32.mrf.mxu0 }
 0x9b8   : > { %v1835_v51 = vadd.f32 %v1834_v4, %v1806_v56 }
 0x9ba   : > { %v1843_v6 = vadd.f32 %v1835_v51, %v1764_v37  ;;  %v7469_v37 = vld [vmem:[%s13939_s3 + $0xc8] sm:$0xff] }
 0x9bb   : > { %1977 = vmatpush.msra.mxu1 %v7469_v37 }
 0x9bc   : > { %v1846_v8 = vsel %vm705_vm0, %v1843_v6, 0.0 }
 0x9bd   : > { %1847 = vadd.xlane.f32.xlu1 %v1846_v8  ;;  %1978 = vmatpush.msra.mxu1 %v7464_v40 }
 0x9bf   : > { %v1837_v9 = vpop.f32.mrf.mxu0 }
 0x9c0   : > { %v1838_v45 = vadd.f32 %v1837_v9, %v1806_v56 }
 0x9c2   : > { %v1844_v11 = vadd.f32 %v1838_v45, %v1765_v14 }
 0x9c4   : > { %v1849_v12 = vsel %vm705_vm0, %v1844_v11, 0.0 }
 0x9c5   : > { %1850 = vadd.xlane.f32.xlu2 %v1849_v12 }
 0x9c7   : > { %v1840_v16 = vpop.f32.mrf.mxu0 }
 0x9c8   : > { %v1841_v17 = vadd.f32 %v1840_v16, %v1806_v56 }
 0x9ca   : > { %v1845_v18 = vadd.f32 %v1841_v17, %v1766_v21 }
 0x9cc   : > { %v1852_v53 = vsel %vm705_vm0, %v1845_v18, 0.0 }
 0x9cd   : > { %1853 = vadd.xlane.f32.xlu0 %v1852_v53 }
 0xa30   : > { %v1848_v46 = vpop.xlane.xlu1 %1847 }
 0xa31   : > { %v1855_v20 = vmul.f32 %v1848_v46, %v9815_v39 }
 0xa33   : > { %v9911_v43 = vsub.f32 %v1843_v6, %v1855_v20 }
 0xa35   : > { %v1861_v23 = vmul.f32 %v9911_v43, %v9911_v43 }
 0xa37   : > { %v1864_v24 = vsel %vm705_vm0, %v1861_v23, 0.0 }
 0xa38   : > { %v1851_v26 = vpop.xlane.xlu2 %1850  ;;  %1865 = vadd.xlane.f32.xlu1 %v1864_v24 }
 0xa39   : > { %v1856_v25 = vmul.f32 %v1851_v26, %v9815_v39 }
 0xa3b   : > { %v9917_v27 = vsub.f32 %v1844_v11, %v1856_v25  ;;  %v9999_v25 = vld [vmem:[%s13941_s5 + $0x10] sm:$0xff] }
 0xa3c   : > { %v2019_v22 = vperm.slane %v9999_v25, 2 }
 0xa3d   : > { %v1862_v28 = vmul.f32 %v9917_v27, %v9917_v27 }
 0xa3f   : > { %v1867_v61 = vsel %vm705_vm0, %v1862_v28, 0.0 }
 0xa40   : > { %v1854_v7 = vpop.xlane.xlu0 %1853  ;;  %1868 = vadd.xlane.f32.xlu2 %v1867_v61 }
 0xa41   : > { %v1857_v29 = vmul.f32 %v1854_v7, %v9815_v39 }
 0xa43   : > { %v9923_v13 = vsub.f32 %v1845_v18, %v1857_v29 }
 0xa45   : > { %v1863_v30 = vmul.f32 %v9923_v13, %v9923_v13 }
 0xa47   : > { %v1870_v31 = vsel %vm705_vm0, %v1863_v30, 0.0 }
 0xa48   : > { %1871 = vadd.xlane.f32.xlu0 %v1870_v31 }
 0xaab   : > { %v1866_v42 = vpop.xlane.xlu1 %1865 }
 0xaac   : > { %v1873_v36 = vmul.f32 %v1866_v42, %v9815_v39 }
 0xaae   : > { %v1876_v44 = vadd.f32 1e-05, %v1873_v36 }
 0xab0   : > { %8810 = vrsqrt.f32 %v1876_v44  ;;  %vm1885_vm7 = vweird.f32 %v1876_v44 }
 0xab3   : > { %v1869_v14 = vpop.xlane.xlu2 %1868 }
 0xab4   : > { %v1874_v47 = vmul.f32 %v1869_v14, %v9815_v39 }
 0xab6   : > { %v8811_v48 = vpop.eup %8810  ;;  %v1877_v15 = vadd.f32 1e-05, %v1874_v47 }
 0xab7   : > { %v1880_v52 = vmul.f32 %v8811_v48, %v1876_v44  ;;  %vm1886_vm6 = vweird.f32 %v8811_v48 }
 0xab8   : > { %8812 = vrsqrt.f32 %v1877_v15  ;;  %vm1887_vm8 = vmor %vm1885_vm7, %vm1886_vm6  ;;  %vm1895_vm10 = vweird.f32 %v1877_v15 }
 0xab9   : > { %v1881_v21 = vmul.f32 %v8811_v48, %v1880_v52 }
 0xabb   : > { %v1882_v54 = vmul.f32 0.5, %v1881_v21  ;;  %v1872_v55 = vpop.xlane.xlu0 %1871 }
 0xabc   : > { %v1875_v57 = vmul.f32 %v1872_v55, %v9815_v39  ;;  %v10053_v55 = vld [vmem:[%s13937_s1] sm:$0xff] }
 0xabd   : > { %v1883_v59 = vsub.f32 1.5, %v1882_v54 }
 0xabe   : > { %v8813_v49 = vpop.eup %8812  ;;  %v1878_v60 = vadd.f32 1e-05, %v1875_v57 }
 0xabf   : > { %v1884_v58 = vmul.f32 %v8811_v48, %v1883_v59  ;;  %v1890_v50 = vmul.f32 %v8813_v49, %v1877_v15  ;;  %vm1896_vm9 = vweird.f32 %v8813_v49 }
 0xac0   : > { %8814 = vrsqrt.f32 %v1878_v60  ;;  %vm1897_vm11 = vmor %vm1895_vm10, %vm1896_vm9  ;;  %vm1905_vm13 = vweird.f32 %v1878_v60 }
 0xac1   : > { %v1888_v63 = vsel %vm1887_vm8, %v8811_v48, %v1884_v58  ;;  %v1891_v1 = vmul.f32 %v8813_v49, %v1890_v50  ;;  %v10061_v58 = vld [vmem:[%s13937_s1 + $0x8] sm:$0xff] }
 0xac2   : > { %v1909_v2 = vmul.f32 %v1888_v63, %v9911_v43 }
 0xac3   : > { %v1892_v56 = vmul.f32 0.5, %v1891_v1 }
 0xac4   : > { %v1913_v4 = vmul.f32 %v1912_v62, %v1909_v2 }
 0xac5   : > { %v1893_v51 = vsub.f32 1.5, %v1892_v56 }
 0xac6   : > { %v8815_v6 = vpop.eup %8814  ;;  %v9970_v8 = vadd.f32 %v1916_v3, %v1913_v4 }
 0xac7   : > { %v1894_v9 = vmul.f32 %v8813_v49, %v1893_v51  ;;  %v1900_v45 = vmul.f32 %v8815_v6, %v1878_v60  ;;  %vm1906_vm12 = vweird.f32 %v8815_v6 }
 0xac8   : > { %7494 = vmatmul.msk.f32.vlgmr.msra.gmra.mxu1 %vm705_vm0, %v9970_v8  ;;  %7497 = vmatmul.msk.f32.vlgmr.msrb.gmra.mxu2 %vm705_vm0, %v9970_v8  ;;  %vm1907_vm14 = vmor %vm1905_vm13, %vm1906_vm12 }
 0xac9   : > { %v1898_v11 = vsel %vm1897_vm11, %v8813_v49, %v1894_v9  ;;  %v1901_v12 = vmul.f32 %v8815_v6, %v1900_v45  ;;  %7500 = vmatmul.msk.f32.vlgmr.msrb.gmra.mxu3 %vm705_vm0, %v9970_v8 }
 0xaca   : > { %v1910_v19 = vmul.f32 %v1898_v11, %v9917_v27  ;;  %v1992_v27 = vperm.slane %v9999_v25, 1 }
 0xacb   : > { %v1902_v16 = vmul.f32 0.5, %v1901_v12 }
 0xacc   : > { %v1914_v17 = vmul.f32 %v1912_v62, %v1910_v19 }
 0xacd   : > { %v1903_v18 = vsub.f32 1.5, %v1902_v16 }
 0xace   : > { %v9979_v53 = vadd.f32 %v1916_v3, %v1914_v17 }
 0xacf   : > { %v1904_v46 = vmul.f32 %v8815_v6, %v1903_v18 }
 0xad0   : > { %7495 = vmatmul.msk.f32.gmra.mxu1 %vm705_vm0, %v9979_v53  ;;  %7498 = vmatmul.msk.f32.gmra.mxu2 %vm705_vm0, %v9979_v53 }
 0xad1   : > { %v1908_v20 = vsel %vm1907_vm14, %v8815_v6, %v1904_v46  ;;  %7501 = vmatmul.msk.f32.gmra.mxu3 %vm705_vm0, %v9979_v53  ;;  %v10070_v6 = vld [vmem:[%s13937_s1 + $0x10] sm:$0xff] }
 0xad2   : > { %v1911_v43 = vmul.f32 %v1908_v20, %v9923_v13  ;;  %v1953_v13 = vperm.slane %v9999_v25, 0 }
 0xad4   : > { %v1915_v23 = vmul.f32 %v1912_v62, %v1911_v43 }
 0xad6   : > { %v9988_v24 = vadd.f32 %v1916_v3, %v1915_v23 }
 0xad8   : > { %7496 = vmatmul.msk.f32.gmra.mxu1 %vm705_vm0, %v9988_v24  ;;  %7499 = vmatmul.msk.f32.gmra.mxu2 %vm705_vm0, %v9988_v24 }
 0xad9   : > { %7502 = vmatmul.msk.f32.gmra.mxu3 %vm705_vm0, %v9988_v24 }
 0xb45   : > { %v1980_v26 = vpop.f32.mrf.mxu1 }
 0xb46   : > { %v1981_v36 = vadd.f32 %v1980_v26, %v1953_v13 }
 0xb48   : > { %v10033_v14 = vmul.f32 0.35355338, %v1981_v36 }
 0xb4b   : > { %v2010_v28 = vpop.f32.mrf.mxu2 }
 0xb4c   : > { %v10002_v61 = vadd.f32 %v2010_v28, %v1992_v27  ;;  %v2037_v7 = vpop.f32.mrf.mxu3 }
 0xb4d   : > { %v1983_v29 = vpop.f32.mrf.mxu1  ;;  %v10028_v44 = vadd.f32 %v2037_v7, %v2019_v22 }
 0xb4e   : > { %2242 = vrot.lane.b32.xlu0 %v10002_v61, %s9066_s26  ;;  %v1984_v30 = vadd.f32 %v1983_v29, %v1953_v13  ;;  %v7472_v29 = vld [vmem:[%s13939_s3 + $0xe0] sm:$0xff] }
 0xb50   : > { %v10007_v0 = vmul.f32 0.35355338, %v1984_v30 }
 0xb53   : > { %v2013_v31 = vpop.f32.mrf.mxu2 }
 0xb54   : > { %v10009_v32 = vadd.f32 %v2013_v31, %v1992_v27  ;;  %v2040_v33 = vpop.f32.mrf.mxu3 }
 0xb55   : > { %v1986_v34 = vpop.f32.mrf.mxu1  ;;  %v2041_v40 = vadd.f32 %v2040_v33, %v2019_v22 }
 0xb56   : > { %2244 = vrot.lane.b32.xlu2 %v10009_v32, %s9066_s26  ;;  %2238 = vrot.lane.b32.xlu0 %v10007_v0, %s9066_s26  ;;  %v1987_v35 = vadd.f32 %v1986_v34, %v1953_v13 }
 0xb58   : > { %v10018_v5 = vmul.f32 0.35355338, %v1987_v35 }
 0xb5b   : > { %v2016_v37 = vpop.f32.mrf.mxu2 }
 0xb5c   : > { %v10016_v10 = vadd.f32 %v2016_v37, %v1992_v27  ;;  %v2043_v38 = vpop.f32.mrf.mxu3 }
 0xb5d   : > { %v2044_v41 = vadd.f32 %v2043_v38, %v2019_v22 }
 0xb5e   : > { %2246 = vrot.lane.b32.xlu1 %v10016_v10, %s9066_s26  ;;  %7503 = vmatpush.xpose.msk.msrb.mxu0 %vm798_vm1, %v10016_v10 }
 0xb5f   : > { %2184 = vmatpush.msrb.mxu1 %v2044_v41  ;;  %2240 = vrot.lane.b32.xlu2 %v10018_v5, %s9066_s26  ;;  %v10026_v42 = vpack.i.bf16 %v2041_v40, %v2044_v41 }
 0xb61   : > { %2185 = vmatpush.msrb.mxu1 %v2041_v40 }
 0xb62   : > { %7504 = vmatpush.xpose.msk.msrb.mxu0 %vm798_vm1, %v10009_v32 }
 0xb63   : > { %2186 = vmatpush.msrb.mxu1 %v10028_v44 }
 0xb65   : > { %2429 = vmatpush.msra.mxu1 %v7472_v29 }
 0xb66   : > { %7505 = vmatpush.xpose.msk.msrb.mxu0 %vm798_vm1, %v10002_v61  ;;  %2236 = vrot.lane.b32.xlu1 %v10033_v14, %s9066_s26 }
 0xb69   : > { %7506 = vmatmul.msk.f32.vlgmr.msrb.gmra.mxu0 %vm798_vm1, %v10033_v14 }
 0xb71   : > { %7507 = vmatmul.msk.f32.gmra.mxu0 %vm798_vm1, %v10007_v0 }
 0xb79   : > { %7508 = vmatmul.msk.f32.gmra.mxu0 %vm798_vm1, %v10018_v5 }
 0xbb0   : > { %v2245_v48 = vpop.permute.xlu2 %2244 }
 0xbb9   : > { %v2241_v49 = vpop.permute.xlu2 %2240 }
 0xbc0   : > { %v2243_v15 = vpop.permute.xlu0 %2242 }
 0xbc8   : > { %v2239_v21 = vpop.permute.xlu0 %2238 }
 0xbd0   : > { %v2247_v47 = vpop.permute.xlu1 %2246 }
 0xbd1   : > { %7515 = vmatpush.xpose.msk.msra.mxu3 %vm798_vm1, %v2247_v47 }
 0xbd5   : > { %7516 = vmatpush.xpose.msk.msra.mxu3 %vm798_vm1, %v2245_v48 }
 0xbd8   : > { %v2237_v52 = vpop.permute.xlu1 %2236 }
 0xbd9   : > { %7517 = vmatpush.xpose.msk.msra.mxu3 %vm798_vm1, %v2243_v15 }
 0xbdc   : > { %7518 = vmatmul.msk.f32.vlgmr.msra.gmra.mxu3 %vm798_vm1, %v2237_v52 }
 0xbe4   : > { %7519 = vmatmul.msk.f32.gmra.mxu3 %vm798_vm1, %v2239_v21 }
 0xbe6   : > { %v2081_v54 = vpop.f32.mrf.mxu0 }
 0xbe7   : > { %v2082_v57 = vadd.f32 %v10053_v55, %v2081_v54 }
 0xbe9   : > { %v2090_v59 = vsel %vm843_vm2, %v2082_v57, -inf }
 0xbea   : > { %2091 = vmax.xlane.f32.xlu1 %v2090_v59 }
 0xbec   : > { %7520 = vmatmul.msk.f32.gmra.mxu3 %vm798_vm1, %v2241_v49 }
 0xbee   : > { %v2084_v60 = vpop.f32.mrf.mxu0 }
 0xbef   : > { %v2085_v50 = vadd.f32 %v10061_v58, %v2084_v60 }
 0xbf1   : > { %v2093_v62 = vsel %vm843_vm2, %v2085_v50, -inf }
 0xbf2   : > { %2094 = vmax.xlane.f32.xlu2 %v2093_v62 }
 0xbf6   : > { %v2087_v4 = vpop.f32.mrf.mxu0 }
 0xbf7   : > { %v2088_v9 = vadd.f32 %v10070_v6, %v2087_v4 }
 0xbf9   : > { %v2096_v16 = vsel %vm843_vm2, %v2088_v9, -inf }
 0xc5d   : > { %v2092_v63 = vpop.xlane.xlu1 %2091 }
 0xc5e   : > { %v2099_v3 = vsub.f32 %v2082_v57, %v2092_v63 }
 0xc5f   : > { %v2277_v1 = vpop.f32.mrf.mxu3 }
 0xc60   : > { %v2278_v2 = vadd.f32 %v10053_v55, %v2277_v1  ;;  %v2102_v51 = vmul.f32 1.442695, %v2099_v3 }
 0xc62   : > { %v2286_v56 = vsel %vm843_vm2, %v2278_v2, -inf  ;;  %8816 = vpow2.f32 %v2102_v51 }
 0xc63   : > { %2287 = vmax.xlane.f32.xlu0 %v2286_v56 }
 0xc65   : > { %v2095_v45 = vpop.xlane.xlu2 %2094 }
 0xc66   : > { %v2100_v19 = vsub.f32 %v2085_v50, %v2095_v45 }
 0xc67   : > { %v2280_v11 = vpop.f32.mrf.mxu3 }
 0xc68   : > { %v2281_v12 = vadd.f32 %v10061_v58, %v2280_v11  ;;  %v2104_v18 = vmul.f32 1.442695, %v2100_v19  ;;  %v10076_v46 = vpop.eup %8816 }
 0xc69   : > { %v2108_v26 = vsel %vm843_vm2, %v10076_v46, 0.0 }
 0xc6a   : > { %v2289_v17 = vsel %vm843_vm2, %v2281_v12, -inf  ;;  %8818 = vpow2.f32 %v2104_v18 }
 0xc6b   : > { %2097 = vmax.xlane.f32.xlu0 %v2096_v16  ;;  %2290 = vmax.xlane.f32.xlu1 %v2289_v17 }
 0xc6f   : > { %v2283_v20 = vpop.f32.mrf.mxu3 }
 0xc70   : > { %v2284_v43 = vadd.f32 %v10070_v6, %v2283_v20  ;;  %v10082_v27 = vpop.eup %8818 }
 0xc71   : > { %v2111_v28 = vsel %vm843_vm2, %v10082_v27, 0.0 }
 0xc72   : > { %v2292_v23 = vsel %vm843_vm2, %v2284_v43, -inf }
 0xc73   : > { %2293 = vmax.xlane.f32.xlu2 %v2292_v23  ;;  %2109 = vadd.xlane.f32.xlu1 %v2108_v26 }
 0xc7b   : > { %2112 = vadd.xlane.f32.xlu2 %v2111_v28 }
 0xc93   : > { %8734 = vrot.lane.b32.xlu2 %v10026_v42, %s9066_s26 }
 0xc9b   : > { %2657 = vrot.lane.b32.xlu2 %v10016_v10, %s9068_s16 }
 0xca3   : > { %2655 = vrot.lane.b32.xlu2 %v10009_v32, %s9068_s16 }
 0xcab   : > { %2443 = vrot.lane.b32.xlu2 %v10033_v14, %s9067_s15 }
 0xcb3   : > { %2649 = vrot.lane.b32.xlu2 %v10007_v0, %s9068_s16 }
 0xcd6   : > { %v2288_v7 = vpop.xlane.xlu0 %2287 }
 0xcd7   : > { %v2295_v34 = vsub.f32 %v2278_v2, %v2288_v7 }
 0xcd9   : > { %v2298_v37 = vmul.f32 1.442695, %v2295_v34 }
 0xcde   : > { %v2098_v13 = vpop.xlane.xlu0 %2097  ;;  %v2291_v30 = vpop.xlane.xlu1 %2290 }
 0xcdf   : > { %v2101_v31 = vsub.f32 %v2088_v9, %v2098_v13  ;;  %v2296_v33 = vsub.f32 %v2281_v12, %v2291_v30 }
 0xce1   : > { %v2106_v35 = vmul.f32 1.442695, %v2101_v31  ;;  %v2300_v22 = vmul.f32 1.442695, %v2296_v33 }
 0xce3   : > { %8820 = vpow2.f32 %v2106_v35 }
 0xce4   : > { %8822 = vpow2.f32 %v2300_v22 }
 0xce6   : > { %v2294_v38 = vpop.xlane.xlu2 %2293  ;;  %v2110_v40 = vpop.xlane.xlu1 %2109 }
 0xce7   : > { %v2297_v41 = vsub.f32 %v2284_v43, %v2294_v38  ;;  %8824 = vrcp.f32 %v2110_v40  ;;  %v2128_v50 = vand.u32 2147483648, %v2110_v40  ;;  %v2126_v1 = vand.u32 2147483647, %v2110_v40 }
 0xce8   : > { %8826 = vpow2.f32 %v2298_v37  ;;  %vm2122_vm3 = vweird.f32 %v2110_v40 }
 0xce9   : > { %v10099_v36 = vpop.eup %8820  ;;  %v2302_v47 = vmul.f32 1.442695, %v2297_v41  ;;  %v2129_v4 = vor.u32 1.1754944e-38, %v2128_v50  ;;  %vm2127_vm6 = vcmp.eq.f32.partialorder %v2126_v1, 8.507059e+37 }
 0xcea   : > { %v10101_v48 = vpop.eup %8822  ;;  %v2114_v15 = vsel %vm843_vm2, %v10099_v36, 0.0 }
 0xceb   : > { %8828 = vpow2.f32 %v2302_v47  ;;  %2115 = vadd.xlane.f32.xlu0 %v2114_v15  ;;  %v2307_v52 = vsel %vm843_vm2, %v10101_v48, 0.0 }
 0xcec   : > { %2308 = vadd.xlane.f32.xlu1 %v2307_v52 }
 0xced   : > { %v8825_v21 = vpop.eup %8824 }
 0xcee   : > { %v10107_v54 = vpop.eup %8826  ;;  %v2118_v57 = vmul.f32 %v8825_v21, %v2110_v40  ;;  %v2113_v59 = vpop.xlane.xlu2 %2112  ;;  %vm2123_vm15 = vweird.f32 %v8825_v21 }
 0xcef   : > { %8830 = vrcp.f32 %v2113_v59  ;;  %v2304_v62 = vsel %vm843_vm2, %v10107_v54, 0.0  ;;  %vm2124_vm4 = vmor %vm2122_vm3, %vm2123_vm15  ;;  %v2143_v17 = vand.u32 2147483648, %v2113_v59  ;;  %v2141_v43 = vand.u32 2147483647, %v2113_v59 }
 0xcf0   : > { %v2119_v49 = vsub.f32 1.0, %v2118_v57  ;;  %vm2137_vm8 = vweird.f32 %v2113_v59 }
 0xcf1   : > { %v10109_v60 = vpop.eup %8828  ;;  %v2144_v26 = vor.u32 1.1754944e-38, %v2143_v17  ;;  %vm2142_vm10 = vcmp.eq.f32.partialorder %v2141_v43, 8.507059e+37 }
 0xcf2   : > { %v2120_v63 = vmul.f32 %v8825_v21, %v2119_v49  ;;  %v2310_v2 = vsel %vm843_vm2, %v10109_v60, 0.0 }
 0xcf3   : > { %2305 = vadd.xlane.f32.xlu0 %v2304_v62 }
 0xcf4   : > { %v2121_v3 = vadd.f32 %v8825_v21, %v2120_v63  ;;  %2311 = vadd.xlane.f32.xlu1 %v2310_v2 }
 0xcf5   : > { %v8831_v56 = vpop.eup %8830 }
 0xcf6   : > { %v2125_v51 = vsel %vm2124_vm4, %v8825_v21, %v2121_v3  ;;  %v2133_v9 = vmul.f32 %v8831_v56, %v2113_v59  ;;  %v8735_v45 = vpop.permute.xlu2 %8734  ;;  %vm2138_vm7 = vweird.f32 %v8831_v56 }
 0xcf7   : > { %v2130_v11 = vsel %vm2127_vm6, %v2129_v4, %v2125_v51  ;;  %v8736_v12 = vunpack.i.l.bf16 %v8735_v45  ;;  %v8737_v18 = vunpack.i.h.bf16 %v8735_v45  ;;  %vm2139_vm9 = vmor %vm2137_vm8, %vm2138_vm7 }
 0xcf8   : > { %v2134_v19 = vsub.f32 1.0, %v2133_v9  ;;  %v2131_v16 = vmul.f32 %v10076_v46, %v2130_v11 }
 0xcf9   : > { %2392 = vmatpush.msra.mxu0 %v8736_v12 }
 0xcfa   : > { %v2135_v20 = vmul.f32 %v8831_v56, %v2134_v19  ;;  %7509 = vmatmul.msk.f32.vlgmr.msrb.gmra.mxu1 %vm843_vm2, %v2131_v16 }
 0xcfb   : > { %2393 = vmatpush.msra.mxu0 %v8737_v18 }
 0xcfc   : > { %v2136_v23 = vadd.f32 %v8831_v56, %v2135_v20 }
 0xcfe   : > { %v2658_v28 = vpop.permute.xlu2 %2657  ;;  %v2140_v7 = vsel %vm2139_vm9, %v8831_v56, %v2136_v23 }
 0xcff   : > { %7539 = vmatpush.xpose.msk.msrb.mxu1 %vm798_vm1, %v2658_v28  ;;  %v2145_v29 = vsel %vm2142_vm10, %v2144_v26, %v2140_v7 }
 0xd00   : > { %v2146_v46 = vmul.f32 %v10082_v27, %v2145_v29 }
 0xd02   : > { %7510 = vmatmul.msk.f32.gmra.mxu1 %vm843_vm2, %v2146_v46 }
 0xd06   : > { %v2656_v13 = vpop.permute.xlu2 %2655 }
 0xd07   : > { %2361 = vrot.lane.b32.xlu0 %v10028_v44, %s9066_s26  ;;  %7540 = vmatpush.xpose.msk.msrb.mxu1 %vm798_vm1, %v2656_v13 }
 0xd0d   : > { %2453 = vrot.lane.b32.xlu1 %v10016_v10, %s9067_s15 }
 0xd0f   : > { %2451 = vrot.lane.b32.xlu0 %v10009_v32, %s9067_s15  ;;  %v7467_v32 = vld [vmem:[%s13939_s3 + $0xb8] sm:$0xff] }
 0xd10   : > { %2221 = vmatpush.msra.mxu2 %v7467_v32 }
 0xd15   : > { %2653 = vrot.lane.b32.xlu1 %v10002_v61, %s9068_s16 }
 0xd17   : > { %2449 = vrot.lane.b32.xlu0 %v10002_v61, %s9067_s15 }
 0xd1d   : > { %2445 = vrot.lane.b32.xlu1 %v10007_v0, %s9067_s15 }
 0xd1f   : > { %2647 = vrot.lane.b32.xlu0 %v10033_v14, %s9068_s16 }
 0xd25   : > { %2651 = vrot.lane.b32.xlu1 %v10018_v5, %s9068_s16 }
 0xd27   : > { %2447 = vrot.lane.b32.xlu0 %v10018_v5, %s9067_s15 }
 0xd5e   : > { %v2116_v10 = vpop.xlane.xlu0 %2115 }
 0xd5f   : > { %8832 = vrcp.f32 %v2116_v10  ;;  %v2309_v61 = vpop.xlane.xlu1 %2308  ;;  %v2158_v34 = vand.u32 2147483648, %v2116_v10  ;;  %v2156_v5 = vand.u32 2147483647, %v2116_v10  ;;  %vm2152_vm12 = vweird.f32 %v2116_v10 }
 0xd60   : > { %8834 = vrcp.f32 %v2309_v61  ;;  %vm2333_vm8 = vweird.f32 %v2309_v61  ;;  %v2337_v19 = vand.u32 2147483647, %v2309_v61 }
 0xd61   : > { %v2159_v40 = vor.u32 1.1754944e-38, %v2158_v34  ;;  %vm2157_vm14 = vcmp.eq.f32.partialorder %v2156_v5, 8.507059e+37 }
 0xd62   : > { %vm2338_vm10 = vcmp.eq.f32.partialorder %v2337_v19, 8.507059e+37 }
 0xd65   : > { %v8833_v27 = vpop.eup %8832 }
 0xd66   : > { %v2148_v0 = vmul.f32 %v8833_v27, %v2116_v10  ;;  %v2306_v30 = vpop.xlane.xlu0 %2305  ;;  %v8835_v31 = vpop.eup %8834  ;;  %vm2153_vm11 = vweird.f32 %v8833_v27 }
 0xd67   : > { %8836 = vrcp.f32 %v2306_v30  ;;  %v10142_v14 = vpop.xlane.xlu1 %2311  ;;  %v2329_v22 = vmul.f32 %v8835_v31, %v2309_v61  ;;  %vm2154_vm13 = vmor %vm2152_vm12, %vm2153_vm11  ;;  %v2324_v49 = vand.u32 2147483648, %v2306_v30  ;;  %v2322_v62 = vand.u32 2147483647, %v2306_v30 }
 0xd68   : > { %v2149_v33 = vsub.f32 1.0, %v2148_v0  ;;  %8838 = vrcp.f32 %v10142_v14  ;;  %vm2318_vm3 = vweird.f32 %v2306_v30  ;;  %vm2334_vm7 = vweird.f32 %v8835_v31  ;;  %v2444_v0 = vpop.permute.xlu2 %2443 }
 0xd69   : > { %v2330_v15 = vsub.f32 1.0, %v2329_v22  ;;  %v2325_v3 = vor.u32 1.1754944e-38, %v2324_v49  ;;  %vm2323_vm6 = vcmp.eq.f32.partialorder %v2322_v62, 8.507059e+37  ;;  %vm2335_vm9 = vmor %vm2333_vm8, %vm2334_vm7  ;;  %v2354_v28 = vand.u32 2147483648, %v10142_v14 }
 0xd6a   : > { %v2150_v35 = vmul.f32 %v8833_v27, %v2149_v33  ;;  %vm2348_vm12 = vweird.f32 %v10142_v14  ;;  %v2352_v29 = vand.u32 2147483647, %v10142_v14 }
 0xd6b   : > { %v2331_v63 = vmul.f32 %v8835_v31, %v2330_v15  ;;  %v2355_v13 = vor.u32 1.1754944e-38, %v2354_v28 }
 0xd6c   : > { %v2151_v37 = vadd.f32 %v8833_v27, %v2150_v35 }
 0xd6d   : > { %v8837_v38 = vpop.eup %8836  ;;  %v2332_v45 = vadd.f32 %v8835_v31, %v2331_v63 }
 0xd6e   : > { %v2314_v41 = vmul.f32 %v8837_v38, %v2306_v30  ;;  %v2155_v47 = vsel %vm2154_vm13, %v8833_v27, %v2151_v37  ;;  %v8839_v21 = vpop.eup %8838  ;;  %vm2319_vm15 = vweird.f32 %v8837_v38 }
 0xd6f   : > { %v2160_v52 = vsel %vm2157_vm14, %v2159_v40, %v2155_v47  ;;  %v2344_v1 = vmul.f32 %v8839_v21, %v10142_v14  ;;  %vm2320_vm4 = vmor %vm2318_vm3, %vm2319_vm15  ;;  %v2336_v17 = vsel %vm2335_vm9, %v8835_v31, %v2332_v45  ;;  %vm2349_vm11 = vweird.f32 %v8839_v21 }
 0xd70   : > { %v2315_v57 = vsub.f32 1.0, %v2314_v41  ;;  %v2161_v59 = vmul.f32 %v10099_v36, %v2160_v52  ;;  %v2339_v36 = vand.u32 2147483648, %v2309_v61  ;;  %vm2350_vm13 = vmor %vm2348_vm12, %vm2349_vm11  ;;  %vm2353_vm14 = vcmp.eq.f32.partialorder %v2352_v29, 8.507059e+37  ;;  %v2650_v35 = vpop.permute.xlu2 %2649 }
 0xd71   : > { %v2345_v51 = vsub.f32 1.0, %v2344_v1 }
 0xd72   : > { %v2316_v50 = vmul.f32 %v8837_v38, %v2315_v57  ;;  %7511 = vmatmul.msk.f32.gmra.mxu1 %vm843_vm2, %v2161_v59  ;;  %v2340_v18 = vor.u32 1.1754944e-38, %v2339_v36 }
 0xd73   : > { %v2346_v16 = vmul.f32 %v8839_v21, %v2345_v51 }
 0xd74   : > { %v2317_v2 = vadd.f32 %v8837_v38, %v2316_v50  ;;  %v2341_v20 = vsel %vm2338_vm10, %v2340_v18, %v2336_v17 }
 0xd75   : > { %v2347_v26 = vadd.f32 %v8839_v21, %v2346_v16  ;;  %v2342_v7 = vmul.f32 %v10101_v48, %v2341_v20 }
 0xd76   : > { %v2321_v56 = vsel %vm2320_vm4, %v8837_v38, %v2317_v2  ;;  %v10176_v38 = vperm.slane %v9999_v25, 3 }
 0xd77   : > { %v2326_v4 = vsel %vm2323_vm6, %v2325_v3, %v2321_v56  ;;  %v2188_v9 = vpop.f32.mrf.mxu1  ;;  %v2351_v46 = vsel %vm2350_vm13, %v8839_v21, %v2347_v26 }
 0xd78   : > { %7512 = vmatmul.msk.f32.vlgmr.msra.gmra.mxu2 %vm798_vm1, %v2188_v9  ;;  %v2327_v11 = vmul.f32 %v10107_v54, %v2326_v4  ;;  %v2356_v32 = vsel %vm2353_vm14, %v2355_v13, %v2351_v46 }
 0xd79   : > { %v2362_v12 = vpop.permute.xlu0 %2361  ;;  %v2357_v27 = vmul.f32 %v10109_v60, %v2356_v32 }
 0xd7a   : > { %2394 = vmatpush.msra.mxu0 %v2362_v12 }
 0xd7b   : > { %7521 = vmatmul.msk.f32.vlgmr.msra.gmra.mxu0 %vm843_vm2, %v2327_v11 }
 0xd7f   : > { %v2454_v43 = vpop.permute.xlu1 %2453  ;;  %v2191_v23 = vpop.f32.mrf.mxu1 }
 0xd80   : > { %7527 = vmatpush.xpose.msk.msrb.mxu2 %vm798_vm1, %v2454_v43 }
 0xd81   : > { %7513 = vmatmul.msk.f32.gmra.mxu2 %vm798_vm1, %v2191_v23  ;;  %v2452_v54 = vpop.permute.xlu0 %2451 }
 0xd83   : > { %7522 = vmatmul.msk.f32.gmra.mxu0 %vm843_vm2, %v2342_v7 }
 0xd84   : > { %7528 = vmatpush.xpose.msk.msrb.mxu2 %vm798_vm1, %v2452_v54 }
 0xd87   : > { %v2654_v10 = vpop.permute.xlu1 %2653 }
 0xd88   : > { %7541 = vmatpush.xpose.msk.msrb.mxu1 %vm798_vm1, %v2654_v10 }
 0xd89   : > { %v2450_v61 = vpop.permute.xlu0 %2449 }
 0xd8a   : > { %7529 = vmatpush.xpose.msk.msrb.mxu2 %vm798_vm1, %v2450_v61 }
 0xd8b   : > { %7523 = vmatmul.msk.f32.gmra.mxu0 %vm843_vm2, %v2357_v27 }
 0xd8f   : > { %v2446_v31 = vpop.permute.xlu1 %2445 }
 0xd91   : > { %v2648_v14 = vpop.permute.xlu0 %2647 }
 0xd97   : > { %v2652_v5 = vpop.permute.xlu1 %2651 }
 0xd99   : > { %v2448_v60 = vpop.permute.xlu0 %2447 }
 0xdef   : > { %v2194_v48 = vpop.f32.mrf.mxu1 }
 0xdf0   : > { %7514 = vmatmul.msk.f32.gmra.mxu2 %vm798_vm1, %v2194_v48 }
 0xdf8   : > { %v2396_v30 = vpop.f32.mrf.mxu0  ;;  %7530 = vmatmul.msk.f32.vlgmr.msrb.gmra.mxu2 %vm798_vm1, %v2444_v0 }
 0xdf9   : > { %7524 = vmatmul.msk.f32.vlgmr.msra.gmra.mxu1 %vm798_vm1, %v2396_v30 }
 0xdfb   : > { %v2223_v22 = vpop.f32.mrf.mxu2 }
 0xdfc   : > { %v2233_v41 = vadd.f32 %v10176_v38, %v2223_v22 }
 0xe00   : > { %v2399_v33 = vpop.f32.mrf.mxu0  ;;  %7531 = vmatmul.msk.f32.gmra.mxu2 %vm798_vm1, %v2446_v31 }
 0xe01   : > { %7525 = vmatmul.msk.f32.gmra.mxu1 %vm798_vm1, %v2399_v33 }
 0xe04   : > { %v10173_v37 = vpop.f32.mrf.mxu2 }
 0xe08   : > { %v2402_v34 = vpop.f32.mrf.mxu0  ;;  %7532 = vmatmul.msk.f32.gmra.mxu2 %vm798_vm1, %v2448_v60 }
 0xe09   : > { %7526 = vmatmul.msk.f32.gmra.mxu1 %vm798_vm1, %v2402_v34 }
 0xe11   : > { %7542 = vmatmul.msk.f32.vlgmr.msrb.gmra.mxu1 %vm798_vm1, %v2648_v14 }
 0xe19   : > { %7543 = vmatmul.msk.f32.gmra.mxu1 %vm798_vm1, %v2650_v35 }
 0xe21   : > { %7544 = vmatmul.msk.f32.gmra.mxu1 %vm798_vm1, %v2652_v5 }
 0xe73   : > { %v2229_v40 = vpop.f32.mrf.mxu2 }
 0xe74   : > { %v2235_v49 = vadd.f32 %v10176_v38, %v2229_v40 }
 0xe76   : > { %v2431_v47 = vpop.f32.mrf.mxu1 }
 0xe77   : > { %v10179_v15 = vadd.f32 %v2431_v47, %v2233_v41 }
 0xe7b   : > { %v2484_v52 = vpop.f32.mrf.mxu2 }
 0xe7c   : > { %v2485_v21 = vadd.f32 %v10053_v55, %v2484_v52 }
 0xe7e   : > { %v10182_v57 = vpop.f32.mrf.mxu1  ;;  %v2493_v59 = vsel %vm843_vm2, %v2485_v21, -inf }
 0xe7f   : > { %2494 = vmax.xlane.f32.xlu0 %v2493_v59 }
 0xe83   : > { %v2487_v1 = vpop.f32.mrf.mxu2 }
 0xe84   : > { %v2488_v3 = vadd.f32 %v10061_v58, %v2487_v1 }
 0xe86   : > { %v2437_v50 = vpop.f32.mrf.mxu1  ;;  %v2496_v9 = vsel %vm843_vm2, %v2488_v3, -inf }
 0xe87   : > { %v10186_v62 = vadd.f32 %v2437_v50, %v2235_v49 }
 0xe8b   : > { %v2490_v45 = vpop.f32.mrf.mxu2 }
 0xe8c   : > { %v2491_v36 = vadd.f32 %v10070_v6, %v2490_v45 }
 0xe8e   : > { %v2688_v25 = vpop.f32.mrf.mxu1 }
 0xe8f   : > { %v2689_v63 = vadd.f32 %v10053_v55, %v2688_v25  ;;  %v2499_v55 = vsel %vm843_vm2, %v2491_v36, -inf }
 0xe91   : > { %v2697_v2 = vsel %vm843_vm2, %v2689_v63, -inf }
 0xe92   : > { %2698 = vmax.xlane.f32.xlu2 %v2697_v2 }
 0xe96   : > { %v2691_v56 = vpop.f32.mrf.mxu1 }
 0xe97   : > { %v2692_v4 = vadd.f32 %v10061_v58, %v2691_v56 }
 0xe99   : > { %v2700_v51 = vsel %vm843_vm2, %v2692_v4, -inf }
 0xe9a   : > { %2701 = vmax.xlane.f32.xlu1 %v2700_v51  ;;  %2497 = vmax.xlane.f32.xlu2 %v2496_v9 }
 0xe9e   : > { %v2694_v17 = vpop.f32.mrf.mxu1 }
 0xe9f   : > { %v2695_v18 = vadd.f32 %v10070_v6, %v2694_v17 }
 0xea1   : > { %v2703_v43 = vsel %vm843_vm2, %v2695_v18, -inf }
 0xea2   : > { %2500 = vmax.xlane.f32.xlu2 %v2499_v55 }
 0xeb3   : > { %8744 = vrot.lane.b32.xlu1 %v10026_v42, %s9067_s15 }
 0xef2   : > { %v2495_v11 = vpop.xlane.xlu0 %2494 }
 0xef3   : > { %v2502_v12 = vsub.f32 %v2485_v21, %v2495_v11 }
 0xef5   : > { %v2505_v19 = vmul.f32 1.442695, %v2502_v12 }
 0xef7   : > { %8840 = vpow2.f32 %v2505_v19 }
 0xefd   : > { %v10198_v58 = vpop.eup %8840 }
 0xefe   : > { %v2511_v16 = vsel %vm843_vm2, %v10198_v58, 0.0 }
 0xeff   : > { %2512 = vadd.xlane.f32.xlu0 %v2511_v16 }
 0xf05   : > { %v2699_v20 = vpop.xlane.xlu2 %2698 }
 0xf06   : > { %v2706_v7 = vsub.f32 %v2689_v63, %v2699_v20 }
 0xf07   : > { %2704 = vmax.xlane.f32.xlu0 %v2703_v43 }
 0xf08   : > { %v2709_v13 = vmul.f32 1.442695, %v2706_v7 }
 0xf0d   : > { %v2498_v23 = vpop.xlane.xlu2 %2497  ;;  %v2702_v26 = vpop.xlane.xlu1 %2701 }
 0xf0e   : > { %v2503_v28 = vsub.f32 %v2488_v3, %v2498_v23  ;;  %v2707_v54 = vsub.f32 %v2692_v4, %v2702_v26 }
 0xf10   : > { %v2507_v29 = vmul.f32 1.442695, %v2503_v28  ;;  %v2711_v46 = vmul.f32 1.442695, %v2707_v54 }
 0xf12   : > { %8842 = vpow2.f32 %v2507_v29 }
 0xf13   : > { %8844 = vpow2.f32 %v2711_v46 }
 0xf14   : > { %8846 = vpow2.f32 %v2709_v13 }
 0xf15   : > { %v2501_v31 = vpop.xlane.xlu2 %2500 }
 0xf16   : > { %v2504_v33 = vsub.f32 %v2491_v36, %v2501_v31 }
 0xf18   : > { %v10204_v32 = vpop.eup %8842  ;;  %v2509_v60 = vmul.f32 1.442695, %v2504_v33 }
 0xf19   : > { %v10206_v10 = vpop.eup %8844  ;;  %v2514_v6 = vsel %vm843_vm2, %v10204_v32, 0.0 }
 0xf1a   : > { %2515 = vadd.xlane.f32.xlu1 %v2514_v6  ;;  %v2718_v61 = vsel %vm843_vm2, %v10206_v10, 0.0  ;;  %v10214_v27 = vpop.eup %8846  ;;  %8848 = vpow2.f32 %v2509_v60 }
 0xf1b   : > { %2719 = vadd.xlane.f32.xlu2 %v2718_v61  ;;  %8739 = vrot.lane.b32.xlu0 %v10026_v42, %s9068_s16  ;;  %v2715_v48 = vsel %vm843_vm2, %v10214_v27, 0.0 }
 0xf20   : > { %v10220_v34 = vpop.eup %8848 }
 0xf21   : > { %v2517_v42 = vsel %vm843_vm2, %v10220_v34, 0.0 }
 0xf22   : > { %2716 = vadd.xlane.f32.xlu1 %v2715_v48 }
 0xf25   : > { %v8745_v0 = vpop.permute.xlu1 %8744 }
 0xf26   : > { %v8746_v30 = vunpack.i.l.bf16 %v8745_v0  ;;  %v8747_v14 = vunpack.i.h.bf16 %v8745_v0 }
 0xf28   : > { %2596 = vmatpush.msrb.mxu3 %v8746_v30 }
 0xf2a   : > { %2597 = vmatpush.msrb.mxu3 %v8747_v14 }
 0xf3b   : > { %2565 = vrot.lane.b32.xlu1 %v10028_v44, %s9067_s15 }
 0xf45   : > { %2518 = vadd.xlane.f32.xlu0 %v2517_v42 }
 0xf72   : > { %v2513_v35 = vpop.xlane.xlu0 %2512 }
 0xf73   : > { %v2531_v51 = vand.u32 2147483648, %v2513_v35  ;;  %vm2525_vm3 = vweird.f32 %v2513_v35  ;;  %v2529_v9 = vand.u32 2147483647, %v2513_v35 }
 0xf75   : > { %v2532_v11 = vor.u32 1.1754944e-38, %v2531_v51  ;;  %vm2530_vm6 = vcmp.eq.f32.partialorder %v2529_v9, 8.507059e+37 }
 0xf7a   : > { %v2705_v5 = vpop.xlane.xlu0 %2704 }
 0xf7b   : > { %v2708_v22 = vsub.f32 %v2695_v18, %v2705_v5 }
 0xf7d   : > { %v2713_v40 = vmul.f32 1.442695, %v2708_v22 }
 0xf7f   : > { %8850 = vpow2.f32 %v2713_v40 }
 0xf80   : > { %8852 = vrcp.f32 %v2513_v35 }
 0xf85   : > { %v10224_v41 = vpop.eup %8850 }
 0xf86   : > { %v2721_v47 = vsel %vm843_vm2, %v10224_v41, 0.0  ;;  %v8853_v50 = vpop.eup %8852 }
 0xf87   : > { %2722 = vadd.xlane.f32.xlu2 %v2721_v47  ;;  %v2521_v25 = vmul.f32 %v8853_v50, %v2513_v35  ;;  %vm2526_vm15 = vweird.f32 %v8853_v50 }
 0xf88   : > { %vm2527_vm4 = vmor %vm2525_vm3, %vm2526_vm15 }
 0xf89   : > { %v2522_v63 = vsub.f32 1.0, %v2521_v25 }
 0xf8b   : > { %v2523_v2 = vmul.f32 %v8853_v50, %v2522_v63 }
 0xf8d   : > { %v8740_v52 = vpop.permute.xlu0 %8739  ;;  %v2516_v49 = vpop.xlane.xlu1 %2515  ;;  %v2524_v56 = vadd.f32 %v8853_v50, %v2523_v2 }
 0xf8e   : > { %v8741_v21 = vunpack.i.l.bf16 %v8740_v52  ;;  %v8742_v59 = vunpack.i.h.bf16 %v8740_v52  ;;  %8854 = vrcp.f32 %v2516_v49  ;;  %v2546_v16 = vand.u32 2147483648, %v2516_v49  ;;  %v2720_v30 = vpop.xlane.xlu2 %2719 }
 0xf8f   : > { %v2528_v36 = vsel %vm2527_vm4, %v8853_v50, %v2524_v56  ;;  %vm2540_vm8 = vweird.f32 %v2516_v49  ;;  %v2544_v18 = vand.u32 2147483647, %v2516_v49  ;;  %v2750_v63 = vand.u32 2147483648, %v2720_v30 }
 0xf90   : > { %2800 = vmatpush.msra.mxu2 %v8741_v21  ;;  %v2533_v12 = vsel %vm2530_vm6, %v2532_v11, %v2528_v36  ;;  %v2547_v43 = vor.u32 1.1754944e-38, %v2546_v16 }
 0xf91   : > { %vm2545_vm10 = vcmp.eq.f32.partialorder %v2544_v18, 8.507059e+37  ;;  %v2751_v9 = vor.u32 1.1754944e-38, %v2750_v63  ;;  %v7477_v18 = vld [vmem:[%s13939_s3 + $0x108] sm:$0xff] }
 0xf92   : > { %2801 = vmatpush.msra.mxu2 %v8742_v59  ;;  %2633 = vmatpush.msrb.mxu0 %v7477_v18 }
 0xf94   : > { %v8855_v1 = vpop.eup %8854 }
 0xf95   : > { %v2536_v3 = vmul.f32 %v8855_v1, %v2516_v49  ;;  %v2717_v45 = vpop.xlane.xlu1 %2716  ;;  %vm2541_vm7 = vweird.f32 %v8855_v1 }
 0xf96   : > { %vm2542_vm9 = vmor %vm2540_vm8, %vm2541_vm7  ;;  %v2735_v40 = vand.u32 2147483648, %v2717_v45  ;;  %vm2729_vm3 = vweird.f32 %v2717_v45  ;;  %v2733_v47 = vand.u32 2147483647, %v2717_v45  ;;  %vm2744_vm8 = vweird.f32 %v2720_v30 }
 0xf97   : > { %v2537_v4 = vsub.f32 1.0, %v2536_v3 }
 0xf98   : > { %v2736_v59 = vor.u32 1.1754944e-38, %v2735_v40  ;;  %vm2734_vm6 = vcmp.eq.f32.partialorder %v2733_v47, 8.507059e+37 }
 0xf99   : > { %v2538_v55 = vmul.f32 %v8855_v1, %v2537_v4 }
 0xf9b   : > { %v2539_v19 = vadd.f32 %v8855_v1, %v2538_v55 }
 0xf9d   : > { %v2543_v20 = vsel %vm2542_vm9, %v8855_v1, %v2539_v19  ;;  %v2748_v1 = vand.u32 2147483647, %v2720_v30 }
 0xf9e   : > { %v2548_v23 = vsel %vm2545_vm10, %v2547_v43, %v2543_v20 }
 0xf9f   : > { %2769 = vrot.lane.b32.xlu2 %v10028_v44, %s9068_s16  ;;  %v2534_v44 = vmul.f32 %v10198_v58, %v2533_v12  ;;  %v2549_v26 = vmul.f32 %v10204_v32, %v2548_v23  ;;  %vm2749_vm10 = vcmp.eq.f32.partialorder %v2748_v1, 8.507059e+37 }
 0xfad   : > { %v2566_v17 = vpop.permute.xlu1 %2565 }
 0xfae   : > { %2598 = vmatpush.msrb.mxu3 %v2566_v17 }
 0xfaf   : > { %7533 = vmatmul.msk.f32.vlgmr.msrb.gmra.mxu3 %vm843_vm2, %v2534_v44 }
 0xfb7   : > { %7534 = vmatmul.msk.f32.gmra.mxu3 %vm843_vm2, %v2549_v26 }
 0xfb8   : > { %v2519_v28 = vpop.xlane.xlu0 %2518 }
 0xfb9   : > { %8856 = vrcp.f32 %v2519_v28  ;;  %v2561_v46 = vand.u32 2147483648, %v2519_v28  ;;  %v2559_v13 = vand.u32 2147483647, %v2519_v28  ;;  %vm2555_vm12 = vweird.f32 %v2519_v28 }
 0xfba   : > { %8858 = vrcp.f32 %v2717_v45 }
 0xfbb   : > { %v2562_v61 = vor.u32 1.1754944e-38, %v2561_v46  ;;  %vm2560_vm14 = vcmp.eq.f32.partialorder %v2559_v13, 8.507059e+37  ;;  %8860 = vrcp.f32 %v2720_v30 }
 0xfbf   : > { %v8857_v54 = vpop.eup %8856 }
 0xfc0   : > { %v2551_v7 = vmul.f32 %v8857_v54, %v2519_v28  ;;  %vm2556_vm11 = vweird.f32 %v8857_v54  ;;  %v8859_v14 = vpop.eup %8858 }
 0xfc1   : > { %vm2557_vm13 = vmor %vm2555_vm12, %vm2556_vm11  ;;  %v2725_v31 = vmul.f32 %v8859_v14, %v2717_v45  ;;  %v8861_v60 = vpop.eup %8860  ;;  %vm2730_vm15 = vweird.f32 %v8859_v14 }
 0xfc2   : > { %v2552_v29 = vsub.f32 1.0, %v2551_v7  ;;  %v2740_v42 = vmul.f32 %v8861_v60, %v2720_v30  ;;  %vm2731_vm4 = vmor %vm2729_vm3, %vm2730_vm15  ;;  %vm2745_vm7 = vweird.f32 %v8861_v60 }
 0xfc3   : > { %v2726_v33 = vsub.f32 1.0, %v2725_v31  ;;  %vm2746_vm9 = vmor %vm2744_vm8, %vm2745_vm7 }
 0xfc4   : > { %v2553_v58 = vmul.f32 %v8857_v54, %v2552_v29  ;;  %v2741_v5 = vsub.f32 1.0, %v2740_v42 }
 0xfc5   : > { %v2727_v35 = vmul.f32 %v8859_v14, %v2726_v33 }
 0xfc6   : > { %v2554_v6 = vadd.f32 %v8857_v54, %v2553_v58  ;;  %v2234_v58 = vadd.f32 %v10176_v38, %v10173_v37 }
 0xfc7   : > { %v2728_v22 = vadd.f32 %v8859_v14, %v2727_v35 }
 0xfc8   : > { %v2558_v48 = vsel %vm2557_vm13, %v8857_v54, %v2554_v6 }
 0xfc9   : > { %v2563_v0 = vsel %vm2560_vm14, %v2562_v61, %v2558_v48  ;;  %v2732_v21 = vsel %vm2731_vm4, %v8859_v14, %v2728_v22  ;;  %v2441_v61 = vadd.f32 %v10182_v57, %v2234_v58 }
 0xfca   : > { %v2564_v32 = vmul.f32 %v10220_v34, %v2563_v0  ;;  %v2742_v34 = vmul.f32 %v8861_v60, %v2741_v5  ;;  %v2737_v49 = vsel %vm2734_vm6, %v2736_v59, %v2732_v21 }
 0xfcb   : > { %v2738_v56 = vmul.f32 %v10214_v27, %v2737_v49 }
 0xfcc   : > { %7535 = vmatmul.msk.f32.gmra.mxu3 %vm843_vm2, %v2564_v32  ;;  %v2743_v50 = vadd.f32 %v8861_v60, %v2742_v34 }
 0xfce   : > { %v2747_v51 = vsel %vm2746_vm9, %v8861_v60, %v2743_v50 }
 0xfcf   : > { %v2752_v36 = vsel %vm2749_vm10, %v2751_v9, %v2747_v51 }
 0xfd0   : > { %v2753_v19 = vmul.f32 %v10206_v10, %v2752_v36  ;;  %v7482_v10 = vld [vmem:[%s13939_s3 + $0x130] sm:$0xff] }
 0xfd1   : > { %2837 = vmatpush.msra.mxu3 %v7482_v10 }
 0xffa   : > { %v2723_v52 = vpop.xlane.xlu2 %2722 }
 0xffb   : > { %8862 = vrcp.f32 %v2723_v52  ;;  %v2765_v11 = vand.u32 2147483648, %v2723_v52  ;;  %vm2759_vm12 = vweird.f32 %v2723_v52  ;;  %v2763_v12 = vand.u32 2147483647, %v2723_v52 }
 0xffd   : > { %v2766_v16 = vor.u32 1.1754944e-38, %v2765_v11  ;;  %vm2764_vm14 = vcmp.eq.f32.partialorder %v2763_v12, 8.507059e+37 }
0x1001   : > { %v8863_v25 = vpop.eup %8862 }
0x1002   : > { %v2755_v2 = vmul.f32 %v8863_v25, %v2723_v52  ;;  %v2770_v3 = vpop.permute.xlu2 %2769  ;;  %vm2760_vm11 = vweird.f32 %v8863_v25 }
0x1003   : > { %2802 = vmatpush.msra.mxu2 %v2770_v3  ;;  %vm2761_vm13 = vmor %vm2759_vm12, %vm2760_vm11 }
0x1004   : > { %v2756_v4 = vsub.f32 1.0, %v2755_v2  ;;  %7545 = vmatmul.msk.f32.vlgmr.msra.gmra.mxu2 %vm843_vm2, %v2738_v56 }
0x1006   : > { %v2757_v45 = vmul.f32 %v8863_v25, %v2756_v4 }
0x1008   : > { %v2758_v55 = vadd.f32 %v8863_v25, %v2757_v45 }
0x100a   : > { %v2762_v27 = vsel %vm2761_vm13, %v8863_v25, %v2758_v55 }
0x100b   : > { %v2767_v17 = vsel %vm2764_vm14, %v2766_v16, %v2762_v27  ;;  %v10277_v16 = vld [vmem:[%s13941_s5 + $0x18] sm:$0x7f] }
0x100c   : > { %7546 = vmatmul.msk.f32.gmra.mxu2 %vm843_vm2, %v2753_v19  ;;  %v2768_v44 = vmul.f32 %v10224_v41, %v2767_v17  ;;  %v10282_v17 = vld [vmem:[%s13941_s5 + $0x10] sm:$0xff] }
0x1014   : > { %7547 = vmatmul.msk.f32.gmra.mxu2 %vm843_vm2, %v2768_v44  ;;  %v2920_v44 = vperm.slane %v10282_v17, 7 }
0x1032   : > { %v2600_v20 = vpop.f32.mrf.mxu3 }
0x1033   : > { %7536 = vmatmul.msk.f32.vlgmr.msrb.gmra.mxu0 %vm798_vm1, %v2600_v20 }
0x103a   : > { %v2603_v43 = vpop.f32.mrf.mxu3 }
0x103b   : > { %7537 = vmatmul.msk.f32.gmra.mxu0 %vm798_vm1, %v2603_v43  ;;  %v2924_v43 = vperm.slane %v10277_v16, 0 }
0x104f   : > { %v2606_v23 = vpop.f32.mrf.mxu3 }
0x1050   : > { %7538 = vmatmul.msk.f32.gmra.mxu0 %vm798_vm1, %v2606_v23 }
0x1087   : > { %v2804_v41 = vpop.f32.mrf.mxu2 }
0x1088   : > { %7548 = vmatmul.msk.f32.vlgmr.msra.gmra.mxu3 %vm798_vm1, %v2804_v41 }
0x108f   : > { %v2807_v26 = vpop.f32.mrf.mxu2 }
0x1090   : > { %7549 = vmatmul.msk.f32.gmra.mxu3 %vm798_vm1, %v2807_v26  ;;  %v2928_v26 = vperm.slane %v10282_v17, 4 }
0x1097   : > { %v2810_v28 = vpop.f32.mrf.mxu2 }
0x1098   : > { %7550 = vmatmul.msk.f32.gmra.mxu3 %vm798_vm1, %v2810_v28 }
0x10b0   : > { %v2635_v54 = vpop.f32.mrf.mxu0 }
0x10b1   : > { %v2644_v7 = vadd.f32 %v2635_v54, %v10179_v15 }
0x10b8   : > { %v2638_v6 = vpop.f32.mrf.mxu0 }
0x10b9   : > { %v2645_v0 = vadd.f32 %v2638_v6, %v2441_v61 }
0x10cd   : > { %v2641_v31 = vpop.f32.mrf.mxu0 }
0x10ce   : > { %v2646_v33 = vadd.f32 %v2641_v31, %v10186_v62 }
0x110b   : > { %v2839_v29 = vpop.f32.mrf.mxu3 }
0x110c   : > { %v2848_v46 = vadd.f32 %v2839_v29, %v2644_v7 }
0x110e   : > { %v2851_v13 = vadd.f32 %v2848_v46, %v9970_v8 }
0x1110   : > { %v2854_v48 = vsel %vm705_vm0, %v2851_v13, 0.0 }
0x1111   : > { %2855 = vadd.xlane.f32.xlu2 %v2854_v48 }
0x1113   : > { %v2842_v32 = vpop.f32.mrf.mxu3 }
0x1114   : > { %v2849_v30 = vadd.f32 %v2842_v32, %v2645_v0 }
0x1116   : > { %v2852_v14 = vadd.f32 %v2849_v30, %v9979_v53 }
0x1118   : > { %v2857_v15 = vsel %vm705_vm0, %v2852_v14, 0.0 }
0x1119   : > { %2858 = vadd.xlane.f32.xlu1 %v2857_v15 }
0x111b   : > { %v2845_v37 = vpop.f32.mrf.mxu3 }
0x111c   : > { %v2850_v38 = vadd.f32 %v2845_v37, %v2646_v33 }
0x111e   : > { %v2853_v8 = vadd.f32 %v2850_v38, %v9988_v24 }
0x1120   : > { %v2860_v57 = vsel %vm705_vm0, %v2853_v8, 0.0 }
0x1121   : > { %2861 = vadd.xlane.f32.xlu0 %v2860_v57 }
0x1184   : > { %v2856_v60 = vpop.xlane.xlu2 %2855 }
0x1185   : > { %v2863_v42 = vmul.f32 %v2856_v60, %v9815_v39 }
0x1187   : > { %v2866_v35 = vsub.f32 %v2851_v13, %v2863_v42 }
0x1189   : > { %v2869_v5 = vmul.f32 %v2866_v35, %v2866_v35 }
0x118b   : > { %v2872_v53 = vsel %vm705_vm0, %v2869_v5, 0.0 }
0x118c   : > { %v2859_v22 = vpop.xlane.xlu1 %2858  ;;  %2873 = vadd.xlane.f32.xlu0 %v2872_v53 }
0x118d   : > { %v2864_v40 = vmul.f32 %v2859_v22, %v9815_v39 }
0x118f   : > { %v2867_v47 = vsub.f32 %v2852_v14, %v2864_v40 }
0x1191   : > { %v2870_v62 = vmul.f32 %v2867_v47, %v2867_v47 }
0x1193   : > { %v2875_v52 = vsel %vm705_vm0, %v2870_v62, 0.0 }
0x1194   : > { %2876 = vadd.xlane.f32.xlu2 %v2875_v52  ;;  %v2862_v24 = vpop.xlane.xlu0 %2861 }
0x1195   : > { %v2865_v34 = vmul.f32 %v2862_v24, %v9815_v39 }
0x1197   : > { %v2868_v21 = vsub.f32 %v2853_v8, %v2865_v34 }
0x1199   : > { %v2871_v59 = vmul.f32 %v2868_v21, %v2868_v21 }
0x119b   : > { %v2878_v49 = vsel %vm705_vm0, %v2871_v59, 0.0 }
0x119c   : > { %2879 = vadd.xlane.f32.xlu0 %v2878_v49 }
0x11ff   : > { %v2874_v50 = vpop.xlane.xlu0 %2873 }
0x1200   : > { %v2881_v25 = vmul.f32 %v2874_v50, %v9815_v39 }
0x1202   : > { %v2884_v63 = vadd.f32 1e-05, %v2881_v25 }
0x1204   : > { %8864 = vrsqrt.f32 %v2884_v63  ;;  %vm2893_vm2 = vweird.f32 %v2884_v63 }
0x1207   : > { %v2877_v1 = vpop.xlane.xlu2 %2876 }
0x1208   : > { %v2882_v2 = vmul.f32 %v2877_v1, %v9815_v39  ;;  %v7478_v1 = vld [vmem:[%s13939_s3 + $0x110] sm:$0xff] }
0x120a   : > { %v8865_v3 = vpop.eup %8864  ;;  %v2885_v56 = vadd.f32 1e-05, %v2882_v2  ;;  %v7473_v2 = vld [vmem:[%s13939_s3 + $0xe8] sm:$0xff] }
0x120b   : > { %v2888_v4 = vmul.f32 %v8865_v3, %v2884_v63  ;;  %vm2894_vm1 = vweird.f32 %v8865_v3  ;;  %v7483_v63 = vld [vmem:[%s13939_s3 + $0x138] sm:$0xff] }
0x120c   : > { %8866 = vrsqrt.f32 %v2885_v56  ;;  %vm2895_vm15 = vmor %vm2893_vm2, %vm2894_vm1  ;;  %vm2903_vm4 = vweird.f32 %v2885_v56  ;;  %3028 = vmatpush.msra.mxu0 %v7483_v63 }
0x120d   : > { %v2889_v51 = vmul.f32 %v8865_v3, %v2888_v4 }
0x120e   : > { %3029 = vmatpush.msra.mxu0 %v7478_v1 }
0x120f   : > { %v2890_v9 = vmul.f32 0.5, %v2889_v51  ;;  %v2880_v45 = vpop.xlane.xlu0 %2879 }
0x1210   : > { %v2883_v36 = vmul.f32 %v2880_v45, %v9815_v39  ;;  %3030 = vmatpush.msra.mxu0 %v7473_v2  ;;  %v3045_v2 = vperm.slane %v10282_v17, 6 }
0x1211   : > { %v2891_v55 = vsub.f32 1.5, %v2890_v9 }
0x1212   : > { %v8867_v11 = vpop.eup %8866  ;;  %v2886_v12 = vadd.f32 1e-05, %v2883_v36 }
0x1213   : > { %v2892_v19 = vmul.f32 %v8865_v3, %v2891_v55  ;;  %v2898_v27 = vmul.f32 %v8867_v11, %v2885_v56  ;;  %vm2904_vm3 = vweird.f32 %v8867_v11 }
0x1214   : > { %8868 = vrsqrt.f32 %v2886_v12  ;;  %vm2905_vm6 = vmor %vm2903_vm4, %vm2904_vm3  ;;  %vm2913_vm8 = vweird.f32 %v2886_v12 }
0x1215   : > { %v2896_v18 = vsel %vm2895_vm15, %v8865_v3, %v2892_v19  ;;  %v2899_v10 = vmul.f32 %v8867_v11, %v2898_v27  ;;  %v7468_v3 = vld [vmem:[%s13939_s3 + $0xc0] sm:$0xff]  ;;  %v7490_v19 = vld [vmem:[%s13940_s4 + $0x70] sm:$0xff] }
0x1216   : > { %v2917_v20 = vmul.f32 %v2896_v18, %v2866_v35  ;;  %3031 = vmatpush.msra.mxu0 %v7468_v3 }
0x1217   : > { %v2900_v23 = vmul.f32 0.5, %v2899_v10 }
0x1218   : > { %v2921_v41 = vmul.f32 %v2920_v44, %v2917_v20 }
0x1219   : > { %v2901_v28 = vsub.f32 1.5, %v2900_v23 }
0x121a   : > { %v8869_v54 = vpop.eup %8868  ;;  %v2925_v7 = vadd.f32 %v2924_v43, %v2921_v41 }
0x121b   : > { %v2902_v29 = vmul.f32 %v8867_v11, %v2901_v28  ;;  %v2908_v46 = vmul.f32 %v8869_v54, %v2886_v12  ;;  %vm2914_vm7 = vweird.f32 %v8869_v54  ;;  %v7491_v12 = vld [vmem:[%s13940_s4 + $0x78] sm:$0xff] }
0x121c   : > { %v2929_v58 = vadd.f32 %v2928_v26, %v2925_v7  ;;  %vm2915_vm9 = vmor %vm2913_vm8, %vm2914_vm7  ;;  %3063 = vmatpush.msra.mxu1 %v7491_v12  ;;  %v7487_v28 = vld [vmem:[%s13940_s4 + $0x58] sm:$0xff] }
0x121d   : > { %v2906_v13 = vsel %vm2905_vm6, %v8867_v11, %v2902_v29  ;;  %v2909_v6 = vmul.f32 %v8869_v54, %v2908_v46  ;;  %v2998_v29 = vperm.slane %v10277_v16, 1 }
0x121e   : > { %v2932_v61 = vsel %vm705_vm0, %v2929_v58, 0.0  ;;  %v2918_v48 = vmul.f32 %v2906_v13, %v2867_v47  ;;  %3064 = vmatpush.msra.mxu1 %v7490_v19 }
0x121f   : > { %v2910_v0 = vmul.f32 0.5, %v2909_v6  ;;  %2933 = vadd.xlane.f32.xlu1 %v2932_v61  ;;  %v3002_v6 = vperm.slane %v10277_v16, 2 }
0x1220   : > { %v2922_v32 = vmul.f32 %v2920_v44, %v2918_v48 }
0x1221   : > { %v2911_v30 = vsub.f32 1.5, %v2910_v0 }
0x1222   : > { %v2926_v14 = vadd.f32 %v2924_v43, %v2922_v32 }
0x1223   : > { %v2912_v31 = vmul.f32 %v8869_v54, %v2911_v30 }
0x1224   : > { %v2930_v15 = vadd.f32 %v2928_v26, %v2926_v14 }
0x1225   : > { %v2916_v33 = vsel %vm2915_vm9, %v8869_v54, %v2912_v31 }
0x1226   : > { %v2935_v37 = vsel %vm705_vm0, %v2930_v15, 0.0  ;;  %v2919_v38 = vmul.f32 %v2916_v33, %v2868_v21 }
0x1227   : > { %2936 = vadd.xlane.f32.xlu2 %v2935_v37 }
0x1228   : > { %v2923_v8 = vmul.f32 %v2920_v44, %v2919_v38  ;;  %v7489_v44 = vld [vmem:[%s13940_s4 + $0x68] sm:$0xff] }
0x1229   : > { %3065 = vmatpush.msra.mxu1 %v7489_v44 }
0x122a   : > { %v2927_v57 = vadd.f32 %v2924_v43, %v2923_v8  ;;  %v7488_v43 = vld [vmem:[%s13940_s4 + $0x60] sm:$0xff] }
0x122b   : > { %3066 = vmatpush.msra.mxu1 %v7488_v43 }
0x122c   : > { %v2931_v60 = vadd.f32 %v2928_v26, %v2927_v57 }
0x122d   : > { %3067 = vmatpush.msra.mxu1 %v7487_v28 }
0x122e   : > { %v2938_v42 = vsel %vm705_vm0, %v2931_v60, 0.0 }
0x122f   : > { %2939 = vadd.xlane.f32.xlu0 %v2938_v42 }
0x1292   : > { %v2934_v35 = vpop.xlane.xlu1 %2933 }
0x1293   : > { %v2941_v5 = vmul.f32 %v2934_v35, %v9815_v39 }
0x1295   : > { %v2944_v53 = vsub.f32 %v2929_v58, %v2941_v5 }
0x1297   : > { %v2947_v22 = vmul.f32 %v2944_v53, %v2944_v53 }
0x1299   : > { %v2950_v40 = vsel %vm705_vm0, %v2947_v22, 0.0 }
0x129a   : > { %v2937_v47 = vpop.xlane.xlu2 %2936  ;;  %2951 = vadd.xlane.f32.xlu1 %v2950_v40  ;;  %v7486_v40 = vld [vmem:[%s13940_s4 + $0x50] sm:$0xff] }
0x129b   : > { %v2942_v62 = vmul.f32 %v2937_v47, %v9815_v39  ;;  %3068 = vmatpush.msra.mxu1 %v7486_v40  ;;  %v7485_v47 = vld [vmem:[%s13940_s4 + $0x48] sm:$0xff]  ;;  %v3154_v40 = vperm.slane %v10277_v16, 4 }
0x129d   : > { %v10293_v52 = vsub.f32 %v2930_v15, %v2942_v62  ;;  %v7484_v62 = vld [vmem:[%s13940_s4 + $0x40] sm:$0xff]  ;;  %3069 = vmatpush.msra.mxu1 %v7485_v47 }
0x129f   : > { %v2948_v24 = vmul.f32 %v10293_v52, %v10293_v52  ;;  %3070 = vmatpush.msra.mxu1 %v7484_v62 }
0x12a1   : > { %v2953_v34 = vsel %vm705_vm0, %v2948_v24, 0.0 }
0x12a2   : > { %2954 = vadd.xlane.f32.xlu2 %v2953_v34  ;;  %v2940_v21 = vpop.xlane.xlu0 %2939 }
0x12a3   : > { %v2943_v59 = vmul.f32 %v2940_v21, %v9815_v39 }
0x12a5   : > { %v10299_v49 = vsub.f32 %v2931_v60, %v2943_v59 }
0x12a7   : > { %v2949_v50 = vmul.f32 %v10299_v49, %v10299_v49 }
0x12a9   : > { %v2956_v25 = vsel %vm705_vm0, %v2949_v50, 0.0 }
0x12aa   : > { %2957 = vadd.xlane.f32.xlu0 %v2956_v25 }
0x130d   : > { %v2952_v56 = vpop.xlane.xlu1 %2951 }
0x130e   : > { %v2959_v4 = vmul.f32 %v2952_v56, %v9815_v39 }
0x1310   : > { %v2962_v51 = vadd.f32 1e-05, %v2959_v4 }
0x1312   : > { %8870 = vrsqrt.f32 %v2962_v51  ;;  %vm2971_vm11 = vweird.f32 %v2962_v51 }
0x1315   : > { %v2955_v9 = vpop.xlane.xlu2 %2954 }
0x1316   : > { %v2960_v45 = vmul.f32 %v2955_v9, %v9815_v39 }
0x1318   : > { %v8871_v36 = vpop.eup %8870  ;;  %v2963_v55 = vadd.f32 1e-05, %v2960_v45 }
0x1319   : > { %v2966_v11 = vmul.f32 %v8871_v36, %v2962_v51  ;;  %vm2972_vm10 = vweird.f32 %v8871_v36 }
0x131a   : > { %8872 = vrsqrt.f32 %v2963_v55  ;;  %vm2973_vm12 = vmor %vm2971_vm11, %vm2972_vm10  ;;  %vm2981_vm14 = vweird.f32 %v2963_v55 }
0x131b   : > { %v2967_v27 = vmul.f32 %v8871_v36, %v2966_v11 }
0x131d   : > { %v2968_v18 = vmul.f32 0.5, %v2967_v27  ;;  %v2958_v10 = vpop.xlane.xlu0 %2957 }
0x131e   : > { %v2961_v20 = vmul.f32 %v2958_v10, %v9815_v39 }
0x131f   : > { %v2969_v23 = vsub.f32 1.5, %v2968_v18 }
0x1320   : > { %v8873_v41 = vpop.eup %8872  ;;  %v2964_v26 = vadd.f32 1e-05, %v2961_v20 }
0x1321   : > { %v2970_v54 = vmul.f32 %v8871_v36, %v2969_v23  ;;  %v2976_v7 = vmul.f32 %v8873_v41, %v2963_v55  ;;  %vm2982_vm13 = vweird.f32 %v8873_v41 }
0x1322   : > { %8874 = vrsqrt.f32 %v2964_v26  ;;  %vm2983_vm1 = vmor %vm2981_vm14, %vm2982_vm13  ;;  %vm2991_vm15 = vweird.f32 %v2964_v26 }
0x1323   : > { %v2974_v46 = vsel %vm2973_vm12, %v8871_v36, %v2970_v54  ;;  %v2977_v58 = vmul.f32 %v8873_v41, %v2976_v7 }
0x1324   : > { %v2995_v13 = vmul.f32 %v2974_v46, %v2944_v53 }
0x1325   : > { %v2978_v61 = vmul.f32 0.5, %v2977_v58 }
0x1326   : > { %v2999_v48 = vmul.f32 %v2998_v29, %v2995_v13 }
0x1327   : > { %v2979_v0 = vsub.f32 1.5, %v2978_v61 }
0x1328   : > { %v8875_v32 = vpop.eup %8874  ;;  %v3003_v30 = vadd.f32 %v3002_v6, %v2999_v48 }
0x1329   : > { %v2980_v14 = vmul.f32 %v8873_v41, %v2979_v0  ;;  %v2986_v31 = vmul.f32 %v8875_v32, %v2964_v26  ;;  %vm2992_vm2 = vweird.f32 %v8875_v32 }
0x132a   : > { %7551 = vmatmul.msk.f32.vlgmr.msra.gmra.mxu0 %vm705_vm0, %v3003_v30  ;;  %vm2993_vm3 = vmor %vm2991_vm15, %vm2992_vm2  ;;  %vm3235_vm2 = vcmask 257024  }
0x132b   : > { %v2984_v15 = vsel %vm2983_vm1, %v8873_v41, %v2980_v14  ;;  %v2987_v33 = vmul.f32 %v8875_v32, %v2986_v31 }
0x132c   : > { %v2996_v37 = vmul.f32 %v2984_v15, %v10293_v52  ;;  %v3006_v52 = vperm.slane %v10282_v17, 5 }
0x132d   : > { %v2988_v38 = vmul.f32 0.5, %v2987_v33 }
0x132e   : > { %v3000_v8 = vmul.f32 %v2998_v29, %v2996_v37 }
0x132f   : > { %v2989_v57 = vsub.f32 1.5, %v2988_v38 }
0x1330   : > { %v3004_v60 = vadd.f32 %v3002_v6, %v3000_v8 }
0x1331   : > { %v2990_v42 = vmul.f32 %v8875_v32, %v2989_v57 }
0x1332   : > { %7552 = vmatmul.msk.f32.gmra.mxu0 %vm705_vm0, %v3004_v60 }
0x1333   : > { %v2994_v35 = vsel %vm2993_vm3, %v8875_v32, %v2990_v42 }
0x1334   : > { %v2997_v5 = vmul.f32 %v2994_v35, %v10299_v49  ;;  %v3150_v35 = vperm.slane %v10277_v16, 3 }
0x1336   : > { %v3001_v53 = vmul.f32 %v2998_v29, %v2997_v5 }
0x1338   : > { %v3005_v22 = vadd.f32 %v3002_v6, %v3001_v53 }
0x133a   : > { %7553 = vmatmul.msk.f32.gmra.mxu0 %vm705_vm0, %v3005_v22 }
0x13a7   : > { %v3033_v24 = vpop.f32.mrf.mxu0 }
0x13a8   : > { %v3034_v34 = vadd.f32 %v3033_v24, %v3006_v52 }
0x13aa   : > { %v3042_v21 = vmax.f32 %v3034_v34, 0.0 }
0x13ac   : > { %7554 = vmatmul.msk.f32.vlgmr.msra.gmra.mxu1 %vm1807_vm5, %v3042_v21 }
0x13af   : > { %v3036_v59 = vpop.f32.mrf.mxu0 }
0x13b0   : > { %v3037_v49 = vadd.f32 %v3036_v59, %v3006_v52 }
0x13b2   : > { %v3043_v50 = vmax.f32 %v3037_v49, 0.0 }
0x13b4   : > { %7555 = vmatmul.msk.f32.gmra.mxu1 %vm1807_vm5, %v3043_v50 }
0x13b7   : > { %v3039_v25 = vpop.f32.mrf.mxu0 }
0x13b8   : > { %v3040_v63 = vadd.f32 %v3039_v25, %v3006_v52 }
0x13ba   : > { %v3044_v1 = vmax.f32 %v3040_v63, 0.0 }
0x13bc   : > { %7556 = vmatmul.msk.f32.gmra.mxu1 %vm1807_vm5, %v3044_v1 }
0x1429   : > { %v3072_v3 = vpop.f32.mrf.mxu1 }
0x142a   : > { %v3073_v56 = vadd.f32 %v3072_v3, %v3045_v2 }
0x142c   : > { %v3081_v4 = vadd.f32 %v3073_v56, %v3003_v30 }
0x142e   : > { %v3084_v51 = vsel %vm705_vm0, %v3081_v4, 0.0 }
0x142f   : > { %3085 = vadd.xlane.f32.xlu1 %v3084_v51 }
0x1431   : > { %v3075_v9 = vpop.f32.mrf.mxu1 }
0x1432   : > { %v3076_v45 = vadd.f32 %v3075_v9, %v3045_v2 }
0x1434   : > { %v3082_v36 = vadd.f32 %v3076_v45, %v3004_v60 }
0x1436   : > { %v3087_v55 = vsel %vm705_vm0, %v3082_v36, 0.0 }
0x1437   : > { %3088 = vadd.xlane.f32.xlu2 %v3087_v55 }
0x1439   : > { %v3078_v11 = vpop.f32.mrf.mxu1 }
0x143a   : > { %v3079_v12 = vadd.f32 %v3078_v11, %v3045_v2 }
0x143c   : > { %v3083_v19 = vadd.f32 %v3079_v12, %v3005_v22 }
0x143e   : > { %v3090_v27 = vsel %vm705_vm0, %v3083_v19, 0.0 }
0x143f   : > { %3091 = vadd.xlane.f32.xlu0 %v3090_v27 }
0x14a2   : > { %v3086_v44 = vpop.xlane.xlu1 %3085 }
0x14a3   : > { %v3093_v17 = vmul.f32 %v3086_v44, %v9815_v39 }
0x14a5   : > { %v3096_v18 = vsub.f32 %v3081_v4, %v3093_v17 }
0x14a7   : > { %v3099_v10 = vmul.f32 %v3096_v18, %v3096_v18 }
0x14a9   : > { %v3102_v20 = vsel %vm705_vm0, %v3099_v10, 0.0 }
0x14aa   : > { %v3089_v43 = vpop.xlane.xlu2 %3088  ;;  %3103 = vadd.xlane.f32.xlu1 %v3102_v20 }
0x14ab   : > { %v3094_v23 = vmul.f32 %v3089_v43, %v9815_v39 }
0x14ad   : > { %v3097_v41 = vsub.f32 %v3082_v36, %v3094_v23 }
0x14af   : > { %v3100_v26 = vmul.f32 %v3097_v41, %v3097_v41 }
0x14b1   : > { %v3105_v28 = vsel %vm705_vm0, %v3100_v26, 0.0 }
0x14b2   : > { %3106 = vadd.xlane.f32.xlu2 %v3105_v28  ;;  %v3092_v54 = vpop.xlane.xlu0 %3091 }
0x14b3   : > { %v3095_v7 = vmul.f32 %v3092_v54, %v9815_v39 }
0x14b5   : > { %v3098_v29 = vsub.f32 %v3083_v19, %v3095_v7 }
0x14b7   : > { %v3101_v46 = vmul.f32 %v3098_v29, %v3098_v29 }
0x14b9   : > { %v3108_v58 = vsel %vm705_vm0, %v3101_v46, 0.0 }
0x14ba   : > { %3109 = vadd.xlane.f32.xlu0 %v3108_v58 }
0x151d   : > { %v3104_v13 = vpop.xlane.xlu1 %3103 }
0x151e   : > { %v3111_v6 = vmul.f32 %v3104_v13, %v9815_v39 }
0x1520   : > { %v3114_v61 = vadd.f32 1e-05, %v3111_v6 }
0x1522   : > { %8876 = vrsqrt.f32 %v3114_v61  ;;  %vm3123_vm4 = vweird.f32 %v3114_v61 }
0x1525   : > { %v3107_v48 = vpop.xlane.xlu2 %3106 }
0x1526   : > { %v3112_v0 = vmul.f32 %v3107_v48, %v9815_v39 }
0x1528   : > { %v8877_v32 = vpop.eup %8876  ;;  %v3115_v30 = vadd.f32 1e-05, %v3112_v0 }
0x1529   : > { %v3118_v14 = vmul.f32 %v8877_v32, %v3114_v61  ;;  %vm3124_vm5 = vweird.f32 %v8877_v32 }
0x152a   : > { %8878 = vrsqrt.f32 %v3115_v30  ;;  %vm3125_vm6 = vmor %vm3123_vm4, %vm3124_vm5  ;;  %vm3133_vm8 = vweird.f32 %v3115_v30 }
0x152b   : > { %v3119_v31 = vmul.f32 %v8877_v32, %v3118_v14 }
0x152d   : > { %v3120_v15 = vmul.f32 0.5, %v3119_v31  ;;  %v3110_v33 = vpop.xlane.xlu0 %3109 }
0x152e   : > { %v3113_v37 = vmul.f32 %v3110_v33, %v9815_v39 }
0x152f   : > { %v3121_v38 = vsub.f32 1.5, %v3120_v15 }
0x1530   : > { %v8879_v8 = vpop.eup %8878  ;;  %v3116_v57 = vadd.f32 1e-05, %v3113_v37 }
0x1531   : > { %v3122_v60 = vmul.f32 %v8877_v32, %v3121_v38  ;;  %v3128_v42 = vmul.f32 %v8879_v8, %v3115_v30  ;;  %vm3134_vm7 = vweird.f32 %v8879_v8 }
0x1532   : > { %8880 = vrsqrt.f32 %v3116_v57  ;;  %vm3135_vm9 = vmor %vm3133_vm8, %vm3134_vm7  ;;  %vm3143_vm11 = vweird.f32 %v3116_v57 }
0x1533   : > { %v3129_v5 = vmul.f32 %v8879_v8, %v3128_v42  ;;  %v3126_v53 = vsel %vm3125_vm6, %v8877_v32, %v3122_v60 }
0x1534   : > { %v3147_v22 = vmul.f32 %v3126_v53, %v3096_v18 }
0x1535   : > { %v3130_v47 = vmul.f32 0.5, %v3129_v5 }
0x1536   : > { %v3151_v62 = vmul.f32 %v3150_v35, %v3147_v22 }
0x1537   : > { %v3131_v52 = vsub.f32 1.5, %v3130_v47 }
0x1538   : > { %v8881_v24 = vpop.eup %8880  ;;  %v3155_v34 = vadd.f32 %v3154_v40, %v3151_v62 }
0x1539   : > { %v3132_v21 = vmul.f32 %v8879_v8, %v3131_v52  ;;  %v3138_v59 = vmul.f32 %v8881_v24, %v3116_v57  ;;  %vm3144_vm10 = vweird.f32 %v8881_v24 }
0x153a   : > { %v3158_v49 = vsel %vm705_vm0, %v3155_v34, 0.0  ;;  %vm3145_vm12 = vmor %vm3143_vm11, %vm3144_vm10 }
0x153b   : > { %v3139_v50 = vmul.f32 %v8881_v24, %v3138_v59  ;;  %3159 = vadd.xlane.f32.xlu1 %v3158_v49  ;;  %v3136_v25 = vsel %vm3135_vm9, %v8879_v8, %v3132_v21  ;;  %v8896_v8 = vld [vmem:[%s13941_s5 + $0x8] sm:$0x7f] }
0x153c   : > { %v3148_v63 = vmul.f32 %v3136_v25, %v3097_v41  ;;  %v3224_v57 = vperm.slane %v8896_v8, 5 }
0x153d   : > { %v3140_v1 = vmul.f32 0.5, %v3139_v50 }
0x153e   : > { %v3152_v2 = vmul.f32 %v3150_v35, %v3148_v63 }
0x153f   : > { %v3141_v3 = vsub.f32 1.5, %v3140_v1 }
0x1540   : > { %v3156_v16 = vadd.f32 %v3154_v40, %v3152_v2 }
0x1541   : > { %v3142_v56 = vmul.f32 %v8881_v24, %v3141_v3 }
0x1542   : > { %v3161_v4 = vsel %vm705_vm0, %v3156_v16, 0.0 }
0x1543   : > { %3162 = vadd.xlane.f32.xlu2 %v3161_v4  ;;  %v3146_v51 = vsel %vm3145_vm12, %v8881_v24, %v3142_v56 }
0x1544   : > { %v3149_v9 = vmul.f32 %v3146_v51, %v3098_v29 }
0x1546   : > { %v3153_v45 = vmul.f32 %v3150_v35, %v3149_v9  ;;  %v3228_v35 = vperm.slane %v8896_v8, 6 }
0x1548   : > { %v3157_v36 = vadd.f32 %v3154_v40, %v3153_v45 }
0x154a   : > { %v3164_v55 = vsel %vm705_vm0, %v3157_v36, 0.0 }
0x154b   : > { %3165 = vadd.xlane.f32.xlu0 %v3164_v55 }
0x15ae   : > { %v3160_v11 = vpop.xlane.xlu1 %3159 }
0x15af   : > { %v3167_v12 = vmul.f32 %v3160_v11, %v9815_v39 }
0x15b1   : > { %v3170_v19 = vsub.f32 %v3155_v34, %v3167_v12 }
0x15b3   : > { %v3173_v27 = vmul.f32 %v3170_v19, %v3170_v19 }
0x15b5   : > { %v3176_v44 = vsel %vm705_vm0, %v3173_v27, 0.0 }
0x15b6   : > { %v3163_v17 = vpop.xlane.xlu2 %3162  ;;  %3177 = vadd.xlane.f32.xlu1 %v3176_v44 }
0x15b7   : > { %v3168_v18 = vmul.f32 %v3163_v17, %v9815_v39 }
0x15b9   : > { %v3171_v10 = vsub.f32 %v3156_v16, %v3168_v18 }
0x15bb   : > { %v3174_v20 = vmul.f32 %v3171_v10, %v3171_v10 }
0x15bd   : > { %v3179_v43 = vsel %vm705_vm0, %v3174_v20, 0.0 }
0x15be   : > { %3180 = vadd.xlane.f32.xlu2 %v3179_v43  ;;  %v3166_v23 = vpop.xlane.xlu0 %3165 }
0x15bf   : > { %v3169_v41 = vmul.f32 %v3166_v23, %v9815_v39 }
0x15c1   : > { %v3172_v26 = vsub.f32 %v3157_v36, %v3169_v41 }
0x15c3   : > { %v3175_v28 = vmul.f32 %v3172_v26, %v3172_v26 }
0x15c5   : > { %v3182_v54 = vsel %vm705_vm0, %v3175_v28, 0.0 }
0x15c6   : > { %3183 = vadd.xlane.f32.xlu0 %v3182_v54 }
0x1629   : > { %v3178_v7 = vpop.xlane.xlu1 %3177 }
0x162a   : > { %v3185_v29 = vmul.f32 %v3178_v7, %v9815_v39 }
0x162c   : > { %v3188_v46 = vadd.f32 1e-05, %v3185_v29 }
0x162e   : > { %8882 = vrsqrt.f32 %v3188_v46  ;;  %vm3197_vm13 = vweird.f32 %v3188_v46 }
0x1631   : > { %v3181_v58 = vpop.xlane.xlu2 %3180 }
0x1632   : > { %v3186_v13 = vmul.f32 %v3181_v58, %v9815_v39 }
0x1634   : > { %v8883_v6 = vpop.eup %8882  ;;  %v3189_v61 = vadd.f32 1e-05, %v3186_v13 }
0x1635   : > { %v3192_v48 = vmul.f32 %v8883_v6, %v3188_v46  ;;  %vm3198_vm0 = vweird.f32 %v8883_v6 }
0x1636   : > { %8884 = vrsqrt.f32 %v3189_v61  ;;  %vm3199_vm14 = vmor %vm3197_vm13, %vm3198_vm0  ;;  %vm3207_vm15 = vweird.f32 %v3189_v61 }
0x1637   : > { %v3193_v0 = vmul.f32 %v8883_v6, %v3192_v48 }
0x1639   : > { %v3194_v32 = vmul.f32 0.5, %v3193_v0  ;;  %v3184_v30 = vpop.xlane.xlu0 %3183 }
0x163a   : > { %v3187_v14 = vmul.f32 %v3184_v30, %v9815_v39 }
0x163b   : > { %v3195_v31 = vsub.f32 1.5, %v3194_v32 }
0x163c   : > { %v8885_v15 = vpop.eup %8884  ;;  %v3190_v33 = vadd.f32 1e-05, %v3187_v14 }
0x163d   : > { %v3196_v37 = vmul.f32 %v8883_v6, %v3195_v31  ;;  %v3202_v38 = vmul.f32 %v8885_v15, %v3189_v61  ;;  %vm3208_vm1 = vweird.f32 %v8885_v15 }
0x163e   : > { %8886 = vrsqrt.f32 %v3190_v33  ;;  %vm3209_vm3 = vmor %vm3207_vm15, %vm3208_vm1  ;;  %vm3217_vm4 = vweird.f32 %v3190_v33 }
0x163f   : > { %v3200_v60 = vsel %vm3199_vm14, %v8883_v6, %v3196_v37  ;;  %v3203_v42 = vmul.f32 %v8885_v15, %v3202_v38 }
0x1640   : > { %v3221_v5 = vmul.f32 %v3200_v60, %v3170_v19 }
0x1641   : > { %v3204_v53 = vmul.f32 0.5, %v3203_v42 }
0x1642   : > { %v3225_v39 = vmul.f32 %v3224_v57, %v3221_v5 }
0x1643   : > { %v3205_v22 = vsub.f32 1.5, %v3204_v53 }
0x1644   : > { %v8887_v40 = vpop.eup %8886  ;;  %v3229_v47 = vadd.f32 %v3228_v35, %v3225_v39 }
0x1645   : > { %v3206_v62 = vmul.f32 %v8885_v15, %v3205_v22  ;;  %v3212_v52 = vmul.f32 %v8887_v40, %v3190_v33  ;;  %vm3218_vm5 = vweird.f32 %v8887_v40 }
0x1646   : > { %v3232_v24 = vpack.c.bf16 %v3229_v47, %v3229_v47  ;;  %vm3219_vm6 = vmor %vm3217_vm4, %vm3218_vm5 }
0x1647   : > { %v3210_v34 = vsel %vm3209_vm3, %v8885_v15, %v3206_v62  ;;  %v3213_v21 = vmul.f32 %v8887_v40, %v3212_v52 }
0x1648   : > { %3236 = vst.msk [vmem:[#allocation2] sm:$0xf] %vm3235_vm2, %v3232_v24  ;;  %v3222_v59 = vmul.f32 %v3210_v34, %v3171_v10 }
0x1649   : > { %v3214_v49 = vmul.f32 0.5, %v3213_v21 }
0x164a   : > { %v3226_v50 = vmul.f32 %v3224_v57, %v3222_v59 }
0x164b   : > { %v3215_v25 = vsub.f32 1.5, %v3214_v49 }
0x164c   : > { %v3230_v63 = vadd.f32 %v3228_v35, %v3226_v50 }
0x164d   : > { %v3216_v1 = vmul.f32 %v8887_v40, %v3215_v25 }
0x164e   : > { %v3233_v2 = vpack.c.bf16 %v3230_v63, %v3230_v63 }
0x164f   : > { %v3220_v3 = vsel %vm3219_vm6, %v8887_v40, %v3216_v1 }
0x1650   : > { %3237 = vst.msk [vmem:[#allocation2 + $0x4] sm:$0xf] %vm3235_vm2, %v3233_v2  ;;  %v3223_v16 = vmul.f32 %v3220_v3, %v3172_v26 }
0x1652   : > { %v3227_v56 = vmul.f32 %v3224_v57, %v3223_v16 }
0x1654   : > { %v3231_v4 = vadd.f32 %v3228_v35, %v3227_v56 }
0x1656   : > { %v3234_v51 = vpack.c.bf16 %v3231_v4, %v3231_v4 }
0x1658   : > { %3238 = vst.msk [vmem:[#allocation2 + $0x8] sm:$0xf] %vm3235_vm2, %v3234_v51 }
0x1659 PF: > { %v7883_v9 = vld [vmem:[%s9496_s14 + $0x280] sm:$0xf]  ;;  %v8465_v36 = vld [vmem:[%s9496_s14 + $0x284] sm:$0xf]  ;;  %v7891_v12 = vld [vmem:[%s9496_s14 + $0x288] sm:$0xf] }
0x165a   : > { %v8505_v45 = vld [vmem:[%s9496_s14 + $0x3bc] sm:$0xf0]  ;;  %v7885_v11 = vld [vmem:[%s9496_s14 + $0x3c0] sm:$0xf0]  ;;  %v8506_v19 = vld [vmem:[%s9496_s14 + $0x3c4] sm:$0xf0] }
0x165b   : > { %v7884_v55 = vor.u32 %v8505_v45, %v7883_v9  ;;  %v7888_v27 = vor.u32 %v8465_v36, %v7885_v11  ;;  %v7892_v44 = vor.u32 %v8506_v19, %v7891_v12  ;;  %v8466_v17 = vld [vmem:[%s9496_s14 + $0x28c] sm:$0xf]  ;;  %v7563_v10 = vld [vmem:[%s9496_s14] sm:$0xf]  ;;  %v8385_v23 = vld [vmem:[%s9496_s14 + $0x4] sm:$0xf] }
0x165c   : > { %v7893_v18 = vld [vmem:[%s9496_s14 + $0x3c8] sm:$0xf0]  ;;  %v8425_v43 = vld [vmem:[%s9496_s14 + $0x13c] sm:$0xf0]  ;;  %v7565_v41 = vld [vmem:[%s9496_s14 + $0x140] sm:$0xf0] }
0x165d   : > { %4513 = vmatpush.bf16.msra.mxu0 %v7884_v55  ;;  %v7896_v20 = vor.u32 %v8466_v17, %v7893_v18  ;;  %4531 = vmatpush.bf16.msra.mxu1 %v7888_v27  ;;  %v7564_v26 = vor.u32 %v8425_v43, %v7563_v10  ;;  %v7568_v28 = vor.u32 %v8385_v23, %v7565_v41  ;;  %v7571_v54 = vld [vmem:[%s9496_s14 + $0x8] sm:$0xf]  ;;  %v8386_v29 = vld [vmem:[%s9496_s14 + $0xc] sm:$0xf]  ;;  %v10403_v13 = vld [vmem:[#allocation2] sm:$0xff]  ;;  %vm4500_vm7 = vcmask 261120  }
0x165e   : > { %4549 = vmatpush.bf16.msra.mxu2 %v7892_v44  ;;  %v8426_v7 = vld [vmem:[%s9496_s14 + $0x144] sm:$0xf0]  ;;  %v7573_v58 = vld [vmem:[%s9496_s14 + $0x148] sm:$0xf0]  ;;  %v7907_v6 = vld [vmem:[%s9496_s14 + $0x298] sm:$0xf] }
0x165f   : > { %4567 = vmatpush.bf16.msra.mxu3 %v7896_v20  ;;  %v7572_v46 = vor.u32 %v8426_v7, %v7571_v54  ;;  %v7576_v61 = vor.u32 %v8386_v29, %v7573_v58  ;;  %v8508_v48 = vld [vmem:[%s9496_s14 + $0x3d4] sm:$0xf0]  ;;  %v8468_v0 = vld [vmem:[%s9496_s14 + $0x29c] sm:$0xf]  ;;  %v7899_v31 = vld [vmem:[%s9496_s14 + $0x290] sm:$0xf] }
0x1660   : > { %v7909_v32 = vld [vmem:[%s9496_s14 + $0x3d8] sm:$0xf0]  ;;  %v7908_v30 = vor.u32 %v8508_v48, %v7907_v6  ;;  %v8507_v15 = vld [vmem:[%s9496_s14 + $0x3cc] sm:$0xf0]  ;;  %v8467_v33 = vld [vmem:[%s9496_s14 + $0x294] sm:$0xf] }
0x1661   : > { %4514 = vmatpush.bf16.msra.mxu0 %v7564_v26  ;;  %v7912_v14 = vor.u32 %v8468_v0, %v7909_v32  ;;  %4532 = vmatpush.bf16.msra.mxu1 %v7568_v28  ;;  %v7900_v37 = vor.u32 %v8507_v15, %v7899_v31  ;;  %v7901_v38 = vld [vmem:[%s9496_s14 + $0x3d0] sm:$0xf0]  ;;  %v7587_v60 = vld [vmem:[%s9496_s14 + $0x18] sm:$0xf]  ;;  %v8388_v5 = vld [vmem:[%s9496_s14 + $0x1c] sm:$0xf] }
0x1662   : > { %4550 = vmatpush.bf16.msra.mxu2 %v7572_v46  ;;  %v6190_v8 = vld [vmem:[%s13938_s2] sm:$0xff]  ;;  %v7904_v57 = vor.u32 %v8467_v33, %v7901_v38  ;;  %v7589_v53 = vld [vmem:[%s9496_s14 + $0x158] sm:$0xf0]  ;;  %v9070_v39 = vmov 0   ;;  %v7579_v62 = vld [vmem:[%s9496_s14 + $0x10] sm:$0xf] }
0x1663   : > { %4568 = vmatpush.bf16.msra.mxu3 %v7576_v61  ;;  %vm6193_vm8 = vcmp.gt.f32.partialorder %v6190_v8, 0.5  ;;  %v8428_v42 = vld [vmem:[%s9496_s14 + $0x154] sm:$0xf0]  ;;  %v7592_v40 = vor.u32 %v8388_v5, %v7589_v53  ;;  %v6191_v47 = vld [vmem:[%s13938_s2 + $0x8] sm:$0xff]  ;;  %v8427_v52 = vld [vmem:[%s9496_s14 + $0x14c] sm:$0xf0]  ;;  %8897 = vset.pattern.permute.xlu0 %v9070_v39 }
0x1664   : > { %8201 = vmatmul.msk.bf16.vlgmr.msra.gmra.mxu0 %vm4500_vm7, %v10403_v13  ;;  %v7588_v35 = vor.u32 %v8428_v42, %v7587_v60  ;;  %8203 = vmatmul.msk.bf16.vlgmr.msra.gmra.mxu1 %vm4500_vm7, %v10403_v13  ;;  %v6196_v22 = vsel %vm6193_vm8, 1, %v9070_v39  ;;  %v6192_v24 = vld [vmem:[%s13938_s2 + $0x10] sm:$0xff]  ;;  %v7580_v34 = vor.u32 %v8427_v52, %v7579_v62  ;;  %v8387_v21 = vld [vmem:[%s9496_s14 + $0x14] sm:$0xf]  ;;  %v3241_v50 = vld [vmem:[#allocation2 + $0x8] sm:$0xf] }
0x1665   : > { %8205 = vmatmul.msk.bf16.vlgmr.msra.gmra.mxu2 %vm4500_vm7, %v10403_v13  ;;  %4585 = vmatpush.bf16.msrb.mxu0 %v7900_v37  ;;  %v7581_v59 = vld [vmem:[%s9496_s14 + $0x150] sm:$0xf0]  ;;  %v7923_v49 = vld [vmem:[%s9496_s14 + $0x2a8] sm:$0xf]  ;;  %v8470_v1 = vld [vmem:[%s9496_s14 + $0x2ac] sm:$0xf]  ;;  %v3697_v11 = vunpack.c.l.b16 %v3241_v50 }
0x1666   : > { %4621 = vmatpush.bf16.msrb.mxu2 %v7908_v30  ;;  %8207 = vmatmul.msk.bf16.vlgmr.msra.gmra.mxu3 %vm4500_vm7, %v10403_v13  ;;  %v7584_v25 = vor.u32 %v8387_v21, %v7581_v59  ;;  %v8510_v63 = vld [vmem:[%s9496_s14 + $0x3e4] sm:$0xf0]  ;;  %v7925_v2 = vld [vmem:[%s9496_s14 + $0x3e8] sm:$0xf0]  ;;  %vm6195_vm9 = vcmp.gt.f32.partialorder %v6192_v24, 0.5  ;;  %vm6194_vm10 = vcmp.gt.f32.partialorder %v6191_v47, 0.5 }
0x1667   : > { %4639 = vmatpush.bf16.msrb.mxu3 %v7912_v14  ;;  %4603 = vmatpush.bf16.msrb.mxu1 %v7904_v57  ;;  %v7924_v3 = vor.u32 %v8510_v63, %v7923_v49  ;;  %v7928_v16 = vor.u32 %v8470_v1, %v7925_v2  ;;  %v7915_v56 = vld [vmem:[%s9496_s14 + $0x2a0] sm:$0xf]  ;;  %v6198_v51 = vsel %vm6195_vm9, 1, %v9070_v39  ;;  %v8469_v45 = vld [vmem:[%s9496_s14 + $0x2a4] sm:$0xf]  ;;  %v6197_v12 = vsel %vm6194_vm10, 1, %v9070_v39 }
0x1668   : > { %6200 = vperm.xlu0 %8897, %v6196_v22   ;;  %v8509_v4 = vld [vmem:[%s9496_s14 + $0x3dc] sm:$0xf0]  ;;  %8898 = vset.pattern.permute.xlu1 %v9070_v39  ;;  %v7917_v36 = vld [vmem:[%s9496_s14 + $0x3e0] sm:$0xf0]  ;;  %v10446_v19 = vpack.c.b16 %v3697_v11, %v3697_v11  ;;  %v7603_v27 = vld [vmem:[%s9496_s14 + $0x28] sm:$0xf] }
0x1669   : > { %v7916_v9 = vor.u32 %v8509_v4, %v7915_v56  ;;  %4586 = vmatpush.bf16.msrb.mxu0 %v7580_v34  ;;  %v7920_v55 = vor.u32 %v8469_v45, %v7917_v36  ;;  %6206 = vperm.xlu1 %8898, %v6198_v51   ;;  %v8430_v44 = vld [vmem:[%s9496_s14 + $0x164] sm:$0xf0]  ;;  %v8390_v17 = vld [vmem:[%s9496_s14 + $0x2c] sm:$0xf]  ;;  %v7595_v20 = vld [vmem:[%s9496_s14 + $0x20] sm:$0xf] }
0x166a   : > { %4622 = vmatpush.bf16.msrb.mxu2 %v7588_v35  ;;  %v7604_v18 = vor.u32 %v8430_v44, %v7603_v27  ;;  %v7605_v10 = vld [vmem:[%s9496_s14 + $0x168] sm:$0xf0]  ;;  %v8429_v43 = vld [vmem:[%s9496_s14 + $0x15c] sm:$0xf0]  ;;  %v8389_v26 = vld [vmem:[%s9496_s14 + $0x24] sm:$0xf] }
0x166b   : > { %4640 = vmatpush.bf16.msrb.mxu3 %v7592_v40  ;;  %4604 = vmatpush.bf16.msrb.mxu1 %v7584_v25  ;;  %v7608_v23 = vor.u32 %v8390_v17, %v7605_v10  ;;  %v7596_v41 = vor.u32 %v8429_v43, %v7595_v20  ;;  %v7597_v28 = vld [vmem:[%s9496_s14 + $0x160] sm:$0xf0]  ;;  %v7939_v7 = vld [vmem:[%s9496_s14 + $0x2b8] sm:$0xf]  ;;  %v8472_v46 = vld [vmem:[%s9496_s14 + $0x2bc] sm:$0xf]  ;;  %v5948_v10 = vlaneseq }
0x166c   : > { %v7600_v54 = vor.u32 %v8389_v26, %v7597_v28  ;;  %v8512_v29 = vld [vmem:[%s9496_s14 + $0x3f4] sm:$0xf0]  ;;  %v7941_v6 = vld [vmem:[%s9496_s14 + $0x3f8] sm:$0xf0]  ;;  %v7931_v61 = vld [vmem:[%s9496_s14 + $0x2b0] sm:$0xf] }
0x166d   : > { %4657 = vmatpush.bf16.msra.mxu0 %v7916_v9  ;;  %v7940_v58 = vor.u32 %v8512_v29, %v7939_v7  ;;  %v8511_v48 = vld [vmem:[%s9496_s14 + $0x3ec] sm:$0xf0]  ;;  %v7944_v0 = vor.u32 %v8472_v46, %v7941_v6  ;;  %v8471_v30 = vld [vmem:[%s9496_s14 + $0x2b4] sm:$0xf]  ;;  %v7619_v15 = vld [vmem:[%s9496_s14 + $0x38] sm:$0xf] }
0x166e   : > { %4693 = vmatpush.bf16.msra.mxu2 %v7924_v3  ;;  %v7932_v32 = vor.u32 %v8511_v48, %v7931_v61  ;;  %v7933_v14 = vld [vmem:[%s9496_s14 + $0x3f0] sm:$0xf0]  ;;  %v8432_v33 = vld [vmem:[%s9496_s14 + $0x174] sm:$0xf0]  ;;  %v8392_v37 = vld [vmem:[%s9496_s14 + $0x3c] sm:$0xf] }
0x166f   : > { %4711 = vmatpush.bf16.msra.mxu3 %v7928_v16  ;;  %4675 = vmatpush.bf16.msra.mxu1 %v7920_v55  ;;  %v7936_v31 = vor.u32 %v8471_v30, %v7933_v14  ;;  %v7620_v38 = vor.u32 %v8432_v33, %v7619_v15  ;;  %v7621_v8 = vld [vmem:[%s9496_s14 + $0x178] sm:$0xf0]  ;;  %v7611_v57 = vld [vmem:[%s9496_s14 + $0x30] sm:$0xf]  ;;  %v8391_v5 = vld [vmem:[%s9496_s14 + $0x34] sm:$0xf] }
0x1670   : > { %6203 = vperm.xlu0 %8897, %v6197_v12   ;;  %v8431_v60 = vld [vmem:[%s9496_s14 + $0x16c] sm:$0xf0]  ;;  %v7624_v42 = vor.u32 %v8392_v37, %v7621_v8  ;;  %v7613_v53 = vld [vmem:[%s9496_s14 + $0x170] sm:$0xf0]  ;;  %v7955_v22 = vld [vmem:[%s9496_s14 + $0x2c8] sm:$0xf] }
0x1671   : > { %4658 = vmatpush.bf16.msra.mxu0 %v7596_v41  ;;  %v7612_v35 = vor.u32 %v8431_v60, %v7611_v57  ;;  %v7616_v39 = vor.u32 %v8391_v5, %v7613_v53  ;;  %v8514_v40 = vld [vmem:[%s9496_s14 + $0x404] sm:$0xf0]  ;;  %v8474_v47 = vld [vmem:[%s9496_s14 + $0x2cc] sm:$0xf]  ;;  %v7947_v24 = vld [vmem:[%s9496_s14 + $0x2c0] sm:$0xf] }
0x1672   : > { %4694 = vmatpush.bf16.msra.mxu2 %v7604_v18  ;;  %v7956_v62 = vor.u32 %v8514_v40, %v7955_v22  ;;  %v7957_v52 = vld [vmem:[%s9496_s14 + $0x408] sm:$0xf0]  ;;  %v8513_v34 = vld [vmem:[%s9496_s14 + $0x3fc] sm:$0xf0]  ;;  %v8473_v49 = vld [vmem:[%s9496_s14 + $0x2c4] sm:$0xf] }
0x1673   : > { %4712 = vmatpush.bf16.msra.mxu3 %v7608_v23  ;;  %4676 = vmatpush.bf16.msra.mxu1 %v7600_v54  ;;  %v7960_v21 = vor.u32 %v8474_v47, %v7957_v52  ;;  %v7948_v59 = vor.u32 %v8513_v34, %v7947_v24  ;;  %v7949_v50 = vld [vmem:[%s9496_s14 + $0x400] sm:$0xf0]  ;;  %v7635_v63 = vld [vmem:[%s9496_s14 + $0x48] sm:$0xf]  ;;  %v8394_v2 = vld [vmem:[%s9496_s14 + $0x4c] sm:$0xf] }
0x1674   : > { %8202 = vmatmul.msk.bf16.gmra.mxu0 %vm4500_vm7, %v10446_v19  ;;  %8204 = vmatmul.msk.bf16.gmra.mxu1 %vm4500_vm7, %v10446_v19  ;;  %v7952_v25 = vor.u32 %v8473_v49, %v7949_v50  ;;  %v8434_v1 = vld [vmem:[%s9496_s14 + $0x184] sm:$0xf0]  ;;  %v7637_v16 = vld [vmem:[%s9496_s14 + $0x188] sm:$0xf0]  ;;  %v7627_v56 = vld [vmem:[%s9496_s14 + $0x40] sm:$0xf] }
0x1675   : > { %8206 = vmatmul.msk.bf16.gmra.mxu2 %vm4500_vm7, %v10446_v19  ;;  %v7636_v3 = vor.u32 %v8434_v1, %v7635_v63  ;;  %v8433_v4 = vld [vmem:[%s9496_s14 + $0x17c] sm:$0xf0]  ;;  %v7640_v51 = vor.u32 %v8394_v2, %v7637_v16  ;;  %v8393_v45 = vld [vmem:[%s9496_s14 + $0x44] sm:$0xf]  ;;  %v7971_v11 = vld [vmem:[%s9496_s14 + $0x2d8] sm:$0xf] }
0x1676   : > { %8208 = vmatmul.msk.bf16.gmra.mxu3 %vm4500_vm7, %v10446_v19  ;;  %v7628_v9 = vor.u32 %v8433_v4, %v7627_v56  ;;  %v7629_v36 = vld [vmem:[%s9496_s14 + $0x180] sm:$0xf0]  ;;  %v8516_v12 = vld [vmem:[%s9496_s14 + $0x414] sm:$0xf0]  ;;  %v8476_v44 = vld [vmem:[%s9496_s14 + $0x2dc] sm:$0xf] }
0x1677   : > { %v7632_v55 = vor.u32 %v8393_v45, %v7629_v36  ;;  %v7972_v27 = vor.u32 %v8516_v12, %v7971_v11  ;;  %v7973_v17 = vld [vmem:[%s9496_s14 + $0x418] sm:$0xf0]  ;;  %v7963_v20 = vld [vmem:[%s9496_s14 + $0x2d0] sm:$0xf]  ;;  %v8475_v23 = vld [vmem:[%s9496_s14 + $0x2d4] sm:$0xf] }
0x1678   : > { %v7976_v18 = vor.u32 %v8476_v44, %v7973_v17  ;;  %v8515_v43 = vld [vmem:[%s9496_s14 + $0x40c] sm:$0xf0]  ;;  %v7965_v26 = vld [vmem:[%s9496_s14 + $0x410] sm:$0xf0]  ;;  %s5947_s16 = smul.u32 10240, %s9134_s30  ;;  %v10548_v7 = vand.u32 127, %v5948_v10 }
0x1679   : > { %v7964_v41 = vor.u32 %v8515_v43, %v7963_v20  ;;  %v7968_v28 = vor.u32 %v8475_v23, %v7965_v26  ;;  %v10545_v54 = vld [vmem:[%s9494_s11] sm:$0xff]  ;;  %v8396_v6 = vld [vmem:[%s9496_s14 + $0x5c] sm:$0xf]  ;;  %v7643_v60 = vld [vmem:[%s9496_s14 + $0x50] sm:$0xf] }
0x167a   : > { %v3412_v29 = vunpack.c.l.bf16 %v10545_v54  ;;  %v7651_v46 = vld [vmem:[%s9496_s14 + $0x58] sm:$0xf]  ;;  %v10562_v61 = vstv %s5947_s16  ;;  %v5950_v48 = vadd.s32 128, %v10548_v7  ;;  %v5952_v57 = vadd.s32 384, %v10548_v7  ;;  %v8395_v5 = vld [vmem:[%s9496_s14 + $0x54] sm:$0xf] }
0x167b   : > { %v10570_v15 = vadd.s32 %v10562_v61, %v10548_v7  ;;  %v7645_v53 = vld [vmem:[%s9496_s14 + $0x190] sm:$0xf0]  ;;  %v7987_v2 = vld [vmem:[%s9496_s14 + $0x2e8] sm:$0xf]  ;;  %v8478_v4 = vld [vmem:[%s9496_s14 + $0x2ec] sm:$0xf] }
0x167c   : > { %v3452_v14 = vperm.slane %v3412_v29, 0  ;;  %v3453_v33 = vperm.slane %v3412_v29, 2  ;;  %v10573_v37 = vadd.s32 %v10562_v61, %v5950_v48  ;;  %v7648_v22 = vor.u32 %v8395_v5, %v7645_v53  ;;  %v8477_v48 = vld [vmem:[%s9496_s14 + $0x2e4] sm:$0xf] }
0x167d   : > { %vm6110_vm12 = vcmp.lt.s32.totalorder %v10570_v15, 16  ;;  %v3455_v52 = vperm.slane %v3412_v29, 6  ;;  %v10596_v24 = vadd.s32 %v10562_v61, %v5952_v57  ;;  %v10720_v53 = vunpack.c.h.bf16 %v10545_v54  ;;  %v7669_v54 = vld [vmem:[%s9496_s14 + $0x1a8] sm:$0xf0] }
0x167e   : > { %v10576_v8 = vperm.slane %v3452_v14, 0  ;;  %vm6111_vm0 = vcmp.lt.s32.totalorder %v10573_v37, 16  ;;  %v5956_v45 = vadd.s32 896, %v10548_v7 }
0x167f   : > { %v10616_v1 = vperm.slane %v3455_v52, 0  ;;  %vm6113_vm2 = vcmp.lt.s32.totalorder %v10596_v24, 16  ;;  %v3458_v26 = vperm.slane %v10720_v53, 4 }
0x1684   : > { %8209 = vmatmul.msk.bf16.vlgmr.msrb.gmra.mxu0 %vm4500_vm7, %v10403_v13  ;;  %8211 = vmatmul.msk.bf16.vlgmr.msrb.gmra.mxu1 %vm4500_vm7, %v10403_v13 }
0x1685   : > { %8213 = vmatmul.msk.bf16.vlgmr.msrb.gmra.mxu2 %vm4500_vm7, %v10403_v13  ;;  %4729 = vmatpush.bf16.msrb.mxu0 %v7932_v32  ;;  %v7653_v32 = vld [vmem:[%s9496_s14 + $0x198] sm:$0xf0] }
0x1686   : > { %8215 = vmatmul.msk.bf16.vlgmr.msrb.gmra.mxu3 %vm4500_vm7, %v10403_v13  ;;  %4765 = vmatpush.bf16.msrb.mxu2 %v7940_v58  ;;  %v8436_v58 = vld [vmem:[%s9496_s14 + $0x194] sm:$0xf0]  ;;  %v7656_v30 = vor.u32 %v8396_v6, %v7653_v32 }
0x1687   : > { %4783 = vmatpush.bf16.msrb.mxu3 %v7944_v0  ;;  %4747 = vmatpush.bf16.msrb.mxu1 %v7936_v31  ;;  %v7652_v0 = vor.u32 %v8436_v58, %v7651_v46  ;;  %v3459_v58 = vperm.slane %v10720_v53, 6 }
0x1689   : > { %4730 = vmatpush.bf16.msrb.mxu0 %v7612_v35 }
0x168a   : > { %4766 = vmatpush.bf16.msrb.mxu2 %v7620_v38  ;;  %v5951_v38 = vadd.s32 256, %v10548_v7 }
0x168b   : > { %4784 = vmatpush.bf16.msrb.mxu3 %v7624_v42  ;;  %4748 = vmatpush.bf16.msrb.mxu1 %v7616_v39  ;;  %v8435_v42 = vld [vmem:[%s9496_s14 + $0x18c] sm:$0xf0]  ;;  %v10585_v39 = vperm.slane %v3453_v33, 0 }
0x168c   : > { %v7644_v35 = vor.u32 %v8435_v42, %v7643_v60  ;;  %v10589_v40 = vadd.s32 %v10562_v61, %v5951_v38 }
0x168e   : > { %vm6112_vm1 = vcmp.lt.s32.totalorder %v10589_v40, 16 }
0x1694   : > { %8210 = vmatmul.msk.bf16.gmra.mxu0 %vm4500_vm7, %v10446_v19  ;;  %8212 = vmatmul.msk.bf16.gmra.mxu1 %vm4500_vm7, %v10446_v19 }
0x1695   : > { %8214 = vmatmul.msk.bf16.gmra.mxu2 %vm4500_vm7, %v10446_v19 }
0x1696   : > { %8216 = vmatmul.msk.bf16.gmra.mxu3 %vm4500_vm7, %v10446_v19 }
0x16a4   : > { %8217 = vmatmul.msk.bf16.vlgmr.msra.gmra.mxu0 %vm4500_vm7, %v10403_v13  ;;  %8219 = vmatmul.msk.bf16.vlgmr.msra.gmra.mxu1 %vm4500_vm7, %v10403_v13 }
0x16a5   : > { %8221 = vmatmul.msk.bf16.vlgmr.msra.gmra.mxu2 %vm4500_vm7, %v10403_v13  ;;  %4801 = vmatpush.bf16.msra.mxu0 %v7948_v59 }
0x16a6   : > { %8223 = vmatmul.msk.bf16.vlgmr.msra.gmra.mxu3 %vm4500_vm7, %v10403_v13  ;;  %4837 = vmatpush.bf16.msra.mxu2 %v7956_v62  ;;  %v3454_v62 = vperm.slane %v3412_v29, 4  ;;  %v8517_v29 = vld [vmem:[%s9496_s14 + $0x41c] sm:$0xf0] }
0x16a7   : > { %4855 = vmatpush.bf16.msra.mxu3 %v7960_v21  ;;  %4819 = vmatpush.bf16.msra.mxu1 %v7952_v25 }
0x16a8   : > { %v10614_v63 = vperm.slane %v3454_v62, 0  ;;  %v8438_v62 = vld [vmem:[%s9496_s14 + $0x1a4] sm:$0xf0] }
0x16a9   : > { %4802 = vmatpush.bf16.msra.mxu0 %v7628_v9 }
0x16aa   : > { %4838 = vmatpush.bf16.msra.mxu2 %v7636_v3  ;;  %v8518_v3 = vld [vmem:[%s9496_s14 + $0x424] sm:$0xf0] }
0x16ab   : > { %4856 = vmatpush.bf16.msra.mxu3 %v7640_v51  ;;  %4820 = vmatpush.bf16.msra.mxu1 %v7632_v55  ;;  %v7988_v56 = vor.u32 %v8518_v3, %v7987_v2  ;;  %v7989_v51 = vld [vmem:[%s9496_s14 + $0x428] sm:$0xf0] }
0x16ac   : > { %v7992_v55 = vor.u32 %v8478_v4, %v7989_v51 }
0x16b4   : > { %8218 = vmatmul.msk.bf16.gmra.mxu0 %vm4500_vm7, %v10446_v19  ;;  %8220 = vmatmul.msk.bf16.gmra.mxu1 %vm4500_vm7, %v10446_v19 }
0x16b5   : > { %8222 = vmatmul.msk.bf16.gmra.mxu2 %vm4500_vm7, %v10446_v19 }
0x16b6   : > { %8224 = vmatmul.msk.bf16.gmra.mxu3 %vm4500_vm7, %v10446_v19 }
0x16c4   : > { %8225 = vmatmul.msk.bf16.vlgmr.msrb.gmra.mxu0 %vm4500_vm7, %v10403_v13  ;;  %8227 = vmatmul.msk.bf16.vlgmr.msrb.gmra.mxu1 %vm4500_vm7, %v10403_v13 }
0x16c5   : > { %8229 = vmatmul.msk.bf16.vlgmr.msrb.gmra.mxu2 %vm4500_vm7, %v10403_v13  ;;  %4873 = vmatpush.bf16.msrb.mxu0 %v7964_v41 }
0x16c6   : > { %8231 = vmatmul.msk.bf16.vlgmr.msrb.gmra.mxu3 %vm4500_vm7, %v10403_v13  ;;  %4909 = vmatpush.bf16.msrb.mxu2 %v7972_v27 }
0x16c7   : > { %4927 = vmatpush.bf16.msrb.mxu3 %v7976_v18  ;;  %4891 = vmatpush.bf16.msrb.mxu1 %v7968_v28  ;;  %v7979_v28 = vld [vmem:[%s9496_s14 + $0x2e0] sm:$0xf] }
0x16c8   : > { %v7980_v6 = vor.u32 %v8517_v29, %v7979_v28  ;;  %v10776_v28 = vadd.s32 %v10562_v61, %v5956_v45 }
0x16c9   : > { %4874 = vmatpush.bf16.msrb.mxu0 %v7644_v35 }
0x16ca   : > { %4910 = vmatpush.bf16.msrb.mxu2 %v7652_v0  ;;  %v7981_v0 = vld [vmem:[%s9496_s14 + $0x420] sm:$0xf0] }
0x16cb   : > { %4928 = vmatpush.bf16.msrb.mxu3 %v7656_v30  ;;  %4892 = vmatpush.bf16.msrb.mxu1 %v7648_v22  ;;  %v7984_v15 = vor.u32 %v8477_v48, %v7981_v0  ;;  %v5954_v22 = vadd.s32 640, %v10548_v7 }
0x16cd   : > { %v10751_v51 = vadd.s32 %v10562_v61, %v5954_v22 }
0x16d4   : > { %8226 = vmatmul.msk.bf16.gmra.mxu0 %vm4500_vm7, %v10446_v19  ;;  %8228 = vmatmul.msk.bf16.gmra.mxu1 %vm4500_vm7, %v10446_v19 }
0x16d5   : > { %8230 = vmatmul.msk.bf16.gmra.mxu2 %vm4500_vm7, %v10446_v19 }
0x16d6   : > { %8232 = vmatmul.msk.bf16.gmra.mxu3 %vm4500_vm7, %v10446_v19 }
0x16da   : > { %v10566_v31 = vpop.permute.xlu0 %6200 }
0x16db   : > { %vm6208_vm11 = vcmp.eq.s32.totalorder %v10566_v31, 1  ;;  %v10643_v36 = vpop.permute.xlu1 %6206 }
0x16dc   : > { %vm6211_vm13 = vmxor %vm6208_vm11, %vm6110_vm12  ;;  %vm6210_vm8 = vcmp.eq.s32.totalorder %v10643_v36, 1 }
0x16dd   : > { %vm6212_vm14 = vmxor %vm6208_vm11, %vm6111_vm0 }
0x16de   : > { %vm10629_vm3 = vmxor %vm6208_vm11, %vm6112_vm1 }
0x16df   : > { %vm10639_vm5 = vmxor %vm6208_vm11, %vm6113_vm2 }
0x16e0   : > { %vm10670_vm9 = vmxor %vm6210_vm8, %vm6110_vm12 }
0x16e1   : > { %v4516_v47 = vpop.f32.mrf.mxu0  ;;  %v4534_v21 = vpop.f32.mrf.mxu1 }
0x16e2   : > { %v4517_v34 = vadd.f32 %v4516_v47, %v10576_v8  ;;  %v4535_v59 = vadd.f32 %v4534_v21, %v10585_v39  ;;  %v10604_v49 = vpop.permute.xlu0 %6203  ;;  %v7667_v47 = vld [vmem:[%s9496_s14 + $0x68] sm:$0xf] }
0x16e3   : > { %vm6209_vm15 = vcmp.eq.s32.totalorder %v10604_v49, 1  ;;  %v7668_v21 = vor.u32 %v8438_v62, %v7667_v47 }
0x16e4   : > { %v6451_v50 = vsel %vm6211_vm13, -3.4028235e+38, %v4517_v34  ;;  %8233 = vmatmul.msk.bf16.vlgmr.msra.gmra.mxu0 %vm4500_vm7, %v10403_v13  ;;  %v6452_v25 = vsel %vm6212_vm14, -3.4028235e+38, %v4535_v59  ;;  %8235 = vmatmul.msk.bf16.vlgmr.msra.gmra.mxu1 %vm4500_vm7, %v10403_v13  ;;  %vm6291_vm4 = vmxor %vm6209_vm15, %vm6110_vm12  ;;  %v8398_v59 = vld [vmem:[%s9496_s14 + $0x6c] sm:$0xf] }
0x16e5   : > { %6691 = vst [vmem:[%s9498_s29] sm:$0xff] %v6451_v50  ;;  %8237 = vmatmul.msk.bf16.vlgmr.msra.gmra.mxu2 %vm4500_vm7, %v10403_v13  ;;  %vm6292_vm6 = vmxor %vm6209_vm15, %vm6111_vm0  ;;  %4945 = vmatpush.bf16.msra.mxu0 %v7980_v6  ;;  %v7672_v2 = vor.u32 %v8398_v59, %v7669_v54 }
0x16e6   : > { %6692 = vst [vmem:[%s9498_s29 + $0x8] sm:$0xff] %v6452_v25  ;;  %8239 = vmatmul.msk.bf16.vlgmr.msra.gmra.mxu3 %vm4500_vm7, %v10403_v13  ;;  %4981 = vmatpush.bf16.msra.mxu2 %v7988_v56  ;;  %vm10680_vm10 = vmxor %vm6209_vm15, %vm6112_vm1  ;;  %v3456_v56 = vperm.slane %v10720_v53, 0 }
0x16e7   : > { %4999 = vmatpush.bf16.msra.mxu3 %v7992_v55  ;;  %vm6294_vm12 = vmxor %vm6209_vm15, %vm6113_vm2  ;;  %4963 = vmatpush.bf16.msra.mxu1 %v7984_v15  ;;  %v7659_v55 = vld [vmem:[%s9496_s14 + $0x60] sm:$0xf] }
0x16e8   : > { %v4552_v9 = vpop.f32.mrf.mxu2  ;;  %vm10697_vm13 = vmxor %vm6210_vm8, %vm6111_vm0 }
0x16e9   : > { %v4553_v11 = vadd.f32 %v4552_v9, %v10614_v63  ;;  %v4570_v12 = vpop.f32.mrf.mxu3  ;;  %v4518_v27 = vpop.f32.mrf.mxu0  ;;  %vm10731_vm0 = vmxor %vm6210_vm8, %vm6112_vm1  ;;  %v5955_v9 = vadd.s32 768, %v10548_v7 }
0x16ea   : > { %v4571_v44 = vadd.f32 %v4570_v12, %v10616_v1  ;;  %v4519_v17 = vadd.f32 %v4518_v27, %v10576_v8  ;;  %v4536_v18 = vpop.f32.mrf.mxu1  ;;  %vm6374_vm14 = vmxor %vm6210_vm8, %vm6113_vm2  ;;  %4982 = vmatpush.bf16.msra.mxu2 %v7668_v21  ;;  %v10759_v12 = vperm.slane %v3456_v56, 0  ;;  %vm6115_vm2 = vcmp.lt.s32.totalorder %v10751_v51, 16  ;;  %v7997_v56 = vld [vmem:[%s9496_s14 + $0x430] sm:$0xf0] }
0x16eb   : > { %v6453_v10 = vsel %vm10629_vm3, -3.4028235e+38, %v4553_v11  ;;  %v4537_v20 = vadd.f32 %v4536_v18, %v10585_v39  ;;  %5000 = vmatpush.bf16.msra.mxu3 %v7672_v2  ;;  %v8437_v11 = vld [vmem:[%s9496_s14 + $0x19c] sm:$0xf0] }
0x16ec   : > { %6693 = vst [vmem:[%s9498_s29 + $0x10] sm:$0xff] %v6453_v10  ;;  %v6454_v43 = vsel %vm10639_vm5, -3.4028235e+38, %v4571_v44  ;;  %v6531_v23 = vsel %vm6291_vm4, -3.4028235e+38, %v4519_v17  ;;  %v7660_v27 = vor.u32 %v8437_v11, %v7659_v55  ;;  %vm6216_vm5 = vmxor %vm6208_vm11, %vm6115_vm2 }
0x16ed   : > { %6694 = vst [vmem:[%s9498_s29 + $0x18] sm:$0xff] %v6454_v43  ;;  %v6532_v41 = vsel %vm6292_vm6, -3.4028235e+38, %v4537_v20  ;;  %v8397_v44 = vld [vmem:[%s9496_s14 + $0x64] sm:$0xf]  ;;  %v10768_v43 = vadd.s32 %v10562_v61, %v5955_v9  ;;  %vm6117_vm6 = vcmp.lt.s32.totalorder %v10776_v28, 16 }
0x16ee   : > { %6771 = vst [vmem:[%s9498_s29 + $0x280] sm:$0xff] %v6531_v23  ;;  %v7661_v17 = vld [vmem:[%s9496_s14 + $0x1a0] sm:$0xf0]  ;;  %4946 = vmatpush.bf16.msra.mxu0 %v7660_v27 }
0x16ef   : > { %6772 = vst [vmem:[%s9498_s29 + $0x288] sm:$0xff] %v6532_v41  ;;  %v7664_v10 = vor.u32 %v8397_v44, %v7661_v17  ;;  %vm6116_vm4 = vcmp.lt.s32.totalorder %v10768_v43, 16 }
0x16f0   : > { %v4554_v46 = vpop.f32.mrf.mxu2 }
0x16f1   : > { %v4555_v32 = vadd.f32 %v4554_v46, %v10614_v63  ;;  %v4572_v30 = vpop.f32.mrf.mxu3  ;;  %v4521_v14 = vpop.f32.mrf.mxu0  ;;  %4964 = vmatpush.bf16.msra.mxu1 %v7664_v10  ;;  %v10884_v10 = vld [vmem:[%s9494_s11 + $0x8] sm:$0xff] }
0x16f2   : > { %v4573_v33 = vadd.f32 %v4572_v30, %v10616_v1  ;;  %v4522_v38 = vadd.f32 %v4521_v14, %v10576_v8  ;;  %v4539_v57 = vpop.f32.mrf.mxu1  ;;  %v10799_v30 = vperm.slane %v3459_v58, 0  ;;  %v8003_v14 = vld [vmem:[%s9496_s14 + $0x2f8] sm:$0xf] }
0x16f3   : > { %v6533_v42 = vsel %vm10680_vm10, -3.4028235e+38, %v4555_v32  ;;  %v4540_v35 = vadd.f32 %v4539_v57, %v10585_v39  ;;  %v5953_v39 = vadd.s32 512, %v10548_v7  ;;  %v10793_v32 = vperm.slane %v3458_v26, 0  ;;  %vm10816_vm10 = vmxor %vm6208_vm11, %vm6117_vm6  ;;  %v7683_v26 = vld [vmem:[%s9496_s14 + $0x78] sm:$0xf] }
0x16f4   : > { %6773 = vst [vmem:[%s9498_s29 + $0x290] sm:$0xff] %v6533_v42  ;;  %v6534_v8 = vsel %vm6294_vm12, -3.4028235e+38, %v4573_v33  ;;  %8234 = vmatmul.msk.bf16.gmra.mxu0 %vm4500_vm7, %v10446_v19  ;;  %v6611_v37 = vsel %vm10670_vm9, -3.4028235e+38, %v4522_v38  ;;  %8236 = vmatmul.msk.bf16.gmra.mxu1 %vm4500_vm7, %v10446_v19  ;;  %vm10806_vm9 = vmxor %vm6208_vm11, %vm6116_vm4 }
0x16f5   : > { %6774 = vst [vmem:[%s9498_s29 + $0x298] sm:$0xff] %v6534_v8  ;;  %8238 = vmatmul.msk.bf16.gmra.mxu2 %vm4500_vm7, %v10446_v19  ;;  %v6612_v5 = vsel %vm10697_vm13, -3.4028235e+38, %v4540_v35  ;;  %v10745_v4 = vadd.s32 %v10562_v61, %v5953_v39  ;;  %v8520_v33 = vld [vmem:[%s9496_s14 + $0x434] sm:$0xf0]  ;;  %vm6296_vm13 = vmxor %vm6209_vm15, %vm6115_vm2 }
0x16f6   : > { %8240 = vmatmul.msk.bf16.gmra.mxu3 %vm4500_vm7, %v10446_v19  ;;  %6851 = vst [vmem:[%s9498_s29 + $0x500] sm:$0xff] %v6611_v37  ;;  %v8480_v38 = vld [vmem:[%s9496_s14 + $0x2fc] sm:$0xf]  ;;  %v8004_v42 = vor.u32 %v8520_v33, %v8003_v14 }
0x16f7   : > { %6852 = vst [vmem:[%s9498_s29 + $0x508] sm:$0xff] %v6612_v5  ;;  %vm6114_vm1 = vcmp.lt.s32.totalorder %v10745_v4, 16  ;;  %v8005_v35 = vld [vmem:[%s9496_s14 + $0x438] sm:$0xf0]  ;;  %v8482_v4 = vld [vmem:[%s9496_s14 + $0x30c] sm:$0xf] }
0x16f8   : > { %v4557_v52 = vpop.f32.mrf.mxu2  ;;  %vm6215_vm3 = vmxor %vm6208_vm11, %vm6114_vm1 }
0x16f9   : > { %v4558_v50 = vadd.f32 %v4557_v52, %v10614_v63  ;;  %v4575_v25 = vpop.f32.mrf.mxu3  ;;  %v4523_v40 = vpop.f32.mrf.mxu0  ;;  %v3457_v63 = vperm.slane %v10720_v53, 2  ;;  %vm6295_vm12 = vmxor %vm6209_vm15, %vm6114_vm1  ;;  %v8008_v53 = vor.u32 %v8480_v38, %v8005_v35 }
0x16fa   : > { %v4576_v3 = vadd.f32 %v4575_v25, %v10616_v1  ;;  %v4541_v16 = vpop.f32.mrf.mxu1  ;;  %v8519_v25 = vld [vmem:[%s9496_s14 + $0x42c] sm:$0xf0] }
0x16fb   : > { %v6613_v24 = vsel %vm10731_vm0, -3.4028235e+38, %v4558_v50  ;;  %v10764_v18 = vperm.slane %v3457_v63, 0  ;;  %vm10845_vm0 = vmxor %vm6209_vm15, %vm6116_vm4  ;;  %v7995_v50 = vld [vmem:[%s9496_s14 + $0x2f0] sm:$0xf] }
0x16fc   : > { %6853 = vst [vmem:[%s9498_s29 + $0x510] sm:$0xff] %v6613_v24  ;;  %v6614_v1 = vsel %vm6374_vm14, -3.4028235e+38, %v4576_v3  ;;  %vm10855_vm14 = vmxor %vm6209_vm15, %vm6117_vm6  ;;  %v7996_v3 = vor.u32 %v8519_v25, %v7995_v50  ;;  %v8479_v16 = vld [vmem:[%s9496_s14 + $0x2f4] sm:$0xf] }
0x16fd   : > { %6854 = vst [vmem:[%s9498_s29 + $0x518] sm:$0xff] %v6614_v1  ;;  %v8000_v45 = vor.u32 %v8479_v16, %v7997_v56 }
0x1700   : > { %v4559_v20 = vpop.f32.mrf.mxu2 }
0x1701   : > { %v4577_v23 = vpop.f32.mrf.mxu3  ;;  %v4588_v41 = vpop.f32.mrf.mxu0  ;;  %v10904_v20 = vunpack.c.l.bf16 %v10884_v10 }
0x1702   : > { %v4589_v29 = vadd.f32 %v4588_v41, %v10759_v12  ;;  %v4606_v46 = vpop.f32.mrf.mxu1  ;;  %v5957_v23 = vadd.s32 1024, %v10548_v7  ;;  %v5958_v41 = vadd.s32 1152, %v10548_v7 }
0x1703   : > { %v4607_v6 = vadd.f32 %v4606_v46, %v10764_v18  ;;  %v3460_v60 = vperm.slane %v10904_v20, 0  ;;  %v3462_v25 = vperm.slane %v10904_v20, 4  ;;  %v3463_v16 = vperm.slane %v10904_v20, 6 }
0x1704   : > { %v6455_v48 = vsel %vm6215_vm3, -3.4028235e+38, %v4589_v29  ;;  %8241 = vmatmul.msk.bf16.vlgmr.msrb.gmra.mxu0 %vm4500_vm7, %v10403_v13  ;;  %8243 = vmatmul.msk.bf16.vlgmr.msrb.gmra.mxu1 %vm4500_vm7, %v10403_v13  ;;  %vm10866_vm3 = vmxor %vm6210_vm8, %vm6114_vm1  ;;  %v8440_v29 = vld [vmem:[%s9496_s14 + $0x1b4] sm:$0xf0]  ;;  %v10935_v35 = vadd.s32 %v10562_v61, %v5958_v41 }
0x1705   : > { %6695 = vst [vmem:[%s9498_s29 + $0x20] sm:$0xff] %v6455_v48  ;;  %v6456_v0 = vsel %vm6216_vm5, -3.4028235e+38, %v4607_v6  ;;  %8245 = vmatmul.msk.bf16.vlgmr.msrb.gmra.mxu2 %vm4500_vm7, %v10403_v13  ;;  %vm10876_vm5 = vmxor %vm6210_vm8, %vm6115_vm2  ;;  %5017 = vmatpush.bf16.msrb.mxu0 %v7996_v3  ;;  %v7684_v6 = vor.u32 %v8440_v29, %v7683_v26  ;;  %v8400_v48 = vld [vmem:[%s9496_s14 + $0x7c] sm:$0xf]  ;;  %v10983_v9 = vperm.slane %v3463_v16, 0 }
0x1706   : > { %6696 = vst [vmem:[%s9498_s29 + $0x28] sm:$0xff] %v6456_v0  ;;  %8247 = vmatmul.msk.bf16.vlgmr.msrb.gmra.mxu3 %vm4500_vm7, %v10403_v13  ;;  %5053 = vmatpush.bf16.msrb.mxu2 %v8004_v42  ;;  %vm10915_vm1 = vmxor %vm6210_vm8, %vm6116_vm4  ;;  %v7685_v0 = vld [vmem:[%s9496_s14 + $0x1b8] sm:$0xf0]  ;;  %v10929_v42 = vadd.s32 %v10562_v61, %v5957_v23 }
0x1707   : > { %5071 = vmatpush.bf16.msrb.mxu3 %v8008_v53  ;;  %5035 = vmatpush.bf16.msrb.mxu1 %v8000_v45  ;;  %vm6378_vm2 = vmxor %vm6210_vm8, %vm6117_vm6  ;;  %v7688_v33 = vor.u32 %v8400_v48, %v7685_v0  ;;  %v8439_v53 = vld [vmem:[%s9496_s14 + $0x1ac] sm:$0xf0]  ;;  %vm6119_vm6 = vcmp.lt.s32.totalorder %v10935_v35, 16  ;;  %v8019_v45 = vld [vmem:[%s9496_s14 + $0x308] sm:$0xf] }
0x1708   : > { %v4624_v57 = vpop.f32.mrf.mxu2  ;;  %vm6118_vm4 = vcmp.lt.s32.totalorder %v10929_v42, 16 }
0x1709   : > { %v4625_v8 = vadd.f32 %v4624_v57, %v10793_v32  ;;  %v4642_v37 = vpop.f32.mrf.mxu3  ;;  %v4590_v5 = vpop.f32.mrf.mxu0 }
0x170a   : > { %v4643_v39 = vadd.f32 %v4642_v37, %v10799_v30  ;;  %v4591_v22 = vadd.f32 %v4590_v5, %v10759_v12  ;;  %v4608_v47 = vpop.f32.mrf.mxu1  ;;  %5054 = vmatpush.bf16.msrb.mxu2 %v7684_v6  ;;  %v5960_v37 = vadd.s32 1408, %v10548_v7  ;;  %v7675_v5 = vld [vmem:[%s9496_s14 + $0x70] sm:$0xf] }
0x170b   : > { %v6457_v62 = vsel %vm10806_vm9, -3.4028235e+38, %v4625_v8  ;;  %v4609_v52 = vadd.f32 %v4608_v47, %v10764_v18  ;;  %5072 = vmatpush.bf16.msrb.mxu3 %v7688_v33  ;;  %v5959_v8 = vadd.s32 1280, %v10548_v7  ;;  %v8399_v47 = vld [vmem:[%s9496_s14 + $0x74] sm:$0xf]  ;;  %vm6219_vm9 = vmxor %vm6208_vm11, %vm6118_vm4 }
0x170c   : > { %6697 = vst [vmem:[%s9498_s29 + $0x30] sm:$0xff] %v6457_v62  ;;  %v6458_v34 = vsel %vm10816_vm10, -3.4028235e+38, %v4643_v39  ;;  %v6535_v21 = vsel %vm6295_vm12, -3.4028235e+38, %v4591_v22  ;;  %v10943_v39 = vperm.slane %v3460_v60, 0  ;;  %v7676_v22 = vor.u32 %v8439_v53, %v7675_v5  ;;  %vm6220_vm10 = vmxor %vm6208_vm11, %vm6119_vm6 }
0x170d   : > { %6698 = vst [vmem:[%s9498_s29 + $0x38] sm:$0xff] %v6458_v34  ;;  %v6536_v59 = vsel %vm6296_vm13, -3.4028235e+38, %v4609_v52  ;;  %v7677_v62 = vld [vmem:[%s9496_s14 + $0x1b0] sm:$0xf0] }
0x170e   : > { %6775 = vst [vmem:[%s9498_s29 + $0x2a0] sm:$0xff] %v6535_v21  ;;  %v7680_v34 = vor.u32 %v8399_v47, %v7677_v62  ;;  %5018 = vmatpush.bf16.msrb.mxu0 %v7676_v22  ;;  %v8013_v60 = vld [vmem:[%s9496_s14 + $0x440] sm:$0xf0] }
0x170f   : > { %6776 = vst [vmem:[%s9498_s29 + $0x2a8] sm:$0xff] %v6536_v59  ;;  %v10952_v59 = vadd.s32 %v10562_v61, %v5959_v8  ;;  %v8035_v8 = vld [vmem:[%s9496_s14 + $0x318] sm:$0xf] }
0x1710   : > { %v4626_v40 = vpop.f32.mrf.mxu2  ;;  %5036 = vmatpush.bf16.msrb.mxu1 %v7680_v34 }
0x1711   : > { %v4627_v24 = vadd.f32 %v4626_v40, %v10793_v32  ;;  %v4644_v63 = vpop.f32.mrf.mxu3  ;;  %v4593_v1 = vpop.f32.mrf.mxu0  ;;  %v10960_v40 = vadd.s32 %v10562_v61, %v5960_v37  ;;  %vm6120_vm12 = vcmp.lt.s32.totalorder %v10952_v59, 16 }
0x1712   : > { %v4645_v55 = vadd.f32 %v4644_v63, %v10799_v30  ;;  %v4594_v11 = vadd.f32 %v4593_v1, %v10759_v12  ;;  %v4611_v27 = vpop.f32.mrf.mxu1  ;;  %v10977_v1 = vperm.slane %v3462_v25, 0  ;;  %v8442_v25 = vld [vmem:[%s9496_s14 + $0x1c4] sm:$0xf0] }
0x1713   : > { %v6537_v44 = vsel %vm10845_vm0, -3.4028235e+38, %v4627_v24  ;;  %v4612_v17 = vadd.f32 %v4611_v27, %v10764_v18  ;;  %vm6121_vm13 = vcmp.lt.s32.totalorder %v10960_v40, 16  ;;  %vm10991_vm0 = vmxor %vm6208_vm11, %vm6120_vm12 }
0x1714   : > { %6777 = vst [vmem:[%s9498_s29 + $0x2b0] sm:$0xff] %v6537_v44  ;;  %v6538_v51 = vsel %vm10855_vm14, -3.4028235e+38, %v4645_v55  ;;  %v6615_v12 = vsel %vm10866_vm3, -3.4028235e+38, %v4594_v11  ;;  %8242 = vmatmul.msk.bf16.gmra.mxu0 %vm4500_vm7, %v10446_v19  ;;  %8244 = vmatmul.msk.bf16.gmra.mxu1 %vm4500_vm7, %v10446_v19  ;;  %vm11001_vm14 = vmxor %vm6208_vm11, %vm6121_vm13 }
0x1715   : > { %6778 = vst [vmem:[%s9498_s29 + $0x2b8] sm:$0xff] %v6538_v51  ;;  %v6616_v18 = vsel %vm10876_vm5, -3.4028235e+38, %v4612_v17  ;;  %8246 = vmatmul.msk.bf16.gmra.mxu2 %vm4500_vm7, %v10446_v19  ;;  %v8522_v55 = vld [vmem:[%s9496_s14 + $0x444] sm:$0xf0]  ;;  %vm6299_vm3 = vmxor %vm6209_vm15, %vm6118_vm4 }
0x1716   : > { %6855 = vst [vmem:[%s9498_s29 + $0x520] sm:$0xff] %v6615_v12  ;;  %8248 = vmatmul.msk.bf16.gmra.mxu3 %vm4500_vm7, %v10446_v19  ;;  %v8020_v27 = vor.u32 %v8522_v55, %v8019_v45  ;;  %v8021_v44 = vld [vmem:[%s9496_s14 + $0x448] sm:$0xf0]  ;;  %vm6300_vm5 = vmxor %vm6209_vm15, %vm6119_vm6 }
0x1717   : > { %6856 = vst [vmem:[%s9498_s29 + $0x528] sm:$0xff] %v6616_v18  ;;  %v8024_v51 = vor.u32 %v8482_v4, %v8021_v44 }
0x1718   : > { %v4629_v46 = vpop.f32.mrf.mxu2 }
0x1719   : > { %v4630_v14 = vadd.f32 %v4629_v46, %v10793_v32  ;;  %v4647_v15 = vpop.f32.mrf.mxu3  ;;  %v4595_v43 = vpop.f32.mrf.mxu0  ;;  %v3461_v32 = vperm.slane %v10904_v20, 2 }
0x171a   : > { %v4648_v38 = vadd.f32 %v4647_v15, %v10799_v30  ;;  %v4613_v57 = vpop.f32.mrf.mxu1  ;;  %v8521_v15 = vld [vmem:[%s9496_s14 + $0x43c] sm:$0xf0] }
0x171b   : > { %v6617_v28 = vsel %vm10915_vm1, -3.4028235e+38, %v4630_v14  ;;  %v10948_v52 = vperm.slane %v3461_v32, 0  ;;  %vm11029_vm1 = vmxor %vm6209_vm15, %vm6120_vm12  ;;  %v8011_v14 = vld [vmem:[%s9496_s14 + $0x300] sm:$0xf] }
0x171c   : > { %6857 = vst [vmem:[%s9498_s29 + $0x530] sm:$0xff] %v6617_v28  ;;  %v6618_v30 = vsel %vm6378_vm2, -3.4028235e+38, %v4648_v38  ;;  %vm11039_vm2 = vmxor %vm6209_vm15, %vm6121_vm13  ;;  %v8012_v38 = vor.u32 %v8521_v15, %v8011_v14  ;;  %v8481_v57 = vld [vmem:[%s9496_s14 + $0x304] sm:$0xf] }
0x171d   : > { %6858 = vst [vmem:[%s9498_s29 + $0x538] sm:$0xff] %v6618_v30  ;;  %v8016_v37 = vor.u32 %v8481_v57, %v8013_v60  ;;  %v11150_v60 = vld [vmem:[#allocation2] sm:$0xff] }
0x1720   : > { %v4631_v21 = vpop.f32.mrf.mxu2 }
0x1721   : > { %v4649_v54 = vpop.f32.mrf.mxu3  ;;  %v4660_v50 = vpop.f32.mrf.mxu0  ;;  %v5961_v21 = vadd.s32 1536, %v10548_v7 }
0x1722   : > { %v4661_v2 = vadd.f32 %v4660_v50, %v10943_v39  ;;  %v4678_v3 = vpop.f32.mrf.mxu1  ;;  %v5962_v54 = vadd.s32 1664, %v10548_v7  ;;  %v7699_v50 = vld [vmem:[%s9496_s14 + $0x88] sm:$0xf] }
0x1723   : > { %v4679_v56 = vadd.f32 %v4678_v3, %v10948_v52  ;;  %v7700_v16 = vor.u32 %v8442_v25, %v7699_v50  ;;  %v11110_v4 = vadd.s32 %v10562_v61, %v5961_v21 }
0x1724   : > { %v6459_v24 = vsel %vm6219_vm9, -3.4028235e+38, %v4661_v2  ;;  %8249 = vmatmul.msk.bf16.vlgmr.msra.gmra.mxu0 %vm4500_vm7, %v10403_v13  ;;  %8251 = vmatmul.msk.bf16.vlgmr.msra.gmra.mxu1 %vm4500_vm7, %v10403_v13  ;;  %vm11050_vm9 = vmxor %vm6210_vm8, %vm6118_vm4  ;;  %v11116_v44 = vadd.s32 %v10562_v61, %v5962_v54 }
0x1725   : > { %6699 = vst [vmem:[%s9498_s29 + $0x40] sm:$0xff] %v6459_v24  ;;  %v6460_v63 = vsel %vm6220_vm10, -3.4028235e+38, %v4679_v56  ;;  %8253 = vmatmul.msk.bf16.vlgmr.msra.gmra.mxu2 %vm4500_vm7, %v10403_v13  ;;  %vm11060_vm10 = vmxor %vm6210_vm8, %vm6119_vm6  ;;  %5089 = vmatpush.bf16.msra.mxu0 %v8012_v38  ;;  %v8402_v56 = vld [vmem:[%s9496_s14 + $0x8c] sm:$0xf] }
0x1726   : > { %6700 = vst [vmem:[%s9498_s29 + $0x48] sm:$0xff] %v6460_v63  ;;  %8255 = vmatmul.msk.bf16.vlgmr.msra.gmra.mxu3 %vm4500_vm7, %v10403_v13  ;;  %5125 = vmatpush.bf16.msra.mxu2 %v8020_v27  ;;  %vm11096_vm4 = vmxor %vm6210_vm8, %vm6120_vm12  ;;  %v5964_v13 = vadd.s32 1920, %v10548_v7  ;;  %vm6122_vm12 = vcmp.lt.s32.totalorder %v11110_v4, 16  ;;  %v8486_v4 = vld [vmem:[%s9496_s14 + $0x32c] sm:$0xf] }
0x1727   : > { %5143 = vmatpush.bf16.msra.mxu3 %v8024_v51  ;;  %5107 = vmatpush.bf16.msra.mxu1 %v8016_v37  ;;  %vm6382_vm6 = vmxor %vm6210_vm8, %vm6121_vm13  ;;  %v7691_v51 = vld [vmem:[%s9496_s14 + $0x80] sm:$0xf]  ;;  %vm6123_vm13 = vcmp.lt.s32.totalorder %v11116_v44, 16 }
0x1728   : > { %v4696_v17 = vpop.f32.mrf.mxu2  ;;  %v11141_v14 = vadd.s32 %v10562_v61, %v5964_v13 }
0x1729   : > { %v4697_v12 = vadd.f32 %v4696_v17, %v10977_v1  ;;  %v4714_v18 = vpop.f32.mrf.mxu3  ;;  %v4662_v20 = vpop.f32.mrf.mxu0  ;;  %v5963_v17 = vadd.s32 1792, %v10548_v7 }
0x172a   : > { %v4715_v23 = vadd.f32 %v4714_v18, %v10983_v9  ;;  %v4663_v41 = vadd.f32 %v4662_v20, %v10943_v39  ;;  %v4680_v26 = vpop.f32.mrf.mxu1  ;;  %5126 = vmatpush.bf16.msra.mxu2 %v7700_v16 }
0x172b   : > { %v6461_v29 = vsel %vm10991_vm0, -3.4028235e+38, %v4697_v12  ;;  %v4681_v46 = vadd.f32 %v4680_v26, %v10948_v52  ;;  %v8441_v12 = vld [vmem:[%s9496_s14 + $0x1bc] sm:$0xf0]  ;;  %vm6223_vm0 = vmxor %vm6208_vm11, %vm6122_vm12 }
0x172c   : > { %6701 = vst [vmem:[%s9498_s29 + $0x50] sm:$0xff] %v6461_v29  ;;  %v6462_v58 = vsel %vm11001_vm14, -3.4028235e+38, %v4715_v23  ;;  %v6539_v6 = vsel %vm6299_vm3, -3.4028235e+38, %v4663_v41  ;;  %v7692_v20 = vor.u32 %v8441_v12, %v7691_v51  ;;  %vm6224_vm14 = vmxor %vm6208_vm11, %vm6123_vm13 }
0x172d   : > { %6702 = vst [vmem:[%s9498_s29 + $0x58] sm:$0xff] %v6462_v58  ;;  %v6540_v48 = vsel %vm6300_vm5, -3.4028235e+38, %v4681_v46  ;;  %v8401_v23 = vld [vmem:[%s9496_s14 + $0x84] sm:$0xf]  ;;  %v11133_v58 = vadd.s32 %v10562_v61, %v5963_v17  ;;  %vm6125_vm5 = vcmp.lt.s32.totalorder %v11141_v14, 16 }
0x172e   : > { %6779 = vst [vmem:[%s9498_s29 + $0x2c0] sm:$0xff] %v6539_v6  ;;  %v7693_v41 = vld [vmem:[%s9496_s14 + $0x1c0] sm:$0xf0]  ;;  %5090 = vmatpush.bf16.msra.mxu0 %v7692_v20 }
0x172f   : > { %6780 = vst [vmem:[%s9498_s29 + $0x2c8] sm:$0xff] %v6540_v48  ;;  %v7696_v29 = vor.u32 %v8401_v23, %v7693_v41  ;;  %vm6124_vm3 = vcmp.lt.s32.totalorder %v11133_v58, 16 }
0x1730   : > { %v4698_v43 = vpop.f32.mrf.mxu2 }
0x1731   : > { %v4699_v28 = vadd.f32 %v4698_v43, %v10977_v1  ;;  %v4716_v32 = vpop.f32.mrf.mxu3  ;;  %v4665_v30 = vpop.f32.mrf.mxu0  ;;  %5108 = vmatpush.bf16.msra.mxu1 %v7696_v29  ;;  %v11251_v29 = vld [vmem:[%s9494_s11 + $0x10] sm:$0xff] }
0x1732   : > { %v4717_v5 = vadd.f32 %v4716_v32, %v10983_v9  ;;  %v4666_v53 = vadd.f32 %v4665_v30, %v10943_v39  ;;  %v4683_v22 = vpop.f32.mrf.mxu1 }
0x1733   : > { %v6541_v42 = vsel %vm11029_vm1, -3.4028235e+38, %v4699_v28  ;;  %v4684_v62 = vadd.f32 %v4683_v22, %v10948_v52  ;;  %v11085_v52 = vunpack.c.h.bf16 %v10884_v10  ;;  %v7701_v10 = vld [vmem:[%s9496_s14 + $0x1c8] sm:$0xf0]  ;;  %vm11173_vm1 = vmxor %vm6208_vm11, %vm6124_vm3 }
0x1734   : > { %6781 = vst [vmem:[%s9498_s29 + $0x2d0] sm:$0xff] %v6541_v42  ;;  %v6542_v35 = vsel %vm11039_vm2, -3.4028235e+38, %v4717_v5  ;;  %v6619_v39 = vsel %vm11050_vm9, -3.4028235e+38, %v4666_v53  ;;  %8250 = vmatmul.msk.bf16.gmra.mxu0 %vm4500_vm7, %v10446_v19  ;;  %8252 = vmatmul.msk.bf16.gmra.mxu1 %vm4500_vm7, %v10446_v19  ;;  %v7704_v45 = vor.u32 %v8402_v56, %v7701_v10  ;;  %vm11183_vm2 = vmxor %vm6208_vm11, %vm6125_vm5 }
0x1735   : > { %6782 = vst [vmem:[%s9498_s29 + $0x2d8] sm:$0xff] %v6542_v35  ;;  %v6620_v34 = vsel %vm11060_vm10, -3.4028235e+38, %v4684_v62  ;;  %8254 = vmatmul.msk.bf16.gmra.mxu2 %vm4500_vm7, %v10446_v19  ;;  %v3464_v27 = vperm.slane %v11085_v52, 0  ;;  %v3466_v0 = vperm.slane %v11085_v52, 4  ;;  %v3467_v33 = vperm.slane %v11085_v52, 6  ;;  %vm6303_vm9 = vmxor %vm6209_vm15, %vm6122_vm12 }
0x1736   : > { %6859 = vst [vmem:[%s9498_s29 + $0x540] sm:$0xff] %v6619_v39  ;;  %8256 = vmatmul.msk.bf16.gmra.mxu3 %vm4500_vm7, %v10446_v19  ;;  %v8524_v5 = vld [vmem:[%s9496_s14 + $0x454] sm:$0xf0]  ;;  %v8484_v53 = vld [vmem:[%s9496_s14 + $0x31c] sm:$0xf]  ;;  %vm6304_vm10 = vmxor %vm6209_vm15, %vm6123_vm13 }
0x1737   : > { %6860 = vst [vmem:[%s9498_s29 + $0x548] sm:$0xff] %v6620_v34  ;;  %5144 = vmatpush.bf16.msra.mxu3 %v7704_v45  ;;  %v11124_v18 = vperm.slane %v3464_v27, 0  ;;  %v11160_v32 = vperm.slane %v3466_v0, 0  ;;  %v11166_v30 = vperm.slane %v3467_v33, 0  ;;  %v8036_v42 = vor.u32 %v8524_v5, %v8035_v8  ;;  %v8037_v62 = vld [vmem:[%s9496_s14 + $0x458] sm:$0xf0] }
0x1738   : > { %v4701_v2 = vpop.f32.mrf.mxu2  ;;  %v8029_v27 = vld [vmem:[%s9496_s14 + $0x450] sm:$0xf0]  ;;  %v7715_v0 = vld [vmem:[%s9496_s14 + $0x98] sm:$0xf] }
0x1739   : > { %v4702_v24 = vadd.f32 %v4701_v2, %v10977_v1  ;;  %v4719_v63 = vpop.f32.mrf.mxu3  ;;  %v4667_v59 = vpop.f32.mrf.mxu0  ;;  %v3465_v1 = vperm.slane %v11085_v52, 2  ;;  %v8040_v52 = vor.u32 %v8484_v53, %v8037_v62 }
0x173a   : > { %v4720_v55 = vadd.f32 %v4719_v63, %v10983_v9  ;;  %v4685_v11 = vpop.f32.mrf.mxu1  ;;  %v8523_v63 = vld [vmem:[%s9496_s14 + $0x44c] sm:$0xf0] }
0x173b   : > { %v6621_v40 = vsel %vm11096_vm4, -3.4028235e+38, %v4702_v24  ;;  %v11129_v26 = vperm.slane %v3465_v1, 0  ;;  %vm11212_vm4 = vmxor %vm6209_vm15, %vm6124_vm3  ;;  %v8027_v24 = vld [vmem:[%s9496_s14 + $0x310] sm:$0xf] }
0x173c   : > { %6861 = vst [vmem:[%s9498_s29 + $0x550] sm:$0xff] %v6621_v40  ;;  %v6622_v9 = vsel %vm6382_vm6, -3.4028235e+38, %v4720_v55  ;;  %vm11222_vm6 = vmxor %vm6209_vm15, %vm6125_vm5  ;;  %v8028_v55 = vor.u32 %v8523_v63, %v8027_v24  ;;  %v8483_v11 = vld [vmem:[%s9496_s14 + $0x314] sm:$0xf] }
0x173d   : > { %6862 = vst [vmem:[%s9498_s29 + $0x558] sm:$0xff] %v6622_v9  ;;  %v8032_v13 = vor.u32 %v8483_v11, %v8029_v27 }
0x1740   : > { %v4703_v46 = vpop.f32.mrf.mxu2 }
0x1741   : > { %v4721_v6 = vpop.f32.mrf.mxu3  ;;  %v4732_v48 = vpop.f32.mrf.mxu0  ;;  %v11271_v46 = vunpack.c.l.bf16 %v11251_v29 }
0x1742   : > { %v4733_v15 = vadd.f32 %v4732_v48, %v11124_v18  ;;  %v4750_v43 = vpop.f32.mrf.mxu1  ;;  %v5965_v6 = vadd.s32 2048, %v10548_v7  ;;  %v5966_v48 = vadd.s32 2176, %v10548_v7 }
0x1743   : > { %v4751_v38 = vadd.f32 %v4750_v43, %v11129_v26  ;;  %v3468_v47 = vperm.slane %v11271_v46, 0  ;;  %v3470_v63 = vperm.slane %v11271_v46, 4  ;;  %v3471_v11 = vperm.slane %v11271_v46, 6 }
0x1744   : > { %v6463_v57 = vsel %vm6223_vm0, -3.4028235e+38, %v4733_v15  ;;  %8257 = vmatmul.msk.bf16.vlgmr.msrb.gmra.mxu0 %vm4500_vm7, %v11150_v60  ;;  %8259 = vmatmul.msk.bf16.vlgmr.msrb.gmra.mxu1 %vm4500_vm7, %v11150_v60  ;;  %vm11233_vm0 = vmxor %vm6210_vm8, %vm6122_vm12  ;;  %v8444_v15 = vld [vmem:[%s9496_s14 + $0x1d4] sm:$0xf0]  ;;  %v11302_v62 = vadd.s32 %v10562_v61, %v5966_v48 }
0x1745   : > { %6703 = vst [vmem:[%s9498_s29 + $0x60] sm:$0xff] %v6463_v57  ;;  %v6464_v28 = vsel %vm6224_vm14, -3.4028235e+38, %v4751_v38  ;;  %8261 = vmatmul.msk.bf16.vlgmr.msrb.gmra.mxu2 %vm4500_vm7, %v11150_v60  ;;  %vm11243_vm14 = vmxor %vm6210_vm8, %vm6123_vm13  ;;  %5161 = vmatpush.bf16.msrb.mxu0 %v8028_v55  ;;  %v7716_v38 = vor.u32 %v8444_v15, %v7715_v0  ;;  %v8404_v57 = vld [vmem:[%s9496_s14 + $0x9c] sm:$0xf]  ;;  %v11350_v17 = vperm.slane %v3471_v11, 0 }
0x1746   : > { %6704 = vst [vmem:[%s9498_s29 + $0x68] sm:$0xff] %v6464_v28  ;;  %8263 = vmatmul.msk.bf16.vlgmr.msrb.gmra.mxu3 %vm4500_vm7, %v11150_v60  ;;  %5197 = vmatpush.bf16.msrb.mxu2 %v8036_v42  ;;  %vm11282_vm12 = vmxor %vm6210_vm8, %vm6124_vm3  ;;  %v7717_v28 = vld [vmem:[%s9496_s14 + $0x1d8] sm:$0xf0]  ;;  %v11296_v42 = vadd.s32 %v10562_v61, %v5965_v6 }
0x1747   : > { %5215 = vmatpush.bf16.msrb.mxu3 %v8040_v52  ;;  %5179 = vmatpush.bf16.msrb.mxu1 %v8032_v13  ;;  %vm6386_vm13 = vmxor %vm6210_vm8, %vm6125_vm5  ;;  %v7720_v5 = vor.u32 %v8404_v57, %v7717_v28  ;;  %v8443_v52 = vld [vmem:[%s9496_s14 + $0x1cc] sm:$0xf0]  ;;  %vm6127_vm5 = vcmp.lt.s32.totalorder %v11302_v62, 16  ;;  %v8051_v13 = vld [vmem:[%s9496_s14 + $0x328] sm:$0xf] }
0x1748   : > { %v4768_v22 = vpop.f32.mrf.mxu2  ;;  %vm6126_vm3 = vcmp.lt.s32.totalorder %v11296_v42, 16 }
0x1749   : > { %v4769_v35 = vadd.f32 %v4768_v22, %v11160_v32  ;;  %v4786_v39 = vpop.f32.mrf.mxu3  ;;  %v4734_v34 = vpop.f32.mrf.mxu0 }
0x174a   : > { %v4787_v21 = vadd.f32 %v4786_v39, %v11166_v30  ;;  %v4735_v54 = vadd.f32 %v4734_v34, %v11124_v18  ;;  %v4752_v50 = vpop.f32.mrf.mxu1  ;;  %5198 = vmatpush.bf16.msrb.mxu2 %v7716_v38  ;;  %v5968_v39 = vadd.s32 2432, %v10548_v7  ;;  %v7707_v34 = vld [vmem:[%s9496_s14 + $0x90] sm:$0xf] }
0x174b   : > { %v6465_v25 = vsel %vm11173_vm1, -3.4028235e+38, %v4769_v35  ;;  %v4753_v2 = vadd.f32 %v4752_v50, %v11129_v26  ;;  %5216 = vmatpush.bf16.msrb.mxu3 %v7720_v5  ;;  %v5967_v35 = vadd.s32 2304, %v10548_v7  ;;  %v8403_v50 = vld [vmem:[%s9496_s14 + $0x94] sm:$0xf]  ;;  %vm6227_vm1 = vmxor %vm6208_vm11, %vm6126_vm3 }
0x174c   : > { %6705 = vst [vmem:[%s9498_s29 + $0x70] sm:$0xff] %v6465_v25  ;;  %v6466_v3 = vsel %vm11183_vm2, -3.4028235e+38, %v4787_v21  ;;  %v6543_v16 = vsel %vm6303_vm9, -3.4028235e+38, %v4735_v54  ;;  %v11310_v21 = vperm.slane %v3468_v47, 0  ;;  %v7708_v54 = vor.u32 %v8443_v52, %v7707_v34  ;;  %vm6228_vm2 = vmxor %vm6208_vm11, %vm6127_vm5 }
0x174d   : > { %6706 = vst [vmem:[%s9498_s29 + $0x78] sm:$0xff] %v6466_v3  ;;  %v6544_v56 = vsel %vm6304_vm10, -3.4028235e+38, %v4753_v2  ;;  %v7709_v25 = vld [vmem:[%s9496_s14 + $0x1d0] sm:$0xf0] }
0x174e   : > { %6783 = vst [vmem:[%s9498_s29 + $0x2e0] sm:$0xff] %v6543_v16  ;;  %v7712_v3 = vor.u32 %v8403_v50, %v7709_v25  ;;  %5162 = vmatpush.bf16.msrb.mxu0 %v7708_v54  ;;  %v8485_v47 = vld [vmem:[%s9496_s14 + $0x324] sm:$0xf] }
0x174f   : > { %6784 = vst [vmem:[%s9498_s29 + $0x2e8] sm:$0xff] %v6544_v56  ;;  %v11319_v56 = vadd.s32 %v10562_v61, %v5967_v35 }
0x1750   : > { %v4770_v59 = vpop.f32.mrf.mxu2  ;;  %5180 = vmatpush.bf16.msrb.mxu1 %v7712_v3 }
0x1751   : > { %v4771_v40 = vadd.f32 %v4770_v59, %v11160_v32  ;;  %v4788_v1 = vpop.f32.mrf.mxu3  ;;  %v4737_v9 = vpop.f32.mrf.mxu0  ;;  %v11327_v59 = vadd.s32 %v10562_v61, %v5968_v39  ;;  %vm6128_vm9 = vcmp.lt.s32.totalorder %v11319_v56, 16  ;;  %v8067_v39 = vld [vmem:[%s9496_s14 + $0x338] sm:$0xf] }
0x1752   : > { %v4789_v51 = vadd.f32 %v4788_v1, %v11166_v30  ;;  %v4738_v12 = vadd.f32 %v4737_v9, %v11124_v18  ;;  %v4755_v20 = vpop.f32.mrf.mxu1  ;;  %v11344_v9 = vperm.slane %v3470_v63, 0  ;;  %v7731_v63 = vld [vmem:[%s9496_s14 + $0xa8] sm:$0xf] }
0x1753   : > { %v6545_v23 = vsel %vm11212_vm4, -3.4028235e+38, %v4771_v40  ;;  %v4756_v41 = vadd.f32 %v4755_v20, %v11129_v26  ;;  %vm6129_vm10 = vcmp.lt.s32.totalorder %v11327_v59, 16  ;;  %vm11358_vm4 = vmxor %vm6208_vm11, %vm6128_vm9 }
0x1754   : > { %6785 = vst [vmem:[%s9498_s29 + $0x2f0] sm:$0xff] %v6545_v23  ;;  %v6546_v44 = vsel %vm11222_vm6, -3.4028235e+38, %v4789_v51  ;;  %v6623_v18 = vsel %vm11233_vm0, -3.4028235e+38, %v4738_v12  ;;  %8258 = vmatmul.msk.bf16.gmra.mxu0 %vm4500_vm7, %v10446_v19  ;;  %8260 = vmatmul.msk.bf16.gmra.mxu1 %vm4500_vm7, %v10446_v19  ;;  %vm11368_vm6 = vmxor %vm6208_vm11, %vm6129_vm10 }
0x1755   : > { %6786 = vst [vmem:[%s9498_s29 + $0x2f8] sm:$0xff] %v6546_v44  ;;  %v6624_v26 = vsel %vm11243_vm14, -3.4028235e+38, %v4756_v41  ;;  %8262 = vmatmul.msk.bf16.gmra.mxu2 %vm4500_vm7, %v10446_v19  ;;  %v8526_v51 = vld [vmem:[%s9496_s14 + $0x464] sm:$0xf0]  ;;  %vm6307_vm0 = vmxor %vm6209_vm15, %vm6126_vm3  ;;  %v5971_v44 = vadd.s32 2816, %v10548_v7 }
0x1756   : > { %6863 = vst [vmem:[%s9498_s29 + $0x560] sm:$0xff] %v6623_v18  ;;  %8264 = vmatmul.msk.bf16.gmra.mxu3 %vm4500_vm7, %v10446_v19  ;;  %v8052_v20 = vor.u32 %v8526_v51, %v8051_v13  ;;  %v8053_v23 = vld [vmem:[%s9496_s14 + $0x468] sm:$0xf0]  ;;  %vm6308_vm14 = vmxor %vm6209_vm15, %vm6127_vm5 }
0x1757   : > { %6864 = vst [vmem:[%s9498_s29 + $0x568] sm:$0xff] %v6624_v26  ;;  %v8056_v18 = vor.u32 %v8486_v4, %v8053_v23 }
0x1758   : > { %v4773_v43 = vpop.f32.mrf.mxu2 }
0x1759   : > { %v4774_v8 = vadd.f32 %v4773_v43, %v11160_v32  ;;  %v4791_v37 = vpop.f32.mrf.mxu3  ;;  %v4739_v58 = vpop.f32.mrf.mxu0  ;;  %v3469_v32 = vperm.slane %v11271_v46, 2 }
0x175a   : > { %v4792_v53 = vadd.f32 %v4791_v37, %v11166_v30  ;;  %v4757_v22 = vpop.f32.mrf.mxu1  ;;  %v8043_v37 = vld [vmem:[%s9496_s14 + $0x320] sm:$0xf] }
0x175b   : > { %v6625_v14 = vsel %vm11282_vm12, -3.4028235e+38, %v4774_v8  ;;  %v11315_v2 = vperm.slane %v3469_v32, 0  ;;  %vm11396_vm12 = vmxor %vm6209_vm15, %vm6128_vm9  ;;  %v8525_v58 = vld [vmem:[%s9496_s14 + $0x45c] sm:$0xf0] }
0x175c   : > { %6865 = vst [vmem:[%s9498_s29 + $0x570] sm:$0xff] %v6625_v14  ;;  %v6626_v30 = vsel %vm6386_vm13, -3.4028235e+38, %v4792_v53  ;;  %vm11406_vm13 = vmxor %vm6209_vm15, %vm6129_vm10  ;;  %v8044_v22 = vor.u32 %v8525_v58, %v8043_v37  ;;  %v8045_v14 = vld [vmem:[%s9496_s14 + $0x460] sm:$0xf0] }
0x175d   : > { %6866 = vst [vmem:[%s9498_s29 + $0x578] sm:$0xff] %v6626_v30  ;;  %v8048_v34 = vor.u32 %v8485_v47, %v8045_v14 }
0x1760   : > { %v4775_v16 = vpop.f32.mrf.mxu2 }
0x1761   : > { %v4793_v10 = vpop.f32.mrf.mxu3  ;;  %v4804_v24 = vpop.f32.mrf.mxu0 }
0x1762   : > { %v4805_v45 = vadd.f32 %v4804_v24, %v11310_v21  ;;  %v4822_v55 = vpop.f32.mrf.mxu1  ;;  %v5969_v10 = vadd.s32 2560, %v10548_v7  ;;  %v5970_v24 = vadd.s32 2688, %v10548_v7 }
0x1763   : > { %v4823_v27 = vadd.f32 %v4822_v55, %v11315_v2 }
0x1764   : > { %v6467_v40 = vsel %vm6227_vm1, -3.4028235e+38, %v4805_v45  ;;  %8265 = vmatmul.msk.bf16.vlgmr.msra.gmra.mxu0 %vm4500_vm7, %v11150_v60  ;;  %8267 = vmatmul.msk.bf16.vlgmr.msra.gmra.mxu1 %vm4500_vm7, %v11150_v60  ;;  %vm11417_vm1 = vmxor %vm6210_vm8, %vm6126_vm3  ;;  %v8446_v45 = vld [vmem:[%s9496_s14 + $0x1e4] sm:$0xf0]  ;;  %v11477_v23 = vadd.s32 %v10562_v61, %v5969_v10 }
0x1765   : > { %6707 = vst [vmem:[%s9498_s29 + $0x80] sm:$0xff] %v6467_v40  ;;  %v6468_v1 = vsel %vm6228_vm2, -3.4028235e+38, %v4823_v27  ;;  %8269 = vmatmul.msk.bf16.vlgmr.msra.gmra.mxu2 %vm4500_vm7, %v11150_v60  ;;  %vm11427_vm2 = vmxor %vm6210_vm8, %vm6127_vm5  ;;  %5233 = vmatpush.bf16.msra.mxu0 %v8044_v22  ;;  %v7732_v27 = vor.u32 %v8446_v45, %v7731_v63  ;;  %v8406_v40 = vld [vmem:[%s9496_s14 + $0xac] sm:$0xf] }
0x1766   : > { %6708 = vst [vmem:[%s9498_s29 + $0x88] sm:$0xff] %v6468_v1  ;;  %8271 = vmatmul.msk.bf16.vlgmr.msra.gmra.mxu3 %vm4500_vm7, %v11150_v60  ;;  %5269 = vmatpush.bf16.msra.mxu2 %v8052_v20  ;;  %vm11463_vm3 = vmxor %vm6210_vm8, %vm6128_vm9  ;;  %vm6130_vm9 = vcmp.lt.s32.totalorder %v11477_v23, 16  ;;  %v8490_v23 = vld [vmem:[%s9496_s14 + $0x34c] sm:$0xf] }
0x1767   : > { %5287 = vmatpush.bf16.msra.mxu3 %v8056_v18  ;;  %5251 = vmatpush.bf16.msra.mxu1 %v8048_v34  ;;  %vm6390_vm5 = vmxor %vm6210_vm8, %vm6129_vm10  ;;  %v5972_v18 = vadd.s32 2944, %v10548_v7 }
0x1768   : > { %v4840_v41 = vpop.f32.mrf.mxu2 }
0x1769   : > { %v4841_v26 = vadd.f32 %v4840_v41, %v11344_v9  ;;  %v4858_v46 = vpop.f32.mrf.mxu3  ;;  %v4806_v6 = vpop.f32.mrf.mxu0  ;;  %v11483_v41 = vadd.s32 %v10562_v61, %v5970_v24  ;;  %v11508_v58 = vadd.s32 %v10562_v61, %v5972_v18 }
0x176a   : > { %v4859_v48 = vadd.f32 %v4858_v46, %v11350_v17  ;;  %v4807_v0 = vadd.f32 %v4806_v6, %v11310_v21  ;;  %v4824_v15 = vpop.f32.mrf.mxu1  ;;  %5270 = vmatpush.bf16.msra.mxu2 %v7732_v27  ;;  %v8445_v46 = vld [vmem:[%s9496_s14 + $0x1dc] sm:$0xf0] }
0x176b   : > { %v6469_v43 = vsel %vm11358_vm4, -3.4028235e+38, %v4841_v26  ;;  %v4825_v33 = vadd.f32 %v4824_v15, %v11315_v2  ;;  %v7723_v26 = vld [vmem:[%s9496_s14 + $0xa0] sm:$0xf]  ;;  %v7725_v15 = vld [vmem:[%s9496_s14 + $0x1e0] sm:$0xf0]  ;;  %vm6231_vm4 = vmxor %vm6208_vm11, %vm6130_vm9 }
0x176c   : > { %6709 = vst [vmem:[%s9498_s29 + $0x90] sm:$0xff] %v6469_v43  ;;  %v6470_v38 = vsel %vm11368_vm6, -3.4028235e+38, %v4859_v48  ;;  %v6547_v57 = vsel %vm6307_vm0, -3.4028235e+38, %v4807_v0  ;;  %v7724_v48 = vor.u32 %v8445_v46, %v7723_v26  ;;  %vm6131_vm10 = vcmp.lt.s32.totalorder %v11483_v41, 16 }
0x176d   : > { %6710 = vst [vmem:[%s9498_s29 + $0x98] sm:$0xff] %v6470_v38  ;;  %v6548_v28 = vsel %vm6308_vm14, -3.4028235e+38, %v4825_v33  ;;  %v8405_v0 = vld [vmem:[%s9496_s14 + $0xa4] sm:$0xf]  ;;  %vm6232_vm6 = vmxor %vm6208_vm11, %vm6131_vm10  ;;  %vm6133_vm14 = vcmp.lt.s32.totalorder %v11508_v58, 16 }
0x176e   : > { %6787 = vst [vmem:[%s9498_s29 + $0x300] sm:$0xff] %v6547_v57  ;;  %v7728_v33 = vor.u32 %v8405_v0, %v7725_v15  ;;  %v11500_v57 = vadd.s32 %v10562_v61, %v5971_v44  ;;  %5234 = vmatpush.bf16.msra.mxu0 %v7724_v48 }
0x176f   : > { %6788 = vst [vmem:[%s9498_s29 + $0x308] sm:$0xff] %v6548_v28 }
0x1770   : > { %v4842_v5 = vpop.f32.mrf.mxu2  ;;  %5252 = vmatpush.bf16.msra.mxu1 %v7728_v33  ;;  %vm6132_vm0 = vcmp.lt.s32.totalorder %v11500_v57, 16  ;;  %v11616_v33 = vld [vmem:[%s9494_s11 + $0x18] sm:$0xff] }
0x1771   : > { %v4843_v32 = vadd.f32 %v4842_v5, %v11344_v9  ;;  %v4860_v30 = vpop.f32.mrf.mxu3  ;;  %v4809_v35 = vpop.f32.mrf.mxu0 }
0x1772   : > { %v4861_v52 = vadd.f32 %v4860_v30, %v11350_v17  ;;  %v4810_v54 = vadd.f32 %v4809_v35, %v11310_v21  ;;  %v4827_v50 = vpop.f32.mrf.mxu1 }
0x1773   : > { %v6549_v42 = vsel %vm11396_vm12, -3.4028235e+38, %v4843_v32  ;;  %v4828_v3 = vadd.f32 %v4827_v50, %v11315_v2  ;;  %v11452_v2 = vunpack.c.h.bf16 %v11251_v29  ;;  %v7733_v29 = vld [vmem:[%s9496_s14 + $0x1e8] sm:$0xf0]  ;;  %vm11538_vm12 = vmxor %vm6208_vm11, %vm6132_vm0 }
0x1774   : > { %6789 = vst [vmem:[%s9498_s29 + $0x310] sm:$0xff] %v6549_v42  ;;  %v6550_v62 = vsel %vm11406_vm13, -3.4028235e+38, %v4861_v52  ;;  %v6627_v21 = vsel %vm11417_vm1, -3.4028235e+38, %v4810_v54  ;;  %8266 = vmatmul.msk.bf16.gmra.mxu0 %vm4500_vm7, %v10446_v19  ;;  %8268 = vmatmul.msk.bf16.gmra.mxu1 %vm4500_vm7, %v10446_v19  ;;  %v7736_v51 = vor.u32 %v8406_v40, %v7733_v29  ;;  %vm11548_vm13 = vmxor %vm6208_vm11, %vm6133_vm14 }
0x1775   : > { %6790 = vst [vmem:[%s9498_s29 + $0x318] sm:$0xff] %v6550_v62  ;;  %v6628_v16 = vsel %vm11427_vm2, -3.4028235e+38, %v4828_v3  ;;  %8270 = vmatmul.msk.bf16.gmra.mxu2 %vm4500_vm7, %v10446_v19  ;;  %v3472_v4 = vperm.slane %v11452_v2, 0  ;;  %v3474_v37 = vperm.slane %v11452_v2, 4  ;;  %v3475_v22 = vperm.slane %v11452_v2, 6  ;;  %vm6311_vm1 = vmxor %vm6209_vm15, %vm6130_vm9 }
0x1776   : > { %6867 = vst [vmem:[%s9498_s29 + $0x580] sm:$0xff] %v6627_v21  ;;  %8272 = vmatmul.msk.bf16.gmra.mxu3 %vm4500_vm7, %v10446_v19  ;;  %v8528_v52 = vld [vmem:[%s9496_s14 + $0x474] sm:$0xf0]  ;;  %v8488_v54 = vld [vmem:[%s9496_s14 + $0x33c] sm:$0xf]  ;;  %vm6312_vm2 = vmxor %vm6209_vm15, %vm6131_vm10 }
0x1777   : > { %6868 = vst [vmem:[%s9498_s29 + $0x588] sm:$0xff] %v6628_v16  ;;  %5288 = vmatpush.bf16.msra.mxu3 %v7736_v51  ;;  %v11491_v6 = vperm.slane %v3472_v4, 0  ;;  %v11525_v30 = vperm.slane %v3474_v37, 0  ;;  %v11531_v35 = vperm.slane %v3475_v22, 0  ;;  %v8068_v42 = vor.u32 %v8528_v52, %v8067_v39  ;;  %v8069_v3 = vld [vmem:[%s9496_s14 + $0x478] sm:$0xf0] }
0x1778   : > { %v4845_v55 = vpop.f32.mrf.mxu2  ;;  %v8061_v4 = vld [vmem:[%s9496_s14 + $0x470] sm:$0xf0]  ;;  %v7747_v37 = vld [vmem:[%s9496_s14 + $0xb8] sm:$0xf] }
0x1779   : > { %v4846_v1 = vadd.f32 %v4845_v55, %v11344_v9  ;;  %v4863_v13 = vpop.f32.mrf.mxu3  ;;  %v4811_v56 = vpop.f32.mrf.mxu0  ;;  %v3473_v9 = vperm.slane %v11452_v2, 2  ;;  %v8072_v2 = vor.u32 %v8488_v54, %v8069_v3 }
0x177a   : > { %v4864_v12 = vadd.f32 %v4863_v13, %v11350_v17  ;;  %v4829_v20 = vpop.f32.mrf.mxu1  ;;  %v8527_v13 = vld [vmem:[%s9496_s14 + $0x46c] sm:$0xf0] }
0x177b   : > { %v6629_v59 = vsel %vm11463_vm3, -3.4028235e+38, %v4846_v1  ;;  %v11496_v43 = vperm.slane %v3473_v9, 0  ;;  %vm11577_vm3 = vmxor %vm6209_vm15, %vm6132_vm0  ;;  %v8059_v1 = vld [vmem:[%s9496_s14 + $0x330] sm:$0xf] }
0x177c   : > { %6869 = vst [vmem:[%s9498_s29 + $0x590] sm:$0xff] %v6629_v59  ;;  %v6630_v17 = vsel %vm6390_vm5, -3.4028235e+38, %v4864_v12  ;;  %vm11587_vm5 = vmxor %vm6209_vm15, %vm6133_vm14  ;;  %v8060_v12 = vor.u32 %v8527_v13, %v8059_v1  ;;  %v8487_v20 = vld [vmem:[%s9496_s14 + $0x334] sm:$0xf] }
0x177d   : > { %6870 = vst [vmem:[%s9498_s29 + $0x598] sm:$0xff] %v6630_v17  ;;  %v8064_v18 = vor.u32 %v8487_v20, %v8061_v4 }
0x1780   : > { %v4847_v38 = vpop.f32.mrf.mxu2 }
0x1781   : > { %v4865_v28 = vpop.f32.mrf.mxu3  ;;  %v4876_v8 = vpop.f32.mrf.mxu0  ;;  %v11636_v38 = vunpack.c.l.bf16 %v11616_v33 }
0x1782   : > { %v4877_v5 = vadd.f32 %v4876_v8, %v11491_v6  ;;  %v4894_v53 = vpop.f32.mrf.mxu1  ;;  %v5973_v28 = vadd.s32 3072, %v10548_v7  ;;  %v5974_v8 = vadd.s32 3200, %v10548_v7 }
0x1783   : > { %v4895_v47 = vadd.f32 %v4894_v53, %v11496_v43  ;;  %v3476_v25 = vperm.slane %v11636_v38, 0  ;;  %v3478_v13 = vperm.slane %v11636_v38, 4  ;;  %v3479_v20 = vperm.slane %v11636_v38, 6 }
0x1784   : > { %v6471_v14 = vsel %vm6231_vm4, -3.4028235e+38, %v4877_v5  ;;  %8273 = vmatmul.msk.bf16.vlgmr.msrb.gmra.mxu0 %vm4500_vm7, %v11150_v60  ;;  %8275 = vmatmul.msk.bf16.vlgmr.msrb.gmra.mxu1 %vm4500_vm7, %v11150_v60  ;;  %vm11598_vm4 = vmxor %vm6210_vm8, %vm6130_vm9  ;;  %v8448_v5 = vld [vmem:[%s9496_s14 + $0x1f4] sm:$0xf0]  ;;  %v11667_v3 = vadd.s32 %v10562_v61, %v5974_v8 }
0x1785   : > { %6711 = vst [vmem:[%s9498_s29 + $0xa0] sm:$0xff] %v6471_v14  ;;  %v6472_v32 = vsel %vm6232_vm6, -3.4028235e+38, %v4895_v47  ;;  %8277 = vmatmul.msk.bf16.vlgmr.msrb.gmra.mxu2 %vm4500_vm7, %v11150_v60  ;;  %vm11608_vm6 = vmxor %vm6210_vm8, %vm6131_vm10  ;;  %5305 = vmatpush.bf16.msrb.mxu0 %v8060_v12  ;;  %v7748_v47 = vor.u32 %v8448_v5, %v7747_v37  ;;  %v8408_v14 = vld [vmem:[%s9496_s14 + $0xbc] sm:$0xf]  ;;  %v11715_v44 = vperm.slane %v3479_v20, 0 }
0x1786   : > { %6712 = vst [vmem:[%s9498_s29 + $0xa8] sm:$0xff] %v6472_v32  ;;  %8279 = vmatmul.msk.bf16.vlgmr.msrb.gmra.mxu3 %vm4500_vm7, %v11150_v60  ;;  %5341 = vmatpush.bf16.msrb.mxu2 %v8068_v42  ;;  %vm11647_vm9 = vmxor %vm6210_vm8, %vm6132_vm0  ;;  %v7749_v32 = vld [vmem:[%s9496_s14 + $0x1f8] sm:$0xf0]  ;;  %v11661_v42 = vadd.s32 %v10562_v61, %v5973_v28 }
0x1787   : > { %5359 = vmatpush.bf16.msrb.mxu3 %v8072_v2  ;;  %5323 = vmatpush.bf16.msrb.mxu1 %v8064_v18  ;;  %vm6394_vm10 = vmxor %vm6210_vm8, %vm6133_vm14  ;;  %v7752_v52 = vor.u32 %v8408_v14, %v7749_v32  ;;  %v8447_v2 = vld [vmem:[%s9496_s14 + $0x1ec] sm:$0xf0]  ;;  %vm6135_vm14 = vcmp.lt.s32.totalorder %v11667_v3, 16  ;;  %v8083_v18 = vld [vmem:[%s9496_s14 + $0x348] sm:$0xf] }
0x1788   : > { %v4912_v50 = vpop.f32.mrf.mxu2  ;;  %vm6134_vm0 = vcmp.lt.s32.totalorder %v11661_v42, 16 }
0x1789   : > { %v4913_v62 = vadd.f32 %v4912_v50, %v11525_v30  ;;  %v4930_v21 = vpop.f32.mrf.mxu3  ;;  %v4878_v16 = vpop.f32.mrf.mxu0 }
0x178a   : > { %v4931_v10 = vadd.f32 %v4930_v21, %v11531_v35  ;;  %v4879_v24 = vadd.f32 %v4878_v16, %v11491_v6  ;;  %v4896_v63 = vpop.f32.mrf.mxu1  ;;  %5342 = vmatpush.bf16.msrb.mxu2 %v7748_v47  ;;  %v5976_v21 = vadd.s32 3456, %v10548_v7  ;;  %v7739_v16 = vld [vmem:[%s9496_s14 + $0xb0] sm:$0xf] }
0x178b   : > { %v6473_v45 = vsel %vm11538_vm12, -3.4028235e+38, %v4913_v62  ;;  %v4897_v55 = vadd.f32 %v4896_v63, %v11496_v43  ;;  %5360 = vmatpush.bf16.msrb.mxu3 %v7752_v52  ;;  %v5975_v62 = vadd.s32 3328, %v10548_v7  ;;  %v8407_v63 = vld [vmem:[%s9496_s14 + $0xb4] sm:$0xf]  ;;  %vm6235_vm12 = vmxor %vm6208_vm11, %vm6134_vm0 }
0x178c   : > { %6713 = vst [vmem:[%s9498_s29 + $0xb0] sm:$0xff] %v6473_v45  ;;  %v6474_v11 = vsel %vm11548_vm13, -3.4028235e+38, %v4931_v10  ;;  %v6551_v27 = vsel %vm6311_vm1, -3.4028235e+38, %v4879_v24  ;;  %v11675_v10 = vperm.slane %v3476_v25, 0  ;;  %v7740_v24 = vor.u32 %v8447_v2, %v7739_v16  ;;  %vm6236_vm13 = vmxor %vm6208_vm11, %vm6135_vm14 }
0x178d   : > { %6714 = vst [vmem:[%s9498_s29 + $0xb8] sm:$0xff] %v6474_v11  ;;  %v6552_v40 = vsel %vm6312_vm2, -3.4028235e+38, %v4897_v55  ;;  %v7741_v45 = vld [vmem:[%s9496_s14 + $0x1f0] sm:$0xf0] }
0x178e   : > { %6791 = vst [vmem:[%s9498_s29 + $0x320] sm:$0xff] %v6551_v27  ;;  %v7744_v11 = vor.u32 %v8407_v63, %v7741_v45  ;;  %5306 = vmatpush.bf16.msrb.mxu0 %v7740_v24  ;;  %v8489_v25 = vld [vmem:[%s9496_s14 + $0x344] sm:$0xf] }
0x178f   : > { %6792 = vst [vmem:[%s9498_s29 + $0x328] sm:$0xff] %v6552_v40  ;;  %v11684_v40 = vadd.s32 %v10562_v61, %v5975_v62 }
0x1790   : > { %v4914_v56 = vpop.f32.mrf.mxu2  ;;  %5324 = vmatpush.bf16.msrb.mxu1 %v7744_v11 }
0x1791   : > { %v4915_v59 = vadd.f32 %v4914_v56, %v11525_v30  ;;  %v4932_v9 = vpop.f32.mrf.mxu3  ;;  %v4881_v17 = vpop.f32.mrf.mxu0  ;;  %v11692_v56 = vadd.s32 %v10562_v61, %v5976_v21  ;;  %vm6136_vm1 = vcmp.lt.s32.totalorder %v11684_v40, 16  ;;  %v8099_v21 = vld [vmem:[%s9496_s14 + $0x358] sm:$0xf] }
0x1792   : > { %v4933_v26 = vadd.f32 %v4932_v9, %v11531_v35  ;;  %v4882_v46 = vadd.f32 %v4881_v17, %v11491_v6  ;;  %v4899_v48 = vpop.f32.mrf.mxu1  ;;  %v11709_v17 = vperm.slane %v3478_v13, 0  ;;  %v7763_v13 = vld [vmem:[%s9496_s14 + $0xc8] sm:$0xf] }
0x1793   : > { %v6553_v0 = vsel %vm11577_vm3, -3.4028235e+38, %v4915_v59  ;;  %v4900_v15 = vadd.f32 %v4899_v48, %v11496_v43  ;;  %vm6137_vm2 = vcmp.lt.s32.totalorder %v11692_v56, 16  ;;  %vm11723_vm3 = vmxor %vm6208_vm11, %vm6136_vm1 }
0x1794   : > { %6793 = vst [vmem:[%s9498_s29 + $0x330] sm:$0xff] %v6553_v0  ;;  %v6554_v41 = vsel %vm11587_vm5, -3.4028235e+38, %v4933_v26  ;;  %v6631_v6 = vsel %vm11598_vm4, -3.4028235e+38, %v4882_v46  ;;  %8274 = vmatmul.msk.bf16.gmra.mxu0 %vm4500_vm7, %v10446_v19  ;;  %8276 = vmatmul.msk.bf16.gmra.mxu1 %vm4500_vm7, %v10446_v19  ;;  %vm11733_vm5 = vmxor %vm6208_vm11, %vm6137_vm2 }
0x1795   : > { %6794 = vst [vmem:[%s9498_s29 + $0x338] sm:$0xff] %v6554_v41  ;;  %v6632_v43 = vsel %vm11608_vm6, -3.4028235e+38, %v4900_v15  ;;  %8278 = vmatmul.msk.bf16.gmra.mxu2 %vm4500_vm7, %v10446_v19  ;;  %v8530_v26 = vld [vmem:[%s9496_s14 + $0x484] sm:$0xf0]  ;;  %vm6315_vm4 = vmxor %vm6209_vm15, %vm6134_vm0  ;;  %v5979_v41 = vadd.s32 3840, %v10548_v7 }
0x1796   : > { %6871 = vst [vmem:[%s9498_s29 + $0x5a0] sm:$0xff] %v6631_v6  ;;  %8280 = vmatmul.msk.bf16.gmra.mxu3 %vm4500_vm7, %v10446_v19  ;;  %v8084_v48 = vor.u32 %v8530_v26, %v8083_v18  ;;  %v8085_v0 = vld [vmem:[%s9496_s14 + $0x488] sm:$0xf0]  ;;  %vm6316_vm6 = vmxor %vm6209_vm15, %vm6135_vm14 }
0x1797   : > { %6872 = vst [vmem:[%s9498_s29 + $0x5a8] sm:$0xff] %v6632_v43  ;;  %v8088_v6 = vor.u32 %v8490_v23, %v8085_v0 }
0x1798   : > { %v4917_v53 = vpop.f32.mrf.mxu2 }
0x1799   : > { %v4918_v39 = vadd.f32 %v4917_v53, %v11525_v30  ;;  %v4935_v34 = vpop.f32.mrf.mxu3  ;;  %v4883_v57 = vpop.f32.mrf.mxu0  ;;  %v3477_v30 = vperm.slane %v11636_v38, 2 }
0x179a   : > { %v4936_v54 = vadd.f32 %v4935_v34, %v11531_v35  ;;  %v4901_v50 = vpop.f32.mrf.mxu1  ;;  %v8075_v34 = vld [vmem:[%s9496_s14 + $0x340] sm:$0xf] }
0x179b   : > { %v6633_v58 = vsel %vm11647_vm9, -3.4028235e+38, %v4918_v39  ;;  %v11680_v55 = vperm.slane %v3477_v30, 0  ;;  %vm11761_vm9 = vmxor %vm6209_vm15, %vm6136_vm1  ;;  %v8529_v57 = vld [vmem:[%s9496_s14 + $0x47c] sm:$0xf0] }
0x179c   : > { %6873 = vst [vmem:[%s9498_s29 + $0x5b0] sm:$0xff] %v6633_v58  ;;  %v6634_v35 = vsel %vm6394_vm10, -3.4028235e+38, %v4936_v54  ;;  %vm11771_vm10 = vmxor %vm6209_vm15, %vm6137_vm2  ;;  %v8076_v50 = vor.u32 %v8529_v57, %v8075_v34  ;;  %v8077_v58 = vld [vmem:[%s9496_s14 + $0x480] sm:$0xf0] }
0x179d   : > { %6874 = vst [vmem:[%s9498_s29 + $0x5b8] sm:$0xff] %v6634_v35  ;;  %v8080_v16 = vor.u32 %v8489_v25, %v8077_v58 }
0x17a0   : > { %v4919_v27 = vpop.f32.mrf.mxu2 }
0x17a1   : > { %v4937_v29 = vpop.f32.mrf.mxu3  ;;  %v4948_v1 = vpop.f32.mrf.mxu0 }
0x17a2   : > { %v4949_v51 = vadd.f32 %v4948_v1, %v11675_v10  ;;  %v4966_v12 = vpop.f32.mrf.mxu1  ;;  %v5977_v29 = vadd.s32 3584, %v10548_v7  ;;  %v5978_v1 = vadd.s32 3712, %v10548_v7 }
0x17a3   : > { %v4967_v4 = vadd.f32 %v4966_v12, %v11680_v55 }
0x17a4   : > { %v6475_v59 = vsel %vm6235_vm12, -3.4028235e+38, %v4949_v51  ;;  %8281 = vmatmul.msk.bf16.vlgmr.msra.gmra.mxu0 %vm4500_vm7, %v11150_v60  ;;  %8283 = vmatmul.msk.bf16.vlgmr.msra.gmra.mxu1 %vm4500_vm7, %v11150_v60  ;;  %vm11782_vm12 = vmxor %vm6210_vm8, %vm6134_vm0  ;;  %v8450_v51 = vld [vmem:[%s9496_s14 + $0x204] sm:$0xf0]  ;;  %v11842_v0 = vadd.s32 %v10562_v61, %v5977_v29 }
0x17a5   : > { %6715 = vst [vmem:[%s9498_s29 + $0xc0] sm:$0xff] %v6475_v59  ;;  %v6476_v9 = vsel %vm6236_vm13, -3.4028235e+38, %v4967_v4  ;;  %8285 = vmatmul.msk.bf16.vlgmr.msra.gmra.mxu2 %vm4500_vm7, %v11150_v60  ;;  %vm11792_vm13 = vmxor %vm6210_vm8, %vm6135_vm14  ;;  %5377 = vmatpush.bf16.msra.mxu0 %v8076_v50  ;;  %v7764_v4 = vor.u32 %v8450_v51, %v7763_v13  ;;  %v8410_v59 = vld [vmem:[%s9496_s14 + $0xcc] sm:$0xf] }
0x17a6   : > { %6716 = vst [vmem:[%s9498_s29 + $0xc8] sm:$0xff] %v6476_v9  ;;  %8287 = vmatmul.msk.bf16.vlgmr.msra.gmra.mxu3 %vm4500_vm7, %v11150_v60  ;;  %5413 = vmatpush.bf16.msra.mxu2 %v8084_v48  ;;  %vm11828_vm0 = vmxor %vm6210_vm8, %vm6136_vm1  ;;  %vm6138_vm1 = vcmp.lt.s32.totalorder %v11842_v0, 16  ;;  %v8494_v0 = vld [vmem:[%s9496_s14 + $0x36c] sm:$0xf] }
0x17a7   : > { %5431 = vmatpush.bf16.msra.mxu3 %v8088_v6  ;;  %5395 = vmatpush.bf16.msra.mxu1 %v8080_v16  ;;  %vm6398_vm14 = vmxor %vm6210_vm8, %vm6137_vm2  ;;  %v5980_v6 = vadd.s32 3968, %v10548_v7 }
0x17a8   : > { %v4984_v15 = vpop.f32.mrf.mxu2 }
0x17a9   : > { %v4985_v43 = vadd.f32 %v4984_v15, %v11709_v17  ;;  %v5002_v38 = vpop.f32.mrf.mxu3  ;;  %v4950_v28 = vpop.f32.mrf.mxu0  ;;  %v11848_v15 = vadd.s32 %v10562_v61, %v5978_v1  ;;  %v11873_v57 = vadd.s32 %v10562_v61, %v5980_v6 }
0x17aa   : > { %v5003_v8 = vadd.f32 %v5002_v38, %v11715_v44  ;;  %v4951_v37 = vadd.f32 %v4950_v28, %v11675_v10  ;;  %v4968_v5 = vpop.f32.mrf.mxu1  ;;  %5414 = vmatpush.bf16.msra.mxu2 %v7764_v4  ;;  %v8449_v38 = vld [vmem:[%s9496_s14 + $0x1fc] sm:$0xf0] }
0x17ab   : > { %v6477_v53 = vsel %vm11723_vm3, -3.4028235e+38, %v4985_v43  ;;  %v4969_v22 = vadd.f32 %v4968_v5, %v11680_v55  ;;  %v7755_v43 = vld [vmem:[%s9496_s14 + $0xc0] sm:$0xf]  ;;  %v7757_v5 = vld [vmem:[%s9496_s14 + $0x200] sm:$0xf0]  ;;  %vm6239_vm3 = vmxor %vm6208_vm11, %vm6138_vm1 }
0x17ac   : > { %6717 = vst [vmem:[%s9498_s29 + $0xd0] sm:$0xff] %v6477_v53  ;;  %v6478_v47 = vsel %vm11733_vm5, -3.4028235e+38, %v5003_v8  ;;  %v6555_v14 = vsel %vm6315_vm4, -3.4028235e+38, %v4951_v37  ;;  %v7756_v8 = vor.u32 %v8449_v38, %v7755_v43  ;;  %vm6139_vm2 = vcmp.lt.s32.totalorder %v11848_v15, 16 }
0x17ad   : > { %6718 = vst [vmem:[%s9498_s29 + $0xd8] sm:$0xff] %v6478_v47  ;;  %v6556_v32 = vsel %vm6316_vm6, -3.4028235e+38, %v4969_v22  ;;  %v8409_v37 = vld [vmem:[%s9496_s14 + $0xc4] sm:$0xf]  ;;  %vm6240_vm5 = vmxor %vm6208_vm11, %vm6139_vm2  ;;  %vm6141_vm6 = vcmp.lt.s32.totalorder %v11873_v57, 16 }
0x17ae   : > { %6795 = vst [vmem:[%s9498_s29 + $0x340] sm:$0xff] %v6555_v14  ;;  %v7760_v22 = vor.u32 %v8409_v37, %v7757_v5  ;;  %v11865_v14 = vadd.s32 %v10562_v61, %v5979_v41  ;;  %5378 = vmatpush.bf16.msra.mxu0 %v7756_v8  ;;  %v11981_v5 = vld [vmem:[%s9494_s11 + $0x20] sm:$0xff] }
0x17af   : > { %6796 = vst [vmem:[%s9498_s29 + $0x348] sm:$0xff] %v6556_v32 }
0x17b0   : > { %v4986_v52 = vpop.f32.mrf.mxu2  ;;  %5396 = vmatpush.bf16.msra.mxu1 %v7760_v22  ;;  %vm6140_vm4 = vcmp.lt.s32.totalorder %v11865_v14, 16  ;;  %v12001_v22 = vunpack.c.l.bf16 %v11981_v5 }
0x17b1   : > { %v4987_v30 = vadd.f32 %v4986_v52, %v11709_v17  ;;  %v5004_v35 = vpop.f32.mrf.mxu3  ;;  %v4953_v62 = vpop.f32.mrf.mxu0 }
0x17b2   : > { %v5005_v2 = vadd.f32 %v5004_v35, %v11715_v44  ;;  %v4954_v24 = vadd.f32 %v4953_v62, %v11675_v10  ;;  %v4971_v63 = vpop.f32.mrf.mxu1 }
0x17b3   : > { %v6557_v42 = vsel %vm11761_vm9, -3.4028235e+38, %v4987_v30  ;;  %v4972_v11 = vadd.f32 %v4971_v63, %v11680_v55  ;;  %v11817_v55 = vunpack.c.h.bf16 %v11616_v33  ;;  %v7765_v33 = vld [vmem:[%s9496_s14 + $0x208] sm:$0xf0]  ;;  %vm11903_vm9 = vmxor %vm6208_vm11, %vm6140_vm4 }
0x17b4   : > { %6797 = vst [vmem:[%s9498_s29 + $0x350] sm:$0xff] %v6557_v42  ;;  %v6558_v3 = vsel %vm11771_vm10, -3.4028235e+38, %v5005_v2  ;;  %v6635_v10 = vsel %vm11782_vm12, -3.4028235e+38, %v4954_v24  ;;  %8282 = vmatmul.msk.bf16.gmra.mxu0 %vm4500_vm7, %v10446_v19  ;;  %8284 = vmatmul.msk.bf16.gmra.mxu1 %vm4500_vm7, %v10446_v19  ;;  %v7768_v26 = vor.u32 %v8410_v59, %v7765_v33  ;;  %vm11913_vm10 = vmxor %vm6208_vm11, %vm6141_vm6 }
0x17b5   : > { %6798 = vst [vmem:[%s9498_s29 + $0x358] sm:$0xff] %v6558_v3  ;;  %v6636_v27 = vsel %vm11792_vm13, -3.4028235e+38, %v4972_v11  ;;  %8286 = vmatmul.msk.bf16.gmra.mxu2 %vm4500_vm7, %v10446_v19  ;;  %v3480_v23 = vperm.slane %v11817_v55, 0  ;;  %v3482_v34 = vperm.slane %v11817_v55, 4  ;;  %v3483_v50 = vperm.slane %v11817_v55, 6  ;;  %vm6319_vm12 = vmxor %vm6209_vm15, %vm6138_vm1 }
0x17b6   : > { %6875 = vst [vmem:[%s9498_s29 + $0x5c0] sm:$0xff] %v6635_v10  ;;  %8288 = vmatmul.msk.bf16.gmra.mxu3 %vm4500_vm7, %v10446_v19  ;;  %v8532_v2 = vld [vmem:[%s9496_s14 + $0x494] sm:$0xf0]  ;;  %v8492_v24 = vld [vmem:[%s9496_s14 + $0x35c] sm:$0xf]  ;;  %vm6320_vm13 = vmxor %vm6209_vm15, %vm6139_vm2 }
0x17b7   : > { %6876 = vst [vmem:[%s9498_s29 + $0x5c8] sm:$0xff] %v6636_v27  ;;  %5432 = vmatpush.bf16.msra.mxu3 %v7768_v26  ;;  %v11856_v28 = vperm.slane %v3480_v23, 0  ;;  %v11890_v35 = vperm.slane %v3482_v34, 0  ;;  %v11896_v62 = vperm.slane %v3483_v50, 0  ;;  %v8100_v45 = vor.u32 %v8532_v2, %v8099_v21  ;;  %v8101_v42 = vld [vmem:[%s9496_s14 + $0x498] sm:$0xf0] }
0x17b8   : > { %v4989_v12 = vpop.f32.mrf.mxu2  ;;  %v8104_v27 = vor.u32 %v8492_v24, %v8101_v42  ;;  %v8091_v33 = vld [vmem:[%s9496_s14 + $0x350] sm:$0xf]  ;;  %v8452_v34 = vld [vmem:[%s9496_s14 + $0x214] sm:$0xf0]  ;;  %v5983_v42 = vadd.s32 4352, %v10548_v7 }
0x17b9   : > { %v4990_v9 = vadd.f32 %v4989_v12, %v11709_v17  ;;  %v5007_v18 = vpop.f32.mrf.mxu3  ;;  %v4955_v40 = vpop.f32.mrf.mxu0  ;;  %v3481_v17 = vperm.slane %v11817_v55, 2 }
0x17ba   : > { %v5008_v46 = vadd.f32 %v5007_v18, %v11715_v44  ;;  %v4973_v48 = vpop.f32.mrf.mxu1 }
0x17bb   : > { %v6637_v56 = vsel %vm11828_vm0, -3.4028235e+38, %v4990_v9  ;;  %v11861_v53 = vperm.slane %v3481_v17, 0  ;;  %vm11942_vm0 = vmxor %vm6209_vm15, %vm6140_vm4  ;;  %v8531_v9 = vld [vmem:[%s9496_s14 + $0x48c] sm:$0xf0] }
0x17bc   : > { %6877 = vst [vmem:[%s9498_s29 + $0x5d0] sm:$0xff] %v6637_v56  ;;  %v6638_v44 = vsel %vm6398_vm14, -3.4028235e+38, %v5008_v46  ;;  %vm11952_vm14 = vmxor %vm6209_vm15, %vm6141_vm6  ;;  %v8092_v26 = vor.u32 %v8531_v9, %v8091_v33  ;;  %v8491_v46 = vld [vmem:[%s9496_s14 + $0x354] sm:$0xf]  ;;  %v3486_v33 = vperm.slane %v12001_v22, 4 }
0x17bd   : > { %6878 = vst [vmem:[%s9498_s29 + $0x5d8] sm:$0xff] %v6638_v44  ;;  %v8093_v48 = vld [vmem:[%s9496_s14 + $0x490] sm:$0xf0] }
0x17be   : > { %v8096_v41 = vor.u32 %v8491_v46, %v8093_v48 }
0x17c0   : > { %v4991_v47 = vpop.f32.mrf.mxu2 }
0x17c1   : > { %v5009_v32 = vpop.f32.mrf.mxu3  ;;  %v5020_v39 = vpop.f32.mrf.mxu0  ;;  %v5981_v47 = vadd.s32 4096, %v10548_v7 }
0x17c2   : > { %v5021_v52 = vadd.f32 %v5020_v39, %v11856_v28  ;;  %v5038_v54 = vpop.f32.mrf.mxu1  ;;  %v5982_v32 = vadd.s32 4224, %v10548_v7  ;;  %v7779_v39 = vld [vmem:[%s9496_s14 + $0xd8] sm:$0xf] }
0x17c3   : > { %v5039_v25 = vadd.f32 %v5038_v54, %v11861_v53  ;;  %v7780_v50 = vor.u32 %v8452_v34, %v7779_v39 }
0x17c4   : > { %v6479_v58 = vsel %vm6239_vm3, -3.4028235e+38, %v5021_v52  ;;  %8289 = vmatmul.msk.bf16.vlgmr.msrb.gmra.mxu0 %vm4500_vm7, %v11150_v60  ;;  %8291 = vmatmul.msk.bf16.vlgmr.msrb.gmra.mxu1 %vm4500_vm7, %v11150_v60  ;;  %vm11963_vm3 = vmxor %vm6210_vm8, %vm6138_vm1 }
0x17c5   : > { %6719 = vst [vmem:[%s9498_s29 + $0xe0] sm:$0xff] %v6479_v58  ;;  %v6480_v30 = vsel %vm6240_vm5, -3.4028235e+38, %v5039_v25  ;;  %8293 = vmatmul.msk.bf16.vlgmr.msrb.gmra.mxu2 %vm4500_vm7, %v11150_v60  ;;  %vm11973_vm5 = vmxor %vm6210_vm8, %vm6139_vm2  ;;  %5449 = vmatpush.bf16.msrb.mxu0 %v8092_v26  ;;  %v8412_v25 = vld [vmem:[%s9496_s14 + $0xdc] sm:$0xf]  ;;  %v3487_v26 = vperm.slane %v12001_v22, 6 }
0x17c6   : > { %6720 = vst [vmem:[%s9498_s29 + $0xe8] sm:$0xff] %v6480_v30  ;;  %8295 = vmatmul.msk.bf16.vlgmr.msrb.gmra.mxu3 %vm4500_vm7, %v11150_v60  ;;  %5485 = vmatpush.bf16.msrb.mxu2 %v8100_v45  ;;  %vm12012_vm1 = vmxor %vm6210_vm8, %vm6140_vm4  ;;  %v7781_v58 = vld [vmem:[%s9496_s14 + $0x218] sm:$0xf0]  ;;  %v12026_v60 = vadd.s32 %v10562_v61, %v5981_v47  ;;  %v12032_v45 = vadd.s32 %v10562_v61, %v5982_v32 }
0x17c7   : > { %5503 = vmatpush.bf16.msrb.mxu3 %v8104_v27  ;;  %5467 = vmatpush.bf16.msrb.mxu1 %v8096_v41  ;;  %vm6402_vm2 = vmxor %vm6210_vm8, %vm6141_vm6  ;;  %v7784_v16 = vor.u32 %v8412_v25, %v7781_v58  ;;  %v12082_v44 = vperm.slane %v3487_v26, 0  ;;  %v8115_v41 = vld [vmem:[%s9496_s14 + $0x368] sm:$0xf] }
0x17c8   : > { %v5056_v63 = vpop.f32.mrf.mxu2  ;;  %vm6142_vm4 = vcmp.lt.s32.totalorder %v12026_v60, 16  ;;  %vm6143_vm6 = vcmp.lt.s32.totalorder %v12032_v45, 16 }
0x17c9   : > { %v5057_v11 = vadd.f32 %v5056_v63, %v11890_v35  ;;  %v5074_v3 = vpop.f32.mrf.mxu3  ;;  %v5022_v10 = vpop.f32.mrf.mxu0  ;;  %v3484_v63 = vperm.slane %v12001_v22, 0 }
0x17ca   : > { %v5075_v55 = vadd.f32 %v5074_v3, %v11896_v62  ;;  %v5023_v29 = vadd.f32 %v5022_v10, %v11856_v28  ;;  %v5040_v1 = vpop.f32.mrf.mxu1  ;;  %5486 = vmatpush.bf16.msrb.mxu2 %v7780_v50  ;;  %v7771_v3 = vld [vmem:[%s9496_s14 + $0xd0] sm:$0xf] }
0x17cb   : > { %v6481_v13 = vsel %vm11903_vm9, -3.4028235e+38, %v5057_v11  ;;  %v5041_v51 = vadd.f32 %v5040_v1, %v11861_v53  ;;  %5504 = vmatpush.bf16.msrb.mxu3 %v7784_v16  ;;  %v5984_v11 = vadd.s32 4480, %v10548_v7  ;;  %v8451_v10 = vld [vmem:[%s9496_s14 + $0x20c] sm:$0xf0]  ;;  %v12040_v27 = vperm.slane %v3484_v63, 0  ;;  %vm6243_vm9 = vmxor %vm6208_vm11, %vm6142_vm4 }
0x17cc   : > { %6721 = vst [vmem:[%s9498_s29 + $0xf0] sm:$0xff] %v6481_v13  ;;  %v6482_v12 = vsel %vm11913_vm10, -3.4028235e+38, %v5075_v55  ;;  %v6559_v20 = vsel %vm6319_vm12, -3.4028235e+38, %v5023_v29  ;;  %v7772_v55 = vor.u32 %v8451_v10, %v7771_v3  ;;  %vm6244_vm10 = vmxor %vm6208_vm11, %vm6143_vm6 }
0x17cd   : > { %6722 = vst [vmem:[%s9498_s29 + $0xf8] sm:$0xff] %v6482_v12  ;;  %v6560_v4 = vsel %vm6320_vm13, -3.4028235e+38, %v5041_v51  ;;  %v8411_v29 = vld [vmem:[%s9496_s14 + $0xd4] sm:$0xf]  ;;  %v12057_v9 = vadd.s32 %v10562_v61, %v5984_v11 }
0x17ce   : > { %6799 = vst [vmem:[%s9498_s29 + $0x360] sm:$0xff] %v6559_v20  ;;  %v7773_v1 = vld [vmem:[%s9496_s14 + $0x210] sm:$0xf0]  ;;  %v12049_v20 = vadd.s32 %v10562_v61, %v5983_v42  ;;  %5450 = vmatpush.bf16.msrb.mxu0 %v7772_v55  ;;  %v8493_v63 = vld [vmem:[%s9496_s14 + $0x364] sm:$0xf] }
0x17cf   : > { %6800 = vst [vmem:[%s9498_s29 + $0x368] sm:$0xff] %v6560_v4  ;;  %v7776_v51 = vor.u32 %v8411_v29, %v7773_v1  ;;  %vm6145_vm13 = vcmp.lt.s32.totalorder %v12057_v9, 16  ;;  %v8131_v11 = vld [vmem:[%s9496_s14 + $0x378] sm:$0xf] }
0x17d0   : > { %v5058_v18 = vpop.f32.mrf.mxu2  ;;  %vm6144_vm12 = vcmp.lt.s32.totalorder %v12049_v20, 16 }
0x17d1   : > { %v5059_v23 = vadd.f32 %v5058_v18, %v11890_v35  ;;  %v5076_v56 = vpop.f32.mrf.mxu3  ;;  %v5025_v17 = vpop.f32.mrf.mxu0  ;;  %5468 = vmatpush.bf16.msrb.mxu1 %v7776_v51 }
0x17d2   : > { %v5077_v6 = vadd.f32 %v5076_v56, %v11896_v62  ;;  %v5026_v43 = vadd.f32 %v5025_v17, %v11856_v28  ;;  %v5043_v38 = vpop.f32.mrf.mxu1  ;;  %v12076_v17 = vperm.slane %v3486_v33, 0  ;;  %v7795_v33 = vld [vmem:[%s9496_s14 + $0xe8] sm:$0xf] }
0x17d3   : > { %v6561_v8 = vsel %vm11942_vm0, -3.4028235e+38, %v5059_v23  ;;  %v5044_v37 = vadd.f32 %v5043_v38, %v11861_v53  ;;  %v12066_v23 = vld [vmem:[#allocation2] sm:$0xff]  ;;  %vm12090_vm0 = vmxor %vm6208_vm11, %vm6144_vm12 }
0x17d4   : > { %6801 = vst [vmem:[%s9498_s29 + $0x370] sm:$0xff] %v6561_v8  ;;  %v6562_v15 = vsel %vm11952_vm14, -3.4028235e+38, %v5077_v6  ;;  %v6639_v28 = vsel %vm11963_vm3, -3.4028235e+38, %v5026_v43  ;;  %8290 = vmatmul.msk.bf16.gmra.mxu0 %vm4500_vm7, %v10446_v19  ;;  %8292 = vmatmul.msk.bf16.gmra.mxu1 %vm4500_vm7, %v10446_v19  ;;  %vm12100_vm14 = vmxor %vm6208_vm11, %vm6145_vm13 }
0x17d5   : > { %6802 = vst [vmem:[%s9498_s29 + $0x378] sm:$0xff] %v6562_v15  ;;  %v6640_v53 = vsel %vm11973_vm5, -3.4028235e+38, %v5044_v37  ;;  %8294 = vmatmul.msk.bf16.gmra.mxu2 %vm4500_vm7, %v10446_v19  ;;  %v8534_v6 = vld [vmem:[%s9496_s14 + $0x4a4] sm:$0xf0]  ;;  %vm6323_vm3 = vmxor %vm6209_vm15, %vm6142_vm4  ;;  %v5987_v15 = vadd.s32 4864, %v10548_v7 }
0x17d6   : > { %6879 = vst [vmem:[%s9498_s29 + $0x5e0] sm:$0xff] %v6639_v28  ;;  %8296 = vmatmul.msk.bf16.gmra.mxu3 %vm4500_vm7, %v10446_v19  ;;  %v8116_v38 = vor.u32 %v8534_v6, %v8115_v41  ;;  %v8117_v8 = vld [vmem:[%s9496_s14 + $0x4a8] sm:$0xf0]  ;;  %vm6324_vm5 = vmxor %vm6209_vm15, %vm6143_vm6 }
0x17d7   : > { %6880 = vst [vmem:[%s9498_s29 + $0x5e8] sm:$0xff] %v6640_v53  ;;  %v8120_v28 = vor.u32 %v8494_v0, %v8117_v8 }
0x17d8   : > { %v5061_v52 = vpop.f32.mrf.mxu2 }
0x17d9   : > { %v5062_v30 = vadd.f32 %v5061_v52, %v11890_v35  ;;  %v5079_v21 = vpop.f32.mrf.mxu3  ;;  %v5027_v14 = vpop.f32.mrf.mxu0  ;;  %v3485_v35 = vperm.slane %v12001_v22, 2 }
0x17da   : > { %v5080_v2 = vadd.f32 %v5079_v21, %v11896_v62  ;;  %v5045_v24 = vpop.f32.mrf.mxu1  ;;  %v8107_v21 = vld [vmem:[%s9496_s14 + $0x360] sm:$0xf] }
0x17db   : > { %v6641_v57 = vsel %vm12012_vm1, -3.4028235e+38, %v5062_v30  ;;  %v12045_v13 = vperm.slane %v3485_v35, 0  ;;  %vm12128_vm1 = vmxor %vm6209_vm15, %vm6144_vm12  ;;  %v8533_v14 = vld [vmem:[%s9496_s14 + $0x49c] sm:$0xf0] }
0x17dc   : > { %6881 = vst [vmem:[%s9498_s29 + $0x5f0] sm:$0xff] %v6641_v57  ;;  %v6642_v62 = vsel %vm6402_vm2, -3.4028235e+38, %v5080_v2  ;;  %vm12138_vm2 = vmxor %vm6209_vm15, %vm6145_vm13  ;;  %v8108_v24 = vor.u32 %v8533_v14, %v8107_v21  ;;  %v8109_v57 = vld [vmem:[%s9496_s14 + $0x4a0] sm:$0xf0] }
0x17dd   : > { %6882 = vst [vmem:[%s9498_s29 + $0x5f8] sm:$0xff] %v6642_v62  ;;  %v8112_v3 = vor.u32 %v8493_v63, %v8109_v57 }
0x17e0   : > { %v5063_v12 = vpop.f32.mrf.mxu2 }
0x17e1   : > { %v5081_v4 = vpop.f32.mrf.mxu3  ;;  %v5092_v59 = vpop.f32.mrf.mxu0 }
0x17e2   : > { %v5093_v18 = vadd.f32 %v5092_v59, %v12040_v27  ;;  %v5110_v40 = vpop.f32.mrf.mxu1  ;;  %v5985_v4 = vadd.s32 4608, %v10548_v7  ;;  %v5986_v59 = vadd.s32 4736, %v10548_v7 }
0x17e3   : > { %v5111_v46 = vadd.f32 %v5110_v40, %v12045_v13 }
0x17e4   : > { %v6483_v48 = vsel %vm6243_vm9, -3.4028235e+38, %v5093_v18  ;;  %8297 = vmatmul.msk.bf16.vlgmr.msra.gmra.mxu0 %vm4500_vm7, %v12066_v23  ;;  %8299 = vmatmul.msk.bf16.vlgmr.msra.gmra.mxu1 %vm4500_vm7, %v12066_v23  ;;  %vm12149_vm9 = vmxor %vm6210_vm8, %vm6142_vm4  ;;  %v8454_v18 = vld [vmem:[%s9496_s14 + $0x224] sm:$0xf0]  ;;  %v12209_v8 = vadd.s32 %v10562_v61, %v5985_v4 }
0x17e5   : > { %6723 = vst [vmem:[%s9498_s29 + $0x100] sm:$0xff] %v6483_v48  ;;  %v6484_v56 = vsel %vm6244_vm10, -3.4028235e+38, %v5111_v46  ;;  %8301 = vmatmul.msk.bf16.vlgmr.msra.gmra.mxu2 %vm4500_vm7, %v12066_v23  ;;  %vm12159_vm10 = vmxor %vm6210_vm8, %vm6143_vm6  ;;  %5521 = vmatpush.bf16.msra.mxu0 %v8108_v24  ;;  %v7796_v46 = vor.u32 %v8454_v18, %v7795_v33  ;;  %v8414_v48 = vld [vmem:[%s9496_s14 + $0xec] sm:$0xf] }
0x17e6   : > { %6724 = vst [vmem:[%s9498_s29 + $0x108] sm:$0xff] %v6484_v56  ;;  %8303 = vmatmul.msk.bf16.vlgmr.msra.gmra.mxu3 %vm4500_vm7, %v12066_v23  ;;  %5557 = vmatpush.bf16.msra.mxu2 %v8116_v38  ;;  %vm12195_vm4 = vmxor %vm6210_vm8, %vm6144_vm12  ;;  %vm6146_vm12 = vcmp.lt.s32.totalorder %v12209_v8, 16  ;;  %v8498_v8 = vld [vmem:[%s9496_s14 + $0x38c] sm:$0xf] }
0x17e7   : > { %5575 = vmatpush.bf16.msra.mxu3 %v8120_v28  ;;  %5539 = vmatpush.bf16.msra.mxu1 %v8112_v3  ;;  %vm6406_vm6 = vmxor %vm6210_vm8, %vm6145_vm13  ;;  %v5988_v28 = vadd.s32 4992, %v10548_v7 }
0x17e8   : > { %v5128_v37 = vpop.f32.mrf.mxu2 }
0x17e9   : > { %v5129_v53 = vadd.f32 %v5128_v37, %v12076_v17  ;;  %v5146_v22 = vpop.f32.mrf.mxu3  ;;  %v5094_v47 = vpop.f32.mrf.mxu0  ;;  %v12215_v37 = vadd.s32 %v10562_v61, %v5986_v59  ;;  %v12240_v14 = vadd.s32 %v10562_v61, %v5988_v28 }
0x17ea   : > { %v5147_v32 = vadd.f32 %v5146_v22, %v12082_v44  ;;  %v5095_v39 = vadd.f32 %v5094_v47, %v12040_v27  ;;  %v5112_v34 = vpop.f32.mrf.mxu1  ;;  %5558 = vmatpush.bf16.msra.mxu2 %v7796_v46  ;;  %v8453_v22 = vld [vmem:[%s9496_s14 + $0x21c] sm:$0xf0] }
0x17eb   : > { %v6485_v52 = vsel %vm12090_vm0, -3.4028235e+38, %v5129_v53  ;;  %v5113_v54 = vadd.f32 %v5112_v34, %v12045_v13  ;;  %v7787_v53 = vld [vmem:[%s9496_s14 + $0xe0] sm:$0xf]  ;;  %v7789_v34 = vld [vmem:[%s9496_s14 + $0x220] sm:$0xf0]  ;;  %vm6247_vm0 = vmxor %vm6208_vm11, %vm6146_vm12 }
0x17ec   : > { %6725 = vst [vmem:[%s9498_s29 + $0x110] sm:$0xff] %v6485_v52  ;;  %v6486_v50 = vsel %vm12100_vm14, -3.4028235e+38, %v5147_v32  ;;  %v6563_v25 = vsel %vm6323_vm3, -3.4028235e+38, %v5095_v39  ;;  %v7788_v32 = vor.u32 %v8453_v22, %v7787_v53  ;;  %vm6147_vm13 = vcmp.lt.s32.totalorder %v12215_v37, 16 }
0x17ed   : > { %6726 = vst [vmem:[%s9498_s29 + $0x118] sm:$0xff] %v6486_v50  ;;  %v6564_v58 = vsel %vm6324_vm5, -3.4028235e+38, %v5113_v54  ;;  %v8413_v39 = vld [vmem:[%s9496_s14 + $0xe4] sm:$0xf]  ;;  %vm6248_vm14 = vmxor %vm6208_vm11, %vm6147_vm13  ;;  %vm6149_vm5 = vcmp.lt.s32.totalorder %v12240_v14, 16 }
0x17ee   : > { %6803 = vst [vmem:[%s9498_s29 + $0x380] sm:$0xff] %v6563_v25  ;;  %v7792_v54 = vor.u32 %v8413_v39, %v7789_v34  ;;  %v12232_v25 = vadd.s32 %v10562_v61, %v5987_v15  ;;  %5522 = vmatpush.bf16.msra.mxu0 %v7788_v32 }
0x17ef   : > { %6804 = vst [vmem:[%s9498_s29 + $0x388] sm:$0xff] %v6564_v58 }
0x17f0   : > { %v5130_v16 = vpop.f32.mrf.mxu2  ;;  %5540 = vmatpush.bf16.msra.mxu1 %v7792_v54  ;;  %vm6148_vm3 = vcmp.lt.s32.totalorder %v12232_v25, 16  ;;  %v12348_v54 = vld [vmem:[%s9494_s11 + $0x28] sm:$0xff] }
0x17f1   : > { %v5131_v35 = vadd.f32 %v5130_v16, %v12076_v17  ;;  %v5148_v62 = vpop.f32.mrf.mxu3  ;;  %v5097_v42 = vpop.f32.mrf.mxu0 }
0x17f2   : > { %v5149_v10 = vadd.f32 %v5148_v62, %v12082_v44  ;;  %v5098_v55 = vadd.f32 %v5097_v42, %v12040_v27  ;;  %v5115_v29 = vpop.f32.mrf.mxu1 }
0x17f3   : > { %v6565_v60 = vsel %vm12128_vm1, -3.4028235e+38, %v5131_v35  ;;  %v5116_v51 = vadd.f32 %v5115_v29, %v12045_v13  ;;  %v12184_v13 = vunpack.c.h.bf16 %v11981_v5  ;;  %v7797_v5 = vld [vmem:[%s9496_s14 + $0x228] sm:$0xf0]  ;;  %vm12270_vm1 = vmxor %vm6208_vm11, %vm6148_vm3 }
0x17f4   : > { %6805 = vst [vmem:[%s9498_s29 + $0x390] sm:$0xff] %v6565_v60  ;;  %v6566_v45 = vsel %vm12138_vm2, -3.4028235e+38, %v5149_v10  ;;  %v6643_v27 = vsel %vm12149_vm9, -3.4028235e+38, %v5098_v55  ;;  %8298 = vmatmul.msk.bf16.gmra.mxu0 %vm4500_vm7, %v10446_v19  ;;  %8300 = vmatmul.msk.bf16.gmra.mxu1 %vm4500_vm7, %v10446_v19  ;;  %v7800_v6 = vor.u32 %v8414_v48, %v7797_v5  ;;  %vm12280_vm2 = vmxor %vm6208_vm11, %vm6149_vm5 }
0x17f5   : > { %6806 = vst [vmem:[%s9498_s29 + $0x398] sm:$0xff] %v6566_v45  ;;  %v6644_v12 = vsel %vm12159_vm10, -3.4028235e+38, %v5116_v51  ;;  %8302 = vmatmul.msk.bf16.gmra.mxu2 %vm4500_vm7, %v10446_v19  ;;  %v3488_v0 = vperm.slane %v12184_v13, 0  ;;  %v3490_v21 = vperm.slane %v12184_v13, 4  ;;  %v3491_v24 = vperm.slane %v12184_v13, 6  ;;  %vm6327_vm9 = vmxor %vm6209_vm15, %vm6146_vm12 }
0x17f6   : > { %6883 = vst [vmem:[%s9498_s29 + $0x600] sm:$0xff] %v6643_v27  ;;  %8304 = vmatmul.msk.bf16.gmra.mxu3 %vm4500_vm7, %v10446_v19  ;;  %v8536_v10 = vld [vmem:[%s9496_s14 + $0x4b4] sm:$0xf0]  ;;  %v8496_v55 = vld [vmem:[%s9496_s14 + $0x37c] sm:$0xf]  ;;  %vm6328_vm10 = vmxor %vm6209_vm15, %vm6147_vm13 }
0x17f7   : > { %6884 = vst [vmem:[%s9498_s29 + $0x608] sm:$0xff] %v6644_v12  ;;  %5576 = vmatpush.bf16.msra.mxu3 %v7800_v6  ;;  %v12223_v47 = vperm.slane %v3488_v0, 0  ;;  %v12257_v62 = vperm.slane %v3490_v21, 0  ;;  %v12263_v42 = vperm.slane %v3491_v24, 0  ;;  %v8132_v60 = vor.u32 %v8536_v10, %v8131_v11  ;;  %v8133_v51 = vld [vmem:[%s9496_s14 + $0x4b8] sm:$0xf0] }
0x17f8   : > { %v5133_v40 = vpop.f32.mrf.mxu2  ;;  %v8125_v0 = vld [vmem:[%s9496_s14 + $0x4b0] sm:$0xf0]  ;;  %v7811_v21 = vld [vmem:[%s9496_s14 + $0xf8] sm:$0xf] }
0x17f9   : > { %v5134_v56 = vadd.f32 %v5133_v40, %v12076_v17  ;;  %v5151_v41 = vpop.f32.mrf.mxu3  ;;  %v5099_v20 = vpop.f32.mrf.mxu0  ;;  %v3489_v17 = vperm.slane %v12184_v13, 2  ;;  %v8136_v13 = vor.u32 %v8496_v55, %v8133_v51 }
0x17fa   : > { %v5152_v43 = vadd.f32 %v5151_v41, %v12082_v44  ;;  %v5117_v38 = vpop.f32.mrf.mxu1  ;;  %v8535_v41 = vld [vmem:[%s9496_s14 + $0x4ac] sm:$0xf0] }
0x17fb   : > { %v6645_v9 = vsel %vm12195_vm4, -3.4028235e+38, %v5134_v56  ;;  %v12228_v52 = vperm.slane %v3489_v17, 0  ;;  %vm12309_vm4 = vmxor %vm6209_vm15, %vm6148_vm3  ;;  %v8123_v56 = vld [vmem:[%s9496_s14 + $0x370] sm:$0xf] }
0x17fc   : > { %6885 = vst [vmem:[%s9498_s29 + $0x610] sm:$0xff] %v6645_v9  ;;  %v6646_v44 = vsel %vm6406_vm6, -3.4028235e+38, %v5152_v43  ;;  %vm12319_vm6 = vmxor %vm6209_vm15, %vm6149_vm5  ;;  %v8124_v43 = vor.u32 %v8535_v41, %v8123_v56  ;;  %v8495_v38 = vld [vmem:[%s9496_s14 + $0x374] sm:$0xf] }
0x17fd   : > { %6886 = vst [vmem:[%s9498_s29 + $0x618] sm:$0xff] %v6646_v44  ;;  %v8128_v28 = vor.u32 %v8495_v38, %v8125_v0 }
0x1800   : > { %v5135_v50 = vpop.f32.mrf.mxu2 }
0x1801   : > { %v5153_v58 = vpop.f32.mrf.mxu3  ;;  %v5164_v30 = vpop.f32.mrf.mxu0  ;;  %v12368_v50 = vunpack.c.l.bf16 %v12348_v54 }
0x1802   : > { %v5165_v16 = vadd.f32 %v5164_v30, %v12223_v47  ;;  %v5182_v2 = vpop.f32.mrf.mxu1  ;;  %v5989_v58 = vadd.s32 5120, %v10548_v7  ;;  %v5990_v30 = vadd.s32 5248, %v10548_v7 }
0x1803   : > { %v5183_v63 = vadd.f32 %v5182_v2, %v12228_v52  ;;  %v3492_v1 = vperm.slane %v12368_v50, 0  ;;  %v3494_v41 = vperm.slane %v12368_v50, 4  ;;  %v3495_v38 = vperm.slane %v12368_v50, 6 }
0x1804   : > { %v6487_v57 = vsel %vm6247_vm0, -3.4028235e+38, %v5165_v16  ;;  %8305 = vmatmul.msk.bf16.vlgmr.msrb.gmra.mxu0 %vm4500_vm7, %v12066_v23  ;;  %8307 = vmatmul.msk.bf16.vlgmr.msrb.gmra.mxu1 %vm4500_vm7, %v12066_v23  ;;  %vm12330_vm0 = vmxor %vm6210_vm8, %vm6146_vm12  ;;  %v8456_v16 = vld [vmem:[%s9496_s14 + $0x234] sm:$0xf0]  ;;  %v12399_v51 = vadd.s32 %v10562_v61, %v5990_v30 }
0x1805   : > { %6727 = vst [vmem:[%s9498_s29 + $0x120] sm:$0xff] %v6487_v57  ;;  %v6488_v35 = vsel %vm6248_vm14, -3.4028235e+38, %v5183_v63  ;;  %8309 = vmatmul.msk.bf16.vlgmr.msrb.gmra.mxu2 %vm4500_vm7, %v12066_v23  ;;  %vm12340_vm14 = vmxor %vm6210_vm8, %vm6147_vm13  ;;  %5593 = vmatpush.bf16.msrb.mxu0 %v8124_v43  ;;  %v7812_v63 = vor.u32 %v8456_v16, %v7811_v21  ;;  %v8416_v57 = vld [vmem:[%s9496_s14 + $0xfc] sm:$0xf]  ;;  %v12447_v15 = vperm.slane %v3495_v38, 0 }
0x1806   : > { %6728 = vst [vmem:[%s9498_s29 + $0x128] sm:$0xff] %v6488_v35  ;;  %8311 = vmatmul.msk.bf16.vlgmr.msrb.gmra.mxu3 %vm4500_vm7, %v12066_v23  ;;  %5629 = vmatpush.bf16.msrb.mxu2 %v8132_v60  ;;  %vm12379_vm12 = vmxor %vm6210_vm8, %vm6148_vm3  ;;  %v7813_v35 = vld [vmem:[%s9496_s14 + $0x238] sm:$0xf0]  ;;  %v12393_v60 = vadd.s32 %v10562_v61, %v5989_v58 }
0x1807   : > { %5647 = vmatpush.bf16.msrb.mxu3 %v8136_v13  ;;  %5611 = vmatpush.bf16.msrb.mxu1 %v8128_v28  ;;  %vm6410_vm13 = vmxor %vm6210_vm8, %vm6149_vm5  ;;  %v7816_v10 = vor.u32 %v8416_v57, %v7813_v35  ;;  %v8455_v13 = vld [vmem:[%s9496_s14 + $0x22c] sm:$0xf0]  ;;  %vm6151_vm5 = vcmp.lt.s32.totalorder %v12399_v51, 16  ;;  %v8147_v28 = vld [vmem:[%s9496_s14 + $0x388] sm:$0xf] }
0x1808   : > { %v5200_v29 = vpop.f32.mrf.mxu2  ;;  %vm6150_vm3 = vcmp.lt.s32.totalorder %v12393_v60, 16 }
0x1809   : > { %v5201_v45 = vadd.f32 %v5200_v29, %v12257_v62  ;;  %v5218_v27 = vpop.f32.mrf.mxu3  ;;  %v5166_v12 = vpop.f32.mrf.mxu0 }
0x180a   : > { %v5219_v4 = vadd.f32 %v5218_v27, %v12263_v42  ;;  %v5167_v59 = vadd.f32 %v5166_v12, %v12223_v47  ;;  %v5184_v33 = vpop.f32.mrf.mxu1  ;;  %5630 = vmatpush.bf16.msrb.mxu2 %v7812_v63  ;;  %v5992_v27 = vadd.s32 5504, %v10548_v7  ;;  %v7803_v12 = vld [vmem:[%s9496_s14 + $0xf0] sm:$0xf] }
0x180b   : > { %v6489_v18 = vsel %vm12270_vm1, -3.4028235e+38, %v5201_v45  ;;  %v5185_v40 = vadd.f32 %v5184_v33, %v12228_v52  ;;  %5648 = vmatpush.bf16.msrb.mxu3 %v7816_v10  ;;  %v5991_v45 = vadd.s32 5376, %v10548_v7  ;;  %v8415_v33 = vld [vmem:[%s9496_s14 + $0xf4] sm:$0xf]  ;;  %vm6251_vm1 = vmxor %vm6208_vm11, %vm6150_vm3 }
0x180c   : > { %6729 = vst [vmem:[%s9498_s29 + $0x130] sm:$0xff] %v6489_v18  ;;  %v6490_v26 = vsel %vm12280_vm2, -3.4028235e+38, %v5219_v4  ;;  %v6567_v46 = vsel %vm6327_vm9, -3.4028235e+38, %v5167_v59  ;;  %v12407_v4 = vperm.slane %v3492_v1, 0  ;;  %v7804_v59 = vor.u32 %v8455_v13, %v7803_v12  ;;  %vm6252_vm2 = vmxor %vm6208_vm11, %vm6151_vm5 }
0x180d   : > { %6730 = vst [vmem:[%s9498_s29 + $0x138] sm:$0xff] %v6490_v26  ;;  %v6568_v48 = vsel %vm6328_vm10, -3.4028235e+38, %v5185_v40  ;;  %v7805_v18 = vld [vmem:[%s9496_s14 + $0x230] sm:$0xf0] }
0x180e   : > { %6807 = vst [vmem:[%s9498_s29 + $0x3a0] sm:$0xff] %v6567_v46  ;;  %v7808_v26 = vor.u32 %v8415_v33, %v7805_v18  ;;  %5594 = vmatpush.bf16.msrb.mxu0 %v7804_v59  ;;  %v8497_v1 = vld [vmem:[%s9496_s14 + $0x384] sm:$0xf] }
0x180f   : > { %6808 = vst [vmem:[%s9498_s29 + $0x3a8] sm:$0xff] %v6568_v48  ;;  %v12416_v48 = vadd.s32 %v10562_v61, %v5991_v45 }
0x1810   : > { %v5202_v20 = vpop.f32.mrf.mxu2  ;;  %5612 = vmatpush.bf16.msrb.mxu1 %v7808_v26 }
0x1811   : > { %v5203_v9 = vadd.f32 %v5202_v20, %v12257_v62  ;;  %v5220_v17 = vpop.f32.mrf.mxu3  ;;  %v5169_v44 = vpop.f32.mrf.mxu0  ;;  %v12424_v20 = vadd.s32 %v10562_v61, %v5992_v27  ;;  %vm6152_vm9 = vcmp.lt.s32.totalorder %v12416_v48, 16  ;;  %v8163_v27 = vld [vmem:[%s9496_s14 + $0x398] sm:$0xf] }
0x1812   : > { %v5221_v53 = vadd.f32 %v5220_v17, %v12263_v42  ;;  %v5170_v22 = vadd.f32 %v5169_v44, %v12223_v47  ;;  %v5187_v32 = vpop.f32.mrf.mxu1  ;;  %v12441_v44 = vperm.slane %v3494_v41, 0  ;;  %v7827_v41 = vld [vmem:[%s9496_s14 + $0x108] sm:$0xf] }
0x1813   : > { %v6569_v39 = vsel %vm12309_vm4, -3.4028235e+38, %v5203_v9  ;;  %v5188_v34 = vadd.f32 %v5187_v32, %v12228_v52  ;;  %vm6153_vm10 = vcmp.lt.s32.totalorder %v12424_v20, 16  ;;  %vm12455_vm4 = vmxor %vm6208_vm11, %vm6152_vm9 }
0x1814   : > { %6809 = vst [vmem:[%s9498_s29 + $0x3b0] sm:$0xff] %v6569_v39  ;;  %v6570_v37 = vsel %vm12319_vm6, -3.4028235e+38, %v5221_v53  ;;  %v6647_v47 = vsel %vm12330_vm0, -3.4028235e+38, %v5170_v22  ;;  %8306 = vmatmul.msk.bf16.gmra.mxu0 %vm4500_vm7, %v10446_v19  ;;  %8308 = vmatmul.msk.bf16.gmra.mxu1 %vm4500_vm7, %v10446_v19  ;;  %vm12465_vm6 = vmxor %vm6208_vm11, %vm6153_vm10 }
0x1815   : > { %6810 = vst [vmem:[%s9498_s29 + $0x3b8] sm:$0xff] %v6570_v37  ;;  %v6648_v52 = vsel %vm12340_vm14, -3.4028235e+38, %v5188_v34  ;;  %8310 = vmatmul.msk.bf16.gmra.mxu2 %vm4500_vm7, %v10446_v19  ;;  %v8538_v53 = vld [vmem:[%s9496_s14 + $0x4c4] sm:$0xf0]  ;;  %vm6331_vm0 = vmxor %vm6209_vm15, %vm6150_vm3  ;;  %v5995_v37 = vadd.s32 5888, %v10548_v7 }
0x1816   : > { %6887 = vst [vmem:[%s9498_s29 + $0x620] sm:$0xff] %v6647_v47  ;;  %8312 = vmatmul.msk.bf16.gmra.mxu3 %vm4500_vm7, %v10446_v19  ;;  %v8148_v32 = vor.u32 %v8538_v53, %v8147_v28  ;;  %v8149_v39 = vld [vmem:[%s9496_s14 + $0x4c8] sm:$0xf0]  ;;  %vm6332_vm14 = vmxor %vm6209_vm15, %vm6151_vm5 }
0x1817   : > { %6888 = vst [vmem:[%s9498_s29 + $0x628] sm:$0xff] %v6648_v52  ;;  %v8152_v47 = vor.u32 %v8498_v8, %v8149_v39 }
0x1818   : > { %v5205_v2 = vpop.f32.mrf.mxu2 }
0x1819   : > { %v5206_v11 = vadd.f32 %v5205_v2, %v12257_v62  ;;  %v5223_v3 = vpop.f32.mrf.mxu3  ;;  %v5171_v25 = vpop.f32.mrf.mxu0  ;;  %v3493_v62 = vperm.slane %v12368_v50, 2 }
0x181a   : > { %v5224_v55 = vadd.f32 %v5223_v3, %v12263_v42  ;;  %v5189_v29 = vpop.f32.mrf.mxu1  ;;  %v8139_v3 = vld [vmem:[%s9496_s14 + $0x380] sm:$0xf] }
0x181b   : > { %v6649_v14 = vsel %vm12379_vm12, -3.4028235e+38, %v5206_v11  ;;  %v12412_v40 = vperm.slane %v3493_v62, 0  ;;  %vm12493_vm12 = vmxor %vm6209_vm15, %vm6152_vm9  ;;  %v8537_v25 = vld [vmem:[%s9496_s14 + $0x4bc] sm:$0xf0] }
0x181c   : > { %6889 = vst [vmem:[%s9498_s29 + $0x630] sm:$0xff] %v6649_v14  ;;  %v6650_v42 = vsel %vm6410_vm13, -3.4028235e+38, %v5224_v55  ;;  %vm12503_vm13 = vmxor %vm6209_vm15, %vm6153_vm10  ;;  %v8140_v29 = vor.u32 %v8537_v25, %v8139_v3  ;;  %v8141_v14 = vld [vmem:[%s9496_s14 + $0x4c0] sm:$0xf0] }
0x181d   : > { %6890 = vst [vmem:[%s9498_s29 + $0x638] sm:$0xff] %v6650_v42  ;;  %v8144_v12 = vor.u32 %v8497_v1, %v8141_v14 }
0x1820   : > { %v5207_v46 = vpop.f32.mrf.mxu2 }
0x1821   : > { %v5225_v5 = vpop.f32.mrf.mxu3  ;;  %v5236_v56 = vpop.f32.mrf.mxu0 }
0x1822   : > { %v5237_v6 = vadd.f32 %v5236_v56, %v12407_v4  ;;  %v5254_v43 = vpop.f32.mrf.mxu1  ;;  %v5993_v5 = vadd.s32 5632, %v10548_v7  ;;  %v5994_v56 = vadd.s32 5760, %v10548_v7 }
0x1823   : > { %v5255_v0 = vadd.f32 %v5254_v43, %v12412_v40 }
0x1824   : > { %v6491_v9 = vsel %vm6251_vm1, -3.4028235e+38, %v5237_v6  ;;  %8313 = vmatmul.msk.bf16.vlgmr.msra.gmra.mxu0 %vm4500_vm7, %v12066_v23  ;;  %8315 = vmatmul.msk.bf16.vlgmr.msra.gmra.mxu1 %vm4500_vm7, %v12066_v23  ;;  %vm12514_vm1 = vmxor %vm6210_vm8, %vm6150_vm3  ;;  %v8458_v6 = vld [vmem:[%s9496_s14 + $0x244] sm:$0xf0]  ;;  %v12574_v39 = vadd.s32 %v10562_v61, %v5993_v5 }
0x1825   : > { %6731 = vst [vmem:[%s9498_s29 + $0x140] sm:$0xff] %v6491_v9  ;;  %v6492_v17 = vsel %vm6252_vm2, -3.4028235e+38, %v5255_v0  ;;  %8317 = vmatmul.msk.bf16.vlgmr.msra.gmra.mxu2 %vm4500_vm7, %v12066_v23  ;;  %vm12524_vm2 = vmxor %vm6210_vm8, %vm6151_vm5  ;;  %5665 = vmatpush.bf16.msra.mxu0 %v8140_v29  ;;  %v7828_v0 = vor.u32 %v8458_v6, %v7827_v41  ;;  %v8418_v9 = vld [vmem:[%s9496_s14 + $0x10c] sm:$0xf] }
0x1826   : > { %6732 = vst [vmem:[%s9498_s29 + $0x148] sm:$0xff] %v6492_v17  ;;  %8319 = vmatmul.msk.bf16.vlgmr.msra.gmra.mxu3 %vm4500_vm7, %v12066_v23  ;;  %5701 = vmatpush.bf16.msra.mxu2 %v8148_v32  ;;  %vm12560_vm3 = vmxor %vm6210_vm8, %vm6152_vm9  ;;  %vm6154_vm9 = vcmp.lt.s32.totalorder %v12574_v39, 16  ;;  %v8502_v39 = vld [vmem:[%s9496_s14 + $0x3ac] sm:$0xf] }
0x1827   : > { %5719 = vmatpush.bf16.msra.mxu3 %v8152_v47  ;;  %5683 = vmatpush.bf16.msra.mxu1 %v8144_v12  ;;  %vm6414_vm5 = vmxor %vm6210_vm8, %vm6153_vm10  ;;  %v5996_v47 = vadd.s32 6016, %v10548_v7 }
0x1828   : > { %v5272_v34 = vpop.f32.mrf.mxu2 }
0x1829   : > { %v5273_v52 = vadd.f32 %v5272_v34, %v12441_v44  ;;  %v5290_v50 = vpop.f32.mrf.mxu3  ;;  %v5238_v58 = vpop.f32.mrf.mxu0  ;;  %v12580_v34 = vadd.s32 %v10562_v61, %v5994_v56  ;;  %v12605_v25 = vadd.s32 %v10562_v61, %v5996_v47 }
0x182a   : > { %v5291_v30 = vadd.f32 %v5290_v50, %v12447_v15  ;;  %v5239_v21 = vadd.f32 %v5238_v58, %v12407_v4  ;;  %v5256_v16 = vpop.f32.mrf.mxu1  ;;  %5702 = vmatpush.bf16.msra.mxu2 %v7828_v0  ;;  %v8457_v50 = vld [vmem:[%s9496_s14 + $0x23c] sm:$0xf0] }
0x182b   : > { %v6493_v2 = vsel %vm12455_vm4, -3.4028235e+38, %v5273_v52  ;;  %v5257_v24 = vadd.f32 %v5256_v16, %v12412_v40  ;;  %v7819_v52 = vld [vmem:[%s9496_s14 + $0x100] sm:$0xf]  ;;  %v7821_v16 = vld [vmem:[%s9496_s14 + $0x240] sm:$0xf0]  ;;  %vm6255_vm4 = vmxor %vm6208_vm11, %vm6154_vm9 }
0x182c   : > { %6733 = vst [vmem:[%s9498_s29 + $0x150] sm:$0xff] %v6493_v2  ;;  %v6494_v63 = vsel %vm12465_vm6, -3.4028235e+38, %v5291_v30  ;;  %v6571_v57 = vsel %vm6331_vm0, -3.4028235e+38, %v5239_v21  ;;  %v7820_v30 = vor.u32 %v8457_v50, %v7819_v52  ;;  %vm6155_vm10 = vcmp.lt.s32.totalorder %v12580_v34, 16 }
0x182d   : > { %6734 = vst [vmem:[%s9498_s29 + $0x158] sm:$0xff] %v6494_v63  ;;  %v6572_v35 = vsel %vm6332_vm14, -3.4028235e+38, %v5257_v24  ;;  %v8417_v21 = vld [vmem:[%s9496_s14 + $0x104] sm:$0xf]  ;;  %vm6256_vm6 = vmxor %vm6208_vm11, %vm6155_vm10  ;;  %vm6157_vm14 = vcmp.lt.s32.totalorder %v12605_v25, 16 }
0x182e   : > { %6811 = vst [vmem:[%s9498_s29 + $0x3c0] sm:$0xff] %v6571_v57  ;;  %v7824_v24 = vor.u32 %v8417_v21, %v7821_v16  ;;  %v12597_v57 = vadd.s32 %v10562_v61, %v5995_v37  ;;  %5666 = vmatpush.bf16.msra.mxu0 %v7820_v30 }
0x182f   : > { %6812 = vst [vmem:[%s9498_s29 + $0x3c8] sm:$0xff] %v6572_v35 }
0x1830   : > { %v5274_v10 = vpop.f32.mrf.mxu2  ;;  %5684 = vmatpush.bf16.msra.mxu1 %v7824_v24  ;;  %vm6156_vm0 = vcmp.lt.s32.totalorder %v12597_v57, 16  ;;  %v12713_v24 = vld [vmem:[%s9494_s11 + $0x30] sm:$0xff] }
0x1831   : > { %v5275_v62 = vadd.f32 %v5274_v10, %v12441_v44  ;;  %v5292_v42 = vpop.f32.mrf.mxu3  ;;  %v5241_v45 = vpop.f32.mrf.mxu0 }
0x1832   : > { %v5293_v13 = vadd.f32 %v5292_v42, %v12447_v15  ;;  %v5242_v59 = vadd.f32 %v5241_v45, %v12407_v4  ;;  %v5259_v33 = vpop.f32.mrf.mxu1 }
0x1833   : > { %v6573_v60 = vsel %vm12493_vm12, -3.4028235e+38, %v5275_v62  ;;  %v5260_v26 = vadd.f32 %v5259_v33, %v12412_v40  ;;  %v12549_v40 = vunpack.c.h.bf16 %v12348_v54  ;;  %v7829_v54 = vld [vmem:[%s9496_s14 + $0x248] sm:$0xf0]  ;;  %vm12635_vm12 = vmxor %vm6208_vm11, %vm6156_vm0 }
0x1834   : > { %6813 = vst [vmem:[%s9498_s29 + $0x3d0] sm:$0xff] %v6573_v60  ;;  %v6574_v51 = vsel %vm12503_vm13, -3.4028235e+38, %v5293_v13  ;;  %v6651_v4 = vsel %vm12514_vm1, -3.4028235e+38, %v5242_v59  ;;  %8314 = vmatmul.msk.bf16.gmra.mxu0 %vm4500_vm7, %v10446_v19  ;;  %8316 = vmatmul.msk.bf16.gmra.mxu1 %vm4500_vm7, %v10446_v19  ;;  %v7832_v53 = vor.u32 %v8418_v9, %v7829_v54  ;;  %vm12645_vm13 = vmxor %vm6208_vm11, %vm6157_vm14 }
0x1835   : > { %6814 = vst [vmem:[%s9498_s29 + $0x3d8] sm:$0xff] %v6574_v51  ;;  %v6652_v46 = vsel %vm12524_vm2, -3.4028235e+38, %v5260_v26  ;;  %8318 = vmatmul.msk.bf16.gmra.mxu2 %vm4500_vm7, %v10446_v19  ;;  %v3496_v8 = vperm.slane %v12549_v40, 0  ;;  %v3498_v3 = vperm.slane %v12549_v40, 4  ;;  %v3499_v29 = vperm.slane %v12549_v40, 6  ;;  %vm6335_vm1 = vmxor %vm6209_vm15, %vm6154_vm9 }
0x1836   : > { %6891 = vst [vmem:[%s9498_s29 + $0x640] sm:$0xff] %v6651_v4  ;;  %8320 = vmatmul.msk.bf16.gmra.mxu3 %vm4500_vm7, %v10446_v19  ;;  %v8540_v13 = vld [vmem:[%s9496_s14 + $0x4d4] sm:$0xf0]  ;;  %v8500_v59 = vld [vmem:[%s9496_s14 + $0x39c] sm:$0xf]  ;;  %vm6336_vm2 = vmxor %vm6209_vm15, %vm6155_vm10 }
0x1837   : > { %6892 = vst [vmem:[%s9498_s29 + $0x648] sm:$0xff] %v6652_v46  ;;  %5720 = vmatpush.bf16.msra.mxu3 %v7832_v53  ;;  %v12588_v58 = vperm.slane %v3496_v8, 0  ;;  %v12622_v42 = vperm.slane %v3498_v3, 0  ;;  %v12628_v45 = vperm.slane %v3499_v29, 0  ;;  %v8164_v60 = vor.u32 %v8540_v13, %v8163_v27  ;;  %v8165_v26 = vld [vmem:[%s9496_s14 + $0x4d8] sm:$0xf0] }
0x1838   : > { %v5277_v43 = vpop.f32.mrf.mxu2  ;;  %v8157_v8 = vld [vmem:[%s9496_s14 + $0x4d0] sm:$0xf0]  ;;  %v7843_v3 = vld [vmem:[%s9496_s14 + $0x118] sm:$0xf] }
0x1839   : > { %v5278_v17 = vadd.f32 %v5277_v43, %v12441_v44  ;;  %v5295_v28 = vpop.f32.mrf.mxu3  ;;  %v5243_v48 = vpop.f32.mrf.mxu0  ;;  %v3497_v44 = vperm.slane %v12549_v40, 2  ;;  %v8168_v40 = vor.u32 %v8500_v59, %v8165_v26 }
0x183a   : > { %v5296_v22 = vadd.f32 %v5295_v28, %v12447_v15  ;;  %v5261_v32 = vpop.f32.mrf.mxu1  ;;  %v8539_v28 = vld [vmem:[%s9496_s14 + $0x4cc] sm:$0xf0] }
0x183b   : > { %v6653_v20 = vsel %vm12560_vm3, -3.4028235e+38, %v5278_v17  ;;  %v12593_v2 = vperm.slane %v3497_v44, 0  ;;  %vm12674_vm3 = vmxor %vm6209_vm15, %vm6156_vm0  ;;  %v8155_v17 = vld [vmem:[%s9496_s14 + $0x390] sm:$0xf] }
0x183c   : > { %6893 = vst [vmem:[%s9498_s29 + $0x650] sm:$0xff] %v6653_v20  ;;  %v6654_v15 = vsel %vm6414_vm5, -3.4028235e+38, %v5296_v22  ;;  %vm12684_vm5 = vmxor %vm6209_vm15, %vm6157_vm14  ;;  %v8156_v22 = vor.u32 %v8539_v28, %v8155_v17  ;;  %v8499_v32 = vld [vmem:[%s9496_s14 + $0x394] sm:$0xf] }
0x183d   : > { %6894 = vst [vmem:[%s9498_s29 + $0x658] sm:$0xff] %v6654_v15  ;;  %v8160_v47 = vor.u32 %v8499_v32, %v8157_v8 }
0x1840   : > { %v5279_v63 = vpop.f32.mrf.mxu2 }
0x1841   : > { %v5297_v35 = vpop.f32.mrf.mxu3  ;;  %v5308_v11 = vpop.f32.mrf.mxu0  ;;  %v12733_v63 = vunpack.c.l.bf16 %v12713_v24 }
0x1842   : > { %v5309_v10 = vadd.f32 %v5308_v11, %v12588_v58  ;;  %v5326_v55 = vpop.f32.mrf.mxu1  ;;  %v5997_v35 = vadd.s32 6144, %v10548_v7  ;;  %v5998_v11 = vadd.s32 6272, %v10548_v7 }
0x1843   : > { %v5327_v1 = vadd.f32 %v5326_v55, %v12593_v2  ;;  %v3500_v18 = vperm.slane %v12733_v63, 0  ;;  %v3502_v28 = vperm.slane %v12733_v63, 4  ;;  %v3503_v32 = vperm.slane %v12733_v63, 6 }
0x1844   : > { %v6495_v14 = vsel %vm6255_vm4, -3.4028235e+38, %v5309_v10  ;;  %8321 = vmatmul.msk.bf16.vlgmr.msrb.gmra.mxu0 %vm4500_vm7, %v12066_v23  ;;  %8323 = vmatmul.msk.bf16.vlgmr.msrb.gmra.mxu1 %vm4500_vm7, %v12066_v23  ;;  %vm12695_vm4 = vmxor %vm6210_vm8, %vm6154_vm9  ;;  %v8460_v10 = vld [vmem:[%s9496_s14 + $0x254] sm:$0xf0]  ;;  %v12764_v26 = vadd.s32 %v10562_v61, %v5998_v11 }
0x1845   : > { %6735 = vst [vmem:[%s9498_s29 + $0x160] sm:$0xff] %v6495_v14  ;;  %v6496_v62 = vsel %vm6256_vm6, -3.4028235e+38, %v5327_v1  ;;  %8325 = vmatmul.msk.bf16.vlgmr.msrb.gmra.mxu2 %vm4500_vm7, %v12066_v23  ;;  %vm12705_vm6 = vmxor %vm6210_vm8, %vm6155_vm10  ;;  %5737 = vmatpush.bf16.msrb.mxu0 %v8156_v22  ;;  %v7844_v1 = vor.u32 %v8460_v10, %v7843_v3  ;;  %v8420_v14 = vld [vmem:[%s9496_s14 + $0x11c] sm:$0xf]  ;;  %v12812_v37 = vperm.slane %v3503_v32, 0 }
0x1846   : > { %6736 = vst [vmem:[%s9498_s29 + $0x168] sm:$0xff] %v6496_v62  ;;  %8327 = vmatmul.msk.bf16.vlgmr.msrb.gmra.mxu3 %vm4500_vm7, %v12066_v23  ;;  %5773 = vmatpush.bf16.msrb.mxu2 %v8164_v60  ;;  %vm12744_vm9 = vmxor %vm6210_vm8, %vm6156_vm0  ;;  %v7845_v62 = vld [vmem:[%s9496_s14 + $0x258] sm:$0xf0]  ;;  %v12758_v60 = vadd.s32 %v10562_v61, %v5997_v35 }
0x1847   : > { %5791 = vmatpush.bf16.msrb.mxu3 %v8168_v40  ;;  %5755 = vmatpush.bf16.msrb.mxu1 %v8160_v47  ;;  %vm6418_vm10 = vmxor %vm6210_vm8, %vm6157_vm14  ;;  %v7848_v13 = vor.u32 %v8420_v14, %v7845_v62  ;;  %v8459_v40 = vld [vmem:[%s9496_s14 + $0x24c] sm:$0xf0]  ;;  %vm6159_vm14 = vcmp.lt.s32.totalorder %v12764_v26, 16  ;;  %v8179_v47 = vld [vmem:[%s9496_s14 + $0x3a8] sm:$0xf] }
0x1848   : > { %v5344_v33 = vpop.f32.mrf.mxu2  ;;  %vm6158_vm0 = vcmp.lt.s32.totalorder %v12758_v60, 16 }
0x1849   : > { %v5345_v51 = vadd.f32 %v5344_v33, %v12622_v42  ;;  %v5362_v4 = vpop.f32.mrf.mxu3  ;;  %v5310_v46 = vpop.f32.mrf.mxu0 }
0x184a   : > { %v5363_v5 = vadd.f32 %v5362_v4, %v12628_v45  ;;  %v5311_v56 = vadd.f32 %v5310_v46, %v12588_v58  ;;  %v5328_v41 = vpop.f32.mrf.mxu1  ;;  %5774 = vmatpush.bf16.msrb.mxu2 %v7844_v1  ;;  %v6000_v4 = vadd.s32 6528, %v10548_v7  ;;  %v7835_v46 = vld [vmem:[%s9496_s14 + $0x110] sm:$0xf] }
0x184b   : > { %v6497_v6 = vsel %vm12635_vm12, -3.4028235e+38, %v5345_v51  ;;  %v5329_v43 = vadd.f32 %v5328_v41, %v12593_v2  ;;  %5792 = vmatpush.bf16.msrb.mxu3 %v7848_v13  ;;  %v5999_v51 = vadd.s32 6400, %v10548_v7  ;;  %v8419_v41 = vld [vmem:[%s9496_s14 + $0x114] sm:$0xf]  ;;  %vm6259_vm12 = vmxor %vm6208_vm11, %vm6158_vm0 }
0x184c   : > { %6737 = vst [vmem:[%s9498_s29 + $0x170] sm:$0xff] %v6497_v6  ;;  %v6498_v38 = vsel %vm12645_vm13, -3.4028235e+38, %v5363_v5  ;;  %v6575_v0 = vsel %vm6335_vm1, -3.4028235e+38, %v5311_v56  ;;  %v12772_v5 = vperm.slane %v3500_v18, 0  ;;  %v7836_v56 = vor.u32 %v8459_v40, %v7835_v46  ;;  %vm6260_vm13 = vmxor %vm6208_vm11, %vm6159_vm14 }
0x184d   : > { %6738 = vst [vmem:[%s9498_s29 + $0x178] sm:$0xff] %v6498_v38  ;;  %v6576_v9 = vsel %vm6336_vm2, -3.4028235e+38, %v5329_v43  ;;  %v7837_v6 = vld [vmem:[%s9496_s14 + $0x250] sm:$0xf0] }
0x184e   : > { %6815 = vst [vmem:[%s9498_s29 + $0x3e0] sm:$0xff] %v6575_v0  ;;  %v7840_v38 = vor.u32 %v8419_v41, %v7837_v6  ;;  %5738 = vmatpush.bf16.msrb.mxu0 %v7836_v56  ;;  %v8173_v18 = vld [vmem:[%s9496_s14 + $0x4e0] sm:$0xf0] }
0x184f   : > { %6816 = vst [vmem:[%s9498_s29 + $0x3e8] sm:$0xff] %v6576_v9  ;;  %v12781_v9 = vadd.s32 %v10562_v61, %v5999_v51  ;;  %v8195_v51 = vld [vmem:[%s9496_s14 + $0x3b8] sm:$0xf] }
0x1850   : > { %v5346_v48 = vpop.f32.mrf.mxu2  ;;  %5756 = vmatpush.bf16.msrb.mxu1 %v7840_v38 }
0x1851   : > { %v5347_v20 = vadd.f32 %v5346_v48, %v12622_v42  ;;  %v5364_v44 = vpop.f32.mrf.mxu3  ;;  %v5313_v15 = vpop.f32.mrf.mxu0  ;;  %v12789_v48 = vadd.s32 %v10562_v61, %v6000_v4  ;;  %vm6160_vm1 = vcmp.lt.s32.totalorder %v12781_v9, 16 }
0x1852   : > { %v5365_v52 = vadd.f32 %v5364_v44, %v12628_v45  ;;  %v5314_v50 = vadd.f32 %v5313_v15, %v12588_v58  ;;  %v5331_v30 = vpop.f32.mrf.mxu1  ;;  %v12806_v15 = vperm.slane %v3502_v28, 0  ;;  %v8462_v28 = vld [vmem:[%s9496_s14 + $0x264] sm:$0xf0] }
0x1853   : > { %v6577_v21 = vsel %vm12674_vm3, -3.4028235e+38, %v5347_v20  ;;  %v5332_v16 = vadd.f32 %v5331_v30, %v12593_v2  ;;  %vm6161_vm2 = vcmp.lt.s32.totalorder %v12789_v48, 16  ;;  %vm12820_vm3 = vmxor %vm6208_vm11, %vm6160_vm1 }
0x1854   : > { %6817 = vst [vmem:[%s9498_s29 + $0x3f0] sm:$0xff] %v6577_v21  ;;  %v6578_v34 = vsel %vm12684_vm5, -3.4028235e+38, %v5365_v52  ;;  %v6655_v58 = vsel %vm12695_vm4, -3.4028235e+38, %v5314_v50  ;;  %8322 = vmatmul.msk.bf16.gmra.mxu0 %vm4500_vm7, %v10446_v19  ;;  %8324 = vmatmul.msk.bf16.gmra.mxu1 %vm4500_vm7, %v10446_v19  ;;  %vm12830_vm5 = vmxor %vm6208_vm11, %vm6161_vm2 }
0x1855   : > { %6818 = vst [vmem:[%s9498_s29 + $0x3f8] sm:$0xff] %v6578_v34  ;;  %v6656_v2 = vsel %vm12705_vm6, -3.4028235e+38, %v5332_v16  ;;  %8326 = vmatmul.msk.bf16.gmra.mxu2 %vm4500_vm7, %v10446_v19  ;;  %v8542_v52 = vld [vmem:[%s9496_s14 + $0x4e4] sm:$0xf0]  ;;  %vm6339_vm4 = vmxor %vm6209_vm15, %vm6158_vm0 }
0x1856   : > { %6895 = vst [vmem:[%s9498_s29 + $0x660] sm:$0xff] %v6655_v58  ;;  %8328 = vmatmul.msk.bf16.gmra.mxu3 %vm4500_vm7, %v10446_v19  ;;  %v8180_v30 = vor.u32 %v8542_v52, %v8179_v47  ;;  %v8181_v21 = vld [vmem:[%s9496_s14 + $0x4e8] sm:$0xf0]  ;;  %vm6340_vm6 = vmxor %vm6209_vm15, %vm6159_vm14 }
0x1857   : > { %6896 = vst [vmem:[%s9498_s29 + $0x668] sm:$0xff] %v6656_v2  ;;  %v8184_v34 = vor.u32 %v8502_v39, %v8181_v21 }
0x1858   : > { %v5349_v55 = vpop.f32.mrf.mxu2 }
0x1859   : > { %v5350_v27 = vadd.f32 %v5349_v55, %v12622_v42  ;;  %v5367_v12 = vpop.f32.mrf.mxu3  ;;  %v5315_v57 = vpop.f32.mrf.mxu0  ;;  %v3501_v42 = vperm.slane %v12733_v63, 2 }
0x185a   : > { %v5368_v59 = vadd.f32 %v5367_v12, %v12628_v45  ;;  %v5333_v33 = vpop.f32.mrf.mxu1  ;;  %v8541_v12 = vld [vmem:[%s9496_s14 + $0x4dc] sm:$0xf0] }
0x185b   : > { %v6657_v25 = vsel %vm12744_vm9, -3.4028235e+38, %v5350_v27  ;;  %v12777_v43 = vperm.slane %v3501_v42, 0  ;;  %vm12858_vm9 = vmxor %vm6209_vm15, %vm6160_vm1  ;;  %v8171_v27 = vld [vmem:[%s9496_s14 + $0x3a0] sm:$0xf] }
0x185c   : > { %6897 = vst [vmem:[%s9498_s29 + $0x670] sm:$0xff] %v6657_v25  ;;  %v6658_v45 = vsel %vm6418_vm10, -3.4028235e+38, %v5368_v59  ;;  %vm12868_vm10 = vmxor %vm6209_vm15, %vm6161_vm2  ;;  %v8172_v59 = vor.u32 %v8541_v12, %v8171_v27  ;;  %v8501_v33 = vld [vmem:[%s9496_s14 + $0x3a4] sm:$0xf] }
0x185d   : > { %6898 = vst [vmem:[%s9498_s29 + $0x678] sm:$0xff] %v6658_v45  ;;  %v8176_v4 = vor.u32 %v8501_v33, %v8173_v18  ;;  %v12979_v18 = vld [vmem:[#allocation2] sm:$0xff] }
0x1860   : > { %v5351_v0 = vpop.f32.mrf.mxu2 }
0x1861   : > { %v5369_v54 = vpop.f32.mrf.mxu3  ;;  %v5380_v17 = vpop.f32.mrf.mxu0  ;;  %v6001_v0 = vadd.s32 6656, %v10548_v7 }
0x1862   : > { %v5381_v53 = vadd.f32 %v5380_v17, %v12772_v5  ;;  %v5398_v22 = vpop.f32.mrf.mxu1  ;;  %v6002_v54 = vadd.s32 6784, %v10548_v7  ;;  %v7859_v17 = vld [vmem:[%s9496_s14 + $0x128] sm:$0xf] }
0x1863   : > { %v5399_v8 = vadd.f32 %v5398_v22, %v12777_v43  ;;  %v7860_v32 = vor.u32 %v8462_v28, %v7859_v17  ;;  %v12939_v39 = vadd.s32 %v10562_v61, %v6001_v0 }
0x1864   : > { %v6499_v20 = vsel %vm6259_vm12, -3.4028235e+38, %v5381_v53  ;;  %8329 = vmatmul.msk.bf16.vlgmr.msra.gmra.mxu0 %vm4500_vm7, %v12066_v23  ;;  %8331 = vmatmul.msk.bf16.vlgmr.msra.gmra.mxu1 %vm4500_vm7, %v12066_v23  ;;  %vm12879_vm12 = vmxor %vm6210_vm8, %vm6158_vm0  ;;  %v12945_v21 = vadd.s32 %v10562_v61, %v6002_v54 }
0x1865   : > { %6739 = vst [vmem:[%s9498_s29 + $0x180] sm:$0xff] %v6499_v20  ;;  %v6500_v44 = vsel %vm6260_vm13, -3.4028235e+38, %v5399_v8  ;;  %8333 = vmatmul.msk.bf16.vlgmr.msra.gmra.mxu2 %vm4500_vm7, %v12066_v23  ;;  %vm12889_vm13 = vmxor %vm6210_vm8, %vm6159_vm14  ;;  %5809 = vmatpush.bf16.msra.mxu0 %v8172_v59  ;;  %v8422_v8 = vld [vmem:[%s9496_s14 + $0x12c] sm:$0xf] }
0x1866   : > { %6740 = vst [vmem:[%s9498_s29 + $0x188] sm:$0xff] %v6500_v44  ;;  %8335 = vmatmul.msk.bf16.vlgmr.msra.gmra.mxu3 %vm4500_vm7, %v12066_v23  ;;  %5845 = vmatpush.bf16.msra.mxu2 %v8180_v30  ;;  %vm12925_vm0 = vmxor %vm6210_vm8, %vm6160_vm1  ;;  %v6004_v23 = vadd.s32 7040, %v10548_v7  ;;  %vm6162_vm1 = vcmp.lt.s32.totalorder %v12939_v39, 16 }
0x1867   : > { %5863 = vmatpush.bf16.msra.mxu3 %v8184_v34  ;;  %5827 = vmatpush.bf16.msra.mxu1 %v8176_v4  ;;  %vm6422_vm14 = vmxor %vm6210_vm8, %vm6161_vm2  ;;  %v7851_v34 = vld [vmem:[%s9496_s14 + $0x120] sm:$0xf]  ;;  %vm6163_vm2 = vcmp.lt.s32.totalorder %v12945_v21, 16 }
0x1868   : > { %v5416_v16 = vpop.f32.mrf.mxu2  ;;  %v12970_v27 = vadd.s32 %v10562_v61, %v6004_v23 }
0x1869   : > { %v5417_v58 = vadd.f32 %v5416_v16, %v12806_v15  ;;  %v5434_v2 = vpop.f32.mrf.mxu3  ;;  %v5382_v63 = vpop.f32.mrf.mxu0  ;;  %v6003_v16 = vadd.s32 6912, %v10548_v7 }
0x186a   : > { %v5435_v35 = vadd.f32 %v5434_v2, %v12812_v37  ;;  %v5383_v11 = vadd.f32 %v5382_v63, %v12772_v5  ;;  %v5400_v3 = vpop.f32.mrf.mxu1  ;;  %5846 = vmatpush.bf16.msra.mxu2 %v7860_v32 }
0x186b   : > { %v6501_v10 = vsel %vm12820_vm3, -3.4028235e+38, %v5417_v58  ;;  %v5401_v55 = vadd.f32 %v5400_v3, %v12777_v43  ;;  %v8461_v58 = vld [vmem:[%s9496_s14 + $0x25c] sm:$0xf0]  ;;  %vm6263_vm3 = vmxor %vm6208_vm11, %vm6162_vm1 }
0x186c   : > { %6741 = vst [vmem:[%s9498_s29 + $0x190] sm:$0xff] %v6501_v10  ;;  %v6502_v29 = vsel %vm12830_vm5, -3.4028235e+38, %v5435_v35  ;;  %v6579_v1 = vsel %vm6339_vm4, -3.4028235e+38, %v5383_v11  ;;  %v7852_v63 = vor.u32 %v8461_v58, %v7851_v34  ;;  %vm6264_vm5 = vmxor %vm6208_vm11, %vm6163_vm2 }
0x186d   : > { %6742 = vst [vmem:[%s9498_s29 + $0x198] sm:$0xff] %v6502_v29  ;;  %v6580_v14 = vsel %vm6340_vm6, -3.4028235e+38, %v5401_v55  ;;  %v8421_v35 = vld [vmem:[%s9496_s14 + $0x124] sm:$0xf]  ;;  %v12962_v29 = vadd.s32 %v10562_v61, %v6003_v16  ;;  %vm6165_vm6 = vcmp.lt.s32.totalorder %v12970_v27, 16 }
0x186e   : > { %6819 = vst [vmem:[%s9498_s29 + $0x400] sm:$0xff] %v6579_v1  ;;  %v7853_v11 = vld [vmem:[%s9496_s14 + $0x260] sm:$0xf0]  ;;  %5810 = vmatpush.bf16.msra.mxu0 %v7852_v63 }
0x186f   : > { %6820 = vst [vmem:[%s9498_s29 + $0x408] sm:$0xff] %v6580_v14  ;;  %v7856_v10 = vor.u32 %v8421_v35, %v7853_v11  ;;  %vm6164_vm4 = vcmp.lt.s32.totalorder %v12962_v29, 16 }
0x1870   : > { %v5418_v57 = vpop.f32.mrf.mxu2 }
0x1871   : > { %v5419_v25 = vadd.f32 %v5418_v57, %v12806_v15  ;;  %v5436_v42 = vpop.f32.mrf.mxu3  ;;  %v5385_v45 = vpop.f32.mrf.mxu0  ;;  %5828 = vmatpush.bf16.msra.mxu1 %v7856_v10  ;;  %v13080_v10 = vld [vmem:[%s9494_s11 + $0x38] sm:$0xff] }
0x1872   : > { %v5437_v46 = vadd.f32 %v5436_v42, %v12812_v37  ;;  %v5386_v40 = vadd.f32 %v5385_v45, %v12772_v5  ;;  %v5403_v56 = vpop.f32.mrf.mxu1 }
0x1873   : > { %v6581_v60 = vsel %vm12858_vm9, -3.4028235e+38, %v5419_v25  ;;  %v5404_v6 = vadd.f32 %v5403_v56, %v12777_v43  ;;  %v12914_v43 = vunpack.c.h.bf16 %v12713_v24  ;;  %v7861_v24 = vld [vmem:[%s9496_s14 + $0x268] sm:$0xf0]  ;;  %vm13002_vm9 = vmxor %vm6208_vm11, %vm6164_vm4 }
0x1874   : > { %6821 = vst [vmem:[%s9498_s29 + $0x410] sm:$0xff] %v6581_v60  ;;  %v6582_v26 = vsel %vm12868_vm10, -3.4028235e+38, %v5437_v46  ;;  %v6659_v5 = vsel %vm12879_vm12, -3.4028235e+38, %v5386_v40  ;;  %8330 = vmatmul.msk.bf16.gmra.mxu0 %vm4500_vm7, %v10446_v19  ;;  %8332 = vmatmul.msk.bf16.gmra.mxu1 %vm4500_vm7, %v10446_v19  ;;  %v7864_v47 = vor.u32 %v8422_v8, %v7861_v24  ;;  %vm13012_vm10 = vmxor %vm6208_vm11, %vm6165_vm6 }
0x1875   : > { %6822 = vst [vmem:[%s9498_s29 + $0x418] sm:$0xff] %v6582_v26  ;;  %v6660_v38 = vsel %vm12889_vm13, -3.4028235e+38, %v5404_v6  ;;  %8334 = vmatmul.msk.bf16.gmra.mxu2 %vm4500_vm7, %v10446_v19  ;;  %v3504_v30 = vperm.slane %v12914_v43, 0  ;;  %v3506_v62 = vperm.slane %v12914_v43, 4  ;;  %v3507_v13 = vperm.slane %v12914_v43, 6  ;;  %vm6343_vm12 = vmxor %vm6209_vm15, %vm6162_vm1 }
0x1876   : > { %6899 = vst [vmem:[%s9498_s29 + $0x680] sm:$0xff] %v6659_v5  ;;  %8336 = vmatmul.msk.bf16.gmra.mxu3 %vm4500_vm7, %v10446_v19  ;;  %v8544_v46 = vld [vmem:[%s9496_s14 + $0x4f4] sm:$0xf0]  ;;  %v8504_v40 = vld [vmem:[%s9496_s14 + $0x3bc] sm:$0xf]  ;;  %vm6344_vm13 = vmxor %vm6209_vm15, %vm6163_vm2 }
0x1877   : > { %6900 = vst [vmem:[%s9498_s29 + $0x688] sm:$0xff] %v6660_v38  ;;  %5864 = vmatpush.bf16.msra.mxu3 %v7864_v47  ;;  %v12953_v2 = vperm.slane %v3504_v30, 0  ;;  %v12989_v42 = vperm.slane %v3506_v62, 0  ;;  %v12995_v45 = vperm.slane %v3507_v13, 0  ;;  %v8196_v60 = vor.u32 %v8544_v46, %v8195_v51  ;;  %v8197_v6 = vld [vmem:[%s9496_s14 + $0x4f8] sm:$0xf0] }
0x1878   : > { %v5421_v53 = vpop.f32.mrf.mxu2  ;;  %v8189_v30 = vld [vmem:[%s9496_s14 + $0x4f0] sm:$0xf0]  ;;  %v7875_v62 = vld [vmem:[%s9496_s14 + $0x138] sm:$0xf] }
0x1879   : > { %v5422_v20 = vadd.f32 %v5421_v53, %v12806_v15  ;;  %v5439_v44 = vpop.f32.mrf.mxu3  ;;  %v5387_v9 = vpop.f32.mrf.mxu0  ;;  %v3505_v15 = vperm.slane %v12914_v43, 2  ;;  %v8200_v43 = vor.u32 %v8504_v40, %v8197_v6 }
0x187a   : > { %v5440_v52 = vadd.f32 %v5439_v44, %v12812_v37  ;;  %v5405_v50 = vpop.f32.mrf.mxu1  ;;  %v8543_v44 = vld [vmem:[%s9496_s14 + $0x4ec] sm:$0xf0] }
0x187b   : > { %v6661_v48 = vsel %vm12925_vm0, -3.4028235e+38, %v5422_v20  ;;  %v12958_v3 = vperm.slane %v3505_v15, 0  ;;  %vm13041_vm0 = vmxor %vm6209_vm15, %vm6164_vm4  ;;  %v8187_v20 = vld [vmem:[%s9496_s14 + $0x3b0] sm:$0xf] }
0x187c   : > { %6901 = vst [vmem:[%s9498_s29 + $0x690] sm:$0xff] %v6661_v48  ;;  %v6662_v37 = vsel %vm6422_vm14, -3.4028235e+38, %v5440_v52  ;;  %vm13051_vm14 = vmxor %vm6209_vm15, %vm6165_vm6  ;;  %v8188_v52 = vor.u32 %v8543_v44, %v8187_v20  ;;  %v8503_v50 = vld [vmem:[%s9496_s14 + $0x3b4] sm:$0xf] }
0x187d   : > { %6902 = vst [vmem:[%s9498_s29 + $0x698] sm:$0xff] %v6662_v37  ;;  %v8192_v23 = vor.u32 %v8503_v50, %v8189_v30 }
0x1880   : > { %v5423_v55 = vpop.f32.mrf.mxu2 }
0x1881   : > { %v5441_v1 = vpop.f32.mrf.mxu3  ;;  %v5452_v14 = vpop.f32.mrf.mxu0  ;;  %v13100_v55 = vunpack.c.l.bf16 %v13080_v10 }
0x1882   : > { %v5453_v12 = vadd.f32 %v5452_v14, %v12953_v2  ;;  %v5470_v57 = vpop.f32.mrf.mxu1  ;;  %v6005_v1 = vadd.s32 7168, %v10548_v7  ;;  %v6006_v14 = vadd.s32 7296, %v10548_v7 }
0x1883   : > { %v5471_v59 = vadd.f32 %v5470_v57, %v12958_v3  ;;  %v3508_v41 = vperm.slane %v13100_v55, 0  ;;  %v3510_v44 = vperm.slane %v13100_v55, 4  ;;  %v3511_v50 = vperm.slane %v13100_v55, 6 }
0x1884   : > { %v6503_v33 = vsel %vm6263_vm3, -3.4028235e+38, %v5453_v12  ;;  %8337 = vmatmul.msk.bf16.vlgmr.msrb.gmra.mxu0 %vm4500_vm7, %v12979_v18  ;;  %8339 = vmatmul.msk.bf16.vlgmr.msrb.gmra.mxu1 %vm4500_vm7, %v12979_v18  ;;  %vm13062_vm3 = vmxor %vm6210_vm8, %vm6162_vm1  ;;  %v8464_v12 = vld [vmem:[%s9496_s14 + $0x274] sm:$0xf0]  ;;  %v13131_v6 = vadd.s32 %v10562_v61, %v6006_v14 }
0x1885   : > { %6743 = vst [vmem:[%s9498_s29 + $0x1a0] sm:$0xff] %v6503_v33  ;;  %v6504_v25 = vsel %vm6264_vm5, -3.4028235e+38, %v5471_v59  ;;  %8341 = vmatmul.msk.bf16.vlgmr.msrb.gmra.mxu2 %vm4500_vm7, %v12979_v18  ;;  %vm13072_vm5 = vmxor %vm6210_vm8, %vm6163_vm2  ;;  %5881 = vmatpush.bf16.msrb.mxu0 %v8188_v52  ;;  %v7876_v59 = vor.u32 %v8464_v12, %v7875_v62  ;;  %v8424_v33 = vld [vmem:[%s9496_s14 + $0x13c] sm:$0xf]  ;;  %v3671_v16 = vperm.slane %v3511_v50, 0 }
0x1886   : > { %6744 = vst [vmem:[%s9498_s29 + $0x1a8] sm:$0xff] %v6504_v25  ;;  %8343 = vmatmul.msk.bf16.vlgmr.msrb.gmra.mxu3 %vm4500_vm7, %v12979_v18  ;;  %5917 = vmatpush.bf16.msrb.mxu2 %v8196_v60  ;;  %vm13111_vm1 = vmxor %vm6210_vm8, %vm6164_vm4  ;;  %v7877_v25 = vld [vmem:[%s9496_s14 + $0x278] sm:$0xf0]  ;;  %v13125_v60 = vadd.s32 %v10562_v61, %v6005_v1 }
0x1887   : > { %5935 = vmatpush.bf16.msrb.mxu3 %v8200_v43  ;;  %5899 = vmatpush.bf16.msrb.mxu1 %v8192_v23  ;;  %vm6426_vm2 = vmxor %vm6210_vm8, %vm6165_vm6  ;;  %v7880_v46 = vor.u32 %v8424_v33, %v7877_v25  ;;  %v8463_v43 = vld [vmem:[%s9496_s14 + $0x26c] sm:$0xf0]  ;;  %vm6167_vm6 = vcmp.lt.s32.totalorder %v13131_v6, 16 }
0x1888   : > { %v5488_v56 = vpop.f32.mrf.mxu2  ;;  %vm6166_vm4 = vcmp.lt.s32.totalorder %v13125_v60, 16 }
0x1889   : > { %v5489_v26 = vadd.f32 %v5488_v56, %v12989_v42  ;;  %v5506_v5 = vpop.f32.mrf.mxu3  ;;  %v5454_v38 = vpop.f32.mrf.mxu0 }
0x188a   : > { %v5507_v0 = vadd.f32 %v5506_v5, %v12995_v45  ;;  %v5455_v54 = vadd.f32 %v5454_v38, %v12953_v2  ;;  %v5472_v17 = vpop.f32.mrf.mxu1  ;;  %5918 = vmatpush.bf16.msrb.mxu2 %v7876_v59  ;;  %v6008_v5 = vadd.s32 7552, %v10548_v7  ;;  %v7867_v38 = vld [vmem:[%s9496_s14 + $0x130] sm:$0xf] }
0x188b   : > { %v6505_v28 = vsel %vm13002_vm9, -3.4028235e+38, %v5489_v26  ;;  %v5473_v53 = vadd.f32 %v5472_v17, %v12958_v3  ;;  %5936 = vmatpush.bf16.msrb.mxu3 %v7880_v46  ;;  %v6007_v26 = vadd.s32 7424, %v10548_v7  ;;  %v8423_v17 = vld [vmem:[%s9496_s14 + $0x134] sm:$0xf]  ;;  %vm6267_vm9 = vmxor %vm6208_vm11, %vm6166_vm4 }
0x188c   : > { %6745 = vst [vmem:[%s9498_s29 + $0x1b0] sm:$0xff] %v6505_v28  ;;  %v6506_v22 = vsel %vm13012_vm10, -3.4028235e+38, %v5507_v0  ;;  %v6583_v32 = vsel %vm6343_vm12, -3.4028235e+38, %v5455_v54  ;;  %v3668_v0 = vperm.slane %v3508_v41, 0  ;;  %v7868_v54 = vor.u32 %v8463_v43, %v7867_v38  ;;  %vm6268_vm10 = vmxor %vm6208_vm11, %vm6167_vm6 }
0x188d   : > { %6746 = vst [vmem:[%s9498_s29 + $0x1b8] sm:$0xff] %v6506_v22  ;;  %v6584_v8 = vsel %vm6344_vm13, -3.4028235e+38, %v5473_v53  ;;  %v7869_v28 = vld [vmem:[%s9496_s14 + $0x270] sm:$0xf0]  ;;  %v6010_v41 = vadd.s32 7808, %v10548_v7 }
0x188e   : > { %6823 = vst [vmem:[%s9498_s29 + $0x420] sm:$0xff] %v6583_v32  ;;  %v7872_v22 = vor.u32 %v8423_v17, %v7869_v28  ;;  %5882 = vmatpush.bf16.msrb.mxu0 %v7868_v54  ;;  %v6011_v17 = vadd.s32 7936, %v10548_v7  ;;  %v6012_v28 = vadd.s32 8064, %v10548_v7  ;;  %s8545_s14 = smul.u32 (%p9149_p5), 640, %s9134_s30 }
0x188f   : > { %6824 = vst [vmem:[%s9498_s29 + $0x428] sm:$0xff] %v6584_v8  ;;  %v13144_v8 = vadd.s32 %v10562_v61, %v6007_v26 }
0x1890   : > { %v5490_v9 = vpop.f32.mrf.mxu2  ;;  %5900 = vmatpush.bf16.msrb.mxu1 %v7872_v22  ;;  %s13603_s27 = scalar_lea.vmem (%p9149_p5), %s13944_s8, %s8545_s14  }
0x1891   : > { %v5491_v48 = vadd.f32 %v5490_v9, %v12989_v42  ;;  %v5508_v15 = vpop.f32.mrf.mxu3  ;;  %v5457_v37 = vpop.f32.mrf.mxu0  ;;  %v13152_v9 = vadd.s32 %v10562_v61, %v6008_v5  ;;  %vm6168_vm12 = vcmp.lt.s32.totalorder %v13144_v8, 16  ;;  %v13243_v8 = vadd.s32 %v10562_v61, %v6011_v17 }
0x1892   : > { %v5509_v34 = vadd.f32 %v5508_v15, %v12995_v45  ;;  %v5458_v58 = vadd.f32 %v5457_v37, %v12953_v2  ;;  %v5475_v63 = vpop.f32.mrf.mxu1  ;;  %v3670_v37 = vperm.slane %v3510_v44, 0 }
0x1893   : > { %v6585_v35 = vsel %vm13041_vm0, -3.4028235e+38, %v5491_v48  ;;  %v5476_v11 = vadd.f32 %v5475_v63, %v12958_v3  ;;  %vm6169_vm13 = vcmp.lt.s32.totalorder %v13152_v9, 16  ;;  %vm6269_vm0 = vmxor %vm6208_vm11, %vm6168_vm12  ;;  %v13250_v9 = vadd.s32 %v10562_v61, %v6012_v28 }
0x1894   : > { %6825 = vst [vmem:[%s9498_s29 + $0x430] sm:$0xff] %v6585_v35  ;;  %v6586_v21 = vsel %vm13051_vm14, -3.4028235e+38, %v5509_v34  ;;  %v6663_v2 = vsel %vm13062_vm3, -3.4028235e+38, %v5458_v58  ;;  %8338 = vmatmul.msk.bf16.gmra.mxu0 %vm4500_vm7, %v10446_v19  ;;  %8340 = vmatmul.msk.bf16.gmra.mxu1 %vm4500_vm7, %v10446_v19  ;;  %vm6270_vm14 = vmxor %vm6208_vm11, %vm6169_vm13 }
0x1895   : > { %6826 = vst [vmem:[%s9498_s29 + $0x438] sm:$0xff] %v6586_v21  ;;  %v6664_v3 = vsel %vm13072_vm5, -3.4028235e+38, %v5476_v11  ;;  %8342 = vmatmul.msk.bf16.gmra.mxu2 %vm4500_vm7, %v10446_v19  ;;  %vm6347_vm3 = vmxor %vm6209_vm15, %vm6166_vm4 }
0x1896   : > { %6903 = vst [vmem:[%s9498_s29 + $0x6a0] sm:$0xff] %v6663_v2  ;;  %8344 = vmatmul.msk.bf16.gmra.mxu3 %vm4500_vm7, %v10446_v19  ;;  %vm6348_vm5 = vmxor %vm6209_vm15, %vm6167_vm6 }
0x1897   : > { %6904 = vst [vmem:[%s9498_s29 + $0x6a8] sm:$0xff] %v6664_v3 }
0x1898   : > { %v5493_v57 = vpop.f32.mrf.mxu2 }
0x1899   : > { %v5494_v51 = vadd.f32 %v5493_v57, %v12989_v42  ;;  %v5511_v4 = vpop.f32.mrf.mxu3  ;;  %v5459_v29 = vpop.f32.mrf.mxu0  ;;  %v3509_v42 = vperm.slane %v13100_v55, 2 }
0x189a   : > { %v5512_v40 = vadd.f32 %v5511_v4, %v12995_v45  ;;  %v5477_v56 = vpop.f32.mrf.mxu1 }
0x189b   : > { %v6665_v27 = vsel %vm13111_vm1, -3.4028235e+38, %v5494_v51  ;;  %v3669_v53 = vperm.slane %v3509_v42, 0  ;;  %vm6349_vm1 = vmxor %vm6209_vm15, %vm6168_vm12  ;;  %v6009_v56 = vadd.s32 7680, %v10548_v7 }
0x189c   : > { %6905 = vst [vmem:[%s9498_s29 + $0x6b0] sm:$0xff] %v6665_v27  ;;  %v6666_v45 = vsel %vm6426_vm2, -3.4028235e+38, %v5512_v40  ;;  %vm6350_vm2 = vmxor %vm6209_vm15, %vm6169_vm13  ;;  %v3427_v40 = vunpack.c.h.bf16 %v13080_v10 }
0x189d   : > { %6906 = vst [vmem:[%s9498_s29 + $0x6b8] sm:$0xff] %v6666_v45  ;;  %v13231_v5 = vadd.s32 %v10562_v61, %v6009_v56 }
0x189e   : > { %v3512_v26 = vperm.slane %v3427_v40, 0  ;;  %v3513_v43 = vperm.slane %v3427_v40, 2  ;;  %v3514_v44 = vperm.slane %v3427_v40, 4  ;;  %v3515_v50 = vperm.slane %v3427_v40, 6 }
0x18a0   : > { %v5495_v32 = vpop.f32.mrf.mxu2  ;;  %v3673_v22 = vperm.slane %v3513_v43, 0 }
0x18a1   : > { %v5513_v24 = vpop.f32.mrf.mxu3  ;;  %v5524_v20 = vpop.f32.mrf.mxu0 }
0x18a2   : > { %v5525_v47 = vadd.f32 %v5524_v20, %v3668_v0  ;;  %v5542_v52 = vpop.f32.mrf.mxu1 }
0x18a3   : > { %v5543_v30 = vadd.f32 %v5542_v52, %v3669_v53 }
0x18a4   : > { %v6507_v48 = vsel %vm6267_vm9, -3.4028235e+38, %v5525_v47  ;;  %8345 = vmatmul.msk.bf16.vlgmr.msra.gmra.mxu0 %vm4500_vm7, %v12979_v18  ;;  %8347 = vmatmul.msk.bf16.vlgmr.msra.gmra.mxu1 %vm4500_vm7, %v12979_v18  ;;  %vm6427_vm9 = vmxor %vm6210_vm8, %vm6166_vm4 }
0x18a5   : > { %6747 = vst [vmem:[%s9498_s29 + $0x1c0] sm:$0xff] %v6507_v48  ;;  %v6508_v15 = vsel %vm6268_vm10, -3.4028235e+38, %v5543_v30  ;;  %8349 = vmatmul.msk.bf16.vlgmr.msra.gmra.mxu2 %vm4500_vm7, %v12979_v18  ;;  %vm6428_vm10 = vmxor %vm6210_vm8, %vm6167_vm6 }
0x18a6   : > { %6748 = vst [vmem:[%s9498_s29 + $0x1c8] sm:$0xff] %v6508_v15  ;;  %8351 = vmatmul.msk.bf16.vlgmr.msra.gmra.mxu3 %vm4500_vm7, %v12979_v18  ;;  %vm6429_vm4 = vmxor %vm6210_vm8, %vm6168_vm12  ;;  %vm6170_vm12 = vcmp.lt.s32.totalorder %v13231_v5, 16 }
0x18a7   : > { %vm6430_vm6 = vmxor %vm6210_vm8, %vm6169_vm13 }
0x18a8   : > { %v5560_v23 = vpop.f32.mrf.mxu2 }
0x18a9   : > { %v5561_v34 = vadd.f32 %v5560_v23, %v3670_v37  ;;  %v5578_v58 = vpop.f32.mrf.mxu3  ;;  %v5526_v63 = vpop.f32.mrf.mxu0 }
0x18aa   : > { %v5579_v39 = vadd.f32 %v5578_v58, %v3671_v16  ;;  %v5527_v35 = vadd.f32 %v5526_v63, %v3668_v0  ;;  %v5544_v11 = vpop.f32.mrf.mxu1 }
0x18ab   : > { %v6509_v21 = vsel %vm6269_vm0, -3.4028235e+38, %v5561_v34  ;;  %v5545_v2 = vadd.f32 %v5544_v11, %v3669_v53  ;;  %vm6271_vm0 = vmxor %vm6208_vm11, %vm6170_vm12 }
0x18ac   : > { %6749 = vst [vmem:[%s9498_s29 + $0x1d0] sm:$0xff] %v6509_v21  ;;  %v6510_v3 = vsel %vm6270_vm14, -3.4028235e+38, %v5579_v39  ;;  %v6587_v55 = vsel %vm6347_vm3, -3.4028235e+38, %v5527_v35  ;;  %vm6172_vm3 = vcmp.lt.s32.totalorder %v13243_v8, 16 }
0x18ad   : > { %6750 = vst [vmem:[%s9498_s29 + $0x1d8] sm:$0xff] %v6510_v3  ;;  %v6588_v1 = vsel %vm6348_vm5, -3.4028235e+38, %v5545_v2  ;;  %vm6173_vm5 = vcmp.lt.s32.totalorder %v13250_v9, 16 }
0x18ae   : > { %6827 = vst [vmem:[%s9498_s29 + $0x440] sm:$0xff] %v6587_v55 }
0x18af   : > { %6828 = vst [vmem:[%s9498_s29 + $0x448] sm:$0xff] %v6588_v1 }
0x18b0   : > { %v5562_v14 = vpop.f32.mrf.mxu2 }
0x18b1   : > { %v5563_v62 = vadd.f32 %v5562_v14, %v3670_v37  ;;  %v5580_v12 = vpop.f32.mrf.mxu3  ;;  %v5529_v57 = vpop.f32.mrf.mxu0 }
0x18b2   : > { %v5581_v13 = vadd.f32 %v5580_v12, %v3671_v16  ;;  %v5530_v59 = vadd.f32 %v5529_v57, %v3668_v0  ;;  %v5547_v33 = vpop.f32.mrf.mxu1  ;;  %v13234_v0 = vadd.s32 %v10562_v61, %v6010_v41 }
0x18b3   : > { %v6589_v25 = vsel %vm6349_vm1, -3.4028235e+38, %v5563_v62  ;;  %v5548_v51 = vadd.f32 %v5547_v33, %v3669_v53  ;;  %v3672_v53 = vperm.slane %v3512_v26, 0  ;;  %vm6273_vm1 = vmxor %vm6208_vm11, %vm6172_vm3 }
0x18b4   : > { %6829 = vst [vmem:[%s9498_s29 + $0x450] sm:$0xff] %v6589_v25  ;;  %v6590_v4 = vsel %vm6350_vm2, -3.4028235e+38, %v5581_v13  ;;  %v6667_v29 = vsel %vm6427_vm9, -3.4028235e+38, %v5530_v59  ;;  %8346 = vmatmul.msk.bf16.gmra.mxu0 %vm4500_vm7, %v10446_v19  ;;  %8348 = vmatmul.msk.bf16.gmra.mxu1 %vm4500_vm7, %v10446_v19  ;;  %vm6171_vm13 = vcmp.lt.s32.totalorder %v13234_v0, 16  ;;  %vm6274_vm2 = vmxor %vm6208_vm11, %vm6173_vm5 }
0x18b5   : > { %6830 = vst [vmem:[%s9498_s29 + $0x458] sm:$0xff] %v6590_v4  ;;  %v6668_v46 = vsel %vm6428_vm10, -3.4028235e+38, %v5548_v51  ;;  %8350 = vmatmul.msk.bf16.gmra.mxu2 %vm4500_vm7, %v10446_v19  ;;  %vm6272_vm14 = vmxor %vm6208_vm11, %vm6171_vm13 }
0x18b6   : > { %6907 = vst [vmem:[%s9498_s29 + $0x6c0] sm:$0xff] %v6667_v29  ;;  %8352 = vmatmul.msk.bf16.gmra.mxu3 %vm4500_vm7, %v10446_v19  ;;  %vm6351_vm9 = vmxor %vm6209_vm15, %vm6170_vm12 }
0x18b7   : > { %6908 = vst [vmem:[%s9498_s29 + $0x6c8] sm:$0xff] %v6668_v46  ;;  %vm6352_vm10 = vmxor %vm6209_vm15, %vm6171_vm13  ;;  %v13317_v46 = vld [vmem:[%s9494_s11 + $0x40] sm:$0xff] }
0x18b8   : > { %v5565_v60 = vpop.f32.mrf.mxu2 }
0x18b9   : > { %v5566_v27 = vadd.f32 %v5565_v60, %v3670_v37  ;;  %v5583_v42 = vpop.f32.mrf.mxu3  ;;  %v5531_v10 = vpop.f32.mrf.mxu0  ;;  %v3674_v37 = vperm.slane %v3514_v44, 0  ;;  %v3428_v60 = vunpack.c.l.bf16 %v13317_v46 }
0x18ba   : > { %v5584_v6 = vadd.f32 %v5583_v42, %v3671_v16  ;;  %v5549_v45 = vpop.f32.mrf.mxu1  ;;  %v3675_v16 = vperm.slane %v3515_v50, 0  ;;  %v6014_v42 = vadd.s32 8320, %v10548_v7 }
0x18bb   : > { %v6669_v38 = vsel %vm6429_vm4, -3.4028235e+38, %v5566_v27  ;;  %vm6353_vm4 = vmxor %vm6209_vm15, %vm6172_vm3  ;;  %v6013_v27 = vadd.s32 8192, %v10548_v7 }
0x18bc   : > { %6909 = vst [vmem:[%s9498_s29 + $0x6d0] sm:$0xff] %v6669_v38  ;;  %v6670_v54 = vsel %vm6430_vm6, -3.4028235e+38, %v5584_v6  ;;  %vm13296_vm6 = vmxor %vm6209_vm15, %vm6173_vm5  ;;  %v3516_v38 = vperm.slane %v3428_v60, 0  ;;  %v6095_v17 = vadd.s32 %v10562_v61, %v6014_v42 }
0x18bd   : > { %6910 = vst [vmem:[%s9498_s29 + $0x6d8] sm:$0xff] %v6670_v54  ;;  %v6094_v43 = vadd.s32 %v10562_v61, %v6013_v27  ;;  %v3517_v54 = vperm.slane %v3428_v60, 2  ;;  %v6018_v27 = vadd.s32 8832, %v10548_v7 }
0x18bf   : > { %v3677_v8 = vperm.slane %v3517_v54, 0 }
0x18c0   : > { %v5567_v32 = vpop.f32.mrf.mxu2 }
0x18c1   : > { %v5585_v24 = vpop.f32.mrf.mxu3  ;;  %v5596_v20 = vpop.f32.mrf.mxu0  ;;  %v3676_v32 = vperm.slane %v3516_v38, 0 }
0x18c2   : > { %v5597_v47 = vadd.f32 %v5596_v20, %v3672_v53  ;;  %v5614_v52 = vpop.f32.mrf.mxu1 }
0x18c3   : > { %v5615_v30 = vadd.f32 %v5614_v52, %v3673_v22 }
0x18c4   : > { %v6511_v48 = vsel %vm6271_vm0, -3.4028235e+38, %v5597_v47  ;;  %8353 = vmatmul.msk.bf16.vlgmr.msrb.gmra.mxu0 %vm4500_vm7, %v12979_v18  ;;  %8355 = vmatmul.msk.bf16.vlgmr.msrb.gmra.mxu1 %vm4500_vm7, %v12979_v18  ;;  %vm13304_vm0 = vmxor %vm6210_vm8, %vm6170_vm12  ;;  %v3518_v47 = vperm.slane %v3428_v60, 4 }
0x18c5   : > { %6751 = vst [vmem:[%s9498_s29 + $0x1e0] sm:$0xff] %v6511_v48  ;;  %v6512_v15 = vsel %vm6272_vm14, -3.4028235e+38, %v5615_v30  ;;  %8357 = vmatmul.msk.bf16.vlgmr.msrb.gmra.mxu2 %vm4500_vm7, %v12979_v18  ;;  %vm13312_vm14 = vmxor %vm6210_vm8, %vm6171_vm13  ;;  %vm6174_vm13 = vcmp.lt.s32.totalorder %v6094_v43, 16  ;;  %v3519_v48 = vperm.slane %v3428_v60, 6  ;;  %v6017_v60 = vadd.s32 8704, %v10548_v7 }
0x18c6   : > { %6752 = vst [vmem:[%s9498_s29 + $0x1e8] sm:$0xff] %v6512_v15  ;;  %8359 = vmatmul.msk.bf16.vlgmr.msrb.gmra.mxu3 %vm4500_vm7, %v12979_v18  ;;  %vm6433_vm12 = vmxor %vm6210_vm8, %vm6172_vm3  ;;  %vm6175_vm3 = vcmp.lt.s32.totalorder %v6095_v17, 16  ;;  %v6019_v17 = vadd.s32 8960, %v10548_v7 }
0x18c8   : > { %v5632_v23 = vpop.f32.mrf.mxu2 }
0x18c9   : > { %v5633_v34 = vadd.f32 %v5632_v23, %v3674_v37  ;;  %v5650_v58 = vpop.f32.mrf.mxu3  ;;  %v5598_v63 = vpop.f32.mrf.mxu0  ;;  %v3678_v23 = vperm.slane %v3518_v47, 0 }
0x18ca   : > { %v5651_v18 = vadd.f32 %v5650_v58, %v3675_v16  ;;  %v5599_v39 = vadd.f32 %v5598_v63, %v3672_v53  ;;  %v5616_v35 = vpop.f32.mrf.mxu1 }
0x18cb   : > { %v6513_v11 = vsel %vm6273_vm1, -3.4028235e+38, %v5633_v34  ;;  %v5617_v21 = vadd.f32 %v5616_v35, %v3673_v22  ;;  %vm6276_vm1 = vmxor %vm6208_vm11, %vm6175_vm3  ;;  %v3679_v34 = vperm.slane %v3519_v48, 0 }
0x18cc   : > { %6753 = vst [vmem:[%s9498_s29 + $0x1f0] sm:$0xff] %v6513_v11  ;;  %v6514_v2 = vsel %vm6274_vm2, -3.4028235e+38, %v5651_v18  ;;  %v6591_v3 = vsel %vm6351_vm9, -3.4028235e+38, %v5599_v39 }
0x18cd   : > { %6754 = vst [vmem:[%s9498_s29 + $0x1f8] sm:$0xff] %v6514_v2  ;;  %v6592_v55 = vsel %vm6352_vm10, -3.4028235e+38, %v5617_v21 }
0x18ce   : > { %6831 = vst [vmem:[%s9498_s29 + $0x460] sm:$0xff] %v6591_v3 }
0x18cf   : > { %6832 = vst [vmem:[%s9498_s29 + $0x468] sm:$0xff] %v6592_v55 }
0x18d0   : > { %v5634_v1 = vpop.f32.mrf.mxu2 }
0x18d1   : > { %v5635_v62 = vadd.f32 %v5634_v1, %v3674_v37  ;;  %v5652_v12 = vpop.f32.mrf.mxu3  ;;  %v5601_v57 = vpop.f32.mrf.mxu0 }
0x18d2   : > { %v5653_v59 = vadd.f32 %v5652_v12, %v3675_v16  ;;  %v5602_v33 = vadd.f32 %v5601_v57, %v3672_v53  ;;  %v5619_v25 = vpop.f32.mrf.mxu1  ;;  %v6015_v53 = vadd.s32 8448, %v10548_v7 }
0x18d3   : > { %v6593_v4 = vsel %vm6353_vm4, -3.4028235e+38, %v5635_v62  ;;  %v5620_v29 = vadd.f32 %v5619_v25, %v3673_v22  ;;  %v6016_v22 = vadd.s32 8576, %v10548_v7 }
0x18d4   : > { %6833 = vst [vmem:[%s9498_s29 + $0x470] sm:$0xff] %v6593_v4  ;;  %v6594_v40 = vsel %vm13296_vm6, -3.4028235e+38, %v5653_v59  ;;  %v6671_v56 = vsel %vm13304_vm0, -3.4028235e+38, %v5602_v33  ;;  %8354 = vmatmul.msk.bf16.gmra.mxu0 %vm4500_vm7, %v10446_v19  ;;  %8356 = vmatmul.msk.bf16.gmra.mxu1 %vm4500_vm7, %v10446_v19  ;;  %v13355_v20 = vadd.s32 %v10562_v61, %v6015_v53  ;;  %vm6355_vm6 = vmxor %vm6209_vm15, %vm6174_vm13 }
0x18d5   : > { %6834 = vst [vmem:[%s9498_s29 + $0x478] sm:$0xff] %v6594_v40  ;;  %v6672_v41 = vsel %vm13312_vm14, -3.4028235e+38, %v5620_v29  ;;  %8358 = vmatmul.msk.bf16.gmra.mxu2 %vm4500_vm7, %v10446_v19  ;;  %v6097_v52 = vadd.s32 %v10562_v61, %v6016_v22  ;;  %vm6356_vm0 = vmxor %vm6209_vm15, %vm6175_vm3 }
0x18d6   : > { %6911 = vst [vmem:[%s9498_s29 + $0x6e0] sm:$0xff] %v6671_v56  ;;  %8360 = vmatmul.msk.bf16.gmra.mxu3 %vm4500_vm7, %v10446_v19  ;;  %vm6434_vm7 = vmxor %vm6210_vm8, %vm6173_vm5  ;;  %vm6176_vm2 = vcmp.lt.s32.totalorder %v13355_v20, 16 }
0x18d7   : > { %6912 = vst [vmem:[%s9498_s29 + $0x6e8] sm:$0xff] %v6672_v41  ;;  %vm6275_vm5 = vmxor %vm6208_vm11, %vm6174_vm13  ;;  %vm6177_vm9 = vcmp.lt.s32.totalorder %v6097_v52, 16  ;;  %v3429_v41 = vunpack.c.h.bf16 %v13317_v46 }
0x18d8   : > { %v5637_v10 = vpop.f32.mrf.mxu2  ;;  %vm6277_vm10 = vmxor %vm6208_vm11, %vm6176_vm2 }
0x18d9   : > { %v5638_v6 = vadd.f32 %v5637_v10, %v3674_v37  ;;  %v5655_v45 = vpop.f32.mrf.mxu3  ;;  %v5603_v19 = vpop.f32.mrf.mxu0  ;;  %vm6278_vm4 = vmxor %vm6208_vm11, %vm6177_vm9  ;;  %v3521_v43 = vperm.slane %v3429_v41, 2 }
0x18da   : > { %v5656_v26 = vadd.f32 %v5655_v45, %v3675_v16  ;;  %v5621_v5 = vpop.f32.mrf.mxu1  ;;  %vm6357_vm14 = vmxor %vm6209_vm15, %vm6176_vm2 }
0x18db   : > { %v6673_v0 = vsel %vm6433_vm12, -3.4028235e+38, %v5638_v6  ;;  %vm6358_vm12 = vmxor %vm6209_vm15, %vm6177_vm9  ;;  %v6098_v5 = vadd.s32 %v10562_v61, %v6017_v60  ;;  %v3681_v22 = vperm.slane %v3521_v43, 0  ;;  %v6022_v60 = vadd.s32 9344, %v10548_v7 }
0x18dc   : > { %6913 = vst [vmem:[%s9498_s29 + $0x6f0] sm:$0xff] %v6673_v0  ;;  %v6674_v28 = vsel %vm6434_vm7, -3.4028235e+38, %v5656_v26  ;;  %vm6435_vm7 = vmxor %vm6210_vm8, %vm6174_vm13  ;;  %v3520_v26 = vperm.slane %v3429_v41, 0  ;;  %v6099_v0 = vadd.s32 %v10562_v61, %v6018_v27 }
0x18dd   : > { %6914 = vst [vmem:[%s9498_s29 + $0x6f8] sm:$0xff] %v6674_v28  ;;  %vm6437_vm13 = vmxor %vm6210_vm8, %vm6176_vm2  ;;  %v6020_v28 = vadd.s32 9088, %v10548_v7  ;;  %v6103_v43 = vadd.s32 %v10562_v61, %v6022_v60 }
0x18de   : > { %v3680_v53 = vperm.slane %v3520_v26, 0  ;;  %vm6179_vm2 = vcmp.lt.s32.totalorder %v6099_v0, 16 }
0x18e0   : > { %v5639_v24 = vpop.f32.mrf.mxu2 }
0x18e1   : > { %v5657_v44 = vpop.f32.mrf.mxu3  ;;  %v5668_v9 = vpop.f32.mrf.mxu0 }
0x18e2   : > { %v5669_v50 = vadd.f32 %v5668_v9, %v3676_v32  ;;  %v5686_v30 = vpop.f32.mrf.mxu1  ;;  %v3522_v44 = vperm.slane %v3429_v41, 4  ;;  %v6101_v9 = vadd.s32 %v10562_v61, %v6020_v28 }
0x18e3   : > { %v5687_v15 = vadd.f32 %v5686_v30, %v3677_v8 }
0x18e4   : > { %v6515_v37 = vsel %vm6275_vm5, -3.4028235e+38, %v5669_v50  ;;  %vm6436_vm5 = vmxor %vm6210_vm8, %vm6175_vm3  ;;  %v3523_v50 = vperm.slane %v3429_v41, 6  ;;  %v6021_v41 = vadd.s32 9216, %v10548_v7 }
0x18e5   : > { %6755 = vst [vmem:[%s9498_s29 + $0x200] sm:$0xff] %v6515_v37  ;;  %v6516_v16 = vsel %vm6276_vm1, -3.4028235e+38, %v5687_v15  ;;  %vm6438_vm3 = vmxor %vm6210_vm8, %vm6177_vm9  ;;  %vm6178_vm1 = vcmp.lt.s32.totalorder %v6098_v5, 16  ;;  %v3682_v37 = vperm.slane %v3522_v44, 0 }
0x18e6   : > { %6756 = vst [vmem:[%s9498_s29 + $0x208] sm:$0xff] %v6516_v16  ;;  %vm6279_vm9 = vmxor %vm6208_vm11, %vm6178_vm1  ;;  %v3683_v16 = vperm.slane %v3523_v50, 0  ;;  %v6102_v26 = vadd.s32 %v10562_v61, %v6021_v41  ;;  %v6026_v41 = vadd.s32 9856, %v10548_v7 }
0x18e8   : > { %v5704_v58 = vpop.f32.mrf.mxu2 }
0x18e9   : > { %v5705_v63 = vadd.f32 %v5704_v58, %v3678_v23  ;;  %v5722_v18 = vpop.f32.mrf.mxu3  ;;  %v5670_v39 = vpop.f32.mrf.mxu0 }
0x18ea   : > { %v5723_v35 = vadd.f32 %v5722_v18, %v3679_v34  ;;  %v5671_v11 = vadd.f32 %v5670_v39, %v3676_v32  ;;  %v5688_v21 = vpop.f32.mrf.mxu1 }
0x18eb   : > { %v6517_v2 = vsel %vm6277_vm10, -3.4028235e+38, %v5705_v63  ;;  %v5689_v3 = vadd.f32 %v5688_v21, %v3677_v8  ;;  %vm6280_vm10 = vmxor %vm6208_vm11, %vm6179_vm2 }
0x18ec   : > { %6757 = vst [vmem:[%s9498_s29 + $0x210] sm:$0xff] %v6517_v2  ;;  %v6518_v55 = vsel %vm6278_vm4, -3.4028235e+38, %v5723_v35  ;;  %v6595_v1 = vsel %vm6355_vm6, -3.4028235e+38, %v5671_v11  ;;  %vm6181_vm6 = vcmp.lt.s32.totalorder %v6101_v9, 16 }
0x18ed   : > { %6758 = vst [vmem:[%s9498_s29 + $0x218] sm:$0xff] %v6518_v55  ;;  %v6596_v14 = vsel %vm6356_vm0, -3.4028235e+38, %v5689_v3 }
0x18ee   : > { %6835 = vst [vmem:[%s9498_s29 + $0x480] sm:$0xff] %v6595_v1 }
0x18ef   : > { %6836 = vst [vmem:[%s9498_s29 + $0x488] sm:$0xff] %v6596_v14 }
0x18f0   : > { %v5706_v62 = vpop.f32.mrf.mxu2 }
0x18f1   : > { %v5707_v12 = vadd.f32 %v5706_v62, %v3678_v23  ;;  %v5724_v57 = vpop.f32.mrf.mxu3  ;;  %v5673_v13 = vpop.f32.mrf.mxu0 }
0x18f2   : > { %v5725_v59 = vadd.f32 %v5724_v57, %v3679_v34  ;;  %v5674_v33 = vadd.f32 %v5673_v13, %v3676_v32  ;;  %v5691_v25 = vpop.f32.mrf.mxu1 }
0x18f3   : > { %v6597_v51 = vsel %vm6357_vm14, -3.4028235e+38, %v5707_v12  ;;  %v5692_v4 = vadd.f32 %v5691_v25, %v3677_v8  ;;  %v13418_v8 = vadd.s32 %v10562_v61, %v6019_v17  ;;  %vm6282_vm14 = vmxor %vm6208_vm11, %vm6181_vm6  ;;  %v6024_v17 = vadd.s32 9600, %v10548_v7 }
0x18f4   : > { %6837 = vst [vmem:[%s9498_s29 + $0x490] sm:$0xff] %v6597_v51  ;;  %v6598_v29 = vsel %vm6358_vm12, -3.4028235e+38, %v5725_v59  ;;  %v6675_v40 = vsel %vm6435_vm7, -3.4028235e+38, %v5674_v33  ;;  %vm6359_vm12 = vmxor %vm6209_vm15, %vm6178_vm1  ;;  %v13461_v51 = vld [vmem:[%s9494_s11 + $0x48] sm:$0xff] }
0x18f5   : > { %6838 = vst [vmem:[%s9498_s29 + $0x498] sm:$0xff] %v6598_v29  ;;  %v6676_v56 = vsel %vm6436_vm5, -3.4028235e+38, %v5692_v4  ;;  %vm6180_vm4 = vcmp.lt.s32.totalorder %v13418_v8, 16  ;;  %vm6360_vm7 = vmxor %vm6209_vm15, %vm6179_vm2  ;;  %v6105_v44 = vadd.s32 %v10562_v61, %v6024_v17  ;;  %s6939_s11 = ssub.s32 (%p9149_p5), 313, %s9487_s22 }
0x18f6   : > { %6915 = vst [vmem:[%s9498_s29 + $0x700] sm:$0xff] %v6675_v40  ;;  %vm6281_vm0 = vmxor %vm6208_vm11, %vm6180_vm4  ;;  %p6940_p12 = scmp.lt.s32.totalorder (%p9149_p5), %s6939_s11, 80 }
0x18f7   : > { %6916 = vst [vmem:[%s9498_s29 + $0x708] sm:$0xff] %v6676_v56  ;;  %vm6361_vm5 = vmxor %vm6209_vm15, %vm6180_vm4  ;;  %v3430_v56 = vunpack.c.l.bf16 %v13461_v51 }
0x18f8   : > { %v5709_v42 = vpop.f32.mrf.mxu2 }
0x18f9   : > { %v5710_v10 = vadd.f32 %v5709_v42, %v3678_v23  ;;  %v5727_v6 = vpop.f32.mrf.mxu3  ;;  %v5675_v46 = vpop.f32.mrf.mxu0 }
0x18fa   : > { %v5728_v45 = vadd.f32 %v5727_v6, %v3679_v34  ;;  %v5693_v19 = vpop.f32.mrf.mxu1 }
0x18fb   : > { %v6677_v38 = vsel %vm6437_vm13, -3.4028235e+38, %v5710_v10  ;;  %vm6362_vm13 = vmxor %vm6209_vm15, %vm6181_vm6  ;;  %v3524_v19 = vperm.slane %v3430_v56, 0 }
0x18fc   : > { %6917 = vst [vmem:[%s9498_s29 + $0x710] sm:$0xff] %v6677_v38  ;;  %v6678_v54 = vsel %vm6438_vm3, -3.4028235e+38, %v5728_v45  ;;  %vm6439_vm3 = vmxor %vm6210_vm8, %vm6178_vm1  ;;  %v3525_v38 = vperm.slane %v3430_v56, 2 }
0x18fd   : > { %6918 = vst [vmem:[%s9498_s29 + $0x718] sm:$0xff] %v6678_v54  ;;  %vm6441_vm1 = vmxor %vm6210_vm8, %vm6180_vm4  ;;  %v6023_v54 = vadd.s32 9472, %v10548_v7  ;;  %v3684_v28 = vperm.slane %v3524_v19, 0  ;;  %vm6183_vm4 = vcmp.lt.s32.totalorder %v6103_v43, 16  ;;  %v6027_v43 = vadd.s32 9984, %v10548_v7 }
0x1900   : > { %v5711_v32 = vpop.f32.mrf.mxu2 }
0x1901   : > { %v5729_v24 = vpop.f32.mrf.mxu3  ;;  %v5740_v20 = vpop.f32.mrf.mxu0  ;;  %v13484_v32 = vadd.s32 %v10562_v61, %v6023_v54 }
0x1902   : > { %v5741_v47 = vadd.f32 %v5740_v20, %v3680_v53  ;;  %v5758_v52 = vpop.f32.mrf.mxu1  ;;  %v3526_v20 = vperm.slane %v3430_v56, 4 }
0x1903   : > { %v5759_v30 = vadd.f32 %v5758_v52, %v3681_v22  ;;  %v3527_v52 = vperm.slane %v3430_v56, 6  ;;  %v6025_v56 = vadd.s32 9728, %v10548_v7 }
0x1904   : > { %v6519_v48 = vsel %vm6279_vm9, -3.4028235e+38, %v5741_v47  ;;  %vm6440_vm9 = vmxor %vm6210_vm8, %vm6179_vm2 }
0x1905   : > { %6759 = vst [vmem:[%s9498_s29 + $0x220] sm:$0xff] %v6519_v48  ;;  %v6520_v15 = vsel %vm6280_vm10, -3.4028235e+38, %v5759_v30  ;;  %vm6442_vm2 = vmxor %vm6210_vm8, %vm6181_vm6  ;;  %vm6182_vm10 = vcmp.lt.s32.totalorder %v6102_v26, 16 }
0x1906   : > { %6760 = vst [vmem:[%s9498_s29 + $0x228] sm:$0xff] %v6520_v15  ;;  %vm6283_vm6 = vmxor %vm6208_vm11, %vm6182_vm10  ;;  %v3686_v15 = vperm.slane %v3526_v20, 0 }
0x1908   : > { %v5776_v23 = vpop.f32.mrf.mxu2 }
0x1909   : > { %v5777_v34 = vadd.f32 %v5776_v23, %v3682_v37  ;;  %v5794_v58 = vpop.f32.mrf.mxu3  ;;  %v5742_v63 = vpop.f32.mrf.mxu0 }
0x190a   : > { %v5795_v18 = vadd.f32 %v5794_v58, %v3683_v16  ;;  %v5743_v39 = vadd.f32 %v5742_v63, %v3680_v53  ;;  %v5760_v35 = vpop.f32.mrf.mxu1 }
0x190b   : > { %v6521_v11 = vsel %vm6281_vm0, -3.4028235e+38, %v5777_v34  ;;  %v5761_v21 = vadd.f32 %v5760_v35, %v3681_v22  ;;  %vm6284_vm0 = vmxor %vm6208_vm11, %vm6183_vm4 }
0x190c   : > { %6761 = vst [vmem:[%s9498_s29 + $0x230] sm:$0xff] %v6521_v11  ;;  %v6522_v2 = vsel %vm6282_vm14, -3.4028235e+38, %v5795_v18  ;;  %v6599_v3 = vsel %vm6359_vm12, -3.4028235e+38, %v5743_v39  ;;  %vm6184_vm14 = vcmp.lt.s32.totalorder %v13484_v32, 16 }
0x190d   : > { %6762 = vst [vmem:[%s9498_s29 + $0x238] sm:$0xff] %v6522_v2  ;;  %v6600_v55 = vsel %vm6360_vm7, -3.4028235e+38, %v5761_v21  ;;  %vm6185_vm12 = vcmp.lt.s32.totalorder %v6105_v44, 16  ;;  %vm6285_vm7 = vmxor %vm6208_vm11, %vm6184_vm14 }
0x190e   : > { %6839 = vst [vmem:[%s9498_s29 + $0x4a0] sm:$0xff] %v6599_v3 }
0x190f   : > { %6840 = vst [vmem:[%s9498_s29 + $0x4a8] sm:$0xff] %v6600_v55 }
0x1910   : > { %v5778_v1 = vpop.f32.mrf.mxu2 }
0x1911   : > { %v5779_v14 = vadd.f32 %v5778_v1, %v3682_v37  ;;  %v5796_v62 = vpop.f32.mrf.mxu3  ;;  %v5745_v12 = vpop.f32.mrf.mxu0 }
0x1912   : > { %v5797_v57 = vadd.f32 %v5796_v62, %v3683_v16  ;;  %v5746_v13 = vadd.f32 %v5745_v12, %v3680_v53  ;;  %v5763_v59 = vpop.f32.mrf.mxu1  ;;  %v3685_v53 = vperm.slane %v3525_v38, 0 }
0x1913   : > { %v6601_v33 = vsel %vm6361_vm5, -3.4028235e+38, %v5779_v14  ;;  %v5764_v25 = vadd.f32 %v5763_v59, %v3681_v22  ;;  %vm6286_vm5 = vmxor %vm6208_vm11, %vm6185_vm12 }
0x1914   : > { %6841 = vst [vmem:[%s9498_s29 + $0x4b0] sm:$0xff] %v6601_v33  ;;  %v6602_v4 = vsel %vm6362_vm13, -3.4028235e+38, %v5797_v57  ;;  %v6679_v29 = vsel %vm6439_vm3, -3.4028235e+38, %v5746_v13  ;;  %vm6363_vm13 = vmxor %vm6209_vm15, %vm6182_vm10 }
0x1915   : > { %6842 = vst [vmem:[%s9498_s29 + $0x4b8] sm:$0xff] %v6602_v4  ;;  %v6680_v40 = vsel %vm6440_vm9, -3.4028235e+38, %v5764_v25  ;;  %vm6364_vm3 = vmxor %vm6209_vm15, %vm6183_vm4 }
0x1916   : > { %6919 = vst [vmem:[%s9498_s29 + $0x720] sm:$0xff] %v6679_v29  ;;  %vm6365_vm9 = vmxor %vm6209_vm15, %vm6184_vm14 }
0x1917   : > { %6920 = vst [vmem:[%s9498_s29 + $0x728] sm:$0xff] %v6680_v40  ;;  %v3431_v40 = vunpack.c.h.bf16 %v13461_v51 }
0x1918   : > { %v5781_v27 = vpop.f32.mrf.mxu2 }
0x1919   : > { %v5782_v42 = vadd.f32 %v5781_v27, %v3682_v37  ;;  %v5799_v10 = vpop.f32.mrf.mxu3  ;;  %v5747_v6 = vpop.f32.mrf.mxu0  ;;  %v3687_v37 = vperm.slane %v3527_v52, 0  ;;  %v3529_v26 = vperm.slane %v3431_v40, 2  ;;  %v3531_v44 = vperm.slane %v3431_v40, 6 }
0x191a   : > { %v5800_v46 = vadd.f32 %v5799_v10, %v3683_v16  ;;  %v5765_v45 = vpop.f32.mrf.mxu1 }
0x191b   : > { %v6681_v5 = vsel %vm6441_vm1, -3.4028235e+38, %v5782_v42  ;;  %vm6366_vm1 = vmxor %vm6209_vm15, %vm6185_vm12  ;;  %v6106_v45 = vadd.s32 %v10562_v61, %v6025_v56  ;;  %v3689_v17 = vperm.slane %v3529_v26, 0 }
0x191c   : > { %6921 = vst [vmem:[%s9498_s29 + $0x730] sm:$0xff] %v6681_v5  ;;  %v6682_v0 = vsel %vm6442_vm2, -3.4028235e+38, %v5800_v46  ;;  %vm6443_vm2 = vmxor %vm6210_vm8, %vm6182_vm10  ;;  %v3528_v46 = vperm.slane %v3431_v40, 0  ;;  %v6107_v5 = vadd.s32 %v10562_v61, %v6026_v41 }
0x191d   : > { %6922 = vst [vmem:[%s9498_s29 + $0x738] sm:$0xff] %v6682_v0  ;;  %vm6445_vm10 = vmxor %vm6210_vm8, %vm6184_vm14  ;;  %v6028_v0 = vadd.s32 10112, %v10548_v7 }
0x191e   : > { %v3688_v54 = vperm.slane %v3528_v46, 0  ;;  %vm6187_vm14 = vcmp.lt.s32.totalorder %v6107_v5, 16 }
0x1920   : > { %v5783_v22 = vpop.f32.mrf.mxu2 }
0x1921   : > { %v5801_v8 = vpop.f32.mrf.mxu3  ;;  %v5812_v24 = vpop.f32.mrf.mxu0 }
0x1922   : > { %v5813_v9 = vadd.f32 %v5812_v24, %v3684_v28  ;;  %v5830_v47 = vpop.f32.mrf.mxu1  ;;  %v3530_v8 = vperm.slane %v3431_v40, 4  ;;  %v6109_v24 = vadd.s32 %v10562_v61, %v6028_v0 }
0x1923   : > { %v5831_v50 = vadd.f32 %v5830_v47, %v3685_v53 }
0x1924   : > { %v6523_v30 = vsel %vm6283_vm6, -3.4028235e+38, %v5813_v9  ;;  %vm6444_vm6 = vmxor %vm6210_vm8, %vm6183_vm4 }
0x1925   : > { %6763 = vst [vmem:[%s9498_s29 + $0x240] sm:$0xff] %v6523_v30  ;;  %v6524_v48 = vsel %vm6284_vm0, -3.4028235e+38, %v5831_v50  ;;  %vm6446_vm4 = vmxor %vm6210_vm8, %vm6185_vm12  ;;  %vm6186_vm0 = vcmp.lt.s32.totalorder %v6106_v45, 16  ;;  %v3690_v50 = vperm.slane %v3530_v8, 0  ;;  %v3691_v30 = vperm.slane %v3531_v44, 0 }
0x1926   : > { %6764 = vst [vmem:[%s9498_s29 + $0x248] sm:$0xff] %v6524_v48  ;;  %vm6287_vm12 = vmxor %vm6208_vm11, %vm6186_vm0 }
0x1928   : > { %v5848_v16 = vpop.f32.mrf.mxu2 }
0x1929   : > { %v5849_v23 = vadd.f32 %v5848_v16, %v3686_v15  ;;  %v5866_v34 = vpop.f32.mrf.mxu3  ;;  %v5814_v58 = vpop.f32.mrf.mxu0 }
0x192a   : > { %v5867_v63 = vadd.f32 %v5866_v34, %v3687_v37  ;;  %v5815_v18 = vadd.f32 %v5814_v58, %v3684_v28  ;;  %v5832_v39 = vpop.f32.mrf.mxu1 }
0x192b   : > { %v6525_v35 = vsel %vm6285_vm7, -3.4028235e+38, %v5849_v23  ;;  %v5833_v11 = vadd.f32 %v5832_v39, %v3685_v53  ;;  %vm6288_vm7 = vmxor %vm6208_vm11, %vm6187_vm14 }
0x192c   : > { %6765 = vst [vmem:[%s9498_s29 + $0x250] sm:$0xff] %v6525_v35  ;;  %v6526_v21 = vsel %vm6286_vm5, -3.4028235e+38, %v5867_v63  ;;  %v6603_v2 = vsel %vm6363_vm13, -3.4028235e+38, %v5815_v18  ;;  %vm6189_vm13 = vcmp.lt.s32.totalorder %v6109_v24, 16 }
0x192d   : > { %6766 = vst [vmem:[%s9498_s29 + $0x258] sm:$0xff] %v6526_v21  ;;  %v6604_v3 = vsel %vm6364_vm3, -3.4028235e+38, %v5833_v11 }
0x192e   : > { %6843 = vst [vmem:[%s9498_s29 + $0x4c0] sm:$0xff] %v6603_v2 }
0x192f   : > { %6844 = vst [vmem:[%s9498_s29 + $0x4c8] sm:$0xff] %v6604_v3 }
0x1930   : > { %v5850_v55 = vpop.f32.mrf.mxu2 }
0x1931   : > { %v5851_v1 = vadd.f32 %v5850_v55, %v3686_v15  ;;  %v5868_v14 = vpop.f32.mrf.mxu3  ;;  %v5817_v62 = vpop.f32.mrf.mxu0 }
0x1932   : > { %v5869_v12 = vadd.f32 %v5868_v14, %v3687_v37  ;;  %v5818_v57 = vadd.f32 %v5817_v62, %v3684_v28  ;;  %v5835_v13 = vpop.f32.mrf.mxu1 }
0x1933   : > { %v6605_v59 = vsel %vm6365_vm9, -3.4028235e+38, %v5851_v1  ;;  %v5836_v33 = vadd.f32 %v5835_v13, %v3685_v53  ;;  %v6108_v53 = vadd.s32 %v10562_v61, %v6027_v43  ;;  %vm6290_vm9 = vmxor %vm6208_vm11, %vm6189_vm13 }
0x1934   : > { %6845 = vst [vmem:[%s9498_s29 + $0x4d0] sm:$0xff] %v6605_v59  ;;  %v6606_v25 = vsel %vm6366_vm1, -3.4028235e+38, %v5869_v12  ;;  %v6683_v4 = vsel %vm6443_vm2, -3.4028235e+38, %v5818_v57  ;;  %vm6367_vm1 = vmxor %vm6209_vm15, %vm6186_vm0 }
0x1935   : > { %6846 = vst [vmem:[%s9498_s29 + $0x4d8] sm:$0xff] %v6606_v25  ;;  %v6684_v29 = vsel %vm6444_vm6, -3.4028235e+38, %v5836_v33  ;;  %vm6188_vm5 = vcmp.lt.s32.totalorder %v6108_v53, 16  ;;  %vm6368_vm2 = vmxor %vm6209_vm15, %vm6187_vm14 }
0x1936   : > { %6923 = vst [vmem:[%s9498_s29 + $0x740] sm:$0xff] %v6683_v4  ;;  %vm6289_vm3 = vmxor %vm6208_vm11, %vm6188_vm5 }
0x1937   : > { %6924 = vst [vmem:[%s9498_s29 + $0x748] sm:$0xff] %v6684_v29  ;;  %vm6369_vm11 = vmxor %vm6209_vm15, %vm6188_vm5 }
0x1938   : > { %v5853_v60 = vpop.f32.mrf.mxu2  ;;  %vm6370_vm6 = vmxor %vm6209_vm15, %vm6189_vm13 }
0x1939   : > { %v5854_v27 = vadd.f32 %v5853_v60, %v3686_v15  ;;  %v5871_v42 = vpop.f32.mrf.mxu3  ;;  %v5819_v51 = vpop.f32.mrf.mxu0  ;;  %vm6449_vm15 = vmxor %vm6210_vm8, %vm6188_vm5 }
0x193a   : > { %v5872_v10 = vadd.f32 %v5871_v42, %v3687_v37  ;;  %v5837_v6 = vpop.f32.mrf.mxu1 }
0x193b   : > { %v6685_v19 = vsel %vm6445_vm10, -3.4028235e+38, %v5854_v27  ;;  %vm6447_vm10 = vmxor %vm6210_vm8, %vm6186_vm0 }
0x193c   : > { %6925 = vst [vmem:[%s9498_s29 + $0x750] sm:$0xff] %v6685_v19  ;;  %v6686_v38 = vsel %vm6446_vm4, -3.4028235e+38, %v5872_v10  ;;  %vm6448_vm4 = vmxor %vm6210_vm8, %vm6187_vm14 }
0x193d   : > { %6926 = vst [vmem:[%s9498_s29 + $0x758] sm:$0xff] %v6686_v38  ;;  %vm6450_vm0 = vmxor %vm6210_vm8, %vm6189_vm13 }
0x1940   : > { %v5855_v28 = vpop.f32.mrf.mxu2 }
0x1941   : > { %v5873_v22 = vpop.f32.mrf.mxu3  ;;  %v5884_v32 = vpop.f32.mrf.mxu0 }
0x1942   : > { %v5885_v20 = vadd.f32 %v5884_v32, %v3688_v54  ;;  %v5902_v7 = vpop.f32.mrf.mxu1 }
0x1943   : > { %v5903_v9 = vadd.f32 %v5902_v7, %v3689_v17 }
0x1944   : > { %v6527_v47 = vsel %vm6287_vm12, -3.4028235e+38, %v5885_v20 }
0x1945   : > { %6767 = vst [vmem:[%s9498_s29 + $0x260] sm:$0xff] %v6527_v47  ;;  %v6528_v52 = vsel %vm6288_vm7, -3.4028235e+38, %v5903_v9 }
0x1946   : > { %6768 = vst [vmem:[%s9498_s29 + $0x268] sm:$0xff] %v6528_v52 }
0x1948   : > { %v5920_v61 = vpop.f32.mrf.mxu2 }
0x1949   : > { %v5921_v48 = vadd.f32 %v5920_v61, %v3690_v50  ;;  %v5938_v15 = vpop.f32.mrf.mxu3  ;;  %v5886_v37 = vpop.f32.mrf.mxu0 }
0x194a   : > { %v5939_v16 = vadd.f32 %v5938_v15, %v3691_v30  ;;  %v5887_v23 = vadd.f32 %v5886_v37, %v3688_v54  ;;  %v5904_v34 = vpop.f32.mrf.mxu1 }
0x194b   : > { %v6529_v58 = vsel %vm6289_vm3, -3.4028235e+38, %v5921_v48  ;;  %v5905_v63 = vadd.f32 %v5904_v34, %v3689_v17 }
0x194c   : > { %6769 = vst [vmem:[%s9498_s29 + $0x270] sm:$0xff] %v6529_v58  ;;  %v6530_v31 = vsel %vm6290_vm9, -3.4028235e+38, %v5939_v16  ;;  %v6607_v18 = vsel %vm6367_vm1, -3.4028235e+38, %v5887_v23 }
0x194d   : > { %6770 = vst [vmem:[%s9498_s29 + $0x278] sm:$0xff] %v6530_v31  ;;  %v6608_v39 = vsel %vm6368_vm2, -3.4028235e+38, %v5905_v63 }
0x194e   : > { %6847 = vst [vmem:[%s9498_s29 + $0x4e0] sm:$0xff] %v6607_v18 }
0x194f   : > { %6848 = vst [vmem:[%s9498_s29 + $0x4e8] sm:$0xff] %v6608_v39 }
0x1950   : > { %v5922_v35 = vpop.f32.mrf.mxu2 }
0x1951   : > { %v5923_v11 = vadd.f32 %v5922_v35, %v3690_v50  ;;  %v5940_v21 = vpop.f32.mrf.mxu3  ;;  %v5889_v2 = vpop.f32.mrf.mxu0 }
0x1952   : > { %v5941_v3 = vadd.f32 %v5940_v21, %v3691_v30  ;;  %v5890_v55 = vadd.f32 %v5889_v2, %v3688_v54  ;;  %v5907_v1 = vpop.f32.mrf.mxu1 }
0x1953   : > { %v6609_v14 = vsel %vm6369_vm11, -3.4028235e+38, %v5923_v11  ;;  %v5908_v62 = vadd.f32 %v5907_v1, %v3689_v17 }
0x1954   : > { %6849 = vst [vmem:[%s9498_s29 + $0x4f0] sm:$0xff] %v6609_v14  ;;  %v6610_v49 = vsel %vm6370_vm6, -3.4028235e+38, %v5941_v3  ;;  %v6687_v12 = vsel %vm6447_vm10, -3.4028235e+38, %v5890_v55 }
0x1955   : > { %6850 = vst [vmem:[%s9498_s29 + $0x4f8] sm:$0xff] %v6610_v49  ;;  %v6688_v57 = vsel %vm6448_vm4, -3.4028235e+38, %v5908_v62 }
0x1956   : > { %6927 = vst [vmem:[%s9498_s29 + $0x760] sm:$0xff] %v6687_v12 }
0x1957   : > { %6928 = vst [vmem:[%s9498_s29 + $0x768] sm:$0xff] %v6688_v57 }
0x1958   : > { %v5925_v13 = vpop.f32.mrf.mxu2 }
0x1959   : > { %v5926_v59 = vadd.f32 %v5925_v13, %v3690_v50  ;;  %v5943_v33 = vpop.f32.mrf.mxu3  ;;  %v5891_v25 = vpop.f32.mrf.mxu0 }
0x195a   : > { %v5944_v4 = vadd.f32 %v5943_v33, %v3691_v30  ;;  %v5909_v29 = vpop.f32.mrf.mxu1 }
0x195b   : > { %v6689_v40 = vsel %vm6449_vm15, -3.4028235e+38, %v5926_v59 }
0x195c   : > { %6929 = vst [vmem:[%s9498_s29 + $0x770] sm:$0xff] %v6689_v40  ;;  %v6690_v56 = vsel %vm6450_vm0, -3.4028235e+38, %v5944_v4 }
0x195d   : > { %6930 = vst [vmem:[%s9498_s29 + $0x778] sm:$0xff] %v6690_v56  ;;  %6937 = sbr.rel (!%p9149_p5) target bundleno = 6694 (0x1a26), region = 83 }
0x1960   : > { %v5927_v41 = vpop.f32.mrf.mxu2 }
0x1961   : > { %v5945_v60 = vpop.f32.mrf.mxu3 }
0x1962   : > { %s14162_s11 = smov (!%p6940_p12, %s6939_s11), 80 }
0x1963   : > { %s6942_s17 = smul.u32 24, %s14162_s11  ;;  %s13605_s18 = sshll.u32 %s14162_s11, 3 }
0x1965   : > { %p8364_p13 = scmp.eq.s32.totalorder %s6942_s17, 0 }
0x1966   : > { %p6950_p0 = scmp.lt.u32.totalorder (!%p8364_p13), %s13605_s18, 8 }
0x1967   : > { %6949 = sbr.rel (%p8364_p13) target bundleno = 6694 (0x1a26), region = 87 }
0x196c   : > { %6953 = sbr.rel (%p6950_p0) target bundleno = 6683 (0x1a1b), region = 91  ;;  %s13609_s13 = sand.u32 (!%p6950_p0), 7, %s13605_s18  }
0x196d   : > { %p6974_p1 = scmp.eq.s32.totalorder (!%p6950_p0), %s13609_s13, 0  ;;  %p8365_p2 = scmp.ne.s32.totalorder (!%p6950_p0), %s13609_s13, 0 }
0x1971   : > { %6977 = sbr.rel (%p8365_p2) target bundleno = 6594 (0x19c2), region = 106  ;;  %s6978_s30 = sshrl.u32 (!%p8365_p2), %s13605_s18, 3 }
0x1972   : > { %8902 = sdivrem.u32 (!%p8365_p2), %s6978_s30, 12 }
0x197b   : > { %s13616_s22 = spop.drf %8902 }
0x197c   : > { %s8904_s19 = spop.drf %8902  ;;  %p8366_p3 = scmp.le.s32.totalorder %s13616_s22, 0 }
0x197d   : > { %s14146_s20 = smov (!%p8366_p3), %s13603_s27  ;;  %s14147_s21 = smov (!%p8366_p3), %s9498_s29 }
0x197e   : > { %7317 = sbr.rel (%p8366_p3) target bundleno = 6568 (0x19a8), region = 198  ;;  %s13625_s23 = smov (!%p8366_p3), 0  }
0x197f   : > { %s13627_s26 = smov (!%p8366_p3), 0  }
0x1983 LB: >> { %v6990_v36 = vld [vmem:[%s9008_s21] sm:$0xff]  ;;  %v6992_v27 = vld [vmem:[%s9008_s21 + $0x8] sm:$0xff]  ;;  %v6994_v42 = vld [vmem:[%s9008_s21 + $0x10] sm:$0xff]  ;;  %s7062_s24 = sadd.s32 1, %s9012_s23  ;;  %s6984_s26 = sadd.s32 1, %s9016_s26   ;;  %s9016_s26 = sphi %s13627_s26, %s6984_s26   ;;  %s9012_s23 = sphi %s13625_s23, %s14150_s23   ;;  %s9008_s21 = sphi %s14147_s21, %s14149_s21   ;;  %s9004_s20 = sphi %s14146_s20, %s14148_s20  }
0x1984   : >> { %6991 = vst [vmem:[%s9004_s20] sm:$0xff] %v6990_v36  ;;  %v6996_v51 = vld [vmem:[%s9008_s21 + $0x18] sm:$0xff]  ;;  %p7063_p4 = scmp.ge.s32.totalorder %s7062_s24, %s13616_s22  ;;  %v6998_v10 = vld [vmem:[%s9008_s21 + $0x20] sm:$0xff]  ;;  %v7000_v6 = vld [vmem:[%s9008_s21 + $0x28] sm:$0xff]  ;;  %p6983_p5 = scmp.ge.s32.totalorder %s6984_s26, %s13616_s22 }
0x1985   : >> { %6993 = vst [vmem:[%s9004_s20 + $0x8] sm:$0xff] %v6992_v27  ;;  %v7002_v46 = vld [vmem:[%s9008_s21 + $0x30] sm:$0xff]  ;;  %v7004_v45 = vld [vmem:[%s9008_s21 + $0x38] sm:$0xff]  ;;  %v7006_v19 = vld [vmem:[%s9008_s21 + $0x40] sm:$0xff] }
0x1986   : >> { %6995 = vst [vmem:[%s9004_s20 + $0x10] sm:$0xff] %v6994_v42  ;;  %s14164_s24 = smov (%p7063_p4, %s7062_s24), 0  ;;  %v7008_v26 = vld [vmem:[%s9008_s21 + $0x48] sm:$0xff]  ;;  %v7010_v5 = vld [vmem:[%s9008_s21 + $0x50] sm:$0xff]  ;;  %v7012_v38 = vld [vmem:[%s9008_s21 + $0x58] sm:$0xff] }
0x1987   : >> { %6997 = vst [vmem:[%s9004_s20 + $0x18] sm:$0xff] %v6996_v51  ;;  %s7065_s15 = smul.u32 96, %s14164_s24  ;;  %v7014_v43 = vld [vmem:[%s9008_s21 + $0x280] sm:$0xff]  ;;  %v7016_v0 = vld [vmem:[%s9008_s21 + $0x288] sm:$0xff]  ;;  %v7018_v54 = vld [vmem:[%s9008_s21 + $0x290] sm:$0xff]  ;;  %s14150_s23 = smov %s14164_s24 }
0x1988   : >> { %6999 = vst [vmem:[%s9004_s20 + $0x20] sm:$0xff] %v6998_v10  ;;  %v7020_v17 = vld [vmem:[%s9008_s21 + $0x298] sm:$0xff]  ;;  %v7022_v28 = vld [vmem:[%s9008_s21 + $0x2a0] sm:$0xff]  ;;  %v7024_v53 = vld [vmem:[%s9008_s21 + $0x2a8] sm:$0xff] }
0x1989   : >> { %7001 = vst [vmem:[%s9004_s20 + $0x28] sm:$0xff] %v7000_v6  ;;  %s13661_s16 = scalar_lea.vmem %s9498_s29, %s7065_s15 [#allocation4]   ;;  %s13664_s11 = scalar_lea.vmem %s13603_s27, %s7065_s15   ;;  %v7026_v22 = vld [vmem:[%s9008_s21 + $0x2b0] sm:$0xff]  ;;  %v7028_v32 = vld [vmem:[%s9008_s21 + $0x2b8] sm:$0xff]  ;;  %v7030_v8 = vld [vmem:[%s9008_s21 + $0x2c0] sm:$0xff] }
0x198a   : >> { %7003 = vst [vmem:[%s9004_s20 + $0x30] sm:$0xff] %v7002_v46  ;;  %v7032_v24 = vld [vmem:[%s9008_s21 + $0x2c8] sm:$0xff]  ;;  %v7034_v20 = vld [vmem:[%s9008_s21 + $0x2d0] sm:$0xff]  ;;  %v7036_v7 = vld [vmem:[%s9008_s21 + $0x2d8] sm:$0xff] }
0x198b   : >> { %7005 = vst [vmem:[%s9004_s20 + $0x38] sm:$0xff] %v7004_v45  ;;  %v7038_v44 = vld [vmem:[%s9008_s21 + $0x500] sm:$0xff]  ;;  %v7040_v9 = vld [vmem:[%s9008_s21 + $0x508] sm:$0xff]  ;;  %v7042_v47 = vld [vmem:[%s9008_s21 + $0x510] sm:$0xff] }
0x198c   : >> { %7007 = vst [vmem:[%s9004_s20 + $0x40] sm:$0xff] %v7006_v19  ;;  %v7044_v52 = vld [vmem:[%s9008_s21 + $0x518] sm:$0xff]  ;;  %v7046_v50 = vld [vmem:[%s9008_s21 + $0x520] sm:$0xff]  ;;  %v7048_v30 = vld [vmem:[%s9008_s21 + $0x528] sm:$0xff] }
0x198d   : >> { %7009 = vst [vmem:[%s9004_s20 + $0x48] sm:$0xff] %v7008_v26  ;;  %v7050_v61 = vld [vmem:[%s9008_s21 + $0x530] sm:$0xff]  ;;  %v7052_v48 = vld [vmem:[%s9008_s21 + $0x538] sm:$0xff]  ;;  %v7054_v15 = vld [vmem:[%s9008_s21 + $0x540] sm:$0xff] }
0x198e   : >> { %7011 = vst [vmem:[%s9004_s20 + $0x50] sm:$0xff] %v7010_v5  ;;  %v7056_v37 = vld [vmem:[%s9008_s21 + $0x548] sm:$0xff]  ;;  %v7058_v16 = vld [vmem:[%s9008_s21 + $0x550] sm:$0xff]  ;;  %v7060_v23 = vld [vmem:[%s9008_s21 + $0x558] sm:$0xff]  ;;  %s14149_s21 = smov %s13661_s16 }
0x198f   : >> { %7013 = vst [vmem:[%s9004_s20 + $0x58] sm:$0xff] %v7012_v38 }
0x1990   : >> { %7015 = vst [vmem:[%s9004_s20 + $0x9c8] sm:$0xff] %v7014_v43 }
0x1991   : >> { %7017 = vst [vmem:[%s9004_s20 + $0x9d0] sm:$0xff] %v7016_v0 }
0x1992   : >> { %7019 = vst [vmem:[%s9004_s20 + $0x9d8] sm:$0xff] %v7018_v54 }
0x1993   : >> { %7021 = vst [vmem:[%s9004_s20 + $0x9e0] sm:$0xff] %v7020_v17 }
0x1994   : >> { %7023 = vst [vmem:[%s9004_s20 + $0x9e8] sm:$0xff] %v7022_v28 }
0x1995   : >> { %7025 = vst [vmem:[%s9004_s20 + $0x9f0] sm:$0xff] %v7024_v53 }
0x1996   : >> { %7027 = vst [vmem:[%s9004_s20 + $0x9f8] sm:$0xff] %v7026_v22 }
0x1997   : >> { %7029 = vst [vmem:[%s9004_s20 + $0xa00] sm:$0xff] %v7028_v32 }
0x1998   : >> { %7031 = vst [vmem:[%s9004_s20 + $0xa08] sm:$0xff] %v7030_v8 }
0x1999   : >> { %7033 = vst [vmem:[%s9004_s20 + $0xa10] sm:$0xff] %v7032_v24 }
0x199a   : >> { %7035 = vst [vmem:[%s9004_s20 + $0xa18] sm:$0xff] %v7034_v20 }
0x199b   : >> { %7037 = vst [vmem:[%s9004_s20 + $0xa20] sm:$0xff] %v7036_v7 }
0x199c   : >> { %7039 = vst [vmem:[%s9004_s20 + $0x1390] sm:$0xff] %v7038_v44 }
0x199d   : >> { %7041 = vst [vmem:[%s9004_s20 + $0x1398] sm:$0xff] %v7040_v9 }
0x199e   : >> { %7043 = vst [vmem:[%s9004_s20 + $0x13a0] sm:$0xff] %v7042_v47 }
0x199f   : >> { %7045 = vst [vmem:[%s9004_s20 + $0x13a8] sm:$0xff] %v7044_v52 }
0x19a0   : >> { %7047 = vst [vmem:[%s9004_s20 + $0x13b0] sm:$0xff] %v7046_v50 }
0x19a1   : >> { %7049 = vst [vmem:[%s9004_s20 + $0x13b8] sm:$0xff] %v7048_v30 }
0x19a2   : >> { %7051 = vst [vmem:[%s9004_s20 + $0x13c0] sm:$0xff] %v7050_v61 }
0x19a3   : >> { %7053 = vst [vmem:[%s9004_s20 + $0x13c8] sm:$0xff] %v7052_v48  ;;  %6986 = sbr.rel (!%p6983_p5) target bundleno = 6531 (0x1983), region = 204 }
0x19a4   : >> { %7055 = vst [vmem:[%s9004_s20 + $0x13d0] sm:$0xff] %v7054_v15 }
0x19a5   : >> { %7057 = vst [vmem:[%s9004_s20 + $0x13d8] sm:$0xff] %v7056_v37 }
0x19a6   : >> { %7059 = vst [vmem:[%s9004_s20 + $0x13e0] sm:$0xff] %v7058_v16 }
0x19a7   : >> { %7061 = vst [vmem:[%s9004_s20 + $0x13e8] sm:$0xff] %v7060_v23  ;;  %s14148_s20 = smov %s13664_s11 }
0x19a8 PF: > { %8905 = sdivrem.u32 %s6978_s30, 12 }
0x19a9   : > { %s8367_s14 = smul.u32 96, %s13616_s22 }
0x19ab   : > { %s13738_s25 = scalar_lea.vmem %s9498_s29, %s8367_s14 [#allocation4]   ;;  %s13741_s10 = scalar_lea.vmem %s13603_s27, %s8367_s14  }
0x19b1   : > { %s8906_s17 = spop.drf %8905 }
0x19b2   : > { %s13743_s19 = spop.drf %8905 }
0x19b3   : > { %p8369_p6 = scmp.le.s32.totalorder %s13743_s19, 0 }
0x19b4   : > { %s14151_s20 = smov (!%p8369_p6), %s13741_s10  ;;  %s9022_s21 = smov (!%p8369_p6), %s13738_s25  }
0x19b5   : > { %7331 = sbr.rel (%p8369_p6) target bundleno = 6594 (0x19c2), region = 209  ;;  %s9026_s23 = smov (!%p8369_p6), 0  }
0x19b6   : > { %s9030_s26 = smov (!%p8369_p6), 0  }
0x19ba LB: >> { %v7085_v34 = vld [vmem:[%s9024_s21] sm:$0xff]  ;;  %s7091_s30 = sadd.s32 1, %s9028_s23  ;;  %s7079_s26 = sadd.s32 1, %s9032_s26   ;;  %s9032_s26 = sphi %s9030_s26, %s7079_s26   ;;  %s9028_s23 = sphi %s9026_s23, %s9027_s23   ;;  %s9024_s21 = sphi %s9022_s21, %s7096_s21   ;;  %s9020_s20 = sphi %s14151_s20, %s7097_s20  }
0x19bb   : >> { %v7087_v58 = vld [vmem:[%s9024_s21 + $0x280] sm:$0xff]  ;;  %7086 = vst [vmem:[%s9020_s20] sm:$0xff] %v7085_v34  ;;  %p7092_p7 = scmp.ge.s32.totalorder %s7091_s30, %s13743_s19  ;;  %p7078_p8 = scmp.ge.s32.totalorder %s7079_s26, %s13743_s19 }
0x19bc   : >> { %v7089_v63 = vld [vmem:[%s9024_s21 + $0x500] sm:$0xff]  ;;  %7088 = vst [vmem:[%s9020_s20 + $0x9c8] sm:$0xff] %v7087_v58 }
0x19bd   : >> { %7090 = vst [vmem:[%s9020_s20 + $0x1390] sm:$0xff] %v7089_v63  ;;  %s14166_s30 = smov (%p7092_p7, %s7091_s30), 0  ;;  %7081 = sbr.rel (!%p7078_p8) target bundleno = 6586 (0x19ba), region = 215 }
0x19be   : >> { %s8370_s22 = sshll.u32 %s14166_s30, 3  ;;  %s9027_s23 = smov %s14166_s30  }
0x19bf   : >> { %s7096_s21 = scalar_lea.vmem %s13738_s25, %s8370_s22 [#allocation4]   ;;  %s7097_s20 = scalar_lea.vmem %s13741_s10, %s8370_s22  }
0x19c2 PF: > { %7100 = sbr.rel (%p6974_p1) target bundleno = 6683 (0x1a1b), region = 124  ;;  %s7102_s24 = ssub.s32 (!%p6974_p1), %s13605_s18, %s13609_s13 }
0x19c3   : > { %s7106_s15 = sshrl.u32 (!%p6974_p1), %s13605_s18, 3  ;;  %s13763_s16 = scalar_lea.vmem (!%p6974_p1), %s9498_s29, %s7102_s24 [#allocation4] }
0x19c4   : > { %s13766_s11 = scalar_lea.vmem (!%p6974_p1), %s13603_s27, %s7102_s24  ;;  %8908 = sdivrem.u32 (!%p6974_p1), %s7106_s15, 12 }
0x19cd   : > { %s13770_s14 = spop.drf %8908 }
0x19ce   : > { %s8910_s25 = spop.drf %8908  ;;  %p8372_p9 = scmp.le.s32.totalorder %s13770_s14, 0 }
0x19cf   : > { %s14152_s10 = smov (!%p8372_p9), %s13603_s27  ;;  %s14153_s17 = smov (!%p8372_p9), %s9498_s29 }
0x19d0   : > { %7345 = sbr.rel (%p8372_p9) target bundleno = 6650 (0x19fa), region = 220  ;;  %s13779_s19 = smov (!%p8372_p9), 0  }
0x19d1   : > { %s13781_s20 = smov (!%p8372_p9), 0  }
0x19d5 LB: >> { %v7118_v31 = vld [vmem:[%s9040_s17] sm:$0xff]  ;;  %v7120_v18 = vld [vmem:[%s9040_s17 + $0x8] sm:$0xff]  ;;  %v7122_v39 = vld [vmem:[%s9040_s17 + $0x10] sm:$0xff]  ;;  %s7190_s21 = sadd.s32 1, %s9044_s19  ;;  %s7112_s20 = sadd.s32 1, %s9048_s20   ;;  %s9048_s20 = sphi %s13781_s20, %s7112_s20   ;;  %s9044_s19 = sphi %s13779_s19, %s14156_s19   ;;  %s9040_s17 = sphi %s14153_s17, %s14155_s17   ;;  %s9036_s10 = sphi %s14152_s10, %s14154_s10  }
0x19d6   : >> { %7119 = vst [vmem:[%s9036_s10] sm:$0xff] %v7118_v31  ;;  %v7124_v35 = vld [vmem:[%s9040_s17 + $0x18] sm:$0xff]  ;;  %p7191_p10 = scmp.ge.s32.totalorder %s7190_s21, %s13770_s14  ;;  %v7126_v11 = vld [vmem:[%s9040_s17 + $0x20] sm:$0xff]  ;;  %v7128_v21 = vld [vmem:[%s9040_s17 + $0x28] sm:$0xff]  ;;  %p7111_p11 = scmp.ge.s32.totalorder %s7112_s20, %s13770_s14 }
0x19d7   : >> { %7121 = vst [vmem:[%s9036_s10 + $0x8] sm:$0xff] %v7120_v18  ;;  %v7130_v2 = vld [vmem:[%s9040_s17 + $0x30] sm:$0xff]  ;;  %v7132_v3 = vld [vmem:[%s9040_s17 + $0x38] sm:$0xff]  ;;  %v7134_v55 = vld [vmem:[%s9040_s17 + $0x40] sm:$0xff] }
0x19d8   : >> { %7123 = vst [vmem:[%s9036_s10 + $0x10] sm:$0xff] %v7122_v39  ;;  %s14168_s21 = smov (%p7191_p10, %s7190_s21), 0  ;;  %v7136_v1 = vld [vmem:[%s9040_s17 + $0x48] sm:$0xff]  ;;  %v7138_v14 = vld [vmem:[%s9040_s17 + $0x50] sm:$0xff]  ;;  %v7140_v62 = vld [vmem:[%s9040_s17 + $0x58] sm:$0xff] }
0x19d9   : >> { %7125 = vst [vmem:[%s9036_s10 + $0x18] sm:$0xff] %v7124_v35  ;;  %s7193_s23 = smul.u32 96, %s14168_s21  ;;  %v7142_v49 = vld [vmem:[%s9040_s17 + $0x280] sm:$0xff]  ;;  %v7144_v12 = vld [vmem:[%s9040_s17 + $0x288] sm:$0xff]  ;;  %v7146_v57 = vld [vmem:[%s9040_s17 + $0x290] sm:$0xff]  ;;  %s14156_s19 = smov %s14168_s21 }
0x19da   : >> { %7127 = vst [vmem:[%s9036_s10 + $0x20] sm:$0xff] %v7126_v11  ;;  %v7148_v13 = vld [vmem:[%s9040_s17 + $0x298] sm:$0xff]  ;;  %v7150_v59 = vld [vmem:[%s9040_s17 + $0x2a0] sm:$0xff]  ;;  %v7152_v33 = vld [vmem:[%s9040_s17 + $0x2a8] sm:$0xff] }
0x19db   : >> { %7129 = vst [vmem:[%s9036_s10 + $0x28] sm:$0xff] %v7128_v21  ;;  %s13815_s26 = scalar_lea.vmem %s9498_s29, %s7193_s23 [#allocation4]   ;;  %s13818_s30 = scalar_lea.vmem %s13603_s27, %s7193_s23   ;;  %v7154_v25 = vld [vmem:[%s9040_s17 + $0x2b0] sm:$0xff]  ;;  %v7156_v4 = vld [vmem:[%s9040_s17 + $0x2b8] sm:$0xff]  ;;  %v7158_v29 = vld [vmem:[%s9040_s17 + $0x2c0] sm:$0xff] }
0x19dc   : >> { %7131 = vst [vmem:[%s9036_s10 + $0x30] sm:$0xff] %v7130_v2  ;;  %v7160_v40 = vld [vmem:[%s9040_s17 + $0x2c8] sm:$0xff]  ;;  %v7162_v56 = vld [vmem:[%s9040_s17 + $0x2d0] sm:$0xff]  ;;  %v7164_v41 = vld [vmem:[%s9040_s17 + $0x2d8] sm:$0xff] }
0x19dd   : >> { %7133 = vst [vmem:[%s9036_s10 + $0x38] sm:$0xff] %v7132_v3  ;;  %v7166_v60 = vld [vmem:[%s9040_s17 + $0x500] sm:$0xff]  ;;  %v7168_v36 = vld [vmem:[%s9040_s17 + $0x508] sm:$0xff]  ;;  %v7170_v27 = vld [vmem:[%s9040_s17 + $0x510] sm:$0xff] }
0x19de   : >> { %7135 = vst [vmem:[%s9036_s10 + $0x40] sm:$0xff] %v7134_v55  ;;  %v7172_v42 = vld [vmem:[%s9040_s17 + $0x518] sm:$0xff]  ;;  %v7174_v51 = vld [vmem:[%s9040_s17 + $0x520] sm:$0xff]  ;;  %v7176_v10 = vld [vmem:[%s9040_s17 + $0x528] sm:$0xff] }
0x19df   : >> { %7137 = vst [vmem:[%s9036_s10 + $0x48] sm:$0xff] %v7136_v1  ;;  %v7178_v6 = vld [vmem:[%s9040_s17 + $0x530] sm:$0xff]  ;;  %v7180_v46 = vld [vmem:[%s9040_s17 + $0x538] sm:$0xff]  ;;  %v7182_v45 = vld [vmem:[%s9040_s17 + $0x540] sm:$0xff] }
0x19e0   : >> { %7139 = vst [vmem:[%s9036_s10 + $0x50] sm:$0xff] %v7138_v14  ;;  %v7184_v19 = vld [vmem:[%s9040_s17 + $0x548] sm:$0xff]  ;;  %v7186_v26 = vld [vmem:[%s9040_s17 + $0x550] sm:$0xff]  ;;  %v7188_v5 = vld [vmem:[%s9040_s17 + $0x558] sm:$0xff]  ;;  %s14155_s17 = smov %s13815_s26 }
0x19e1   : >> { %7141 = vst [vmem:[%s9036_s10 + $0x58] sm:$0xff] %v7140_v62 }
0x19e2   : >> { %7143 = vst [vmem:[%s9036_s10 + $0x9c8] sm:$0xff] %v7142_v49 }
0x19e3   : >> { %7145 = vst [vmem:[%s9036_s10 + $0x9d0] sm:$0xff] %v7144_v12 }
0x19e4   : >> { %7147 = vst [vmem:[%s9036_s10 + $0x9d8] sm:$0xff] %v7146_v57 }
0x19e5   : >> { %7149 = vst [vmem:[%s9036_s10 + $0x9e0] sm:$0xff] %v7148_v13 }
0x19e6   : >> { %7151 = vst [vmem:[%s9036_s10 + $0x9e8] sm:$0xff] %v7150_v59 }
0x19e7   : >> { %7153 = vst [vmem:[%s9036_s10 + $0x9f0] sm:$0xff] %v7152_v33 }
0x19e8   : >> { %7155 = vst [vmem:[%s9036_s10 + $0x9f8] sm:$0xff] %v7154_v25 }
0x19e9   : >> { %7157 = vst [vmem:[%s9036_s10 + $0xa00] sm:$0xff] %v7156_v4 }
0x19ea   : >> { %7159 = vst [vmem:[%s9036_s10 + $0xa08] sm:$0xff] %v7158_v29 }
0x19eb   : >> { %7161 = vst [vmem:[%s9036_s10 + $0xa10] sm:$0xff] %v7160_v40 }
0x19ec   : >> { %7163 = vst [vmem:[%s9036_s10 + $0xa18] sm:$0xff] %v7162_v56 }
0x19ed   : >> { %7165 = vst [vmem:[%s9036_s10 + $0xa20] sm:$0xff] %v7164_v41 }
0x19ee   : >> { %7167 = vst [vmem:[%s9036_s10 + $0x1390] sm:$0xff] %v7166_v60 }
0x19ef   : >> { %7169 = vst [vmem:[%s9036_s10 + $0x1398] sm:$0xff] %v7168_v36 }
0x19f0   : >> { %7171 = vst [vmem:[%s9036_s10 + $0x13a0] sm:$0xff] %v7170_v27 }
0x19f1   : >> { %7173 = vst [vmem:[%s9036_s10 + $0x13a8] sm:$0xff] %v7172_v42 }
0x19f2   : >> { %7175 = vst [vmem:[%s9036_s10 + $0x13b0] sm:$0xff] %v7174_v51 }
0x19f3   : >> { %7177 = vst [vmem:[%s9036_s10 + $0x13b8] sm:$0xff] %v7176_v10 }
0x19f4   : >> { %7179 = vst [vmem:[%s9036_s10 + $0x13c0] sm:$0xff] %v7178_v6 }
0x19f5   : >> { %7181 = vst [vmem:[%s9036_s10 + $0x13c8] sm:$0xff] %v7180_v46  ;;  %7114 = sbr.rel (!%p7111_p11) target bundleno = 6613 (0x19d5), region = 226 }
0x19f6   : >> { %7183 = vst [vmem:[%s9036_s10 + $0x13d0] sm:$0xff] %v7182_v45 }
0x19f7   : >> { %7185 = vst [vmem:[%s9036_s10 + $0x13d8] sm:$0xff] %v7184_v19 }
0x19f8   : >> { %7187 = vst [vmem:[%s9036_s10 + $0x13e0] sm:$0xff] %v7186_v26 }
0x19f9   : >> { %7189 = vst [vmem:[%s9036_s10 + $0x13e8] sm:$0xff] %v7188_v5  ;;  %s14154_s10 = smov %s13818_s30 }
0x19fa PF: > { %8911 = sdivrem.u32 %s7106_s15, 12 }
0x19fb   : > { %s8373_s22 = smul.u32 96, %s13770_s14 }
0x19fd   : > { %s13892_s24 = scalar_lea.vmem %s9498_s29, %s8373_s22 [#allocation4]   ;;  %s13895_s25 = scalar_lea.vmem %s13603_s27, %s8373_s22  }
0x1a03   : > { %s8912_s23 = spop.drf %8911 }
0x1a04   : > { %s13897_s30 = spop.drf %8911 }
0x1a05   : > { %p8375_p12 = scmp.le.s32.totalorder %s13897_s30, 0 }
0x1a06   : > { %s14157_s10 = smov (!%p8375_p12), %s13895_s25  ;;  %s9054_s17 = smov (!%p8375_p12), %s13892_s24  }
0x1a07   : > { %7359 = sbr.rel (%p8375_p12) target bundleno = 6676 (0x1a14), region = 231  ;;  %s9058_s19 = smov (!%p8375_p12), 0  }
0x1a08   : > { %s9062_s20 = smov (!%p8375_p12), 0  }
0x1a0c LB: >> { %v7213_v38 = vld [vmem:[%s9056_s17] sm:$0xff]  ;;  %s7219_s15 = sadd.s32 1, %s9060_s19  ;;  %s7207_s20 = sadd.s32 1, %s9064_s20   ;;  %s9064_s20 = sphi %s9062_s20, %s7207_s20   ;;  %s9060_s19 = sphi %s9058_s19, %s9059_s19   ;;  %s9056_s17 = sphi %s9054_s17, %s7224_s17   ;;  %s9052_s10 = sphi %s14157_s10, %s7225_s10  }
0x1a0d   : >> { %v7215_v43 = vld [vmem:[%s9056_s17 + $0x280] sm:$0xff]  ;;  %7214 = vst [vmem:[%s9052_s10] sm:$0xff] %v7213_v38  ;;  %p7220_p13 = scmp.ge.s32.totalorder %s7219_s15, %s13897_s30  ;;  %p7206_p0 = scmp.ge.s32.totalorder %s7207_s20, %s13897_s30 }
0x1a0e   : >> { %v7217_v0 = vld [vmem:[%s9056_s17 + $0x500] sm:$0xff]  ;;  %7216 = vst [vmem:[%s9052_s10 + $0x9c8] sm:$0xff] %v7215_v43 }
0x1a0f   : >> { %7218 = vst [vmem:[%s9052_s10 + $0x1390] sm:$0xff] %v7217_v0  ;;  %s14170_s15 = smov (%p7220_p13, %s7219_s15), 0  ;;  %7209 = sbr.rel (!%p7206_p0) target bundleno = 6668 (0x1a0c), region = 237 }
0x1a10   : >> { %s8376_s14 = sshll.u32 %s14170_s15, 3  ;;  %s9059_s19 = smov %s14170_s15  }
0x1a11   : >> { %s7224_s17 = scalar_lea.vmem %s13892_s24, %s8376_s14 [#allocation4]   ;;  %s7225_s10 = scalar_lea.vmem %s13895_s25, %s8376_s14  }
0x1a14 PF: > { %s9071_s21 = smov 1  }
0x1a15   : > { %s7226_s26 = sshll.u32 %s9071_s21, %s13609_s13 }
0x1a16   : > { %s8378_s22 = sadd.s32 4294967295, %s7226_s26 }
0x1a17   : > { %v7236_v54 = vld [vmem:[%s13763_s16] sm:%s8378_s22] }
0x1a18   : > { %v7238_v17 = vld [vmem:[%s13763_s16 + $0x280] sm:%s8378_s22]  ;;  %7237 = vst [vmem:[%s13766_s11] sm:%s8378_s22] %v7236_v54 }
0x1a19   : > { %v7240_v28 = vld [vmem:[%s13763_s16 + $0x500] sm:%s8378_s22]  ;;  %7239 = vst [vmem:[%s13766_s11 + $0x9c8] sm:%s8378_s22] %v7238_v17 }
0x1a1a   : > { %7241 = vst [vmem:[%s13766_s11 + $0x1390] sm:%s8378_s22] %v7240_v28 }
0x1a1b PF: > { %p8379_p1 = scmp.ge.u32.totalorder %s13605_s18, 8 }
0x1a1c   : > { %s9072_s24 = smov (!%p8379_p1), 1  }
0x1a1d   : > { %6956 = sbr.rel (%p8379_p1) target bundleno = 6694 (0x1a26), region = 95  ;;  %s6957_s13 = sshll.u32 (!%p8379_p1), %s9072_s24, %s13605_s18 }
0x1a1e   : > { %s8380_s25 = sadd.s32 (!%p8379_p1), 4294967295, %s6957_s13 }
0x1a22   : > { %v6967_v53 = vld [vmem:[%s9498_s29] sm:%s8380_s25] }
0x1a23   : > { %v6969_v22 = vld [vmem:[%s9498_s29 + $0x280] sm:%s8380_s25]  ;;  %6968 = vst [vmem:[%s13603_s27] sm:%s8380_s25] %v6967_v53 }
0x1a24   : > { %v6971_v32 = vld [vmem:[%s9498_s29 + $0x500] sm:%s8380_s25]  ;;  %6970 = vst [vmem:[%s13603_s27 + $0x9c8] sm:%s8380_s25] %v6969_v22 }
0x1a25   : > { %6972 = vst [vmem:[%s13603_s27 + $0x1390] sm:%s8380_s25] %v6971_v32 }
0x1a26 PF: > { %p15_p2 = scmp.ge.s32.totalorder %s9137_s9, 6   ;;  %s14158_s27 = smov %s8996_s28 }
0x1a27   : > { %s14159_s28 = smov %s9147_s12  ;;  %s14160_s29 = smov %s9137_s9 }
0x1a28   :  { %17 = sbr.rel (!%p15_p2) target bundleno = 2 (0x2), region = 248 }

</bundles_post_ra>
